<compile_context>
chip_gen: v6e
topology: v6e:2x2x1
jax: 0.10.0
libtpu: 0.0.40
codegen_flags: <defaults>
</compile_context>

<pallas_src>
import jax
import jax.numpy as jnp
from jax.experimental import pallas as pl
from jax.experimental.pallas import tpu as pltpu

BN_EPS = 1e-5
_TM_TARGET = 512   # rows per tile; keeps 2x double-buffered blocks tiny vs VMEM


def _pick_tm(m, target=_TM_TARGET):
    """Largest row tile <= target that divides m (multiple of 8 when possible)."""
    if m <= target:
        return m
    for tm in range(target, 7, -8):
        if m % tm == 0:
            return tm
    return m


# ----------------------------- Pallas kernels ------------------------------ #

def _mm_stats_body(x_bf16, w_ref, o_ref, sum_ref, sq_ref):
    """o = x @ w (f32 acc); accumulate per-channel sum / sumsq across row tiles."""
    @pl.when(pl.program_id(0) == 0)
    def _():
        sum_ref[...] = jnp.zeros_like(sum_ref)
        sq_ref[...] = jnp.zeros_like(sq_ref)

    y = jnp.dot(x_bf16, w_ref[...], preferred_element_type=jnp.float32)
    o_ref[...] = y
    sum_ref[...] += jnp.sum(y, axis=0, keepdims=True)
    sq_ref[...] += jnp.sum(y * y, axis=0, keepdims=True)


def _conv_kernel(x_ref, w_ref, o_ref, sum_ref, sq_ref):
    _mm_stats_body(x_ref[...], w_ref, o_ref, sum_ref, sq_ref)


def _bn_conv_kernel(y_ref, scale_ref, shift_ref, w_ref, o_ref, sum_ref, sq_ref):
    # Fused: relu(scale*y + shift) of the previous layer, then this layer's matmul.
    x = jnp.maximum(y_ref[...] * scale_ref[...] + shift_ref[...], 0.0)
    _mm_stats_body(x.astype(jnp.bfloat16), w_ref, o_ref, sum_ref, sq_ref)


def _bn_relu_kernel(y_ref, scale_ref, shift_ref, o_ref):
    y = y_ref[...] * scale_ref[...] + shift_ref[...]
    o_ref[...] = jnp.maximum(y, 0.0).astype(o_ref.dtype)


def _fc_fused_kernel(x_ref, scale_ref, shift_ref,
                     w1_ref, b1_ref, w2_ref, b2_ref, w3_ref, b3_ref, o_ref):
    # BN6+ReLU of the last conv (channel-major flattened), then fc1->fc2->out.
    x = jnp.maximum(x_ref[...] * scale_ref[...] + shift_ref[...], 0.0)
    h = jnp.dot(x, w1_ref[...], preferred_element_type=jnp.float32) + b1_ref[...]
    h = jnp.maximum(h, 0.0)
    h = jnp.dot(h, w2_ref[...], preferred_element_type=jnp.float32) + b2_ref[...]
    h = jnp.maximum(h, 0.0)
    o_ref[...] = (jnp.dot(h, w3_ref[...], preferred_element_type=jnp.float32)
                  + b3_ref[...]).astype(o_ref.dtype)


# ----------------------------- kernel wrappers ------------------------------ #

def conv_matmul_stats(x, w, *, scale=None, shift=None):
    """x: (M, K) bf16 patches (or f32 pre-BN activation when scale/shift given).
    w: (K, N) bf16.  Returns (pre-activation f32 (M, N), sum (1, N), sumsq (1, N))."""
    m, k = x.shape
    n = w.shape[1]
    tm = _pick_tm(m)
    grid = (m // tm,)

    row_spec = pl.BlockSpec((tm, k), lambda i: (i, 0))
    w_spec = pl.BlockSpec((k, n), lambda i: (0, 0))
    chan_spec = pl.BlockSpec((1, n), lambda i: (0, 0))

    if scale is None:
        kernel = _conv_kernel
        in_specs = [row_spec, w_spec]
        args = (x, w)
    else:
        kernel = _bn_conv_kernel
        ss_spec = pl.BlockSpec((1, k), lambda i: (0, 0))
        in_specs = [row_spec, ss_spec, ss_spec, w_spec]
        args = (x, scale.reshape(1, k), shift.reshape(1, k), w)

    return pl.pallas_call(
        kernel,
        out_shape=(jax.ShapeDtypeStruct((m, n), jnp.float32),
                   jax.ShapeDtypeStruct((1, n), jnp.float32),
                   jax.ShapeDtypeStruct((1, n), jnp.float32)),
        grid=grid,
        in_specs=in_specs,
        out_specs=(pl.BlockSpec((tm, n), lambda i: (i, 0)), chan_spec, chan_spec),
        # stats outputs are revisited accumulators -> reduction axis is "arbitrary"
        compiler_params=pltpu.CompilerParams(dimension_semantics=("arbitrary",)),
        cost_estimate=pl.CostEstimate(
            flops=2 * m * k * n,
            transcendentals=0,
            bytes_accessed=m * k * x.dtype.itemsize + k * n * 2 + m * n * 4),
    )(*args)


def bn_relu(preact, scale, shift, out_dtype=jnp.bfloat16):
    """y = relu(scale * preact + shift), row-tiled, megacore-parallel."""
    m, n = preact.shape
    tm = _pick_tm(m)
    return pl.pallas_call(
        _bn_relu_kernel,
        out_shape=jax.ShapeDtypeStruct((m, n), out_dtype),
        grid=(m // tm,),
        in_specs=[pl.BlockSpec((tm, n), lambda i: (i, 0)),
                  pl.BlockSpec((1, n), lambda i: (0, 0)),
                  pl.BlockSpec((1, n), lambda i: (0, 0))],
        out_specs=pl.BlockSpec((tm, n), lambda i: (i, 0)),
        compiler_params=pltpu.CompilerParams(dimension_semantics=("parallel",)),
    )(preact, scale.reshape(1, n), shift.reshape(1, n))


def _full_spec(a):
    nd = a.ndim
    return pl.BlockSpec(a.shape, lambda i: (0,) * nd)


def fc_fused(x_flat, scale_flat, shift_flat, fcs):
    """relu(bn6) fold + fc1 -> relu -> fc2 -> relu -> out, in one kernel."""
    (w1, b1), (w2, b2), (w3, b3) = fcs
    b_rows = x_flat.shape[0]
    n_out = w3.shape[1]
    args = (x_flat, scale_flat, shift_flat,
            w1, b1.reshape(1, -1), w2, b2.reshape(1, -1), w3, b3.reshape(1, -1))
    return pl.pallas_call(
        _fc_fused_kernel,
        out_shape=jax.ShapeDtypeStruct((b_rows, n_out), jnp.float32),
        grid=(1,),
        in_specs=[_full_spec(a) for a in args],
        out_specs=pl.BlockSpec((b_rows, n_out), lambda i: (0, 0)),
    )(*args)


# ------------------------------ XLA-side glue ------------------------------- #

def im2col(x_nhwc, ksize, stride, pad):
    """Extract conv patches (bf16); returns ((B*Ho*Wo, kh*kw*C), Ho, Wo)."""
    # TODO(synk): still materialized in HBM; kept in bf16 to halve the traffic.
    B, H, W, C = x_nhwc.shape
    xp = jnp.pad(x_nhwc, ((0, 0), (pad, pad), (pad, pad), (0, 0)))
    Ho = (H + 2 * pad - ksize) // stride + 1
    Wo = (W + 2 * pad - ksize) // stride + 1
    cols = []
    for i in range(ksize):
        for j in range(ksize):
            cols.append(xp[:, i:i + stride * Ho:stride, j:j + stride * Wo:stride, :])
    patches = jnp.stack(cols, axis=3)                 # (B, Ho, Wo, kh*kw, C)
    return patches.reshape(B * Ho * Wo, ksize * ksize * C), Ho, Wo


def _bn_scale_shift(chan_sum, chan_sq, m_rows, gamma, beta):
    """Fold batch mean/var (biased, train-mode) + gamma/beta into scale/shift."""
    mean = chan_sum[0] / m_rows
    var = jnp.maximum(chan_sq[0] / m_rows - mean * mean, 0.0)
    scale = gamma * jax.lax.rsqrt(var + BN_EPS)
    shift = beta - mean * scale
    return scale, shift


# --------------------------- deterministic params --------------------------- #

def conv_weight(key, out_c, in_c, k):
    fan_in = in_c * k * k
    bound = 1.0 / (fan_in ** 0.5)
    w = jax.random.uniform(key, (out_c, in_c, k, k), jnp.float32, -bound, bound)
    # (O, I, kh, kw) -> (kh, kw, I, O) -> (kh*kw*I, O); matches im2col layout.
    # Conv bias is omitted: cancelled exactly by train-mode BatchNorm mean.
    return jnp.transpose(w, (2, 3, 1, 0)).reshape(k * k * in_c, out_c).astype(jnp.bfloat16)


def linear_params(key, in_f, out_f):
    k1, k2 = jax.random.split(key)
    bound = 1.0 / (in_f ** 0.5)
    w = jax.random.uniform(k1, (out_f, in_f), jnp.float32, -bound, bound)
    b = jax.random.uniform(k2, (out_f,), jnp.float32, -bound, bound)
    return w.T, b


def init_allconv_params(key, hid_dim_full=32, num_classes=10):
    keys = jax.random.split(key, 9)
    convs = [
        conv_weight(keys[0], 16, 3, 5),    # conv1: 5x5, pad 2
        conv_weight(keys[1], 16, 16, 3),   # conv2: 3x3, pad 1, stride 2
        conv_weight(keys[2], 32, 16, 5),   # conv3: 5x5, pad 2
        conv_weight(keys[3], 32, 32, 3),   # conv4: 3x3, pad 1, stride 2
        conv_weight(keys[4], 32, 32, 1),   # conv5: 1x1
        conv_weight(keys[5], 4, 32, 1),    # conv6: 1x1
    ]
    bns = [(jnp.ones((c,), jnp.float32), jnp.zeros((c,), jnp.float32))
           for c in (16, 16, 32, 32, 32, 4)]
    fcs = [
        linear_params(keys[6], 8 * 8 * 4, hid_dim_full),
        linear_params(keys[7], hid_dim_full, hid_dim_full // 2),
        linear_params(keys[8], hid_dim_full // 2, num_classes),
    ]
    return convs, bns, fcs


# ------------------------------ forward pass -------------------------------- #

# (ksize, stride, pad) for conv1..conv6
_CONV_CFG = [(5, 1, 2), (3, 2, 1), (5, 1, 2), (3, 2, 1), (1, 1, 0), (1, 1, 0)]


def allconv_forward(x_nchw, params):
    convs, bns, fcs = params
    B = x_nchw.shape[0]
    x = jnp.transpose(x_nchw, (0, 2, 3, 1)).astype(jnp.bfloat16)   # NCHW -> NHWC

    pre = None
    scale = shift = None
    Ho = Wo = None

    # conv1..conv4: im2col (bf16) -> matmul + stats -> BN+ReLU.
    # conv4's BN+ReLU is folded into conv5's matmul kernel.
    for li in range(4):
        ks, st, pd = _CONV_CFG[li]
        patches, Ho, Wo = im2col(x, ks, st, pd)
        preact, csum, csq = conv_matmul_stats(patches, convs[li])
        gamma, beta = bns[li]
        scale, shift = _bn_scale_shift(csum, csq, patches.shape[0], gamma, beta)
        if li < 3:
            act = bn_relu(preact, scale, shift)                    # (M, C) bf16
            x = act.reshape(B, Ho, Wo, convs[li].shape[1])
        else:
            pre = preact                                           # conv4 pre-activation

    # conv5 / conv6 (1x1 convs on the 8x8 map): fuse previous BN+ReLU into matmul.
    preact, csum, csq = conv_matmul_stats(pre, convs[4], scale=scale, shift=shift)
    gamma, beta = bns[4]
    scale, shift = _bn_scale_shift(csum, csq, pre.shape[0], gamma, beta)

    preact, csum, csq = conv_matmul_stats(preact, convs[5], scale=scale, shift=shift)
    gamma, beta = bns[5]
    scale, shift = _bn_scale_shift(csum, csq, preact.shape[0], gamma, beta)

    # Flatten conv6's *pre-activation* exactly like PyTorch's x.view(-1, 8*8*4)
    # on an NCHW tensor; BN6+ReLU is folded into the fused FC kernel.
    c_out = convs[5].shape[1]                                      # 4
    pre_flat = preact.reshape(B, Ho, Wo, c_out)
    pre_flat = jnp.transpose(pre_flat, (0, 3, 1, 2)).reshape(B, c_out * Ho * Wo)
    scale_flat = jnp.repeat(scale, Ho * Wo).reshape(1, -1)
    shift_flat = jnp.repeat(shift, Ho * Wo).reshape(1, -1)

    return fc_fused(pre_flat, scale_flat, shift_flat, fcs)


# ----------------------------------- main ----------------------------------- #

if __name__ == "__main__":
    key = jax.random.PRNGKey(0)
    k_params, k_x = jax.random.split(key)

    params = init_allconv_params(k_params)
    # Input must be (B, 3, 32, 32) so the flatten to 8*8*4 is consistent.
    x = jax.random.normal(k_x, (2, 3, 32, 32), jnp.float32)

    fwd = jax.jit(allconv_forward)
    logits = fwd(x, params)
    jax.block_until_ready(logits)
    assert logits.shape == (2, 10), logits.shape
    print("KERNEL_OK")
</pallas_src>

<mosaic_0001>
module attributes {stable_mosaic.version = 11 : i64} {
  func.func @_conv_kernel(%arg0: i32, %arg1: memref<512x75xbf16, #tpu.memory_space<vmem>>, %arg2: memref<75x16xbf16, #tpu.memory_space<vmem>>, %arg3: memref<512x16xf32, #tpu.memory_space<vmem>>, %arg4: memref<1x16xf32, #tpu.memory_space<vmem>>, %arg5: memref<1x16xf32, #tpu.memory_space<vmem>>) attributes {dimension_semantics = [#tpu.dimension_semantics<arbitrary>], iteration_bounds = array<i64: 4>, scalar_prefetch = 0 : i64, scratch_operands = 0 : i64, tpu.core_type = #tpu.core_type<tc>, window_params = [{transform_indices = @transform_0, window_bounds = array<i64: 512, 75>}, {pipeline_mode = #tpu.pipeline_mode<synchronous>, transform_indices = @transform_1, window_bounds = array<i64: 75, 16>}, {transform_indices = @transform_2, window_bounds = array<i64: 512, 16>}, {pipeline_mode = #tpu.pipeline_mode<synchronous>, transform_indices = @transform_3, window_bounds = array<i64: 1, 16>}, {pipeline_mode = #tpu.pipeline_mode<synchronous>, transform_indices = @transform_4, window_bounds = array<i64: 1, 16>}]} {
    %c0 = arith.constant 0 : index
    %c0_0 = arith.constant 0 : index
    %0 = vector.load %arg1[%c0, %c0_0] : memref<512x75xbf16, #tpu.memory_space<vmem>>, vector<512x75xbf16>
    %c0_i32 = arith.constant 0 : i32
    %1 = arith.cmpi eq, %arg0, %c0_i32 : i32
    %2 = arith.extui %1 : i1 to i32
    %c0_i32_1 = arith.constant 0 : i32
    %3 = arith.cmpi ne, %2, %c0_i32_1 : i32
    scf.if %3 {
      %cst_16 = arith.constant 0.000000e+00 : f32
      %18 = vector.broadcast %cst_16 : f32 to vector<1x16xf32>
      %c0_17 = arith.constant 0 : index
      %c0_18 = arith.constant 0 : index
      %19 = vector.load %arg4[%c0_17, %c0_18] : memref<1x16xf32, #tpu.memory_space<vmem>>, vector<1x16xf32>
      tpu.vector_store %arg4[%c0_17, %c0_18], %18 {strides = array<i32>} : memref<1x16xf32, #tpu.memory_space<vmem>>, vector<1x16xf32>,
      %cst_19 = arith.constant 0.000000e+00 : f32
      %20 = vector.broadcast %cst_19 : f32 to vector<1x16xf32>
      %c0_20 = arith.constant 0 : index
      %c0_21 = arith.constant 0 : index
      %21 = vector.load %arg5[%c0_20, %c0_21] : memref<1x16xf32, #tpu.memory_space<vmem>>, vector<1x16xf32>
      tpu.vector_store %arg5[%c0_20, %c0_21], %20 {strides = array<i32>} : memref<1x16xf32, #tpu.memory_space<vmem>>, vector<1x16xf32>,
    } else {
    }
    %c0_2 = arith.constant 0 : index
    %c0_3 = arith.constant 0 : index
    %4 = vector.load %arg2[%c0_2, %c0_3] : memref<75x16xbf16, #tpu.memory_space<vmem>>, vector<75x16xbf16>
    %cst = arith.constant dense<0.000000e+00> : vector<512x16xf32>
    %5 = tpu.matmul %0, %4, %cst {dimension_numbers = #tpu.dot_dimension_numbers<[1], [0], [0], [1], [0, 0, 1, 1], [], []>} : vector<512x75xbf16>, vector<75x16xbf16>, vector<512x16xf32> -> vector<512x16xf32>
    %c0_4 = arith.constant 0 : index
    %c0_5 = arith.constant 0 : index
    %6 = vector.load %arg3[%c0_4, %c0_5] : memref<512x16xf32, #tpu.memory_space<vmem>>, vector<512x16xf32>
    tpu.vector_store %arg3[%c0_4, %c0_5], %5 {strides = array<i32>} : memref<512x16xf32, #tpu.memory_space<vmem>>, vector<512x16xf32>,
    %c0_6 = arith.constant 0 : index
    %c0_7 = arith.constant 0 : index
    %7 = vector.load %arg4[%c0_6, %c0_7] : memref<1x16xf32, #tpu.memory_space<vmem>>, vector<1x16xf32>
    %cst_8 = arith.constant dense<0.000000e+00> : vector<16xf32>
    %8 = vector.multi_reduction <add>, %5, %cst_8 [0] : vector<512x16xf32> to vector<16xf32>
    %9 = vector.shape_cast %8 : vector<16xf32> to vector<1x16xf32>
    %10 = arith.addf %7, %9 : vector<1x16xf32>
    %c0_9 = arith.constant 0 : index
    %c0_10 = arith.constant 0 : index
    %11 = vector.load %arg4[%c0_9, %c0_10] : memref<1x16xf32, #tpu.memory_space<vmem>>, vector<1x16xf32>
    tpu.vector_store %arg4[%c0_9, %c0_10], %10 {strides = array<i32>} : memref<1x16xf32, #tpu.memory_space<vmem>>, vector<1x16xf32>,
    %c0_11 = arith.constant 0 : index
    %c0_12 = arith.constant 0 : index
    %12 = vector.load %arg5[%c0_11, %c0_12] : memref<1x16xf32, #tpu.memory_space<vmem>>, vector<1x16xf32>
    %13 = arith.mulf %5, %5 : vector<512x16xf32>
    %cst_13 = arith.constant dense<0.000000e+00> : vector<16xf32>
    %14 = vector.multi_reduction <add>, %13, %cst_13 [0] : vector<512x16xf32> to vector<16xf32>
    %15 = vector.shape_cast %14 : vector<16xf32> to vector<1x16xf32>
    %16 = arith.addf %12, %15 : vector<1x16xf32>
    %c0_14 = arith.constant 0 : index
    %c0_15 = arith.constant 0 : index
    %17 = vector.load %arg5[%c0_14, %c0_15] : memref<1x16xf32, #tpu.memory_space<vmem>>, vector<1x16xf32>
    tpu.vector_store %arg5[%c0_14, %c0_15], %16 {strides = array<i32>} : memref<1x16xf32, #tpu.memory_space<vmem>>, vector<1x16xf32>,
    return
  }
  func.func @transform_0(%arg0: i32) -> (i32, i32) {
    %c0_i32 = arith.constant 0 : i32
    %c0_i32_0 = arith.constant 0 : i32
    return %arg0, %c0_i32 : i32, i32
  }
  func.func @transform_1(%arg0: i32) -> (i32, i32) {
    %c0_i32 = arith.constant 0 : i32
    %c0_i32_0 = arith.constant 0 : i32
    %c0_i32_1 = arith.constant 0 : i32
    return %c0_i32, %c0_i32_0 : i32, i32
  }
  func.func @transform_2(%arg0: i32) -> (i32, i32) {
    %c0_i32 = arith.constant 0 : i32
    %c0_i32_0 = arith.constant 0 : i32
    return %arg0, %c0_i32 : i32, i32
  }
  func.func @transform_3(%arg0: i32) -> (i32, i32) {
    %c0_i32 = arith.constant 0 : i32
    %c0_i32_0 = arith.constant 0 : i32
    %c0_i32_1 = arith.constant 0 : i32
    return %c0_i32, %c0_i32_0 : i32, i32
  }
  func.func @transform_4(%arg0: i32) -> (i32, i32) {
    %c0_i32 = arith.constant 0 : i32
    %c0_i32_0 = arith.constant 0 : i32
    %c0_i32_1 = arith.constant 0 : i32
    return %c0_i32, %c0_i32_0 : i32, i32
  }
}

module attributes {stable_mosaic.version = 11 : i64} {
  func.func @_bn_relu_kernel(%arg0: i32, %arg1: memref<512x16xf32, #tpu.memory_space<vmem>>, %arg2: memref<1x16xf32, #tpu.memory_space<vmem>>, %arg3: memref<1x16xf32, #tpu.memory_space<vmem>>, %arg4: memref<512x16xbf16, #tpu.memory_space<vmem>>) attributes {dimension_semantics = [#tpu.dimension_semantics<parallel>], iteration_bounds = array<i64: 4>, scalar_prefetch = 0 : i64, scratch_operands = 0 : i64, tpu.core_type = #tpu.core_type<tc>, window_params = [{transform_indices = @transform_0, window_bounds = array<i64: 512, 16>}, {pipeline_mode = #tpu.pipeline_mode<synchronous>, transform_indices = @transform_1, window_bounds = array<i64: 1, 16>}, {pipeline_mode = #tpu.pipeline_mode<synchronous>, transform_indices = @transform_2, window_bounds = array<i64: 1, 16>}, {transform_indices = @transform_3, window_bounds = array<i64: 512, 16>}]} {
    %c0 = arith.constant 0 : index
    %c0_0 = arith.constant 0 : index
    %0 = vector.load %arg1[%c0, %c0_0] : memref<512x16xf32, #tpu.memory_space<vmem>>, vector<512x16xf32>
    %c0_1 = arith.constant 0 : index
    %c0_2 = arith.constant 0 : index
    %1 = vector.load %arg2[%c0_1, %c0_2] : memref<1x16xf32, #tpu.memory_space<vmem>>, vector<1x16xf32>
    %2 = vector.broadcast %1 : vector<1x16xf32> to vector<512x16xf32>
    %3 = arith.mulf %0, %2 : vector<512x16xf32>
    %c0_3 = arith.constant 0 : index
    %c0_4 = arith.constant 0 : index
    %4 = vector.load %arg3[%c0_3, %c0_4] : memref<1x16xf32, #tpu.memory_space<vmem>>, vector<1x16xf32>
    %5 = vector.broadcast %4 : vector<1x16xf32> to vector<512x16xf32>
    %6 = arith.addf %3, %5 : vector<512x16xf32>
    %cst = arith.constant 0.000000e+00 : f32
    %7 = vector.broadcast %cst : f32 to vector<512x16xf32>
    %8 = arith.maximumf %6, %7 : vector<512x16xf32>
    %9 = arith.truncf %8 : vector<512x16xf32> to vector<512x16xbf16>
    %c0_5 = arith.constant 0 : index
    %c0_6 = arith.constant 0 : index
    %10 = vector.load %arg4[%c0_5, %c0_6] : memref<512x16xbf16, #tpu.memory_space<vmem>>, vector<512x16xbf16>
    tpu.vector_store %arg4[%c0_5, %c0_6], %9 {strides = array<i32>} : memref<512x16xbf16, #tpu.memory_space<vmem>>, vector<512x16xbf16>,
    return
  }
  func.func @transform_0(%arg0: i32) -> (i32, i32) {
    %c0_i32 = arith.constant 0 : i32
    %c0_i32_0 = arith.constant 0 : i32
    return %arg0, %c0_i32 : i32, i32
  }
  func.func @transform_1(%arg0: i32) -> (i32, i32) {
    %c0_i32 = arith.constant 0 : i32
    %c0_i32_0 = arith.constant 0 : i32
    %c0_i32_1 = arith.constant 0 : i32
    return %c0_i32, %c0_i32_0 : i32, i32
  }
  func.func @transform_2(%arg0: i32) -> (i32, i32) {
    %c0_i32 = arith.constant 0 : i32
    %c0_i32_0 = arith.constant 0 : i32
    %c0_i32_1 = arith.constant 0 : i32
    return %c0_i32, %c0_i32_0 : i32, i32
  }
  func.func @transform_3(%arg0: i32) -> (i32, i32) {
    %c0_i32 = arith.constant 0 : i32
    %c0_i32_0 = arith.constant 0 : i32
    return %arg0, %c0_i32 : i32, i32
  }
}

module attributes {stable_mosaic.version = 11 : i64} {
  func.func @_conv_kernel(%arg0: i32, %arg1: memref<512x144xbf16, #tpu.memory_space<vmem>>, %arg2: memref<144x16xbf16, #tpu.memory_space<vmem>>, %arg3: memref<512x16xf32, #tpu.memory_space<vmem>>, %arg4: memref<1x16xf32, #tpu.memory_space<vmem>>, %arg5: memref<1x16xf32, #tpu.memory_space<vmem>>) attributes {dimension_semantics = [#tpu.dimension_semantics<arbitrary>], iteration_bounds = array<i64: 1>, scalar_prefetch = 0 : i64, scratch_operands = 0 : i64, tpu.core_type = #tpu.core_type<tc>, window_params = [{transform_indices = @transform_0, window_bounds = array<i64: 512, 144>}, {pipeline_mode = #tpu.pipeline_mode<synchronous>, transform_indices = @transform_1, window_bounds = array<i64: 144, 16>}, {transform_indices = @transform_2, window_bounds = array<i64: 512, 16>}, {pipeline_mode = #tpu.pipeline_mode<synchronous>, transform_indices = @transform_3, window_bounds = array<i64: 1, 16>}, {pipeline_mode = #tpu.pipeline_mode<synchronous>, transform_indices = @transform_4, window_bounds = array<i64: 1, 16>}]} {
    %c0 = arith.constant 0 : index
    %c0_0 = arith.constant 0 : index
    %0 = vector.load %arg1[%c0, %c0_0] : memref<512x144xbf16, #tpu.memory_space<vmem>>, vector<512x144xbf16>
    %c0_i32 = arith.constant 0 : i32
    %1 = arith.cmpi eq, %arg0, %c0_i32 : i32
    %2 = arith.extui %1 : i1 to i32
    %c0_i32_1 = arith.constant 0 : i32
    %3 = arith.cmpi ne, %2, %c0_i32_1 : i32
    scf.if %3 {
      %cst_16 = arith.constant 0.000000e+00 : f32
      %18 = vector.broadcast %cst_16 : f32 to vector<1x16xf32>
      %c0_17 = arith.constant 0 : index
      %c0_18 = arith.constant 0 : index
      %19 = vector.load %arg4[%c0_17, %c0_18] : memref<1x16xf32, #tpu.memory_space<vmem>>, vector<1x16xf32>
      tpu.vector_store %arg4[%c0_17, %c0_18], %18 {strides = array<i32>} : memref<1x16xf32, #tpu.memory_space<vmem>>, vector<1x16xf32>,
      %cst_19 = arith.constant 0.000000e+00 : f32
      %20 = vector.broadcast %cst_19 : f32 to vector<1x16xf32>
      %c0_20 = arith.constant 0 : index
      %c0_21 = arith.constant 0 : index
      %21 = vector.load %arg5[%c0_20, %c0_21] : memref<1x16xf32, #tpu.memory_space<vmem>>, vector<1x16xf32>
      tpu.vector_store %arg5[%c0_20, %c0_21], %20 {strides = array<i32>} : memref<1x16xf32, #tpu.memory_space<vmem>>, vector<1x16xf32>,
    } else {
    }
    %c0_2 = arith.constant 0 : index
    %c0_3 = arith.constant 0 : index
    %4 = vector.load %arg2[%c0_2, %c0_3] : memref<144x16xbf16, #tpu.memory_space<vmem>>, vector<144x16xbf16>
    %cst = arith.constant dense<0.000000e+00> : vector<512x16xf32>
    %5 = tpu.matmul %0, %4, %cst {dimension_numbers = #tpu.dot_dimension_numbers<[1], [0], [0], [1], [0, 0, 1, 1], [], []>} : vector<512x144xbf16>, vector<144x16xbf16>, vector<512x16xf32> -> vector<512x16xf32>
    %c0_4 = arith.constant 0 : index
    %c0_5 = arith.constant 0 : index
    %6 = vector.load %arg3[%c0_4, %c0_5] : memref<512x16xf32, #tpu.memory_space<vmem>>, vector<512x16xf32>
    tpu.vector_store %arg3[%c0_4, %c0_5], %5 {strides = array<i32>} : memref<512x16xf32, #tpu.memory_space<vmem>>, vector<512x16xf32>,
    %c0_6 = arith.constant 0 : index
    %c0_7 = arith.constant 0 : index
    %7 = vector.load %arg4[%c0_6, %c0_7] : memref<1x16xf32, #tpu.memory_space<vmem>>, vector<1x16xf32>
    %cst_8 = arith.constant dense<0.000000e+00> : vector<16xf32>
    %8 = vector.multi_reduction <add>, %5, %cst_8 [0] : vector<512x16xf32> to vector<16xf32>
    %9 = vector.shape_cast %8 : vector<16xf32> to vector<1x16xf32>
    %10 = arith.addf %7, %9 : vector<1x16xf32>
    %c0_9 = arith.constant 0 : index
    %c0_10 = arith.constant 0 : index
    %11 = vector.load %arg4[%c0_9, %c0_10] : memref<1x16xf32, #tpu.memory_space<vmem>>, vector<1x16xf32>
    tpu.vector_store %arg4[%c0_9, %c0_10], %10 {strides = array<i32>} : memref<1x16xf32, #tpu.memory_space<vmem>>, vector<1x16xf32>,
    %c0_11 = arith.constant 0 : index
    %c0_12 = arith.constant 0 : index
    %12 = vector.load %arg5[%c0_11, %c0_12] : memref<1x16xf32, #tpu.memory_space<vmem>>, vector<1x16xf32>
    %13 = arith.mulf %5, %5 : vector<512x16xf32>
    %cst_13 = arith.constant dense<0.000000e+00> : vector<16xf32>
    %14 = vector.multi_reduction <add>, %13, %cst_13 [0] : vector<512x16xf32> to vector<16xf32>
    %15 = vector.shape_cast %14 : vector<16xf32> to vector<1x16xf32>
    %16 = arith.addf %12, %15 : vector<1x16xf32>
    %c0_14 = arith.constant 0 : index
    %c0_15 = arith.constant 0 : index
    %17 = vector.load %arg5[%c0_14, %c0_15] : memref<1x16xf32, #tpu.memory_space<vmem>>, vector<1x16xf32>
    tpu.vector_store %arg5[%c0_14, %c0_15], %16 {strides = array<i32>} : memref<1x16xf32, #tpu.memory_space<vmem>>, vector<1x16xf32>,
    return
  }
  func.func @transform_0(%arg0: i32) -> (i32, i32) {
    %c0_i32 = arith.constant 0 : i32
    %c0_i32_0 = arith.constant 0 : i32
    return %arg0, %c0_i32 : i32, i32
  }
  func.func @transform_1(%arg0: i32) -> (i32, i32) {
    %c0_i32 = arith.constant 0 : i32
    %c0_i32_0 = arith.constant 0 : i32
    %c0_i32_1 = arith.constant 0 : i32
    return %c0_i32, %c0_i32_0 : i32, i32
  }
  func.func @transform_2(%arg0: i32) -> (i32, i32) {
    %c0_i32 = arith.constant 0 : i32
    %c0_i32_0 = arith.constant 0 : i32
    return %arg0, %c0_i32 : i32, i32
  }
  func.func @transform_3(%arg0: i32) -> (i32, i32) {
    %c0_i32 = arith.constant 0 : i32
    %c0_i32_0 = arith.constant 0 : i32
    %c0_i32_1 = arith.constant 0 : i32
    return %c0_i32, %c0_i32_0 : i32, i32
  }
  func.func @transform_4(%arg0: i32) -> (i32, i32) {
    %c0_i32 = arith.constant 0 : i32
    %c0_i32_0 = arith.constant 0 : i32
    %c0_i32_1 = arith.constant 0 : i32
    return %c0_i32, %c0_i32_0 : i32, i32
  }
}

module attributes {stable_mosaic.version = 11 : i64} {
  func.func @_bn_relu_kernel(%arg0: i32, %arg1: memref<512x16xf32, #tpu.memory_space<vmem>>, %arg2: memref<1x16xf32, #tpu.memory_space<vmem>>, %arg3: memref<1x16xf32, #tpu.memory_space<vmem>>, %arg4: memref<512x16xbf16, #tpu.memory_space<vmem>>) attributes {dimension_semantics = [#tpu.dimension_semantics<parallel>], iteration_bounds = array<i64: 1>, scalar_prefetch = 0 : i64, scratch_operands = 0 : i64, tpu.core_type = #tpu.core_type<tc>, window_params = [{transform_indices = @transform_0, window_bounds = array<i64: 512, 16>}, {pipeline_mode = #tpu.pipeline_mode<synchronous>, transform_indices = @transform_1, window_bounds = array<i64: 1, 16>}, {pipeline_mode = #tpu.pipeline_mode<synchronous>, transform_indices = @transform_2, window_bounds = array<i64: 1, 16>}, {transform_indices = @transform_3, window_bounds = array<i64: 512, 16>}]} {
    %c0 = arith.constant 0 : index
    %c0_0 = arith.constant 0 : index
    %0 = vector.load %arg1[%c0, %c0_0] : memref<512x16xf32, #tpu.memory_space<vmem>>, vector<512x16xf32>
    %c0_1 = arith.constant 0 : index
    %c0_2 = arith.constant 0 : index
    %1 = vector.load %arg2[%c0_1, %c0_2] : memref<1x16xf32, #tpu.memory_space<vmem>>, vector<1x16xf32>
    %2 = vector.broadcast %1 : vector<1x16xf32> to vector<512x16xf32>
    %3 = arith.mulf %0, %2 : vector<512x16xf32>
    %c0_3 = arith.constant 0 : index
    %c0_4 = arith.constant 0 : index
    %4 = vector.load %arg3[%c0_3, %c0_4] : memref<1x16xf32, #tpu.memory_space<vmem>>, vector<1x16xf32>
    %5 = vector.broadcast %4 : vector<1x16xf32> to vector<512x16xf32>
    %6 = arith.addf %3, %5 : vector<512x16xf32>
    %cst = arith.constant 0.000000e+00 : f32
    %7 = vector.broadcast %cst : f32 to vector<512x16xf32>
    %8 = arith.maximumf %6, %7 : vector<512x16xf32>
    %9 = arith.truncf %8 : vector<512x16xf32> to vector<512x16xbf16>
    %c0_5 = arith.constant 0 : index
    %c0_6 = arith.constant 0 : index
    %10 = vector.load %arg4[%c0_5, %c0_6] : memref<512x16xbf16, #tpu.memory_space<vmem>>, vector<512x16xbf16>
    tpu.vector_store %arg4[%c0_5, %c0_6], %9 {strides = array<i32>} : memref<512x16xbf16, #tpu.memory_space<vmem>>, vector<512x16xbf16>,
    return
  }
  func.func @transform_0(%arg0: i32) -> (i32, i32) {
    %c0_i32 = arith.constant 0 : i32
    %c0_i32_0 = arith.constant 0 : i32
    return %arg0, %c0_i32 : i32, i32
  }
  func.func @transform_1(%arg0: i32) -> (i32, i32) {
    %c0_i32 = arith.constant 0 : i32
    %c0_i32_0 = arith.constant 0 : i32
    %c0_i32_1 = arith.constant 0 : i32
    return %c0_i32, %c0_i32_0 : i32, i32
  }
  func.func @transform_2(%arg0: i32) -> (i32, i32) {
    %c0_i32 = arith.constant 0 : i32
    %c0_i32_0 = arith.constant 0 : i32
    %c0_i32_1 = arith.constant 0 : i32
    return %c0_i32, %c0_i32_0 : i32, i32
  }
  func.func @transform_3(%arg0: i32) -> (i32, i32) {
    %c0_i32 = arith.constant 0 : i32
    %c0_i32_0 = arith.constant 0 : i32
    return %arg0, %c0_i32 : i32, i32
  }
}

module attributes {stable_mosaic.version = 11 : i64} {
  func.func @_conv_kernel(%arg0: i32, %arg1: memref<512x400xbf16, #tpu.memory_space<vmem>>, %arg2: memref<400x32xbf16, #tpu.memory_space<vmem>>, %arg3: memref<512x32xf32, #tpu.memory_space<vmem>>, %arg4: memref<1x32xf32, #tpu.memory_space<vmem>>, %arg5: memref<1x32xf32, #tpu.memory_space<vmem>>) attributes {dimension_semantics = [#tpu.dimension_semantics<arbitrary>], iteration_bounds = array<i64: 1>, scalar_prefetch = 0 : i64, scratch_operands = 0 : i64, tpu.core_type = #tpu.core_type<tc>, window_params = [{transform_indices = @transform_0, window_bounds = array<i64: 512, 400>}, {pipeline_mode = #tpu.pipeline_mode<synchronous>, transform_indices = @transform_1, window_bounds = array<i64: 400, 32>}, {transform_indices = @transform_2, window_bounds = array<i64: 512, 32>}, {pipeline_mode = #tpu.pipeline_mode<synchronous>, transform_indices = @transform_3, window_bounds = array<i64: 1, 32>}, {pipeline_mode = #tpu.pipeline_mode<synchronous>, transform_indices = @transform_4, window_bounds = array<i64: 1, 32>}]} {
    %c0 = arith.constant 0 : index
    %c0_0 = arith.constant 0 : index
    %0 = vector.load %arg1[%c0, %c0_0] : memref<512x400xbf16, #tpu.memory_space<vmem>>, vector<512x400xbf16>
    %c0_i32 = arith.constant 0 : i32
    %1 = arith.cmpi eq, %arg0, %c0_i32 : i32
    %2 = arith.extui %1 : i1 to i32
    %c0_i32_1 = arith.constant 0 : i32
    %3 = arith.cmpi ne, %2, %c0_i32_1 : i32
    scf.if %3 {
      %cst_16 = arith.constant 0.000000e+00 : f32
      %18 = vector.broadcast %cst_16 : f32 to vector<1x32xf32>
      %c0_17 = arith.constant 0 : index
      %c0_18 = arith.constant 0 : index
      %19 = vector.load %arg4[%c0_17, %c0_18] : memref<1x32xf32, #tpu.memory_space<vmem>>, vector<1x32xf32>
      tpu.vector_store %arg4[%c0_17, %c0_18], %18 {strides = array<i32>} : memref<1x32xf32, #tpu.memory_space<vmem>>, vector<1x32xf32>,
      %cst_19 = arith.constant 0.000000e+00 : f32
      %20 = vector.broadcast %cst_19 : f32 to vector<1x32xf32>
      %c0_20 = arith.constant 0 : index
      %c0_21 = arith.constant 0 : index
      %21 = vector.load %arg5[%c0_20, %c0_21] : memref<1x32xf32, #tpu.memory_space<vmem>>, vector<1x32xf32>
      tpu.vector_store %arg5[%c0_20, %c0_21], %20 {strides = array<i32>} : memref<1x32xf32, #tpu.memory_space<vmem>>, vector<1x32xf32>,
    } else {
    }
    %c0_2 = arith.constant 0 : index
    %c0_3 = arith.constant 0 : index
    %4 = vector.load %arg2[%c0_2, %c0_3] : memref<400x32xbf16, #tpu.memory_space<vmem>>, vector<400x32xbf16>
    %cst = arith.constant dense<0.000000e+00> : vector<512x32xf32>
    %5 = tpu.matmul %0, %4, %cst {dimension_numbers = #tpu.dot_dimension_numbers<[1], [0], [0], [1], [0, 0, 1, 1], [], []>} : vector<512x400xbf16>, vector<400x32xbf16>, vector<512x32xf32> -> vector<512x32xf32>
    %c0_4 = arith.constant 0 : index
    %c0_5 = arith.constant 0 : index
    %6 = vector.load %arg3[%c0_4, %c0_5] : memref<512x32xf32, #tpu.memory_space<vmem>>, vector<512x32xf32>
    tpu.vector_store %arg3[%c0_4, %c0_5], %5 {strides = array<i32>} : memref<512x32xf32, #tpu.memory_space<vmem>>, vector<512x32xf32>,
    %c0_6 = arith.constant 0 : index
    %c0_7 = arith.constant 0 : index
    %7 = vector.load %arg4[%c0_6, %c0_7] : memref<1x32xf32, #tpu.memory_space<vmem>>, vector<1x32xf32>
    %cst_8 = arith.constant dense<0.000000e+00> : vector<32xf32>
    %8 = vector.multi_reduction <add>, %5, %cst_8 [0] : vector<512x32xf32> to vector<32xf32>
    %9 = vector.shape_cast %8 : vector<32xf32> to vector<1x32xf32>
    %10 = arith.addf %7, %9 : vector<1x32xf32>
    %c0_9 = arith.constant 0 : index
    %c0_10 = arith.constant 0 : index
    %11 = vector.load %arg4[%c0_9, %c0_10] : memref<1x32xf32, #tpu.memory_space<vmem>>, vector<1x32xf32>
    tpu.vector_store %arg4[%c0_9, %c0_10], %10 {strides = array<i32>} : memref<1x32xf32, #tpu.memory_space<vmem>>, vector<1x32xf32>,
    %c0_11 = arith.constant 0 : index
    %c0_12 = arith.constant 0 : index
    %12 = vector.load %arg5[%c0_11, %c0_12] : memref<1x32xf32, #tpu.memory_space<vmem>>, vector<1x32xf32>
    %13 = arith.mulf %5, %5 : vector<512x32xf32>
    %cst_13 = arith.constant dense<0.000000e+00> : vector<32xf32>
    %14 = vector.multi_reduction <add>, %13, %cst_13 [0] : vector<512x32xf32> to vector<32xf32>
    %15 = vector.shape_cast %14 : vector<32xf32> to vector<1x32xf32>
    %16 = arith.addf %12, %15 : vector<1x32xf32>
    %c0_14 = arith.constant 0 : index
    %c0_15 = arith.constant 0 : index
    %17 = vector.load %arg5[%c0_14, %c0_15] : memref<1x32xf32, #tpu.memory_space<vmem>>, vector<1x32xf32>
    tpu.vector_store %arg5[%c0_14, %c0_15], %16 {strides = array<i32>} : memref<1x32xf32, #tpu.memory_space<vmem>>, vector<1x32xf32>,
    return
  }
  func.func @transform_0(%arg0: i32) -> (i32, i32) {
    %c0_i32 = arith.constant 0 : i32
    %c0_i32_0 = arith.constant 0 : i32
    return %arg0, %c0_i32 : i32, i32
  }
  func.func @transform_1(%arg0: i32) -> (i32, i32) {
    %c0_i32 = arith.constant 0 : i32
    %c0_i32_0 = arith.constant 0 : i32
    %c0_i32_1 = arith.constant 0 : i32
    return %c0_i32, %c0_i32_0 : i32, i32
  }
  func.func @transform_2(%arg0: i32) -> (i32, i32) {
    %c0_i32 = arith.constant 0 : i32
    %c0_i32_0 = arith.constant 0 : i32
    return %arg0, %c0_i32 : i32, i32
  }
  func.func @transform_3(%arg0: i32) -> (i32, i32) {
    %c0_i32 = arith.constant 0 : i32
    %c0_i32_0 = arith.constant 0 : i32
    %c0_i32_1 = arith.constant 0 : i32
    return %c0_i32, %c0_i32_0 : i32, i32
  }
  func.func @transform_4(%arg0: i32) -> (i32, i32) {
    %c0_i32 = arith.constant 0 : i32
    %c0_i32_0 = arith.constant 0 : i32
    %c0_i32_1 = arith.constant 0 : i32
    return %c0_i32, %c0_i32_0 : i32, i32
  }
}

module attributes {stable_mosaic.version = 11 : i64} {
  func.func @_bn_relu_kernel(%arg0: i32, %arg1: memref<512x32xf32, #tpu.memory_space<vmem>>, %arg2: memref<1x32xf32, #tpu.memory_space<vmem>>, %arg3: memref<1x32xf32, #tpu.memory_space<vmem>>, %arg4: memref<512x32xbf16, #tpu.memory_space<vmem>>) attributes {dimension_semantics = [#tpu.dimension_semantics<parallel>], iteration_bounds = array<i64: 1>, scalar_prefetch = 0 : i64, scratch_operands = 0 : i64, tpu.core_type = #tpu.core_type<tc>, window_params = [{transform_indices = @transform_0, window_bounds = array<i64: 512, 32>}, {pipeline_mode = #tpu.pipeline_mode<synchronous>, transform_indices = @transform_1, window_bounds = array<i64: 1, 32>}, {pipeline_mode = #tpu.pipeline_mode<synchronous>, transform_indices = @transform_2, window_bounds = array<i64: 1, 32>}, {transform_indices = @transform_3, window_bounds = array<i64: 512, 32>}]} {
    %c0 = arith.constant 0 : index
    %c0_0 = arith.constant 0 : index
    %0 = vector.load %arg1[%c0, %c0_0] : memref<512x32xf32, #tpu.memory_space<vmem>>, vector<512x32xf32>
    %c0_1 = arith.constant 0 : index
    %c0_2 = arith.constant 0 : index
    %1 = vector.load %arg2[%c0_1, %c0_2] : memref<1x32xf32, #tpu.memory_space<vmem>>, vector<1x32xf32>
    %2 = vector.broadcast %1 : vector<1x32xf32> to vector<512x32xf32>
    %3 = arith.mulf %0, %2 : vector<512x32xf32>
    %c0_3 = arith.constant 0 : index
    %c0_4 = arith.constant 0 : index
    %4 = vector.load %arg3[%c0_3, %c0_4] : memref<1x32xf32, #tpu.memory_space<vmem>>, vector<1x32xf32>
    %5 = vector.broadcast %4 : vector<1x32xf32> to vector<512x32xf32>
    %6 = arith.addf %3, %5 : vector<512x32xf32>
    %cst = arith.constant 0.000000e+00 : f32
    %7 = vector.broadcast %cst : f32 to vector<512x32xf32>
    %8 = arith.maximumf %6, %7 : vector<512x32xf32>
    %9 = arith.truncf %8 : vector<512x32xf32> to vector<512x32xbf16>
    %c0_5 = arith.constant 0 : index
    %c0_6 = arith.constant 0 : index
    %10 = vector.load %arg4[%c0_5, %c0_6] : memref<512x32xbf16, #tpu.memory_space<vmem>>, vector<512x32xbf16>
    tpu.vector_store %arg4[%c0_5, %c0_6], %9 {strides = array<i32>} : memref<512x32xbf16, #tpu.memory_space<vmem>>, vector<512x32xbf16>,
    return
  }
  func.func @transform_0(%arg0: i32) -> (i32, i32) {
    %c0_i32 = arith.constant 0 : i32
    %c0_i32_0 = arith.constant 0 : i32
    return %arg0, %c0_i32 : i32, i32
  }
  func.func @transform_1(%arg0: i32) -> (i32, i32) {
    %c0_i32 = arith.constant 0 : i32
    %c0_i32_0 = arith.constant 0 : i32
    %c0_i32_1 = arith.constant 0 : i32
    return %c0_i32, %c0_i32_0 : i32, i32
  }
  func.func @transform_2(%arg0: i32) -> (i32, i32) {
    %c0_i32 = arith.constant 0 : i32
    %c0_i32_0 = arith.constant 0 : i32
    %c0_i32_1 = arith.constant 0 : i32
    return %c0_i32, %c0_i32_0 : i32, i32
  }
  func.func @transform_3(%arg0: i32) -> (i32, i32) {
    %c0_i32 = arith.constant 0 : i32
    %c0_i32_0 = arith.constant 0 : i32
    return %arg0, %c0_i32 : i32, i32
  }
}

module attributes {stable_mosaic.version = 11 : i64} {
  func.func @_conv_kernel(%arg0: i32, %arg1: memref<128x288xbf16, #tpu.memory_space<vmem>>, %arg2: memref<288x32xbf16, #tpu.memory_space<vmem>>, %arg3: memref<128x32xf32, #tpu.memory_space<vmem>>, %arg4: memref<1x32xf32, #tpu.memory_space<vmem>>, %arg5: memref<1x32xf32, #tpu.memory_space<vmem>>) attributes {dimension_semantics = [#tpu.dimension_semantics<arbitrary>], iteration_bounds = array<i64: 1>, scalar_prefetch = 0 : i64, scratch_operands = 0 : i64, tpu.core_type = #tpu.core_type<tc>, window_params = [{transform_indices = @transform_0, window_bounds = array<i64: 128, 288>}, {pipeline_mode = #tpu.pipeline_mode<synchronous>, transform_indices = @transform_1, window_bounds = array<i64: 288, 32>}, {transform_indices = @transform_2, window_bounds = array<i64: 128, 32>}, {pipeline_mode = #tpu.pipeline_mode<synchronous>, transform_indices = @transform_3, window_bounds = array<i64: 1, 32>}, {pipeline_mode = #tpu.pipeline_mode<synchronous>, transform_indices = @transform_4, window_bounds = array<i64: 1, 32>}]} {
    %c0 = arith.constant 0 : index
    %c0_0 = arith.constant 0 : index
    %0 = vector.load %arg1[%c0, %c0_0] : memref<128x288xbf16, #tpu.memory_space<vmem>>, vector<128x288xbf16>
    %c0_i32 = arith.constant 0 : i32
    %1 = arith.cmpi eq, %arg0, %c0_i32 : i32
    %2 = arith.extui %1 : i1 to i32
    %c0_i32_1 = arith.constant 0 : i32
    %3 = arith.cmpi ne, %2, %c0_i32_1 : i32
    scf.if %3 {
      %cst_16 = arith.constant 0.000000e+00 : f32
      %18 = vector.broadcast %cst_16 : f32 to vector<1x32xf32>
      %c0_17 = arith.constant 0 : index
      %c0_18 = arith.constant 0 : index
      %19 = vector.load %arg4[%c0_17, %c0_18] : memref<1x32xf32, #tpu.memory_space<vmem>>, vector<1x32xf32>
      tpu.vector_store %arg4[%c0_17, %c0_18], %18 {strides = array<i32>} : memref<1x32xf32, #tpu.memory_space<vmem>>, vector<1x32xf32>,
      %cst_19 = arith.constant 0.000000e+00 : f32
      %20 = vector.broadcast %cst_19 : f32 to vector<1x32xf32>
      %c0_20 = arith.constant 0 : index
      %c0_21 = arith.constant 0 : index
      %21 = vector.load %arg5[%c0_20, %c0_21] : memref<1x32xf32, #tpu.memory_space<vmem>>, vector<1x32xf32>
      tpu.vector_store %arg5[%c0_20, %c0_21], %20 {strides = array<i32>} : memref<1x32xf32, #tpu.memory_space<vmem>>, vector<1x32xf32>,
    } else {
    }
    %c0_2 = arith.constant 0 : index
    %c0_3 = arith.constant 0 : index
    %4 = vector.load %arg2[%c0_2, %c0_3] : memref<288x32xbf16, #tpu.memory_space<vmem>>, vector<288x32xbf16>
    %cst = arith.constant dense<0.000000e+00> : vector<128x32xf32>
    %5 = tpu.matmul %0, %4, %cst {dimension_numbers = #tpu.dot_dimension_numbers<[1], [0], [0], [1], [0, 0, 1, 1], [], []>} : vector<128x288xbf16>, vector<288x32xbf16>, vector<128x32xf32> -> vector<128x32xf32>
    %c0_4 = arith.constant 0 : index
    %c0_5 = arith.constant 0 : index
    %6 = vector.load %arg3[%c0_4, %c0_5] : memref<128x32xf32, #tpu.memory_space<vmem>>, vector<128x32xf32>
    tpu.vector_store %arg3[%c0_4, %c0_5], %5 {strides = array<i32>} : memref<128x32xf32, #tpu.memory_space<vmem>>, vector<128x32xf32>,
    %c0_6 = arith.constant 0 : index
    %c0_7 = arith.constant 0 : index
    %7 = vector.load %arg4[%c0_6, %c0_7] : memref<1x32xf32, #tpu.memory_space<vmem>>, vector<1x32xf32>
    %cst_8 = arith.constant dense<0.000000e+00> : vector<32xf32>
    %8 = vector.multi_reduction <add>, %5, %cst_8 [0] : vector<128x32xf32> to vector<32xf32>
    %9 = vector.shape_cast %8 : vector<32xf32> to vector<1x32xf32>
    %10 = arith.addf %7, %9 : vector<1x32xf32>
    %c0_9 = arith.constant 0 : index
    %c0_10 = arith.constant 0 : index
    %11 = vector.load %arg4[%c0_9, %c0_10] : memref<1x32xf32, #tpu.memory_space<vmem>>, vector<1x32xf32>
    tpu.vector_store %arg4[%c0_9, %c0_10], %10 {strides = array<i32>} : memref<1x32xf32, #tpu.memory_space<vmem>>, vector<1x32xf32>,
    %c0_11 = arith.constant 0 : index
    %c0_12 = arith.constant 0 : index
    %12 = vector.load %arg5[%c0_11, %c0_12] : memref<1x32xf32, #tpu.memory_space<vmem>>, vector<1x32xf32>
    %13 = arith.mulf %5, %5 : vector<128x32xf32>
    %cst_13 = arith.constant dense<0.000000e+00> : vector<32xf32>
    %14 = vector.multi_reduction <add>, %13, %cst_13 [0] : vector<128x32xf32> to vector<32xf32>
    %15 = vector.shape_cast %14 : vector<32xf32> to vector<1x32xf32>
    %16 = arith.addf %12, %15 : vector<1x32xf32>
    %c0_14 = arith.constant 0 : index
    %c0_15 = arith.constant 0 : index
    %17 = vector.load %arg5[%c0_14, %c0_15] : memref<1x32xf32, #tpu.memory_space<vmem>>, vector<1x32xf32>
    tpu.vector_store %arg5[%c0_14, %c0_15], %16 {strides = array<i32>} : memref<1x32xf32, #tpu.memory_space<vmem>>, vector<1x32xf32>,
    return
  }
  func.func @transform_0(%arg0: i32) -> (i32, i32) {
    %c0_i32 = arith.constant 0 : i32
    %c0_i32_0 = arith.constant 0 : i32
    return %arg0, %c0_i32 : i32, i32
  }
  func.func @transform_1(%arg0: i32) -> (i32, i32) {
    %c0_i32 = arith.constant 0 : i32
    %c0_i32_0 = arith.constant 0 : i32
    %c0_i32_1 = arith.constant 0 : i32
    return %c0_i32, %c0_i32_0 : i32, i32
  }
  func.func @transform_2(%arg0: i32) -> (i32, i32) {
    %c0_i32 = arith.constant 0 : i32
    %c0_i32_0 = arith.constant 0 : i32
    return %arg0, %c0_i32 : i32, i32
  }
  func.func @transform_3(%arg0: i32) -> (i32, i32) {
    %c0_i32 = arith.constant 0 : i32
    %c0_i32_0 = arith.constant 0 : i32
    %c0_i32_1 = arith.constant 0 : i32
    return %c0_i32, %c0_i32_0 : i32, i32
  }
  func.func @transform_4(%arg0: i32) -> (i32, i32) {
    %c0_i32 = arith.constant 0 : i32
    %c0_i32_0 = arith.constant 0 : i32
    %c0_i32_1 = arith.constant 0 : i32
    return %c0_i32, %c0_i32_0 : i32, i32
  }
}

module attributes {stable_mosaic.version = 11 : i64} {
  func.func @_bn_conv_kernel(%arg0: i32, %arg1: memref<128x32xf32, #tpu.memory_space<vmem>>, %arg2: memref<1x32xf32, #tpu.memory_space<vmem>>, %arg3: memref<1x32xf32, #tpu.memory_space<vmem>>, %arg4: memref<32x32xbf16, #tpu.memory_space<vmem>>, %arg5: memref<128x32xf32, #tpu.memory_space<vmem>>, %arg6: memref<1x32xf32, #tpu.memory_space<vmem>>, %arg7: memref<1x32xf32, #tpu.memory_space<vmem>>) attributes {dimension_semantics = [#tpu.dimension_semantics<arbitrary>], iteration_bounds = array<i64: 1>, scalar_prefetch = 0 : i64, scratch_operands = 0 : i64, tpu.core_type = #tpu.core_type<tc>, window_params = [{transform_indices = @transform_0, window_bounds = array<i64: 128, 32>}, {pipeline_mode = #tpu.pipeline_mode<synchronous>, transform_indices = @transform_1, window_bounds = array<i64: 1, 32>}, {pipeline_mode = #tpu.pipeline_mode<synchronous>, transform_indices = @transform_2, window_bounds = array<i64: 1, 32>}, {pipeline_mode = #tpu.pipeline_mode<synchronous>, transform_indices = @transform_3, window_bounds = array<i64: 32, 32>}, {transform_indices = @transform_4, window_bounds = array<i64: 128, 32>}, {pipeline_mode = #tpu.pipeline_mode<synchronous>, transform_indices = @transform_5, window_bounds = array<i64: 1, 32>}, {pipeline_mode = #tpu.pipeline_mode<synchronous>, transform_indices = @transform_6, window_bounds = array<i64: 1, 32>}]} {
    %c0 = arith.constant 0 : index
    %c0_0 = arith.constant 0 : index
    %0 = vector.load %arg1[%c0, %c0_0] : memref<128x32xf32, #tpu.memory_space<vmem>>, vector<128x32xf32>
    %c0_1 = arith.constant 0 : index
    %c0_2 = arith.constant 0 : index
    %1 = vector.load %arg2[%c0_1, %c0_2] : memref<1x32xf32, #tpu.memory_space<vmem>>, vector<1x32xf32>
    %2 = vector.broadcast %1 : vector<1x32xf32> to vector<128x32xf32>
    %3 = arith.mulf %0, %2 : vector<128x32xf32>
    %c0_3 = arith.constant 0 : index
    %c0_4 = arith.constant 0 : index
    %4 = vector.load %arg3[%c0_3, %c0_4] : memref<1x32xf32, #tpu.memory_space<vmem>>, vector<1x32xf32>
    %5 = vector.broadcast %4 : vector<1x32xf32> to vector<128x32xf32>
    %6 = arith.addf %3, %5 : vector<128x32xf32>
    %cst = arith.constant 0.000000e+00 : f32
    %7 = vector.broadcast %cst : f32 to vector<128x32xf32>
    %8 = arith.maximumf %6, %7 : vector<128x32xf32>
    %9 = arith.truncf %8 : vector<128x32xf32> to vector<128x32xbf16>
    %c0_i32 = arith.constant 0 : i32
    %10 = arith.cmpi eq, %arg0, %c0_i32 : i32
    %11 = arith.extui %10 : i1 to i32
    %c0_i32_5 = arith.constant 0 : i32
    %12 = arith.cmpi ne, %11, %c0_i32_5 : i32
    scf.if %12 {
      %cst_21 = arith.constant 0.000000e+00 : f32
      %27 = vector.broadcast %cst_21 : f32 to vector<1x32xf32>
      %c0_22 = arith.constant 0 : index
      %c0_23 = arith.constant 0 : index
      %28 = vector.load %arg6[%c0_22, %c0_23] : memref<1x32xf32, #tpu.memory_space<vmem>>, vector<1x32xf32>
      tpu.vector_store %arg6[%c0_22, %c0_23], %27 {strides = array<i32>} : memref<1x32xf32, #tpu.memory_space<vmem>>, vector<1x32xf32>,
      %cst_24 = arith.constant 0.000000e+00 : f32
      %29 = vector.broadcast %cst_24 : f32 to vector<1x32xf32>
      %c0_25 = arith.constant 0 : index
      %c0_26 = arith.constant 0 : index
      %30 = vector.load %arg7[%c0_25, %c0_26] : memref<1x32xf32, #tpu.memory_space<vmem>>, vector<1x32xf32>
      tpu.vector_store %arg7[%c0_25, %c0_26], %29 {strides = array<i32>} : memref<1x32xf32, #tpu.memory_space<vmem>>, vector<1x32xf32>,
    } else {
    }
    %c0_6 = arith.constant 0 : index
    %c0_7 = arith.constant 0 : index
    %13 = vector.load %arg4[%c0_6, %c0_7] : memref<32x32xbf16, #tpu.memory_space<vmem>>, vector<32x32xbf16>
    %cst_8 = arith.constant dense<0.000000e+00> : vector<128x32xf32>
    %14 = tpu.matmul %9, %13, %cst_8 {dimension_numbers = #tpu.dot_dimension_numbers<[1], [0], [0], [1], [0, 0, 1, 1], [], []>} : vector<128x32xbf16>, vector<32x32xbf16>, vector<128x32xf32> -> vector<128x32xf32>
    %c0_9 = arith.constant 0 : index
    %c0_10 = arith.constant 0 : index
    %15 = vector.load %arg5[%c0_9, %c0_10] : memref<128x32xf32, #tpu.memory_space<vmem>>, vector<128x32xf32>
    tpu.vector_store %arg5[%c0_9, %c0_10], %14 {strides = array<i32>} : memref<128x32xf32, #tpu.memory_space<vmem>>, vector<128x32xf32>,
    %c0_11 = arith.constant 0 : index
    %c0_12 = arith.constant 0 : index
    %16 = vector.load %arg6[%c0_11, %c0_12] : memref<1x32xf32, #tpu.memory_space<vmem>>, vector<1x32xf32>
    %cst_13 = arith.constant dense<0.000000e+00> : vector<32xf32>
    %17 = vector.multi_reduction <add>, %14, %cst_13 [0] : vector<128x32xf32> to vector<32xf32>
    %18 = vector.shape_cast %17 : vector<32xf32> to vector<1x32xf32>
    %19 = arith.addf %16, %18 : vector<1x32xf32>
    %c0_14 = arith.constant 0 : index
    %c0_15 = arith.constant 0 : index
    %20 = vector.load %arg6[%c0_14, %c0_15] : memref<1x32xf32, #tpu.memory_space<vmem>>, vector<1x32xf32>
    tpu.vector_store %arg6[%c0_14, %c0_15], %19 {strides = array<i32>} : memref<1x32xf32, #tpu.memory_space<vmem>>, vector<1x32xf32>,
    %c0_16 = arith.constant 0 : index
    %c0_17 = arith.constant 0 : index
    %21 = vector.load %arg7[%c0_16, %c0_17] : memref<1x32xf32, #tpu.memory_space<vmem>>, vector<1x32xf32>
    %22 = arith.mulf %14, %14 : vector<128x32xf32>
    %cst_18 = arith.constant dense<0.000000e+00> : vector<32xf32>
    %23 = vector.multi_reduction <add>, %22, %cst_18 [0] : vector<128x32xf32> to vector<32xf32>
    %24 = vector.shape_cast %23 : vector<32xf32> to vector<1x32xf32>
    %25 = arith.addf %21, %24 : vector<1x32xf32>
    %c0_19 = arith.constant 0 : index
    %c0_20 = arith.constant 0 : index
    %26 = vector.load %arg7[%c0_19, %c0_20] : memref<1x32xf32, #tpu.memory_space<vmem>>, vector<1x32xf32>
    tpu.vector_store %arg7[%c0_19, %c0_20], %25 {strides = array<i32>} : memref<1x32xf32, #tpu.memory_space<vmem>>, vector<1x32xf32>,
    return
  }
  func.func @transform_0(%arg0: i32) -> (i32, i32) {
    %c0_i32 = arith.constant 0 : i32
    %c0_i32_0 = arith.constant 0 : i32
    return %arg0, %c0_i32 : i32, i32
  }
  func.func @transform_1(%arg0: i32) -> (i32, i32) {
    %c0_i32 = arith.constant 0 : i32
    %c0_i32_0 = arith.constant 0 : i32
    %c0_i32_1 = arith.constant 0 : i32
    return %c0_i32, %c0_i32_0 : i32, i32
  }
  func.func @transform_2(%arg0: i32) -> (i32, i32) {
    %c0_i32 = arith.constant 0 : i32
    %c0_i32_0 = arith.constant 0 : i32
    %c0_i32_1 = arith.constant 0 : i32
    return %c0_i32, %c0_i32_0 : i32, i32
  }
  func.func @transform_3(%arg0: i32) -> (i32, i32) {
    %c0_i32 = arith.constant 0 : i32
    %c0_i32_0 = arith.constant 0 : i32
    %c0_i32_1 = arith.constant 0 : i32
    return %c0_i32, %c0_i32_0 : i32, i32
  }
  func.func @transform_4(%arg0: i32) -> (i32, i32) {
    %c0_i32 = arith.constant 0 : i32
    %c0_i32_0 = arith.constant 0 : i32
    return %arg0, %c0_i32 : i32, i32
  }
  func.func @transform_5(%arg0: i32) -> (i32, i32) {
    %c0_i32 = arith.constant 0 : i32
    %c0_i32_0 = arith.constant 0 : i32
    %c0_i32_1 = arith.constant 0 : i32
    return %c0_i32, %c0_i32_0 : i32, i32
  }
  func.func @transform_6(%arg0: i32) -> (i32, i32) {
    %c0_i32 = arith.constant 0 : i32
    %c0_i32_0 = arith.constant 0 : i32
    %c0_i32_1 = arith.constant 0 : i32
    return %c0_i32, %c0_i32_0 : i32, i32
  }
}

module attributes {stable_mosaic.version = 11 : i64} {
  func.func @_bn_conv_kernel(%arg0: i32, %arg1: memref<128x32xf32, #tpu.memory_space<vmem>>, %arg2: memref<1x32xf32, #tpu.memory_space<vmem>>, %arg3: memref<1x32xf32, #tpu.memory_space<vmem>>, %arg4: memref<32x4xbf16, #tpu.memory_space<vmem>>, %arg5: memref<128x4xf32, #tpu.memory_space<vmem>>, %arg6: memref<1x4xf32, #tpu.memory_space<vmem>>, %arg7: memref<1x4xf32, #tpu.memory_space<vmem>>) attributes {dimension_semantics = [#tpu.dimension_semantics<arbitrary>], iteration_bounds = array<i64: 1>, scalar_prefetch = 0 : i64, scratch_operands = 0 : i64, tpu.core_type = #tpu.core_type<tc>, window_params = [{transform_indices = @transform_0, window_bounds = array<i64: 128, 32>}, {pipeline_mode = #tpu.pipeline_mode<synchronous>, transform_indices = @transform_1, window_bounds = array<i64: 1, 32>}, {pipeline_mode = #tpu.pipeline_mode<synchronous>, transform_indices = @transform_2, window_bounds = array<i64: 1, 32>}, {pipeline_mode = #tpu.pipeline_mode<synchronous>, transform_indices = @transform_3, window_bounds = array<i64: 32, 4>}, {transform_indices = @transform_4, window_bounds = array<i64: 128, 4>}, {pipeline_mode = #tpu.pipeline_mode<synchronous>, transform_indices = @transform_5, window_bounds = array<i64: 1, 4>}, {pipeline_mode = #tpu.pipeline_mode<synchronous>, transform_indices = @transform_6, window_bounds = array<i64: 1, 4>}]} {
    %c0 = arith.constant 0 : index
    %c0_0 = arith.constant 0 : index
    %0 = vector.load %arg1[%c0, %c0_0] : memref<128x32xf32, #tpu.memory_space<vmem>>, vector<128x32xf32>
    %c0_1 = arith.constant 0 : index
    %c0_2 = arith.constant 0 : index
    %1 = vector.load %arg2[%c0_1, %c0_2] : memref<1x32xf32, #tpu.memory_space<vmem>>, vector<1x32xf32>
    %2 = vector.broadcast %1 : vector<1x32xf32> to vector<128x32xf32>
    %3 = arith.mulf %0, %2 : vector<128x32xf32>
    %c0_3 = arith.constant 0 : index
    %c0_4 = arith.constant 0 : index
    %4 = vector.load %arg3[%c0_3, %c0_4] : memref<1x32xf32, #tpu.memory_space<vmem>>, vector<1x32xf32>
    %5 = vector.broadcast %4 : vector<1x32xf32> to vector<128x32xf32>
    %6 = arith.addf %3, %5 : vector<128x32xf32>
    %cst = arith.constant 0.000000e+00 : f32
    %7 = vector.broadcast %cst : f32 to vector<128x32xf32>
    %8 = arith.maximumf %6, %7 : vector<128x32xf32>
    %9 = arith.truncf %8 : vector<128x32xf32> to vector<128x32xbf16>
    %c0_i32 = arith.constant 0 : i32
    %10 = arith.cmpi eq, %arg0, %c0_i32 : i32
    %11 = arith.extui %10 : i1 to i32
    %c0_i32_5 = arith.constant 0 : i32
    %12 = arith.cmpi ne, %11, %c0_i32_5 : i32
    scf.if %12 {
      %cst_21 = arith.constant 0.000000e+00 : f32
      %27 = vector.broadcast %cst_21 : f32 to vector<1x4xf32>
      %c0_22 = arith.constant 0 : index
      %c0_23 = arith.constant 0 : index
      %28 = vector.load %arg6[%c0_22, %c0_23] : memref<1x4xf32, #tpu.memory_space<vmem>>, vector<1x4xf32>
      tpu.vector_store %arg6[%c0_22, %c0_23], %27 {strides = array<i32>} : memref<1x4xf32, #tpu.memory_space<vmem>>, vector<1x4xf32>,
      %cst_24 = arith.constant 0.000000e+00 : f32
      %29 = vector.broadcast %cst_24 : f32 to vector<1x4xf32>
      %c0_25 = arith.constant 0 : index
      %c0_26 = arith.constant 0 : index
      %30 = vector.load %arg7[%c0_25, %c0_26] : memref<1x4xf32, #tpu.memory_space<vmem>>, vector<1x4xf32>
      tpu.vector_store %arg7[%c0_25, %c0_26], %29 {strides = array<i32>} : memref<1x4xf32, #tpu.memory_space<vmem>>, vector<1x4xf32>,
    } else {
    }
    %c0_6 = arith.constant 0 : index
    %c0_7 = arith.constant 0 : index
    %13 = vector.load %arg4[%c0_6, %c0_7] : memref<32x4xbf16, #tpu.memory_space<vmem>>, vector<32x4xbf16>
    %cst_8 = arith.constant dense<0.000000e+00> : vector<128x4xf32>
    %14 = tpu.matmul %9, %13, %cst_8 {dimension_numbers = #tpu.dot_dimension_numbers<[1], [0], [0], [1], [0, 0, 1, 1], [], []>} : vector<128x32xbf16>, vector<32x4xbf16>, vector<128x4xf32> -> vector<128x4xf32>
    %c0_9 = arith.constant 0 : index
    %c0_10 = arith.constant 0 : index
    %15 = vector.load %arg5[%c0_9, %c0_10] : memref<128x4xf32, #tpu.memory_space<vmem>>, vector<128x4xf32>
    tpu.vector_store %arg5[%c0_9, %c0_10], %14 {strides = array<i32>} : memref<128x4xf32, #tpu.memory_space<vmem>>, vector<128x4xf32>,
    %c0_11 = arith.constant 0 : index
    %c0_12 = arith.constant 0 : index
    %16 = vector.load %arg6[%c0_11, %c0_12] : memref<1x4xf32, #tpu.memory_space<vmem>>, vector<1x4xf32>
    %cst_13 = arith.constant dense<0.000000e+00> : vector<4xf32>
    %17 = vector.multi_reduction <add>, %14, %cst_13 [0] : vector<128x4xf32> to vector<4xf32>
    %18 = vector.shape_cast %17 : vector<4xf32> to vector<1x4xf32>
    %19 = arith.addf %16, %18 : vector<1x4xf32>
    %c0_14 = arith.constant 0 : index
    %c0_15 = arith.constant 0 : index
    %20 = vector.load %arg6[%c0_14, %c0_15] : memref<1x4xf32, #tpu.memory_space<vmem>>, vector<1x4xf32>
    tpu.vector_store %arg6[%c0_14, %c0_15], %19 {strides = array<i32>} : memref<1x4xf32, #tpu.memory_space<vmem>>, vector<1x4xf32>,
    %c0_16 = arith.constant 0 : index
    %c0_17 = arith.constant 0 : index
    %21 = vector.load %arg7[%c0_16, %c0_17] : memref<1x4xf32, #tpu.memory_space<vmem>>, vector<1x4xf32>
    %22 = arith.mulf %14, %14 : vector<128x4xf32>
    %cst_18 = arith.constant dense<0.000000e+00> : vector<4xf32>
    %23 = vector.multi_reduction <add>, %22, %cst_18 [0] : vector<128x4xf32> to vector<4xf32>
    %24 = vector.shape_cast %23 : vector<4xf32> to vector<1x4xf32>
    %25 = arith.addf %21, %24 : vector<1x4xf32>
    %c0_19 = arith.constant 0 : index
    %c0_20 = arith.constant 0 : index
    %26 = vector.load %arg7[%c0_19, %c0_20] : memref<1x4xf32, #tpu.memory_space<vmem>>, vector<1x4xf32>
    tpu.vector_store %arg7[%c0_19, %c0_20], %25 {strides = array<i32>} : memref<1x4xf32, #tpu.memory_space<vmem>>, vector<1x4xf32>,
    return
  }
  func.func @transform_0(%arg0: i32) -> (i32, i32) {
    %c0_i32 = arith.constant 0 : i32
    %c0_i32_0 = arith.constant 0 : i32
    return %arg0, %c0_i32 : i32, i32
  }
  func.func @transform_1(%arg0: i32) -> (i32, i32) {
    %c0_i32 = arith.constant 0 : i32
    %c0_i32_0 = arith.constant 0 : i32
    %c0_i32_1 = arith.constant 0 : i32
    return %c0_i32, %c0_i32_0 : i32, i32
  }
  func.func @transform_2(%arg0: i32) -> (i32, i32) {
    %c0_i32 = arith.constant 0 : i32
    %c0_i32_0 = arith.constant 0 : i32
    %c0_i32_1 = arith.constant 0 : i32
    return %c0_i32, %c0_i32_0 : i32, i32
  }
  func.func @transform_3(%arg0: i32) -> (i32, i32) {
    %c0_i32 = arith.constant 0 : i32
    %c0_i32_0 = arith.constant 0 : i32
    %c0_i32_1 = arith.constant 0 : i32
    return %c0_i32, %c0_i32_0 : i32, i32
  }
  func.func @transform_4(%arg0: i32) -> (i32, i32) {
    %c0_i32 = arith.constant 0 : i32
    %c0_i32_0 = arith.constant 0 : i32
    return %arg0, %c0_i32 : i32, i32
  }
  func.func @transform_5(%arg0: i32) -> (i32, i32) {
    %c0_i32 = arith.constant 0 : i32
    %c0_i32_0 = arith.constant 0 : i32
    %c0_i32_1 = arith.constant 0 : i32
    return %c0_i32, %c0_i32_0 : i32, i32
  }
  func.func @transform_6(%arg0: i32) -> (i32, i32) {
    %c0_i32 = arith.constant 0 : i32
    %c0_i32_0 = arith.constant 0 : i32
    %c0_i32_1 = arith.constant 0 : i32
    return %c0_i32, %c0_i32_0 : i32, i32
  }
}

module attributes {stable_mosaic.version = 11 : i64} {
  func.func @_fc_fused_kernel(%arg0: i32, %arg1: memref<2x256xf32, #tpu.memory_space<vmem>>, %arg2: memref<1x256xf32, #tpu.memory_space<vmem>>, %arg3: memref<1x256xf32, #tpu.memory_space<vmem>>, %arg4: memref<256x32xf32, #tpu.memory_space<vmem>>, %arg5: memref<1x32xf32, #tpu.memory_space<vmem>>, %arg6: memref<32x16xf32, #tpu.memory_space<vmem>>, %arg7: memref<1x16xf32, #tpu.memory_space<vmem>>, %arg8: memref<16x10xf32, #tpu.memory_space<vmem>>, %arg9: memref<1x10xf32, #tpu.memory_space<vmem>>, %arg10: memref<2x10xf32, #tpu.memory_space<vmem>>) attributes {dimension_semantics = [#tpu.dimension_semantics<arbitrary>], iteration_bounds = array<i64: 1>, scalar_prefetch = 0 : i64, scratch_operands = 0 : i64, tpu.core_type = #tpu.core_type<tc>, window_params = [{pipeline_mode = #tpu.pipeline_mode<synchronous>, transform_indices = @transform_0, window_bounds = array<i64: 2, 256>}, {pipeline_mode = #tpu.pipeline_mode<synchronous>, transform_indices = @transform_1, window_bounds = array<i64: 1, 256>}, {pipeline_mode = #tpu.pipeline_mode<synchronous>, transform_indices = @transform_2, window_bounds = array<i64: 1, 256>}, {pipeline_mode = #tpu.pipeline_mode<synchronous>, transform_indices = @transform_3, window_bounds = array<i64: 256, 32>}, {pipeline_mode = #tpu.pipeline_mode<synchronous>, transform_indices = @transform_4, window_bounds = array<i64: 1, 32>}, {pipeline_mode = #tpu.pipeline_mode<synchronous>, transform_indices = @transform_5, window_bounds = array<i64: 32, 16>}, {pipeline_mode = #tpu.pipeline_mode<synchronous>, transform_indices = @transform_6, window_bounds = array<i64: 1, 16>}, {pipeline_mode = #tpu.pipeline_mode<synchronous>, transform_indices = @transform_7, window_bounds = array<i64: 16, 10>}, {pipeline_mode = #tpu.pipeline_mode<synchronous>, transform_indices = @transform_8, window_bounds = array<i64: 1, 10>}, {pipeline_mode = #tpu.pipeline_mode<synchronous>, transform_indices = @transform_9, window_bounds = array<i64: 2, 10>}]} {
    %c0 = arith.constant 0 : index
    %c0_0 = arith.constant 0 : index
    %0 = vector.load %arg1[%c0, %c0_0] : memref<2x256xf32, #tpu.memory_space<vmem>>, vector<2x256xf32>
    %c0_1 = arith.constant 0 : index
    %c0_2 = arith.constant 0 : index
    %1 = vector.load %arg2[%c0_1, %c0_2] : memref<1x256xf32, #tpu.memory_space<vmem>>, vector<1x256xf32>
    %2 = vector.broadcast %1 : vector<1x256xf32> to vector<2x256xf32>
    %3 = arith.mulf %0, %2 : vector<2x256xf32>
    %c0_3 = arith.constant 0 : index
    %c0_4 = arith.constant 0 : index
    %4 = vector.load %arg3[%c0_3, %c0_4] : memref<1x256xf32, #tpu.memory_space<vmem>>, vector<1x256xf32>
    %5 = vector.broadcast %4 : vector<1x256xf32> to vector<2x256xf32>
    %6 = arith.addf %3, %5 : vector<2x256xf32>
    %cst = arith.constant 0.000000e+00 : f32
    %7 = vector.broadcast %cst : f32 to vector<2x256xf32>
    %8 = arith.maximumf %6, %7 : vector<2x256xf32>
    %c0_5 = arith.constant 0 : index
    %c0_6 = arith.constant 0 : index
    %9 = vector.load %arg4[%c0_5, %c0_6] : memref<256x32xf32, #tpu.memory_space<vmem>>, vector<256x32xf32>
    %cst_7 = arith.constant dense<0.000000e+00> : vector<2x32xf32>
    %10 = tpu.matmul %8, %9, %cst_7 {dimension_numbers = #tpu.dot_dimension_numbers<[1], [0], [0], [1], [0, 0, 1, 1], [], []>} : vector<2x256xf32>, vector<256x32xf32>, vector<2x32xf32> -> vector<2x32xf32>
    %c0_8 = arith.constant 0 : index
    %c0_9 = arith.constant 0 : index
    %11 = vector.load %arg5[%c0_8, %c0_9] : memref<1x32xf32, #tpu.memory_space<vmem>>, vector<1x32xf32>
    %12 = vector.broadcast %11 : vector<1x32xf32> to vector<2x32xf32>
    %13 = arith.addf %10, %12 : vector<2x32xf32>
    %cst_10 = arith.constant 0.000000e+00 : f32
    %14 = vector.broadcast %cst_10 : f32 to vector<2x32xf32>
    %15 = arith.maximumf %13, %14 : vector<2x32xf32>
    %c0_11 = arith.constant 0 : index
    %c0_12 = arith.constant 0 : index
    %16 = vector.load %arg6[%c0_11, %c0_12] : memref<32x16xf32, #tpu.memory_space<vmem>>, vector<32x16xf32>
    %cst_13 = arith.constant dense<0.000000e+00> : vector<2x16xf32>
    %17 = tpu.matmul %15, %16, %cst_13 {dimension_numbers = #tpu.dot_dimension_numbers<[1], [0], [0], [1], [0, 0, 1, 1], [], []>} : vector<2x32xf32>, vector<32x16xf32>, vector<2x16xf32> -> vector<2x16xf32>
    %c0_14 = arith.constant 0 : index
    %c0_15 = arith.constant 0 : index
    %18 = vector.load %arg7[%c0_14, %c0_15] : memref<1x16xf32, #tpu.memory_space<vmem>>, vector<1x16xf32>
    %19 = vector.broadcast %18 : vector<1x16xf32> to vector<2x16xf32>
    %20 = arith.addf %17, %19 : vector<2x16xf32>
    %cst_16 = arith.constant 0.000000e+00 : f32
    %21 = vector.broadcast %cst_16 : f32 to vector<2x16xf32>
    %22 = arith.maximumf %20, %21 : vector<2x16xf32>
    %c0_17 = arith.constant 0 : index
    %c0_18 = arith.constant 0 : index
    %23 = vector.load %arg8[%c0_17, %c0_18] : memref<16x10xf32, #tpu.memory_space<vmem>>, vector<16x10xf32>
    %cst_19 = arith.constant dense<0.000000e+00> : vector<2x10xf32>
    %24 = tpu.matmul %22, %23, %cst_19 {dimension_numbers = #tpu.dot_dimension_numbers<[1], [0], [0], [1], [0, 0, 1, 1], [], []>} : vector<2x16xf32>, vector<16x10xf32>, vector<2x10xf32> -> vector<2x10xf32>
    %c0_20 = arith.constant 0 : index
    %c0_21 = arith.constant 0 : index
    %25 = vector.load %arg9[%c0_20, %c0_21] : memref<1x10xf32, #tpu.memory_space<vmem>>, vector<1x10xf32>
    %26 = vector.broadcast %25 : vector<1x10xf32> to vector<2x10xf32>
    %27 = arith.addf %24, %26 : vector<2x10xf32>
    %c0_22 = arith.constant 0 : index
    %c0_23 = arith.constant 0 : index
    %28 = vector.load %arg10[%c0_22, %c0_23] : memref<2x10xf32, #tpu.memory_space<vmem>>, vector<2x10xf32>
    tpu.vector_store %arg10[%c0_22, %c0_23], %27 {strides = array<i32>} : memref<2x10xf32, #tpu.memory_space<vmem>>, vector<2x10xf32>,
    return
  }
  func.func @transform_0(%arg0: i32) -> (i32, i32) {
    %c0_i32 = arith.constant 0 : i32
    %c0_i32_0 = arith.constant 0 : i32
    %c0_i32_1 = arith.constant 0 : i32
    return %c0_i32, %c0_i32_0 : i32, i32
  }
  func.func @transform_1(%arg0: i32) -> (i32, i32) {
    %c0_i32 = arith.constant 0 : i32
    %c0_i32_0 = arith.constant 0 : i32
    %c0_i32_1 = arith.constant 0 : i32
    return %c0_i32, %c0_i32_0 : i32, i32
  }
  func.func @transform_2(%arg0: i32) -> (i32, i32) {
    %c0_i32 = arith.constant 0 : i32
    %c0_i32_0 = arith.constant 0 : i32
    %c0_i32_1 = arith.constant 0 : i32
    return %c0_i32, %c0_i32_0 : i32, i32
  }
  func.func @transform_3(%arg0: i32) -> (i32, i32) {
    %c0_i32 = arith.constant 0 : i32
    %c0_i32_0 = arith.constant 0 : i32
    %c0_i32_1 = arith.constant 0 : i32
    return %c0_i32, %c0_i32_0 : i32, i32
  }
  func.func @transform_4(%arg0: i32) -> (i32, i32) {
    %c0_i32 = arith.constant 0 : i32
    %c0_i32_0 = arith.constant 0 : i32
    %c0_i32_1 = arith.constant 0 : i32
    return %c0_i32, %c0_i32_0 : i32, i32
  }
  func.func @transform_5(%arg0: i32) -> (i32, i32) {
    %c0_i32 = arith.constant 0 : i32
    %c0_i32_0 = arith.constant 0 : i32
    %c0_i32_1 = arith.constant 0 : i32
    return %c0_i32, %c0_i32_0 : i32, i32
  }
  func.func @transform_6(%arg0: i32) -> (i32, i32) {
    %c0_i32 = arith.constant 0 : i32
    %c0_i32_0 = arith.constant 0 : i32
    %c0_i32_1 = arith.constant 0 : i32
    return %c0_i32, %c0_i32_0 : i32, i32
  }
  func.func @transform_7(%arg0: i32) -> (i32, i32) {
    %c0_i32 = arith.constant 0 : i32
    %c0_i32_0 = arith.constant 0 : i32
    %c0_i32_1 = arith.constant 0 : i32
    return %c0_i32, %c0_i32_0 : i32, i32
  }
  func.func @transform_8(%arg0: i32) -> (i32, i32) {
    %c0_i32 = arith.constant 0 : i32
    %c0_i32_0 = arith.constant 0 : i32
    %c0_i32_1 = arith.constant 0 : i32
    return %c0_i32, %c0_i32_0 : i32, i32
  }
  func.func @transform_9(%arg0: i32) -> (i32, i32) {
    %c0_i32 = arith.constant 0 : i32
    %c0_i32_0 = arith.constant 0 : i32
    %c0_i32_1 = arith.constant 0 : i32
    return %c0_i32, %c0_i32_0 : i32, i32
  }
}

</mosaic_0001>

<bundles_post_ra>
// kernel: allconv_forward.10
= control target key start
LH: loop header
LB: loop body
LE: loop exit
PB: predicated region body
PF: predicated region fallthrough
CT: control target
= control target key end

     0   :  { %s1582_s15 = smov 0   ;;  %s2370_s0 = inlined_call_operand.vmem [shape: bf16[2048,75], index: 0, kind: input, shape index: {}]   ;;  %s2371_s1 = inlined_call_operand.vmem [shape: bf16[75,16], index: 1, kind: input, shape index: {}]   ;;  %s2372_s2 = inlined_call_operand.vmem [shape: f32[2048,16], index: 2, kind: output, shape index: {0}]   ;;  %s2373_s3 = inlined_call_operand.vmem [shape: f32[1,16], index: 3, kind: output, shape index: {1}]   ;;  %s2374_s4 = inlined_call_operand.vmem [shape: f32[1,16], index: 4, kind: output, shape index: {2}]  }
   0x1 LB: > { %s1330_s16 = sadd.s32 4294967295, %s1553_s15   ;;  %p1334_p0 = scmp.ge.s32.totalorder %s1553_s15, 1  ;;  %s1553_s15 = sphi %s1582_s15, %s15_s15  }
   0x2   : > { %p158_p1 = scmp.lt.s32.totalorder %s1553_s15, 5 }
   0x4   : > { %p159_p2 = pnand %p1334_p0, %p158_p1 }
   0x6   : > { %162 = sbr.rel (%p159_p2) target bundleno = 412 (0x19c), region = 28 }
   0xb   : > { %s1335_s17 = sshll.u32 %s1330_s16, 6  ;;  %p1339_p4 = scmp.ne.s32.totalorder %s1330_s16, 0 }
   0xc   : > { %p185_p3 = scmp.lt.s32.totalorder %s1335_s17, 255 }
   0xe   : > { %s2392_s17 = smov (!%p185_p3, %s1335_s17), 255 }
   0xf   : > { %s1336_s18 = sshll.u32 %s2392_s17, 2  ;;  %s1338_s19 = sshll.u32 %s2392_s17, 3 }
  0x10   : > { %s1595_s22 = scalar_lea.vmem %s2370_s0, %s1336_s18  ;;  %s1600_s25 = scalar_lea.vmem %s2372_s2, %s1338_s19 }
  0x11   : > { %v1603_v0 = vld [vmem:[%s1595_s22] sm:$0xf]  ;;  %v1606_v1 = vld [vmem:[%s1595_s22 + $0x4] sm:$0xf]  ;;  %v1609_v2 = vld [vmem:[%s1595_s22 + $0x8] sm:$0xf] }
  0x12   : > { %v1612_v3 = vld [vmem:[%s1595_s22 + $0xc] sm:$0xf]  ;;  %v1615_v4 = vld [vmem:[%s1595_s22 + $0x10] sm:$0xf]  ;;  %v1618_v5 = vld [vmem:[%s1595_s22 + $0x14] sm:$0xf] }
  0x13   : > { %v1621_v6 = vld [vmem:[%s1595_s22 + $0x18] sm:$0xf]  ;;  %v1624_v7 = vld [vmem:[%s1595_s22 + $0x1c] sm:$0xf]  ;;  %v1627_v8 = vld [vmem:[%s1595_s22 + $0x20] sm:$0xf] }
  0x14   : > { %v1630_v9 = vld [vmem:[%s1595_s22 + $0x24] sm:$0xf]  ;;  %v1633_v10 = vld [vmem:[%s1595_s22 + $0x28] sm:$0xf]  ;;  %v1636_v11 = vld [vmem:[%s1595_s22 + $0x2c] sm:$0xf] }
  0x15   : > { %v1639_v12 = vld [vmem:[%s1595_s22 + $0x30] sm:$0xf]  ;;  %v1642_v13 = vld [vmem:[%s1595_s22 + $0x34] sm:$0xf]  ;;  %v1645_v14 = vld [vmem:[%s1595_s22 + $0x38] sm:$0xf] }
  0x16   : > { %v1648_v15 = vld [vmem:[%s1595_s22 + $0x3c] sm:$0xf]  ;;  %v1651_v16 = vld [vmem:[%s1595_s22 + $0x40] sm:$0xf]  ;;  %v1654_v17 = vld [vmem:[%s1595_s22 + $0x44] sm:$0xf] }
  0x17   : > { %v1657_v18 = vld [vmem:[%s1595_s22 + $0x48] sm:$0xf]  ;;  %v1660_v19 = vld [vmem:[%s1595_s22 + $0x4c] sm:$0xf]  ;;  %v1663_v20 = vld [vmem:[%s1595_s22 + $0x50] sm:$0xf] }
  0x18   : > { %v1666_v21 = vld [vmem:[%s1595_s22 + $0x54] sm:$0xf]  ;;  %v1669_v22 = vld [vmem:[%s1595_s22 + $0x58] sm:$0xf]  ;;  %v1672_v23 = vld [vmem:[%s1595_s22 + $0x5c] sm:$0xf] }
  0x19   : > { %v1675_v24 = vld [vmem:[%s1595_s22 + $0x60] sm:$0xf]  ;;  %v1678_v25 = vld [vmem:[%s1595_s22 + $0x64] sm:$0xf]  ;;  %v1681_v26 = vld [vmem:[%s1595_s22 + $0x68] sm:$0xf] }
  0x1a   : > { %v1684_v27 = vld [vmem:[%s1595_s22 + $0x6c] sm:$0xf]  ;;  %v1687_v28 = vld [vmem:[%s1595_s22 + $0x70] sm:$0xf]  ;;  %v1690_v29 = vld [vmem:[%s1595_s22 + $0x74] sm:$0xf] }
  0x1b   : > { %v1693_v30 = vld [vmem:[%s1595_s22 + $0x78] sm:$0xf]  ;;  %v1696_v31 = vld [vmem:[%s1595_s22 + $0x7c] sm:$0xf]  ;;  %v229_v32 = vld [vmem:[%s1595_s22 + $0x80] sm:$0xf] }
  0x1c   : > { %2375 = vst [vmem:[#allocation2_spill] sm:$0xff] %v1693_v30  ;;  %2376 = vst [vmem:[#allocation3_spill] sm:$0xff] %v1696_v31  ;;  %v230_v33 = vld [vmem:[%s1595_s22 + $0x84] sm:$0xf]  ;;  %v1701_v34 = vld [vmem:[%s1595_s22 + $0x88] sm:$0xf] }
  0x1d   : > { %v1704_v35 = vld [vmem:[%s1595_s22 + $0x8c] sm:$0xf]  ;;  %v1707_v36 = vld [vmem:[%s1595_s22 + $0x90] sm:$0xf]  ;;  %v1710_v37 = vld [vmem:[%s1595_s22 + $0x94] sm:$0xf] }
  0x1e   : > { %v1713_v38 = vld [vmem:[%s1595_s22 + $0x98] sm:$0xf]  ;;  %v1716_v39 = vld [vmem:[%s1595_s22 + $0x9c] sm:$0xf]  ;;  %v1719_v40 = vld [vmem:[%s1595_s22 + $0xa0] sm:$0xf] }
  0x1f   : > { %v1722_v41 = vld [vmem:[%s1595_s22 + $0xa4] sm:$0xf]  ;;  %v1725_v42 = vld [vmem:[%s1595_s22 + $0xa8] sm:$0xf]  ;;  %v1728_v43 = vld [vmem:[%s1595_s22 + $0xac] sm:$0xf] }
  0x20   : > { %v1731_v44 = vld [vmem:[%s1595_s22 + $0xb0] sm:$0xf]  ;;  %v1734_v45 = vld [vmem:[%s1595_s22 + $0xb4] sm:$0xf]  ;;  %v1737_v46 = vld [vmem:[%s1595_s22 + $0xb8] sm:$0xf] }
  0x21   : > { %v1740_v47 = vld [vmem:[%s1595_s22 + $0xbc] sm:$0xf]  ;;  %v1743_v48 = vld [vmem:[%s1595_s22 + $0xc0] sm:$0xf]  ;;  %v1746_v49 = vld [vmem:[%s1595_s22 + $0xc4] sm:$0xf] }
  0x22   : > { %v1749_v50 = vld [vmem:[%s1595_s22 + $0xc8] sm:$0xf]  ;;  %v1752_v51 = vld [vmem:[%s1595_s22 + $0xcc] sm:$0xf]  ;;  %v1755_v52 = vld [vmem:[%s1595_s22 + $0xd0] sm:$0xf] }
  0x23   : > { %v1758_v53 = vld [vmem:[%s1595_s22 + $0xd4] sm:$0xf]  ;;  %v1761_v54 = vld [vmem:[%s1595_s22 + $0xd8] sm:$0xf]  ;;  %v1764_v55 = vld [vmem:[%s1595_s22 + $0xdc] sm:$0xf] }
  0x24   : > { %v1767_v56 = vld [vmem:[%s1595_s22 + $0xe0] sm:$0xf]  ;;  %v1770_v57 = vld [vmem:[%s1595_s22 + $0xe4] sm:$0xf]  ;;  %v1773_v58 = vld [vmem:[%s1595_s22 + $0xe8] sm:$0xf] }
  0x25   : > { %2377 = vst [vmem:[#allocation4_spill] sm:$0xff] %v1773_v58  ;;  %v1776_v59 = vld [vmem:[%s1595_s22 + $0xec] sm:$0xf]  ;;  %v1779_v60 = vld [vmem:[%s1595_s22 + $0xf0] sm:$0xf]  ;;  %264 = sbr.rel (%p1339_p4) target bundleno = 44 (0x2c), region = 32 }
  0x26   : > { %2378 = vst [vmem:[#allocation5_spill] sm:$0xff] %v1776_v59  ;;  %2379 = vst [vmem:[#allocation6_spill] sm:$0xff] %v1779_v60  ;;  %v1782_v61 = vld [vmem:[%s1595_s22 + $0xf4] sm:$0xf]  ;;  %v1785_v62 = vld [vmem:[%s1595_s22 + $0xf8] sm:$0xf] }
  0x27   : > { %2380 = vst [vmem:[#allocation7_spill] sm:$0xff] %v1782_v61  ;;  %2381 = vst [vmem:[#allocation8_spill] sm:$0xff] %v1785_v62  ;;  %v1788_v63 = vld [vmem:[%s1595_s22 + $0xfc] sm:$0xf] }
  0x28   : > { %2382 = vst [vmem:[#allocation9_spill] sm:$0xff] %v1788_v63 }
  0x2a   : > { %vm265_vm0 = vcmask 122880   ;;  %v1555_v30 = vmov 0.0  }
  0x2b   : > { %266 = vst.msk [vmem:[%s2373_s3] sm:$0x1] %vm265_vm0, %v1555_v30  ;;  %267 = vst.msk [vmem:[%s2374_s4] sm:$0x1] %vm265_vm0, %v1555_v30 }
  0x2c PF: > { %v1542_v62 = vld [vmem:[%s2371_s1 + $0x20] sm:$0x3f]   ;;  %vm564_vm1 = vcmask 1044480   ;;  %vm565_vm2 = vcmask 1045504   ;;  %v1556_v63 = vmov 65535   ;;  %v1340_v60 = vcombine.low %v1603_v0, %v1606_v1  ;;  %v1543_v58 = vld [vmem:[%s2371_s1 + $0x18] sm:$0xff]  }
  0x2d   : > { %v566_v31 = vsel %vm564_vm1, 4294967295, %v1556_v63  ;;  %vm467_vm3 = vcmask 613376   ;;  %v1356_v30 = vcombine.low %v229_v32, %v230_v33  ;;  %v1544_v63 = vld [vmem:[%s2371_s1 + $0x10] sm:$0xff]   ;;  %v1545_v0 = vld [vmem:[%s2371_s1 + $0x8] sm:$0xff]   ;;  %v1546_v1 = vld [vmem:[%s2371_s1] sm:$0xff]   ;;  %v1342_v32 = vcombine.low %v1615_v4, %v1618_v5 }
  0x2e   : > { %v567_v61 = vsel %vm565_vm2, %v566_v31, 0  ;;  %1458 = vmatprep.mubr.msk.bf16.mxu0 %vm467_vm3, %v1340_v60  ;;  %v1341_v31 = vcombine.low %v1609_v2, %v1612_v3  ;;  %v1357_v33 = vcombine.low %v1701_v34, %v1704_v35  ;;  %v1343_v2 = vcombine.low %v1621_v6, %v1624_v7 }
  0x2f   : > { %v569_v59 = vand.u32 %v1542_v62, %v567_v61  ;;  %1490 = vmatprep.mubr.msk.bf16.mxu1 %vm467_vm3, %v1356_v30  ;;  %v1344_v3 = vcombine.low %v1627_v8, %v1630_v9  ;;  %v1359_v4 = vcombine.low %v1713_v38, %v1716_v39  ;;  %v1360_v5 = vcombine.low %v1719_v40, %v1722_v41 }
  0x30   : > { %v1345_v6 = vcombine.low %v1633_v10, %v1636_v11  ;;  %v1346_v7 = vcombine.low %v1639_v12, %v1642_v13  ;;  %v1361_v8 = vcombine.low %v1725_v42, %v1728_v43  ;;  %v1362_v9 = vcombine.low %v1731_v44, %v1734_v45  ;;  %v2385_v35 = vld [vmem:[#allocation7_spill] sm:$0xff]  ;;  %v2390_v38 = vld [vmem:[#allocation8_spill] sm:$0xff] }
  0x31   : > { %1448 = vmatprep.subr.bf16.mxu0 %v569_v59  ;;  %1522 = vmatprep.subr.bf16.mxu1 %v569_v59  ;;  %v1347_v10 = vcombine.low %v1645_v14, %v1648_v15  ;;  %v1348_v11 = vcombine.low %v1651_v16, %v1654_v17  ;;  %v1363_v12 = vcombine.low %v1737_v46, %v1740_v47  ;;  %vm860_vm4 = vcmask 130048  }
  0x32   : > { %1449 = vmatpush3.bf16.msra.mxu0 %v569_v59  ;;  %1527 = vmatpush3.bf16.msra.mxu1 %v569_v59  ;;  %v1364_v13 = vcombine.low %v1743_v48, %v1746_v49  ;;  %v1349_v14 = vcombine.low %v1657_v18, %v1660_v19  ;;  %v1350_v15 = vcombine.low %v1663_v20, %v1666_v21  ;;  %vm1060_vm5 = vcmask 122880  }
  0x33   : > { %1450 = vmatprep.subr.bf16.mxu0 %v1543_v58  ;;  %1523 = vmatprep.subr.bf16.mxu1 %v1543_v58  ;;  %v1365_v16 = vcombine.low %v1749_v50, %v1752_v51  ;;  %v1366_v17 = vcombine.low %v1755_v52, %v1758_v53  ;;  %v1351_v18 = vcombine.low %v1669_v22, %v1672_v23 }
  0x34   : > { %v1352_v19 = vcombine.low %v1675_v24, %v1678_v25  ;;  %v1367_v20 = vcombine.low %v1761_v54, %v1764_v55  ;;  %v1368_v21 = vcombine.low %v1767_v56, %v1770_v57  ;;  %v1353_v22 = vcombine.low %v1681_v26, %v1684_v27  ;;  %v2383_v24 = vld [vmem:[#allocation5_spill] sm:$0xff]  ;;  %v2384_v25 = vld [vmem:[#allocation4_spill] sm:$0xff]  ;;  %v2387_v26 = vld [vmem:[#allocation3_spill] sm:$0xff] }
  0x35   : > { %v1354_v23 = vcombine.low %v1687_v28, %v1690_v29  ;;  %v1369_v34 = vcombine.low %v2384_v25, %v2383_v24  ;;  %v2388_v27 = vld [vmem:[#allocation2_spill] sm:$0xff]  ;;  %v2389_v29 = vld [vmem:[#allocation9_spill] sm:$0xff] }
  0x36   : > { %1451 = vmatpush3.bf16.msra.mxu0 %v1543_v58  ;;  %1528 = vmatpush3.bf16.msra.mxu1 %v1543_v58  ;;  %v1358_v58 = vcombine.low %v1707_v36, %v1710_v37  ;;  %v2386_v36 = vld [vmem:[#allocation6_spill] sm:$0xff]  ;;  %v1355_v28 = vcombine.low %v2388_v27, %v2387_v26  ;;  %v1371_v39 = vcombine.low %v2390_v38, %v2389_v29 }
  0x37   : > { %1452 = vmatprep.subr.bf16.mxu0 %v1544_v63  ;;  %1524 = vmatprep.subr.bf16.mxu1 %v1544_v63  ;;  %v1370_v37 = vcombine.low %v2386_v36, %v2385_v35 }
  0x3a   : > { %1453 = vmatpush3.bf16.msra.mxu0 %v1544_v63  ;;  %1529 = vmatpush3.bf16.msra.mxu1 %v1544_v63 }
  0x3b   : > { %1454 = vmatprep.subr.bf16.mxu0 %v1545_v0  ;;  %1525 = vmatprep.subr.bf16.mxu1 %v1545_v0 }
  0x3e   : > { %1455 = vmatpush3.bf16.msra.mxu0 %v1545_v0  ;;  %1530 = vmatpush3.bf16.msra.mxu1 %v1545_v0 }
  0x3f   : > { %1456 = vmatprep.subr.bf16.mxu0 %v1546_v1  ;;  %1526 = vmatprep.subr.bf16.mxu1 %v1546_v1 }
  0x42   : > { %1457 = vmatpush3.bf16.msra.mxu0 %v1546_v1  ;;  %1531 = vmatpush3.bf16.msra.mxu1 %v1546_v1 }
  0x45   : > { %1459 = vmatmul.mubr.msk.bf16.vlgmr.msra.gmra.mxu0 %vm467_vm3, %v1341_v31  ;;  %1491 = vmatmul.mubr.msk.bf16.vlgmr.msra.gmra.mxu1 %vm467_vm3, %v1357_v33 }
  0x46   : > { %1462 = vmatprep.mubr.msk.bf16.mxu0 %vm467_vm3, %v1342_v32  ;;  %1494 = vmatprep.mubr.msk.bf16.mxu1 %vm467_vm3, %v1358_v58 }
  0x4d   : > { %1463 = vmatmul.mubr.msk.bf16.gmra.mxu0 %vm467_vm3, %v1343_v2  ;;  %1495 = vmatmul.mubr.msk.bf16.gmra.mxu1 %vm467_vm3, %v1359_v4 }
  0x4e   : > { %1466 = vmatprep.mubr.msk.bf16.mxu0 %vm467_vm3, %v1344_v3  ;;  %1498 = vmatprep.mubr.msk.bf16.mxu1 %vm467_vm3, %v1360_v5 }
  0x55   : > { %1467 = vmatmul.mubr.msk.bf16.gmra.mxu0 %vm467_vm3, %v1345_v6  ;;  %1499 = vmatmul.mubr.msk.bf16.gmra.mxu1 %vm467_vm3, %v1361_v8 }
  0x56   : > { %1470 = vmatprep.mubr.msk.bf16.mxu0 %vm467_vm3, %v1346_v7  ;;  %1502 = vmatprep.mubr.msk.bf16.mxu1 %vm467_vm3, %v1362_v9 }
  0x5d   : > { %1471 = vmatmul.mubr.msk.bf16.gmra.mxu0 %vm467_vm3, %v1347_v10  ;;  %1503 = vmatmul.mubr.msk.bf16.gmra.mxu1 %vm467_vm3, %v1363_v12 }
  0x5e   : > { %1474 = vmatprep.mubr.msk.bf16.mxu0 %vm467_vm3, %v1348_v11  ;;  %1506 = vmatprep.mubr.msk.bf16.mxu1 %vm467_vm3, %v1364_v13 }
  0x65   : > { %1475 = vmatmul.mubr.msk.bf16.gmra.mxu0 %vm467_vm3, %v1349_v14  ;;  %1507 = vmatmul.mubr.msk.bf16.gmra.mxu1 %vm467_vm3, %v1365_v16 }
  0x66   : > { %1478 = vmatprep.mubr.msk.bf16.mxu0 %vm467_vm3, %v1350_v15  ;;  %1510 = vmatprep.mubr.msk.bf16.mxu1 %vm467_vm3, %v1366_v17 }
  0x6d   : > { %1479 = vmatmul.mubr.msk.bf16.gmra.mxu0 %vm467_vm3, %v1351_v18  ;;  %1511 = vmatmul.mubr.msk.bf16.gmra.mxu1 %vm467_vm3, %v1367_v20 }
  0x6e   : > { %1482 = vmatprep.mubr.msk.bf16.mxu0 %vm467_vm3, %v1352_v19  ;;  %1514 = vmatprep.mubr.msk.bf16.mxu1 %vm467_vm3, %v1368_v21 }
  0x75   : > { %1483 = vmatmul.mubr.msk.bf16.gmra.mxu0 %vm467_vm3, %v1353_v22  ;;  %1515 = vmatmul.mubr.msk.bf16.gmra.mxu1 %vm467_vm3, %v1369_v34 }
  0x76   : > { %1486 = vmatprep.mubr.msk.bf16.mxu0 %vm467_vm3, %v1354_v23  ;;  %1518 = vmatprep.mubr.msk.bf16.mxu1 %vm467_vm3, %v1370_v37 }
  0x7d   : > { %1487 = vmatmul.mubr.msk.bf16.gmra.mxu0 %vm467_vm3, %v1355_v28  ;;  %1519 = vmatmul.mubr.msk.bf16.gmra.mxu1 %vm467_vm3, %v1371_v39 }
 0x105   : > { %v1460_v40 = vpop.f32.mrf.mxu0  ;;  %v1909_v41 = vpop.f32.mrf.mxu1 }
 0x106   : > { %863 = vst.msk [vmem:[%s1600_s25 + $0x10] sm:$0xff] %vm860_vm4, %v1460_v40  ;;  %895 = vst.msk [vmem:[%s1600_s25 + $0x110] sm:$0xff] %vm860_vm4, %v1909_v41  ;;  %v1065_v48 = vmul.f32 %v1460_v40, %v1460_v40  ;;  %v929_v55 = vsel %vm860_vm4, %v1460_v40, 0.0 }
 0x107   : > { %v605_v42 = vpop.f32.mrf.mxu0  ;;  %v1916_v43 = vpop.f32.mrf.mxu1 }
 0x108   : > { %861 = vst.msk [vmem:[%s1600_s25] sm:$0xff] %vm860_vm4, %v605_v42  ;;  %893 = vst.msk [vmem:[%s1600_s25 + $0x100] sm:$0xff] %vm860_vm4, %v1916_v43  ;;  %v1063_v45 = vmul.f32 %v605_v42, %v605_v42  ;;  %v926_v49 = vsel %vm860_vm4, %v605_v42, 0.0  ;;  %v1130_v63 = vsel %vm860_vm4, %v1065_v48, 0.0 }
 0x109   : > { %v1461_v44 = vpop.f32.mrf.mxu0  ;;  %v1923_v46 = vpop.f32.mrf.mxu1 }
 0x10a   : > { %864 = vst.msk [vmem:[%s1600_s25 + $0x18] sm:$0xff] %vm860_vm4, %v1461_v44  ;;  %896 = vst.msk [vmem:[%s1600_s25 + $0x118] sm:$0xff] %vm860_vm4, %v1923_v46  ;;  %v1127_v56 = vsel %vm860_vm4, %v1063_v45, 0.0  ;;  %v1066_v57 = vmul.f32 %v1461_v44, %v1461_v44  ;;  %v931_v0 = vsel %vm860_vm4, %v1461_v44, 0.0 }
 0x10b   : > { %v608_v47 = vpop.f32.mrf.mxu0  ;;  %v1932_v52 = vpop.f32.mrf.mxu1 }
 0x10c   : > { %862 = vst.msk [vmem:[%s1600_s25 + $0x8] sm:$0xff] %vm860_vm4, %v608_v47  ;;  %v927_v50 = vsel %vm860_vm4, %v608_v47, 0.0  ;;  %v1064_v51 = vmul.f32 %v608_v47, %v608_v47  ;;  %894 = vst.msk [vmem:[%s1600_s25 + $0x108] sm:$0xff] %vm860_vm4, %v1932_v52  ;;  %v1132_v2 = vsel %vm860_vm4, %v1066_v57, 0.0 }
 0x10d   : > { %v928_v53 = vadd.f32 %v927_v50, %v926_v49  ;;  %v1464_v54 = vpop.f32.mrf.mxu0  ;;  %v1942_v60 = vpop.f32.mrf.mxu1 }
 0x10e   : > { %v1128_v59 = vsel %vm860_vm4, %v1064_v51, 0.0  ;;  %867 = vst.msk [vmem:[%s1600_s25 + $0x30] sm:$0xff] %vm860_vm4, %v1464_v54  ;;  %899 = vst.msk [vmem:[%s1600_s25 + $0x130] sm:$0xff] %vm860_vm4, %v1942_v60  ;;  %v1069_v8 = vmul.f32 %v1464_v54, %v1464_v54  ;;  %v937_v16 = vsel %vm860_vm4, %v1464_v54, 0.0 }
 0x10f   : > { %v930_v61 = vadd.f32 %v929_v55, %v928_v53  ;;  %v1129_v62 = vadd.f32 %v1128_v59, %v1127_v56  ;;  %v621_v30 = vpop.f32.mrf.mxu0  ;;  %v1951_v31 = vpop.f32.mrf.mxu1 }
 0x110   : > { %865 = vst.msk [vmem:[%s1600_s25 + $0x20] sm:$0xff] %vm860_vm4, %v621_v30  ;;  %v1067_v1 = vmul.f32 %v621_v30, %v621_v30  ;;  %897 = vst.msk [vmem:[%s1600_s25 + $0x120] sm:$0xff] %vm860_vm4, %v1951_v31  ;;  %v933_v3 = vsel %vm860_vm4, %v621_v30, 0.0  ;;  %v1138_v23 = vsel %vm860_vm4, %v1069_v8, 0.0 }
 0x111   : > { %v1131_v32 = vadd.f32 %v1130_v63, %v1129_v62  ;;  %v932_v33 = vadd.f32 %v931_v0, %v930_v61  ;;  %v1465_v58 = vpop.f32.mrf.mxu0  ;;  %v1960_v4 = vpop.f32.mrf.mxu1 }
 0x112   : > { %868 = vst.msk [vmem:[%s1600_s25 + $0x38] sm:$0xff] %vm860_vm4, %v1465_v58  ;;  %900 = vst.msk [vmem:[%s1600_s25 + $0x138] sm:$0xff] %vm860_vm4, %v1960_v4  ;;  %v1134_v9 = vsel %vm860_vm4, %v1067_v1, 0.0  ;;  %v1070_v17 = vmul.f32 %v1465_v58, %v1465_v58  ;;  %v939_v24 = vsel %vm860_vm4, %v1465_v58, 0.0 }
 0x113   : > { %v934_v5 = vadd.f32 %v933_v3, %v932_v33  ;;  %v1133_v6 = vadd.f32 %v1132_v2, %v1131_v32  ;;  %v624_v7 = vpop.f32.mrf.mxu0  ;;  %v1969_v12 = vpop.f32.mrf.mxu1 }
 0x114   : > { %866 = vst.msk [vmem:[%s1600_s25 + $0x28] sm:$0xff] %vm860_vm4, %v624_v7  ;;  %v935_v10 = vsel %vm860_vm4, %v624_v7, 0.0  ;;  %v1068_v11 = vmul.f32 %v624_v7, %v624_v7  ;;  %898 = vst.msk [vmem:[%s1600_s25 + $0x128] sm:$0xff] %vm860_vm4, %v1969_v12  ;;  %v1140_v26 = vsel %vm860_vm4, %v1070_v17, 0.0 }
 0x115   : > { %v1135_v13 = vadd.f32 %v1134_v9, %v1133_v6  ;;  %v936_v14 = vadd.f32 %v935_v10, %v934_v5  ;;  %v1468_v15 = vpop.f32.mrf.mxu0  ;;  %v1978_v19 = vpop.f32.mrf.mxu1 }
 0x116   : > { %v1136_v18 = vsel %vm860_vm4, %v1068_v11, 0.0  ;;  %871 = vst.msk [vmem:[%s1600_s25 + $0x50] sm:$0xff] %vm860_vm4, %v1468_v15  ;;  %903 = vst.msk [vmem:[%s1600_s25 + $0x150] sm:$0xff] %vm860_vm4, %v1978_v19  ;;  %v1073_v40 = vmul.f32 %v1468_v15, %v1468_v15  ;;  %v945_v51 = vsel %vm860_vm4, %v1468_v15, 0.0 }
 0x117   : > { %v938_v20 = vadd.f32 %v937_v16, %v936_v14  ;;  %v1137_v21 = vadd.f32 %v1136_v18, %v1135_v13  ;;  %v637_v22 = vpop.f32.mrf.mxu0  ;;  %v1987_v34 = vpop.f32.mrf.mxu1 }
 0x118   : > { %869 = vst.msk [vmem:[%s1600_s25 + $0x40] sm:$0xff] %vm860_vm4, %v637_v22  ;;  %v1071_v25 = vmul.f32 %v637_v22, %v637_v22  ;;  %901 = vst.msk [vmem:[%s1600_s25 + $0x140] sm:$0xff] %vm860_vm4, %v1987_v34  ;;  %v941_v27 = vsel %vm860_vm4, %v637_v22, 0.0  ;;  %v1146_v61 = vsel %vm860_vm4, %v1073_v40, 0.0 }
 0x119   : > { %v1139_v35 = vadd.f32 %v1138_v23, %v1137_v21  ;;  %v940_v36 = vadd.f32 %v939_v24, %v938_v20  ;;  %v1469_v37 = vpop.f32.mrf.mxu0  ;;  %v1996_v28 = vpop.f32.mrf.mxu1 }
 0x11a   : > { %872 = vst.msk [vmem:[%s1600_s25 + $0x58] sm:$0xff] %vm860_vm4, %v1469_v37  ;;  %904 = vst.msk [vmem:[%s1600_s25 + $0x158] sm:$0xff] %vm860_vm4, %v1996_v28  ;;  %v1142_v42 = vsel %vm860_vm4, %v1071_v25, 0.0  ;;  %v1074_v53 = vmul.f32 %v1469_v37, %v1469_v37  ;;  %v947_v62 = vsel %vm860_vm4, %v1469_v37, 0.0 }
 0x11b   : > { %v942_v29 = vadd.f32 %v941_v27, %v940_v36  ;;  %v1141_v38 = vadd.f32 %v1140_v26, %v1139_v35  ;;  %v640_v39 = vpop.f32.mrf.mxu0  ;;  %v2005_v47 = vpop.f32.mrf.mxu1 }
 0x11c   : > { %870 = vst.msk [vmem:[%s1600_s25 + $0x48] sm:$0xff] %vm860_vm4, %v640_v39  ;;  %v943_v44 = vsel %vm860_vm4, %v640_v39, 0.0  ;;  %v1072_v45 = vmul.f32 %v640_v39, %v640_v39  ;;  %902 = vst.msk [vmem:[%s1600_s25 + $0x148] sm:$0xff] %vm860_vm4, %v2005_v47  ;;  %v1148_v33 = vsel %vm860_vm4, %v1074_v53, 0.0 }
 0x11d   : > { %v1143_v48 = vadd.f32 %v1142_v42, %v1141_v38  ;;  %v944_v49 = vadd.f32 %v943_v44, %v942_v29  ;;  %v1472_v50 = vpop.f32.mrf.mxu0  ;;  %v2014_v55 = vpop.f32.mrf.mxu1 }
 0x11e   : > { %v1144_v54 = vsel %vm860_vm4, %v1072_v45, 0.0  ;;  %875 = vst.msk [vmem:[%s1600_s25 + $0x70] sm:$0xff] %vm860_vm4, %v1472_v50  ;;  %907 = vst.msk [vmem:[%s1600_s25 + $0x170] sm:$0xff] %vm860_vm4, %v2014_v55  ;;  %v1077_v7 = vmul.f32 %v1472_v50, %v1472_v50  ;;  %v953_v16 = vsel %vm860_vm4, %v1472_v50, 0.0 }
 0x11f   : > { %v946_v56 = vadd.f32 %v945_v51, %v944_v49  ;;  %v1145_v57 = vadd.f32 %v1144_v54, %v1143_v48  ;;  %v653_v59 = vpop.f32.mrf.mxu0  ;;  %v2023_v63 = vpop.f32.mrf.mxu1 }
 0x120   : > { %873 = vst.msk [vmem:[%s1600_s25 + $0x60] sm:$0xff] %vm860_vm4, %v653_v59  ;;  %v1075_v30 = vmul.f32 %v653_v59, %v653_v59  ;;  %905 = vst.msk [vmem:[%s1600_s25 + $0x160] sm:$0xff] %vm860_vm4, %v2023_v63  ;;  %v949_v58 = vsel %vm860_vm4, %v653_v59, 0.0  ;;  %v1154_v24 = vsel %vm860_vm4, %v1077_v7, 0.0 }
 0x121   : > { %v1147_v0 = vadd.f32 %v1146_v61, %v1145_v57  ;;  %v948_v1 = vadd.f32 %v947_v62, %v946_v56  ;;  %v1473_v32 = vpop.f32.mrf.mxu0  ;;  %v2032_v2 = vpop.f32.mrf.mxu1 }
 0x122   : > { %876 = vst.msk [vmem:[%s1600_s25 + $0x78] sm:$0xff] %vm860_vm4, %v1473_v32  ;;  %908 = vst.msk [vmem:[%s1600_s25 + $0x178] sm:$0xff] %vm860_vm4, %v2032_v2  ;;  %v1150_v8 = vsel %vm860_vm4, %v1075_v30, 0.0  ;;  %v1078_v17 = vmul.f32 %v1473_v32, %v1473_v32  ;;  %v955_v25 = vsel %vm860_vm4, %v1473_v32, 0.0 }
 0x123   : > { %v950_v3 = vadd.f32 %v949_v58, %v948_v1  ;;  %v1149_v5 = vadd.f32 %v1148_v33, %v1147_v0  ;;  %v656_v6 = vpop.f32.mrf.mxu0  ;;  %v2041_v11 = vpop.f32.mrf.mxu1 }
 0x124   : > { %874 = vst.msk [vmem:[%s1600_s25 + $0x68] sm:$0xff] %vm860_vm4, %v656_v6  ;;  %v951_v9 = vsel %vm860_vm4, %v656_v6, 0.0  ;;  %v1076_v10 = vmul.f32 %v656_v6, %v656_v6  ;;  %906 = vst.msk [vmem:[%s1600_s25 + $0x168] sm:$0xff] %vm860_vm4, %v2041_v11  ;;  %v1156_v29 = vsel %vm860_vm4, %v1078_v17, 0.0 }
 0x125   : > { %v1151_v13 = vadd.f32 %v1150_v8, %v1149_v5  ;;  %v952_v14 = vadd.f32 %v951_v9, %v950_v3  ;;  %v1476_v15 = vpop.f32.mrf.mxu0  ;;  %v2050_v20 = vpop.f32.mrf.mxu1 }
 0x126   : > { %v1152_v18 = vsel %vm860_vm4, %v1076_v10, 0.0  ;;  %879 = vst.msk [vmem:[%s1600_s25 + $0x90] sm:$0xff] %vm860_vm4, %v1476_v15  ;;  %911 = vst.msk [vmem:[%s1600_s25 + $0x190] sm:$0xff] %vm860_vm4, %v2050_v20  ;;  %v1081_v45 = vmul.f32 %v1476_v15, %v1476_v15  ;;  %v961_v57 = vsel %vm860_vm4, %v1476_v15, 0.0 }
 0x127   : > { %v954_v21 = vadd.f32 %v953_v16, %v952_v14  ;;  %v1153_v22 = vadd.f32 %v1152_v18, %v1151_v13  ;;  %v669_v23 = vpop.f32.mrf.mxu0  ;;  %v2059_v36 = vpop.f32.mrf.mxu1 }
 0x128   : > { %877 = vst.msk [vmem:[%s1600_s25 + $0x80] sm:$0xff] %vm860_vm4, %v669_v23  ;;  %v1079_v35 = vmul.f32 %v669_v23, %v669_v23  ;;  %909 = vst.msk [vmem:[%s1600_s25 + $0x180] sm:$0xff] %vm860_vm4, %v2059_v36  ;;  %v957_v38 = vsel %vm860_vm4, %v669_v23, 0.0  ;;  %v1162_v32 = vsel %vm860_vm4, %v1081_v45, 0.0 }
 0x129   : > { %v1155_v37 = vadd.f32 %v1154_v24, %v1153_v22  ;;  %v956_v26 = vadd.f32 %v955_v25, %v954_v21  ;;  %v1477_v27 = vpop.f32.mrf.mxu0  ;;  %v2068_v39 = vpop.f32.mrf.mxu1 }
 0x12a   : > { %880 = vst.msk [vmem:[%s1600_s25 + $0x98] sm:$0xff] %vm860_vm4, %v1477_v27  ;;  %912 = vst.msk [vmem:[%s1600_s25 + $0x198] sm:$0xff] %vm860_vm4, %v2068_v39  ;;  %v1158_v48 = vsel %vm860_vm4, %v1079_v35, 0.0  ;;  %v1082_v59 = vmul.f32 %v1477_v27, %v1477_v27  ;;  %v963_v33 = vsel %vm860_vm4, %v1477_v27, 0.0 }
 0x12b   : > { %v958_v40 = vadd.f32 %v957_v38, %v956_v26  ;;  %v1157_v42 = vadd.f32 %v1156_v29, %v1155_v37  ;;  %v672_v44 = vpop.f32.mrf.mxu0  ;;  %v2077_v51 = vpop.f32.mrf.mxu1 }
 0x12c   : > { %878 = vst.msk [vmem:[%s1600_s25 + $0x88] sm:$0xff] %vm860_vm4, %v672_v44  ;;  %v959_v49 = vsel %vm860_vm4, %v672_v44, 0.0  ;;  %v1080_v50 = vmul.f32 %v672_v44, %v672_v44  ;;  %910 = vst.msk [vmem:[%s1600_s25 + $0x188] sm:$0xff] %vm860_vm4, %v2077_v51  ;;  %v1164_v8 = vsel %vm860_vm4, %v1082_v59, 0.0 }
 0x12d   : > { %v1159_v53 = vadd.f32 %v1158_v48, %v1157_v42  ;;  %v960_v54 = vadd.f32 %v959_v49, %v958_v40  ;;  %v1480_v56 = vpop.f32.mrf.mxu0  ;;  %v2086_v62 = vpop.f32.mrf.mxu1 }
 0x12e   : > { %v1160_v61 = vsel %vm860_vm4, %v1080_v50, 0.0  ;;  %883 = vst.msk [vmem:[%s1600_s25 + $0xb0] sm:$0xff] %vm860_vm4, %v1480_v56  ;;  %915 = vst.msk [vmem:[%s1600_s25 + $0x1b0] sm:$0xff] %vm860_vm4, %v2086_v62  ;;  %v1085_v16 = vmul.f32 %v1480_v56, %v1480_v56  ;;  %v969_v35 = vsel %vm860_vm4, %v1480_v56, 0.0 }
 0x12f   : > { %v962_v30 = vadd.f32 %v961_v57, %v960_v54  ;;  %v1161_v0 = vadd.f32 %v1160_v61, %v1159_v53  ;;  %v685_v1 = vpop.f32.mrf.mxu0  ;;  %v2095_v3 = vpop.f32.mrf.mxu1 }
 0x130   : > { %881 = vst.msk [vmem:[%s1600_s25 + $0xa0] sm:$0xff] %vm860_vm4, %v685_v1  ;;  %v1083_v58 = vmul.f32 %v685_v1, %v685_v1  ;;  %913 = vst.msk [vmem:[%s1600_s25 + $0x1a0] sm:$0xff] %vm860_vm4, %v2095_v3  ;;  %v965_v9 = vsel %vm860_vm4, %v685_v1, 0.0  ;;  %v1170_v42 = vsel %vm860_vm4, %v1085_v16, 0.0 }
 0x131   : > { %v1163_v5 = vadd.f32 %v1162_v32, %v1161_v0  ;;  %v964_v6 = vadd.f32 %v963_v33, %v962_v30  ;;  %v1481_v7 = vpop.f32.mrf.mxu0  ;;  %v2104_v10 = vpop.f32.mrf.mxu1 }
 0x132   : > { %884 = vst.msk [vmem:[%s1600_s25 + $0xb8] sm:$0xff] %vm860_vm4, %v1481_v7  ;;  %916 = vst.msk [vmem:[%s1600_s25 + $0x1b8] sm:$0xff] %vm860_vm4, %v2104_v10  ;;  %v1166_v17 = vsel %vm860_vm4, %v1083_v58, 0.0  ;;  %v1086_v37 = vmul.f32 %v1481_v7, %v1481_v7  ;;  %v971_v44 = vsel %vm860_vm4, %v1481_v7, 0.0 }
 0x133   : > { %v966_v13 = vadd.f32 %v965_v9, %v964_v6  ;;  %v1165_v14 = vadd.f32 %v1164_v8, %v1163_v5  ;;  %v688_v15 = vpop.f32.mrf.mxu0  ;;  %v2113_v22 = vpop.f32.mrf.mxu1 }
 0x134   : > { %882 = vst.msk [vmem:[%s1600_s25 + $0xa8] sm:$0xff] %vm860_vm4, %v688_v15  ;;  %v967_v18 = vsel %vm860_vm4, %v688_v15, 0.0  ;;  %v1084_v21 = vmul.f32 %v688_v15, %v688_v15  ;;  %914 = vst.msk [vmem:[%s1600_s25 + $0x1a8] sm:$0xff] %vm860_vm4, %v2113_v22  ;;  %v1172_v54 = vsel %vm860_vm4, %v1086_v37, 0.0 }
 0x135   : > { %v1167_v23 = vadd.f32 %v1166_v17, %v1165_v14  ;;  %v968_v24 = vadd.f32 %v967_v18, %v966_v13  ;;  %v1484_v25 = vpop.f32.mrf.mxu0  ;;  %v2122_v27 = vpop.f32.mrf.mxu1 }
 0x136   : > { %v1168_v26 = vsel %vm860_vm4, %v1084_v21, 0.0  ;;  %887 = vst.msk [vmem:[%s1600_s25 + $0xd0] sm:$0xff] %vm860_vm4, %v1484_v25  ;;  %919 = vst.msk [vmem:[%s1600_s25 + $0x1d0] sm:$0xff] %vm860_vm4, %v2122_v27  ;;  %v1089_v0 = vmul.f32 %v1484_v25, %v1484_v25  ;;  %v977_v8 = vsel %vm860_vm4, %v1484_v25, 0.0 }
 0x137   : > { %v970_v29 = vadd.f32 %v969_v35, %v968_v24  ;;  %v1169_v38 = vadd.f32 %v1168_v26, %v1167_v23  ;;  %v701_v40 = vpop.f32.mrf.mxu0  ;;  %v2131_v48 = vpop.f32.mrf.mxu1 }
 0x138   : > { %885 = vst.msk [vmem:[%s1600_s25 + $0xc0] sm:$0xff] %vm860_vm4, %v701_v40  ;;  %v1087_v45 = vmul.f32 %v701_v40, %v701_v40  ;;  %917 = vst.msk [vmem:[%s1600_s25 + $0x1c0] sm:$0xff] %vm860_vm4, %v2131_v48  ;;  %v973_v56 = vsel %vm860_vm4, %v701_v40, 0.0  ;;  %v1178_v18 = vsel %vm860_vm4, %v1089_v0, 0.0 }
 0x139   : > { %v1171_v49 = vadd.f32 %v1170_v42, %v1169_v38  ;;  %v972_v50 = vadd.f32 %v971_v44, %v970_v29  ;;  %v1485_v53 = vpop.f32.mrf.mxu0  ;;  %v2140_v57 = vpop.f32.mrf.mxu1 }
 0x13a   : > { %888 = vst.msk [vmem:[%s1600_s25 + $0xd8] sm:$0xff] %vm860_vm4, %v1485_v53  ;;  %920 = vst.msk [vmem:[%s1600_s25 + $0x1d8] sm:$0xff] %vm860_vm4, %v2140_v57  ;;  %v1174_v1 = vsel %vm860_vm4, %v1087_v45, 0.0  ;;  %v1090_v9 = vmul.f32 %v1485_v53, %v1485_v53  ;;  %v979_v21 = vsel %vm860_vm4, %v1485_v53, 0.0 }
 0x13b   : > { %v974_v59 = vadd.f32 %v973_v56, %v972_v50  ;;  %v1173_v61 = vadd.f32 %v1172_v54, %v1171_v49  ;;  %v704_v30 = vpop.f32.mrf.mxu0  ;;  %v2149_v58 = vpop.f32.mrf.mxu1 }
 0x13c   : > { %886 = vst.msk [vmem:[%s1600_s25 + $0xc8] sm:$0xff] %vm860_vm4, %v704_v30  ;;  %v975_v32 = vsel %vm860_vm4, %v704_v30, 0.0  ;;  %v1088_v33 = vmul.f32 %v704_v30, %v704_v30  ;;  %918 = vst.msk [vmem:[%s1600_s25 + $0x1c8] sm:$0xff] %vm860_vm4, %v2149_v58  ;;  %v1180_v26 = vsel %vm860_vm4, %v1090_v9, 0.0 }
 0x13d   : > { %v1175_v5 = vadd.f32 %v1174_v1, %v1173_v61  ;;  %v976_v6 = vadd.f32 %v975_v32, %v974_v59  ;;  %v1488_v7 = vpop.f32.mrf.mxu0  ;;  %v2158_v14 = vpop.f32.mrf.mxu1 }
 0x13e   : > { %v1176_v13 = vsel %vm860_vm4, %v1088_v33, 0.0  ;;  %891 = vst.msk [vmem:[%s1600_s25 + $0xf0] sm:$0xff] %vm860_vm4, %v1488_v7  ;;  %923 = vst.msk [vmem:[%s1600_s25 + $0x1f0] sm:$0xff] %vm860_vm4, %v2158_v14  ;;  %v1093_v45 = vmul.f32 %v1488_v7, %v1488_v7  ;;  %v985_v61 = vsel %vm860_vm4, %v1488_v7, 0.0  ;;  %v1096_v7 = vmul.f32 %v1932_v52, %v1932_v52 }
 0x13f   : > { %v978_v15 = vadd.f32 %v977_v8, %v976_v6  ;;  %v1177_v16 = vadd.f32 %v1176_v13, %v1175_v5  ;;  %v717_v17 = vpop.f32.mrf.mxu0  ;;  %v2167_v24 = vpop.f32.mrf.mxu1  ;;  %v1095_v6 = vmul.f32 %v1916_v43, %v1916_v43 }
 0x140   : > { %889 = vst.msk [vmem:[%s1600_s25 + $0xe0] sm:$0xff] %vm860_vm4, %v717_v17  ;;  %v1091_v23 = vmul.f32 %v717_v17, %v717_v17  ;;  %921 = vst.msk [vmem:[%s1600_s25 + $0x1e0] sm:$0xff] %vm860_vm4, %v2167_v24  ;;  %v981_v29 = vsel %vm860_vm4, %v717_v17, 0.0  ;;  %v1186_v33 = vsel %vm860_vm4, %v1093_v45, 0.0 }
 0x141   : > { %v1179_v25 = vadd.f32 %v1178_v18, %v1177_v16  ;;  %v980_v35 = vadd.f32 %v979_v21, %v978_v15  ;;  %v1489_v37 = vpop.f32.mrf.mxu0  ;;  %v2176_v38 = vpop.f32.mrf.mxu1  ;;  %v989_v15 = vsel %vm860_vm4, %v1916_v43, 0.0  ;;  %v1097_v18 = vmul.f32 %v1909_v41, %v1909_v41 }
 0x142   : > { %892 = vst.msk [vmem:[%s1600_s25 + $0xf8] sm:$0xff] %vm860_vm4, %v1489_v37  ;;  %924 = vst.msk [vmem:[%s1600_s25 + $0x1f8] sm:$0xff] %vm860_vm4, %v2176_v38  ;;  %v1182_v49 = vsel %vm860_vm4, %v1091_v23, 0.0  ;;  %v1094_v30 = vmul.f32 %v1489_v37, %v1489_v37  ;;  %v987_v5 = vsel %vm860_vm4, %v1489_v37, 0.0  ;;  %v1190_v21 = vsel %vm860_vm4, %v1095_v6, 0.0 }
 0x143   : > { %v982_v40 = vadd.f32 %v981_v29, %v980_v35  ;;  %v1181_v42 = vadd.f32 %v1180_v26, %v1179_v25  ;;  %v720_v44 = vpop.f32.mrf.mxu0  ;;  %v2185_v54 = vpop.f32.mrf.mxu1  ;;  %v991_v23 = vsel %vm860_vm4, %v1932_v52, 0.0  ;;  %v993_v37 = vsel %vm860_vm4, %v1909_v41, 0.0 }
 0x144   : > { %890 = vst.msk [vmem:[%s1600_s25 + $0xe8] sm:$0xff] %vm860_vm4, %v720_v44  ;;  %v983_v50 = vsel %vm860_vm4, %v720_v44, 0.0  ;;  %v1092_v53 = vmul.f32 %v720_v44, %v720_v44  ;;  %922 = vst.msk [vmem:[%s1600_s25 + $0x1e8] sm:$0xff] %vm860_vm4, %v2185_v54  ;;  %v1188_v13 = vsel %vm860_vm4, %v1094_v30, 0.0  ;;  %v1098_v43 = vmul.f32 %v1923_v46, %v1923_v46 }
 0x145   : > { %v1183_v56 = vadd.f32 %v1182_v49, %v1181_v42  ;;  %v984_v59 = vadd.f32 %v983_v50, %v982_v40  ;;  %v1192_v26 = vsel %vm860_vm4, %v1096_v7, 0.0  ;;  %v1194_v42 = vsel %vm860_vm4, %v1097_v18, 0.0 }
 0x146   : > { %v1184_v0 = vsel %vm860_vm4, %v1092_v53, 0.0  ;;  %v995_v44 = vsel %vm860_vm4, %v1923_v46, 0.0  ;;  %v1099_v52 = vmul.f32 %v1951_v31, %v1951_v31  ;;  %v1196_v50 = vsel %vm860_vm4, %v1098_v43, 0.0 }
 0x147   : > { %v986_v1 = vadd.f32 %v985_v61, %v984_v59  ;;  %v1185_v32 = vadd.f32 %v1184_v0, %v1183_v56  ;;  %v997_v41 = vsel %vm860_vm4, %v1951_v31, 0.0  ;;  %v1100_v53 = vmul.f32 %v1969_v12, %v1969_v12 }
 0x148   : > { %v1101_v61 = vmul.f32 %v1942_v60, %v1942_v60  ;;  %v1198_v46 = vsel %vm860_vm4, %v1099_v52, 0.0  ;;  %v999_v30 = vsel %vm860_vm4, %v1969_v12, 0.0  ;;  %v1102_v31 = vmul.f32 %v1960_v4, %v1960_v4 }
 0x149   : > { %v988_v8 = vadd.f32 %v987_v5, %v986_v1  ;;  %v1187_v9 = vadd.f32 %v1186_v33, %v1185_v32  ;;  %v1001_v32 = vsel %vm860_vm4, %v1942_v60, 0.0  ;;  %v1200_v33 = vsel %vm860_vm4, %v1100_v53, 0.0 }
 0x14a   : > { %v1103_v12 = vmul.f32 %v1987_v34, %v1987_v34  ;;  %v1204_v7 = vsel %vm860_vm4, %v1102_v31, 0.0  ;;  %v1005_v60 = vsel %vm860_vm4, %v1987_v34, 0.0  ;;  %v1106_v34 = vmul.f32 %v1996_v28, %v1996_v28 }
 0x14b   : > { %v1189_v16 = vadd.f32 %v1188_v13, %v1187_v9  ;;  %v990_v17 = vadd.f32 %v989_v15, %v988_v8  ;;  %v1202_v8 = vsel %vm860_vm4, %v1101_v61, 0.0  ;;  %v1003_v9 = vsel %vm860_vm4, %v1960_v4, 0.0 }
 0x14c   : > { %v1206_v4 = vsel %vm860_vm4, %v1103_v12, 0.0  ;;  %v1109_v53 = vmul.f32 %v2014_v55, %v2014_v55  ;;  %v1019_v31 = vsel %vm860_vm4, %v2032_v2, 0.0 }
 0x14d   : > { %v992_v25 = vadd.f32 %v991_v23, %v990_v17  ;;  %v1191_v35 = vadd.f32 %v1190_v21, %v1189_v16  ;;  %v1104_v16 = vmul.f32 %v2005_v47, %v2005_v47  ;;  %v1105_v21 = vmul.f32 %v1978_v19, %v1978_v19 }
 0x14e   : > { %v1007_v23 = vsel %vm860_vm4, %v2005_v47, 0.0  ;;  %v1107_v47 = vmul.f32 %v2023_v63, %v2023_v63 }
 0x14f   : > { %v994_v29 = vadd.f32 %v993_v37, %v992_v25  ;;  %v1193_v40 = vadd.f32 %v1192_v26, %v1191_v35  ;;  %v1009_v37 = vsel %vm860_vm4, %v1978_v19, 0.0  ;;  %v1208_v43 = vsel %vm860_vm4, %v1104_v16, 0.0 }
 0x150   : > { %v1013_v19 = vsel %vm860_vm4, %v2023_v63, 0.0  ;;  %v1110_v63 = vmul.f32 %v2032_v2, %v2032_v2  ;;  %v1025_v16 = vsel %vm860_vm4, %v2050_v20, 0.0 }
 0x151   : > { %v1195_v45 = vadd.f32 %v1194_v42, %v1193_v40  ;;  %v996_v49 = vadd.f32 %v995_v44, %v994_v29  ;;  %v1210_v40 = vsel %vm860_vm4, %v1105_v21, 0.0  ;;  %v1011_v42 = vsel %vm860_vm4, %v1996_v28, 0.0 }
 0x152   : > { %v1214_v28 = vsel %vm860_vm4, %v1107_v47, 0.0 }
 0x153   : > { %v998_v56 = vadd.f32 %v997_v41, %v996_v49  ;;  %v1197_v59 = vadd.f32 %v1196_v50, %v1195_v45  ;;  %v1212_v45 = vsel %vm860_vm4, %v1106_v34, 0.0  ;;  %v1108_v49 = vmul.f32 %v2041_v11, %v2041_v11 }
 0x154   : > { %v1116_v34 = vmul.f32 %v2113_v22, %v2113_v22 }
 0x155   : > { %v1199_v0 = vadd.f32 %v1198_v46, %v1197_v59  ;;  %v1000_v1 = vadd.f32 %v999_v30, %v998_v56  ;;  %v1015_v56 = vsel %vm860_vm4, %v2041_v11, 0.0  ;;  %v1017_v46 = vsel %vm860_vm4, %v2014_v55, 0.0 }
 0x156   : > { %v1216_v30 = vsel %vm860_vm4, %v1108_v49, 0.0  ;;  %v1111_v11 = vmul.f32 %v2059_v36, %v2059_v36  ;;  %v1021_v55 = vsel %vm860_vm4, %v2059_v36, 0.0  ;;  %v1114_v36 = vmul.f32 %v2068_v39, %v2068_v39 }
 0x157   : > { %v1002_v5 = vadd.f32 %v1001_v32, %v1000_v1  ;;  %v1201_v6 = vadd.f32 %v1200_v33, %v1199_v0  ;;  %v1218_v32 = vsel %vm860_vm4, %v1109_v53, 0.0 }
 0x158   : > { %v1222_v2 = vsel %vm860_vm4, %v1111_v11, 0.0 }
 0x159   : > { %v1203_v13 = vadd.f32 %v1202_v8, %v1201_v6  ;;  %v1004_v15 = vadd.f32 %v1003_v9, %v1002_v5  ;;  %v1220_v6 = vsel %vm860_vm4, %v1110_v63, 0.0  ;;  %v1112_v8 = vmul.f32 %v2077_v51, %v2077_v51 }
 0x15a   : > { %v1039_v63 = vsel %vm860_vm4, %v2149_v58, 0.0 }
 0x15b   : > { %v1006_v17 = vadd.f32 %v1005_v60, %v1004_v15  ;;  %v1205_v18 = vadd.f32 %v1204_v7, %v1203_v13  ;;  %v1113_v13 = vmul.f32 %v2050_v20, %v2050_v20  ;;  %v1023_v15 = vsel %vm860_vm4, %v2077_v51, 0.0 }
 0x15c   : > { %v1115_v51 = vmul.f32 %v2095_v3, %v2095_v3  ;;  %v1029_v20 = vsel %vm860_vm4, %v2095_v3, 0.0  ;;  %v1118_v3 = vmul.f32 %v2104_v10, %v2104_v10 }
 0x15d   : > { %v1207_v25 = vadd.f32 %v1206_v4, %v1205_v18  ;;  %v1008_v35 = vadd.f32 %v1007_v23, %v1006_v17  ;;  %v1224_v17 = vsel %vm860_vm4, %v1112_v8, 0.0  ;;  %v1226_v4 = vsel %vm860_vm4, %v1113_v13, 0.0 }
 0x15e   : > { %v1027_v23 = vsel %vm860_vm4, %v2068_v39, 0.0  ;;  %v1230_v39 = vsel %vm860_vm4, %v1115_v51, 0.0 }
 0x15f   : > { %v1010_v26 = vadd.f32 %v1009_v37, %v1008_v35  ;;  %v1209_v29 = vadd.f32 %v1208_v43, %v1207_v25  ;;  %v1228_v37 = vsel %vm860_vm4, %v1114_v36, 0.0 }
 0x161   : > { %v1211_v44 = vadd.f32 %v1210_v40, %v1209_v29  ;;  %v1012_v52 = vadd.f32 %v1011_v42, %v1010_v26  ;;  %v1117_v29 = vmul.f32 %v2086_v62, %v2086_v62  ;;  %v1031_v40 = vsel %vm860_vm4, %v2113_v22, 0.0 }
 0x162   : > { %v1119_v22 = vmul.f32 %v2131_v48, %v2131_v48 }
 0x163   : > { %v1014_v50 = vadd.f32 %v1013_v19, %v1012_v52  ;;  %v1213_v41 = vadd.f32 %v1212_v45, %v1211_v44  ;;  %v1033_v44 = vsel %vm860_vm4, %v2086_v62, 0.0  ;;  %v1232_v52 = vsel %vm860_vm4, %v1116_v34, 0.0 }
 0x164   : > { %v1234_v49 = vsel %vm860_vm4, %v1117_v29, 0.0  ;;  %v1037_v62 = vsel %vm860_vm4, %v2131_v48, 0.0  ;;  %v1122_v48 = vmul.f32 %v2140_v57, %v2140_v57 }
 0x165   : > { %v1215_v59 = vadd.f32 %v1214_v28, %v1213_v41  ;;  %v1016_v61 = vadd.f32 %v1015_v56, %v1014_v50  ;;  %v1035_v50 = vsel %vm860_vm4, %v2104_v10, 0.0  ;;  %v1236_v28 = vsel %vm860_vm4, %v1118_v3, 0.0 }
 0x166   : > { %v1120_v56 = vmul.f32 %v2149_v58, %v2149_v58  ;;  %v1238_v10 = vsel %vm860_vm4, %v1119_v22, 0.0  ;;  %v1123_v58 = vmul.f32 %v2167_v24, %v2167_v24  ;;  %v1244_v8 = vsel %vm860_vm4, %v1122_v48, 0.0 }
 0x167   : > { %v1018_v0 = vadd.f32 %v1017_v46, %v1016_v61  ;;  %v1217_v1 = vadd.f32 %v1216_v30, %v1215_v59  ;;  %v1121_v46 = vmul.f32 %v2122_v27, %v2122_v27 }
 0x169   : > { %v1219_v33 = vadd.f32 %v1218_v32, %v1217_v1  ;;  %v1020_v5 = vadd.f32 %v1019_v31, %v1018_v0  ;;  %v1041_v1 = vsel %vm860_vm4, %v2122_v27, 0.0  ;;  %v1240_v32 = vsel %vm860_vm4, %v1120_v56, 0.0 }
 0x16a   : > { %v1045_v27 = vsel %vm860_vm4, %v2167_v24, 0.0  ;;  %v1126_v24 = vmul.f32 %v2176_v38, %v2176_v38 }
 0x16b   : > { %v1022_v9 = vadd.f32 %v1021_v55, %v1020_v5  ;;  %v1221_v12 = vadd.f32 %v1220_v6, %v1219_v33  ;;  %v1242_v33 = vsel %vm860_vm4, %v1121_v46, 0.0  ;;  %v1043_v5 = vsel %vm860_vm4, %v2140_v57, 0.0 }
 0x16c   : > { %v1246_v57 = vsel %vm860_vm4, %v1123_v58, 0.0 }
 0x16d   : > { %v1223_v7 = vadd.f32 %v1222_v2, %v1221_v12  ;;  %v1024_v60 = vadd.f32 %v1023_v15, %v1022_v9  ;;  %v1124_v9 = vmul.f32 %v2185_v54, %v2185_v54  ;;  %v1125_v2 = vmul.f32 %v2158_v14, %v2158_v14 }
 0x16e   : > { %v1047_v15 = vsel %vm860_vm4, %v2185_v54, 0.0  ;;  %v1252_v54 = vsel %vm860_vm4, %v1126_v24, 0.0 }
 0x16f   : > { %v1026_v18 = vadd.f32 %v1025_v16, %v1024_v60  ;;  %v1225_v21 = vadd.f32 %v1224_v17, %v1223_v7  ;;  %v1049_v16 = vsel %vm860_vm4, %v2158_v14, 0.0  ;;  %v1248_v36 = vsel %vm860_vm4, %v1124_v9, 0.0 }
 0x171   : > { %v1227_v25 = vadd.f32 %v1226_v4, %v1225_v21  ;;  %v1028_v35 = vadd.f32 %v1027_v23, %v1026_v18  ;;  %v1250_v21 = vsel %vm860_vm4, %v1125_v2, 0.0  ;;  %v1051_v4 = vsel %vm860_vm4, %v2176_v38, 0.0 }
 0x173   : > { %v1030_v43 = vadd.f32 %v1029_v20, %v1028_v35  ;;  %v1229_v26 = vadd.f32 %v1228_v37, %v1227_v25 }
 0x175   : > { %v1231_v42 = vadd.f32 %v1230_v39, %v1229_v26  ;;  %v1032_v47 = vadd.f32 %v1031_v40, %v1030_v43  ;;  %v925_v40 = vld [vmem:[%s2373_s3] sm:$0x1] }
 0x177   : > { %v1034_v45 = vadd.f32 %v1033_v44, %v1032_v47  ;;  %v1233_v19 = vadd.f32 %v1232_v52, %v1231_v42  ;;  %v1062_v47 = vld [vmem:[%s2374_s4] sm:$0x1] }
 0x179   : > { %v1235_v41 = vadd.f32 %v1234_v49, %v1233_v19  ;;  %v1036_v53 = vadd.f32 %v1035_v50, %v1034_v45 }
 0x17b   : > { %v1038_v59 = vadd.f32 %v1037_v62, %v1036_v53  ;;  %v1237_v61 = vadd.f32 %v1236_v28, %v1235_v41 }
 0x17d   : > { %v1239_v30 = vadd.f32 %v1238_v10, %v1237_v61  ;;  %v1040_v0 = vadd.f32 %v1039_v63, %v1038_v59 }
 0x17f   : > { %v1042_v31 = vadd.f32 %v1041_v1, %v1040_v0  ;;  %v1241_v11 = vadd.f32 %v1240_v32, %v1239_v30 }
 0x181   : > { %v1243_v6 = vadd.f32 %v1242_v33, %v1241_v11  ;;  %v1044_v55 = vadd.f32 %v1043_v5, %v1042_v31 }
 0x183   : > { %v1046_v12 = vadd.f32 %v1045_v27, %v1044_v55  ;;  %v1245_v13 = vadd.f32 %v1244_v8, %v1243_v6 }
 0x185   : > { %v1247_v7 = vadd.f32 %v1246_v57, %v1245_v13  ;;  %v1048_v60 = vadd.f32 %v1047_v15, %v1046_v12 }
 0x187   : > { %v1050_v17 = vadd.f32 %v1049_v16, %v1048_v60  ;;  %v1249_v18 = vadd.f32 %v1248_v36, %v1247_v7 }
 0x189   : > { %v1052_v23 = vadd.f32 %v1051_v4, %v1050_v17  ;;  %v1251_v51 = vadd.f32 %v1250_v21, %v1249_v18 }
 0x18b   : > { %v1053_v25 = vrot.slane %v1052_v23, 4  ;;  %v1253_v35 = vadd.f32 %v1252_v54, %v1251_v51 }
 0x18d   : > { %v1054_v37 = vadd.f32 %v1053_v25, %v1052_v23  ;;  %v1254_v14 = vrot.slane %v1253_v35, 4 }
 0x18f   : > { %v1055_v20 = vrot.slane %v1054_v37, 2  ;;  %v1255_v34 = vadd.f32 %v1254_v14, %v1253_v35 }
 0x191   : > { %v1056_v43 = vadd.f32 %v1055_v20, %v1054_v37  ;;  %v1256_v26 = vrot.slane %v1255_v34, 2 }
 0x193   : > { %v1057_v29 = vrot.slane %v1056_v43, 1  ;;  %v1257_v39 = vadd.f32 %v1256_v26, %v1255_v34 }
 0x195   : > { %v1058_v42 = vadd.f32 %v1057_v29, %v1056_v43  ;;  %v1258_v38 = vrot.slane %v1257_v39, 1 }
 0x197   : > { %v1059_v44 = vadd.f32 %v1058_v42, %v925_v40  ;;  %v1259_v3 = vadd.f32 %v1258_v38, %v1257_v39 }
 0x199   : > { %1061 = vst.msk [vmem:[%s2373_s3] sm:$0x1] %vm1060_vm5, %v1059_v44  ;;  %v1260_v52 = vadd.f32 %v1259_v3, %v1062_v47 }
 0x19b   : > { %1261 = vst.msk [vmem:[%s2374_s4] sm:$0x1] %vm1060_vm5, %v1260_v52 }
 0x19c PF: > { %s15_s15 = sadd.s32 1, %s1553_s15  }
 0x19d   : > { %p12_p5 = scmp.ge.s32.totalorder %s15_s15, 6  }
 0x19f   :  { %14 = sbr.rel (!%p12_p5) target bundleno = 1 (0x1), region = 78 }

// kernel: allconv_forward.11
= control target key start
LH: loop header
LB: loop body
LE: loop exit
PB: predicated region body
PF: predicated region fallthrough
CT: control target
= control target key end

     0   :  { %s998_s12 = smov 0   ;;  %s1353_s0 = inlined_call_operand.vmem [shape: f32[2048,16], index: 0, kind: input, shape index: {}]   ;;  %s1354_s1 = inlined_call_operand.vmem [shape: f32[1,16], index: 1, kind: input, shape index: {}]   ;;  %s1355_s2 = inlined_call_operand.vmem [shape: f32[1,16], index: 2, kind: input, shape index: {}]   ;;  %s1356_s3 = inlined_call_operand.vmem [shape: bf16[2048,16], index: 3, kind: output, shape index: {}]  }
   0x1 LB: > { %s821_s13 = sadd.s32 4294967295, %s976_s12   ;;  %p825_p0 = scmp.ge.s32.totalorder %s976_s12, 1  ;;  %s976_s12 = sphi %s998_s12, %s13_s12  }
   0x2   : > { %p138_p1 = scmp.lt.s32.totalorder %s976_s12, 5 }
   0x4   : > { %p139_p2 = pnand %p825_p0, %p138_p1 }
   0x5   : > { %s826_s14 = sshll.u32 (!%p139_p2), %s821_s13, 6 }
   0x6   : > { %142 = sbr.rel (%p139_p2) target bundleno = 90 (0x5a), region = 32  ;;  %p163_p3 = scmp.lt.s32.totalorder (!%p139_p2), %s826_s14, 255 }
   0xb   : > { %s1358_s14 = smov (!%p163_p3, %s826_s14), 255  ;;  %v1012_v0 = vld [vmem:[%s1354_s1] ss:$0 sm:$0xff]  ;;  %vm700_vm0 = vcmask 125952  }
   0xc   : > { %s827_s15 = sshll.u32 %s1358_s14, 3  ;;  %v1022_v1 = vld [vmem:[%s1355_s2] ss:$0 sm:$0xff]  ;;  %s829_s23 = sshll.u32 %s1358_s14, 2 }
   0xd   : > { %s1017_s20 = scalar_lea.vmem %s1353_s0, %s827_s15  ;;  %s1051_s26 = scalar_lea.vmem %s1356_s3, %s829_s23 }
   0xe   : > { %v174_v2 = vld [vmem:[%s1017_s20] sm:$0xff]  ;;  %v175_v3 = vld [vmem:[%s1017_s20 + $0x8] sm:$0xff]  ;;  %v176_v4 = vld [vmem:[%s1017_s20 + $0x10] sm:$0xff] }
   0xf   : > { %v245_v5 = vmul.f32 %v1012_v0, %v174_v2  ;;  %v246_v6 = vmul.f32 %v1012_v0, %v175_v3  ;;  %v247_v7 = vmul.f32 %v1012_v0, %v176_v4  ;;  %v177_v8 = vld [vmem:[%s1017_s20 + $0x18] sm:$0xff]  ;;  %v178_v9 = vld [vmem:[%s1017_s20 + $0x20] sm:$0xff]  ;;  %v179_v10 = vld [vmem:[%s1017_s20 + $0x28] sm:$0xff] }
  0x10   : > { %v248_v11 = vmul.f32 %v1012_v0, %v177_v8  ;;  %v249_v12 = vmul.f32 %v1012_v0, %v178_v9  ;;  %v250_v13 = vmul.f32 %v1012_v0, %v179_v10  ;;  %v180_v14 = vld [vmem:[%s1017_s20 + $0x30] sm:$0xff]  ;;  %v181_v15 = vld [vmem:[%s1017_s20 + $0x38] sm:$0xff]  ;;  %v182_v32 = vld [vmem:[%s1017_s20 + $0x40] sm:$0xff] }
  0x11   : > { %v316_v16 = vadd.f32 %v1022_v1, %v245_v5  ;;  %v317_v17 = vadd.f32 %v1022_v1, %v246_v6  ;;  %v318_v18 = vadd.f32 %v1022_v1, %v247_v7  ;;  %v251_v19 = vmul.f32 %v1012_v0, %v180_v14  ;;  %v183_v33 = vld [vmem:[%s1017_s20 + $0x48] sm:$0xff]  ;;  %v184_v34 = vld [vmem:[%s1017_s20 + $0x50] sm:$0xff]  ;;  %v185_v39 = vld [vmem:[%s1017_s20 + $0x58] sm:$0xff] }
  0x12   : > { %v319_v20 = vadd.f32 %v1022_v1, %v248_v11  ;;  %v320_v21 = vadd.f32 %v1022_v1, %v249_v12  ;;  %v321_v22 = vadd.f32 %v1022_v1, %v250_v13  ;;  %v252_v23 = vmul.f32 %v1012_v0, %v181_v15  ;;  %v186_v40 = vld [vmem:[%s1017_s20 + $0x60] sm:$0xff]  ;;  %v187_v41 = vld [vmem:[%s1017_s20 + $0x68] sm:$0xff]  ;;  %v188_v46 = vld [vmem:[%s1017_s20 + $0x70] sm:$0xff] }
  0x13   : > { %v380_v24 = vmax.f32 %v316_v16, 0.0  ;;  %v381_v25 = vmax.f32 %v317_v17, 0.0  ;;  %v382_v26 = vmax.f32 %v318_v18, 0.0  ;;  %v322_v27 = vadd.f32 %v1022_v1, %v251_v19  ;;  %v189_v51 = vld [vmem:[%s1017_s20 + $0x78] sm:$0xff]  ;;  %v190_v10 = vld [vmem:[%s1017_s20 + $0x80] sm:$0xff]  ;;  %v191_v11 = vld [vmem:[%s1017_s20 + $0x88] sm:$0xff] }
  0x14   : > { %v383_v28 = vmax.f32 %v319_v20, 0.0  ;;  %v384_v29 = vmax.f32 %v320_v21, 0.0  ;;  %v385_v30 = vmax.f32 %v321_v22, 0.0  ;;  %v323_v31 = vadd.f32 %v1022_v1, %v252_v23  ;;  %v192_v12 = vld [vmem:[%s1017_s20 + $0x90] sm:$0xff]  ;;  %v193_v17 = vld [vmem:[%s1017_s20 + $0x98] sm:$0xff]  ;;  %v194_v18 = vld [vmem:[%s1017_s20 + $0xa0] sm:$0xff] }
  0x15   : > { %v898_v35 = vpack.c.bf16 %v380_v24, %v380_v24  ;;  %v899_v36 = vpack.c.bf16 %v381_v25, %v381_v25  ;;  %v900_v37 = vpack.c.bf16 %v382_v26, %v382_v26  ;;  %v386_v38 = vmax.f32 %v322_v27, 0.0  ;;  %v195_v19 = vld [vmem:[%s1017_s20 + $0xa8] sm:$0xff]  ;;  %v196_v24 = vld [vmem:[%s1017_s20 + $0xb0] sm:$0xff] }
  0x16   : > { %v901_v42 = vpack.c.bf16 %v383_v28, %v383_v28  ;;  %v902_v43 = vpack.c.bf16 %v384_v29, %v384_v29  ;;  %v903_v44 = vpack.c.bf16 %v385_v30, %v385_v30  ;;  %v387_v45 = vmax.f32 %v323_v31, 0.0  ;;  %v197_v29 = vld [vmem:[%s1017_s20 + $0xb8] sm:$0xff] }
  0x17   : > { %701 = vst.msk [vmem:[%s1051_s26] sm:$0xf] %vm700_vm0, %v898_v35  ;;  %702 = vst.msk [vmem:[%s1051_s26 + $0x4] sm:$0xf] %vm700_vm0, %v899_v36  ;;  %v904_v47 = vpack.c.bf16 %v386_v38, %v386_v38  ;;  %v253_v48 = vmul.f32 %v1012_v0, %v182_v32  ;;  %v254_v49 = vmul.f32 %v1012_v0, %v183_v33 }
  0x18   : > { %703 = vst.msk [vmem:[%s1051_s26 + $0x8] sm:$0xf] %vm700_vm0, %v900_v37  ;;  %v255_v50 = vmul.f32 %v1012_v0, %v184_v34  ;;  %704 = vst.msk [vmem:[%s1051_s26 + $0xc] sm:$0xf] %vm700_vm0, %v901_v42  ;;  %v905_v52 = vpack.c.bf16 %v387_v45, %v387_v45  ;;  %v256_v53 = vmul.f32 %v1012_v0, %v185_v39 }
  0x19   : > { %705 = vst.msk [vmem:[%s1051_s26 + $0x10] sm:$0xf] %vm700_vm0, %v902_v43  ;;  %706 = vst.msk [vmem:[%s1051_s26 + $0x14] sm:$0xf] %vm700_vm0, %v903_v44  ;;  %v257_v54 = vmul.f32 %v1012_v0, %v186_v40  ;;  %v258_v55 = vmul.f32 %v1012_v0, %v187_v41  ;;  %v324_v56 = vadd.f32 %v1022_v1, %v253_v48 }
  0x1a   : > { %707 = vst.msk [vmem:[%s1051_s26 + $0x18] sm:$0xf] %vm700_vm0, %v904_v47  ;;  %v325_v57 = vadd.f32 %v1022_v1, %v254_v49  ;;  %v326_v58 = vadd.f32 %v1022_v1, %v255_v50  ;;  %v259_v59 = vmul.f32 %v1012_v0, %v188_v46  ;;  %708 = vst.msk [vmem:[%s1051_s26 + $0x1c] sm:$0xf] %vm700_vm0, %v905_v52  ;;  %v198_v50 = vld [vmem:[%s1017_s20 + $0xc0] sm:$0xff]  ;;  %v200_v52 = vld [vmem:[%s1017_s20 + $0xd0] sm:$0xff] }
  0x1b   : > { %v327_v60 = vadd.f32 %v1022_v1, %v256_v53  ;;  %v328_v61 = vadd.f32 %v1022_v1, %v257_v54  ;;  %v329_v62 = vadd.f32 %v1022_v1, %v258_v55  ;;  %v260_v63 = vmul.f32 %v1012_v0, %v189_v51  ;;  %v199_v51 = vld [vmem:[%s1017_s20 + $0xc8] sm:$0xff] }
  0x1c   : > { %v388_v2 = vmax.f32 %v324_v56, 0.0  ;;  %v389_v3 = vmax.f32 %v325_v57, 0.0  ;;  %v390_v4 = vmax.f32 %v326_v58, 0.0  ;;  %v330_v5 = vadd.f32 %v1022_v1, %v259_v59  ;;  %v201_v57 = vld [vmem:[%s1017_s20 + $0xd8] sm:$0xff]  ;;  %v202_v58 = vld [vmem:[%s1017_s20 + $0xe0] sm:$0xff]  ;;  %v203_v59 = vld [vmem:[%s1017_s20 + $0xe8] sm:$0xff] }
  0x1d   : > { %v391_v6 = vmax.f32 %v327_v60, 0.0  ;;  %v392_v7 = vmax.f32 %v328_v61, 0.0  ;;  %v393_v8 = vmax.f32 %v329_v62, 0.0  ;;  %v331_v9 = vadd.f32 %v1022_v1, %v260_v63 }
  0x1e   : > { %v906_v13 = vpack.c.bf16 %v388_v2, %v388_v2  ;;  %v907_v14 = vpack.c.bf16 %v389_v3, %v389_v3  ;;  %v908_v15 = vpack.c.bf16 %v390_v4, %v390_v4  ;;  %v394_v16 = vmax.f32 %v330_v5, 0.0  ;;  %v204_v2 = vld [vmem:[%s1017_s20 + $0xf0] sm:$0xff] }
  0x1f   : > { %v909_v20 = vpack.c.bf16 %v391_v6, %v391_v6  ;;  %v910_v21 = vpack.c.bf16 %v392_v7, %v392_v7  ;;  %v911_v22 = vpack.c.bf16 %v393_v8, %v393_v8  ;;  %v395_v23 = vmax.f32 %v331_v9, 0.0  ;;  %v205_v7 = vld [vmem:[%s1017_s20 + $0xf8] sm:$0xff] }
  0x20   : > { %709 = vst.msk [vmem:[%s1051_s26 + $0x20] sm:$0xf] %vm700_vm0, %v906_v13  ;;  %710 = vst.msk [vmem:[%s1051_s26 + $0x24] sm:$0xf] %vm700_vm0, %v907_v14  ;;  %v912_v25 = vpack.c.bf16 %v394_v16, %v394_v16  ;;  %v261_v26 = vmul.f32 %v1012_v0, %v190_v10  ;;  %v262_v27 = vmul.f32 %v1012_v0, %v191_v11 }
  0x21   : > { %711 = vst.msk [vmem:[%s1051_s26 + $0x28] sm:$0xf] %vm700_vm0, %v908_v15  ;;  %v263_v28 = vmul.f32 %v1012_v0, %v192_v12  ;;  %712 = vst.msk [vmem:[%s1051_s26 + $0x2c] sm:$0xf] %vm700_vm0, %v909_v20  ;;  %v913_v30 = vpack.c.bf16 %v395_v23, %v395_v23  ;;  %v264_v31 = vmul.f32 %v1012_v0, %v193_v17 }
  0x22   : > { %713 = vst.msk [vmem:[%s1051_s26 + $0x30] sm:$0xf] %vm700_vm0, %v910_v21  ;;  %714 = vst.msk [vmem:[%s1051_s26 + $0x34] sm:$0xf] %vm700_vm0, %v911_v22  ;;  %v265_v32 = vmul.f32 %v1012_v0, %v194_v18  ;;  %v266_v33 = vmul.f32 %v1012_v0, %v195_v19  ;;  %v332_v34 = vadd.f32 %v1022_v1, %v261_v26 }
  0x23   : > { %715 = vst.msk [vmem:[%s1051_s26 + $0x38] sm:$0xf] %vm700_vm0, %v912_v25  ;;  %v333_v35 = vadd.f32 %v1022_v1, %v262_v27  ;;  %v334_v36 = vadd.f32 %v1022_v1, %v263_v28  ;;  %v267_v37 = vmul.f32 %v1012_v0, %v196_v24  ;;  %716 = vst.msk [vmem:[%s1051_s26 + $0x3c] sm:$0xf] %vm700_vm0, %v913_v30  ;;  %v206_v28 = vld [vmem:[%s1017_s20 + $0x100] sm:$0xff]  ;;  %v208_v30 = vld [vmem:[%s1017_s20 + $0x110] sm:$0xff] }
  0x24   : > { %v335_v38 = vadd.f32 %v1022_v1, %v264_v31  ;;  %v336_v39 = vadd.f32 %v1022_v1, %v265_v32  ;;  %v337_v40 = vadd.f32 %v1022_v1, %v266_v33  ;;  %v268_v41 = vmul.f32 %v1012_v0, %v197_v29  ;;  %v207_v29 = vld [vmem:[%s1017_s20 + $0x108] sm:$0xff] }
  0x25   : > { %v396_v42 = vmax.f32 %v332_v34, 0.0  ;;  %v397_v43 = vmax.f32 %v333_v35, 0.0  ;;  %v398_v44 = vmax.f32 %v334_v36, 0.0  ;;  %v338_v45 = vadd.f32 %v1022_v1, %v267_v37  ;;  %v209_v35 = vld [vmem:[%s1017_s20 + $0x118] sm:$0xff]  ;;  %v210_v36 = vld [vmem:[%s1017_s20 + $0x120] sm:$0xff]  ;;  %v211_v37 = vld [vmem:[%s1017_s20 + $0x128] sm:$0xff] }
  0x26   : > { %v399_v46 = vmax.f32 %v335_v38, 0.0  ;;  %v400_v47 = vmax.f32 %v336_v39, 0.0  ;;  %v401_v48 = vmax.f32 %v337_v40, 0.0  ;;  %v339_v49 = vadd.f32 %v1022_v1, %v268_v41 }
  0x27   : > { %v914_v53 = vpack.c.bf16 %v396_v42, %v396_v42  ;;  %v915_v54 = vpack.c.bf16 %v397_v43, %v397_v43  ;;  %v916_v55 = vpack.c.bf16 %v398_v44, %v398_v44  ;;  %v402_v56 = vmax.f32 %v338_v45, 0.0  ;;  %v212_v42 = vld [vmem:[%s1017_s20 + $0x130] sm:$0xff] }
  0x28   : > { %v917_v60 = vpack.c.bf16 %v399_v46, %v399_v46  ;;  %v918_v61 = vpack.c.bf16 %v400_v47, %v400_v47  ;;  %v919_v62 = vpack.c.bf16 %v401_v48, %v401_v48  ;;  %v403_v63 = vmax.f32 %v339_v49, 0.0  ;;  %v213_v47 = vld [vmem:[%s1017_s20 + $0x138] sm:$0xff] }
  0x29   : > { %717 = vst.msk [vmem:[%s1051_s26 + $0x40] sm:$0xf] %vm700_vm0, %v914_v53  ;;  %718 = vst.msk [vmem:[%s1051_s26 + $0x44] sm:$0xf] %vm700_vm0, %v915_v54  ;;  %v920_v3 = vpack.c.bf16 %v402_v56, %v402_v56  ;;  %v269_v4 = vmul.f32 %v1012_v0, %v198_v50  ;;  %v270_v5 = vmul.f32 %v1012_v0, %v199_v51 }
  0x2a   : > { %719 = vst.msk [vmem:[%s1051_s26 + $0x48] sm:$0xf] %vm700_vm0, %v916_v55  ;;  %v271_v6 = vmul.f32 %v1012_v0, %v200_v52  ;;  %720 = vst.msk [vmem:[%s1051_s26 + $0x4c] sm:$0xf] %vm700_vm0, %v917_v60  ;;  %v921_v8 = vpack.c.bf16 %v403_v63, %v403_v63  ;;  %v272_v9 = vmul.f32 %v1012_v0, %v201_v57 }
  0x2b   : > { %721 = vst.msk [vmem:[%s1051_s26 + $0x50] sm:$0xf] %vm700_vm0, %v918_v61  ;;  %722 = vst.msk [vmem:[%s1051_s26 + $0x54] sm:$0xf] %vm700_vm0, %v919_v62  ;;  %v273_v10 = vmul.f32 %v1012_v0, %v202_v58  ;;  %v274_v11 = vmul.f32 %v1012_v0, %v203_v59  ;;  %v340_v12 = vadd.f32 %v1022_v1, %v269_v4 }
  0x2c   : > { %723 = vst.msk [vmem:[%s1051_s26 + $0x58] sm:$0xf] %vm700_vm0, %v920_v3  ;;  %v341_v13 = vadd.f32 %v1022_v1, %v270_v5  ;;  %v342_v14 = vadd.f32 %v1022_v1, %v271_v6  ;;  %v275_v15 = vmul.f32 %v1012_v0, %v204_v2  ;;  %724 = vst.msk [vmem:[%s1051_s26 + $0x5c] sm:$0xf] %vm700_vm0, %v921_v8  ;;  %v214_v6 = vld [vmem:[%s1017_s20 + $0x140] sm:$0xff]  ;;  %v216_v8 = vld [vmem:[%s1017_s20 + $0x150] sm:$0xff] }
  0x2d   : > { %v343_v16 = vadd.f32 %v1022_v1, %v272_v9  ;;  %v344_v17 = vadd.f32 %v1022_v1, %v273_v10  ;;  %v345_v18 = vadd.f32 %v1022_v1, %v274_v11  ;;  %v276_v19 = vmul.f32 %v1012_v0, %v205_v7  ;;  %v215_v7 = vld [vmem:[%s1017_s20 + $0x148] sm:$0xff] }
  0x2e   : > { %v404_v20 = vmax.f32 %v340_v12, 0.0  ;;  %v405_v21 = vmax.f32 %v341_v13, 0.0  ;;  %v406_v22 = vmax.f32 %v342_v14, 0.0  ;;  %v346_v23 = vadd.f32 %v1022_v1, %v275_v15  ;;  %v217_v13 = vld [vmem:[%s1017_s20 + $0x158] sm:$0xff]  ;;  %v218_v14 = vld [vmem:[%s1017_s20 + $0x160] sm:$0xff]  ;;  %v219_v15 = vld [vmem:[%s1017_s20 + $0x168] sm:$0xff] }
  0x2f   : > { %v407_v24 = vmax.f32 %v343_v16, 0.0  ;;  %v408_v25 = vmax.f32 %v344_v17, 0.0  ;;  %v409_v26 = vmax.f32 %v345_v18, 0.0  ;;  %v347_v27 = vadd.f32 %v1022_v1, %v276_v19 }
  0x30   : > { %v922_v31 = vpack.c.bf16 %v404_v20, %v404_v20  ;;  %v923_v32 = vpack.c.bf16 %v405_v21, %v405_v21  ;;  %v924_v33 = vpack.c.bf16 %v406_v22, %v406_v22  ;;  %v410_v34 = vmax.f32 %v346_v23, 0.0  ;;  %v220_v20 = vld [vmem:[%s1017_s20 + $0x170] sm:$0xff] }
  0x31   : > { %v925_v38 = vpack.c.bf16 %v407_v24, %v407_v24  ;;  %v926_v39 = vpack.c.bf16 %v408_v25, %v408_v25  ;;  %v927_v40 = vpack.c.bf16 %v409_v26, %v409_v26  ;;  %v411_v41 = vmax.f32 %v347_v27, 0.0  ;;  %v221_v25 = vld [vmem:[%s1017_s20 + $0x178] sm:$0xff] }
  0x32   : > { %725 = vst.msk [vmem:[%s1051_s26 + $0x60] sm:$0xf] %vm700_vm0, %v922_v31  ;;  %726 = vst.msk [vmem:[%s1051_s26 + $0x64] sm:$0xf] %vm700_vm0, %v923_v32  ;;  %v928_v43 = vpack.c.bf16 %v410_v34, %v410_v34  ;;  %v277_v44 = vmul.f32 %v1012_v0, %v206_v28  ;;  %v278_v45 = vmul.f32 %v1012_v0, %v207_v29 }
  0x33   : > { %727 = vst.msk [vmem:[%s1051_s26 + $0x68] sm:$0xf] %vm700_vm0, %v924_v33  ;;  %v279_v46 = vmul.f32 %v1012_v0, %v208_v30  ;;  %728 = vst.msk [vmem:[%s1051_s26 + $0x6c] sm:$0xf] %vm700_vm0, %v925_v38  ;;  %v929_v48 = vpack.c.bf16 %v411_v41, %v411_v41  ;;  %v280_v49 = vmul.f32 %v1012_v0, %v209_v35 }
  0x34   : > { %729 = vst.msk [vmem:[%s1051_s26 + $0x70] sm:$0xf] %vm700_vm0, %v926_v39  ;;  %730 = vst.msk [vmem:[%s1051_s26 + $0x74] sm:$0xf] %vm700_vm0, %v927_v40  ;;  %v281_v50 = vmul.f32 %v1012_v0, %v210_v36  ;;  %v282_v51 = vmul.f32 %v1012_v0, %v211_v37  ;;  %v348_v52 = vadd.f32 %v1022_v1, %v277_v44 }
  0x35   : > { %731 = vst.msk [vmem:[%s1051_s26 + $0x78] sm:$0xf] %vm700_vm0, %v928_v43  ;;  %v349_v53 = vadd.f32 %v1022_v1, %v278_v45  ;;  %v350_v54 = vadd.f32 %v1022_v1, %v279_v46  ;;  %v283_v55 = vmul.f32 %v1012_v0, %v212_v42  ;;  %732 = vst.msk [vmem:[%s1051_s26 + $0x7c] sm:$0xf] %vm700_vm0, %v929_v48  ;;  %v222_v46 = vld [vmem:[%s1017_s20 + $0x180] sm:$0xff]  ;;  %v224_v48 = vld [vmem:[%s1017_s20 + $0x190] sm:$0xff] }
  0x36   : > { %v351_v56 = vadd.f32 %v1022_v1, %v280_v49  ;;  %v352_v57 = vadd.f32 %v1022_v1, %v281_v50  ;;  %v353_v58 = vadd.f32 %v1022_v1, %v282_v51  ;;  %v284_v59 = vmul.f32 %v1012_v0, %v213_v47  ;;  %v223_v47 = vld [vmem:[%s1017_s20 + $0x188] sm:$0xff] }
  0x37   : > { %v412_v60 = vmax.f32 %v348_v52, 0.0  ;;  %v413_v61 = vmax.f32 %v349_v53, 0.0  ;;  %v414_v62 = vmax.f32 %v350_v54, 0.0  ;;  %v354_v63 = vadd.f32 %v1022_v1, %v283_v55  ;;  %v225_v53 = vld [vmem:[%s1017_s20 + $0x198] sm:$0xff]  ;;  %v226_v54 = vld [vmem:[%s1017_s20 + $0x1a0] sm:$0xff]  ;;  %v227_v55 = vld [vmem:[%s1017_s20 + $0x1a8] sm:$0xff] }
  0x38   : > { %v415_v2 = vmax.f32 %v351_v56, 0.0  ;;  %v416_v3 = vmax.f32 %v352_v57, 0.0  ;;  %v417_v4 = vmax.f32 %v353_v58, 0.0  ;;  %v355_v5 = vadd.f32 %v1022_v1, %v284_v59 }
  0x39   : > { %v930_v9 = vpack.c.bf16 %v412_v60, %v412_v60  ;;  %v931_v10 = vpack.c.bf16 %v413_v61, %v413_v61  ;;  %v932_v11 = vpack.c.bf16 %v414_v62, %v414_v62  ;;  %v418_v12 = vmax.f32 %v354_v63, 0.0  ;;  %v228_v60 = vld [vmem:[%s1017_s20 + $0x1b0] sm:$0xff] }
  0x3a   : > { %v933_v16 = vpack.c.bf16 %v415_v2, %v415_v2  ;;  %v934_v17 = vpack.c.bf16 %v416_v3, %v416_v3  ;;  %v935_v18 = vpack.c.bf16 %v417_v4, %v417_v4  ;;  %v419_v19 = vmax.f32 %v355_v5, 0.0  ;;  %v229_v3 = vld [vmem:[%s1017_s20 + $0x1b8] sm:$0xff] }
  0x3b   : > { %733 = vst.msk [vmem:[%s1051_s26 + $0x80] sm:$0xf] %vm700_vm0, %v930_v9  ;;  %734 = vst.msk [vmem:[%s1051_s26 + $0x84] sm:$0xf] %vm700_vm0, %v931_v10  ;;  %v936_v21 = vpack.c.bf16 %v418_v12, %v418_v12  ;;  %v285_v22 = vmul.f32 %v1012_v0, %v214_v6  ;;  %v286_v23 = vmul.f32 %v1012_v0, %v215_v7 }
  0x3c   : > { %735 = vst.msk [vmem:[%s1051_s26 + $0x88] sm:$0xf] %vm700_vm0, %v932_v11  ;;  %v287_v24 = vmul.f32 %v1012_v0, %v216_v8  ;;  %736 = vst.msk [vmem:[%s1051_s26 + $0x8c] sm:$0xf] %vm700_vm0, %v933_v16  ;;  %v937_v26 = vpack.c.bf16 %v419_v19, %v419_v19  ;;  %v288_v27 = vmul.f32 %v1012_v0, %v217_v13 }
  0x3d   : > { %737 = vst.msk [vmem:[%s1051_s26 + $0x90] sm:$0xf] %vm700_vm0, %v934_v17  ;;  %738 = vst.msk [vmem:[%s1051_s26 + $0x94] sm:$0xf] %vm700_vm0, %v935_v18  ;;  %v289_v28 = vmul.f32 %v1012_v0, %v218_v14  ;;  %v290_v29 = vmul.f32 %v1012_v0, %v219_v15  ;;  %v356_v30 = vadd.f32 %v1022_v1, %v285_v22 }
  0x3e   : > { %739 = vst.msk [vmem:[%s1051_s26 + $0x98] sm:$0xf] %vm700_vm0, %v936_v21  ;;  %v357_v31 = vadd.f32 %v1022_v1, %v286_v23  ;;  %v358_v32 = vadd.f32 %v1022_v1, %v287_v24  ;;  %v291_v33 = vmul.f32 %v1012_v0, %v220_v20  ;;  %740 = vst.msk [vmem:[%s1051_s26 + $0x9c] sm:$0xf] %vm700_vm0, %v937_v26  ;;  %v230_v24 = vld [vmem:[%s1017_s20 + $0x1c0] sm:$0xff]  ;;  %v232_v26 = vld [vmem:[%s1017_s20 + $0x1d0] sm:$0xff] }
  0x3f   : > { %v359_v34 = vadd.f32 %v1022_v1, %v288_v27  ;;  %v360_v35 = vadd.f32 %v1022_v1, %v289_v28  ;;  %v361_v36 = vadd.f32 %v1022_v1, %v290_v29  ;;  %v292_v37 = vmul.f32 %v1012_v0, %v221_v25  ;;  %v231_v25 = vld [vmem:[%s1017_s20 + $0x1c8] sm:$0xff] }
  0x40   : > { %v420_v38 = vmax.f32 %v356_v30, 0.0  ;;  %v421_v39 = vmax.f32 %v357_v31, 0.0  ;;  %v422_v40 = vmax.f32 %v358_v32, 0.0  ;;  %v362_v41 = vadd.f32 %v1022_v1, %v291_v33  ;;  %v233_v31 = vld [vmem:[%s1017_s20 + $0x1d8] sm:$0xff]  ;;  %v234_v32 = vld [vmem:[%s1017_s20 + $0x1e0] sm:$0xff]  ;;  %v235_v33 = vld [vmem:[%s1017_s20 + $0x1e8] sm:$0xff] }
  0x41   : > { %v423_v42 = vmax.f32 %v359_v34, 0.0  ;;  %v424_v43 = vmax.f32 %v360_v35, 0.0  ;;  %v425_v44 = vmax.f32 %v361_v36, 0.0  ;;  %v363_v45 = vadd.f32 %v1022_v1, %v292_v37 }
  0x42   : > { %v938_v49 = vpack.c.bf16 %v420_v38, %v420_v38  ;;  %v939_v50 = vpack.c.bf16 %v421_v39, %v421_v39  ;;  %v940_v51 = vpack.c.bf16 %v422_v40, %v422_v40  ;;  %v426_v52 = vmax.f32 %v362_v41, 0.0  ;;  %v236_v38 = vld [vmem:[%s1017_s20 + $0x1f0] sm:$0xff] }
  0x43   : > { %v941_v56 = vpack.c.bf16 %v423_v42, %v423_v42  ;;  %v942_v57 = vpack.c.bf16 %v424_v43, %v424_v43  ;;  %v943_v58 = vpack.c.bf16 %v425_v44, %v425_v44  ;;  %v427_v59 = vmax.f32 %v363_v45, 0.0  ;;  %v237_v43 = vld [vmem:[%s1017_s20 + $0x1f8] sm:$0xff] }
  0x44   : > { %741 = vst.msk [vmem:[%s1051_s26 + $0xa0] sm:$0xf] %vm700_vm0, %v938_v49  ;;  %742 = vst.msk [vmem:[%s1051_s26 + $0xa4] sm:$0xf] %vm700_vm0, %v939_v50  ;;  %v944_v61 = vpack.c.bf16 %v426_v52, %v426_v52  ;;  %v293_v62 = vmul.f32 %v1012_v0, %v222_v46  ;;  %v294_v63 = vmul.f32 %v1012_v0, %v223_v47 }
  0x45   : > { %743 = vst.msk [vmem:[%s1051_s26 + $0xa8] sm:$0xf] %vm700_vm0, %v940_v51  ;;  %v295_v2 = vmul.f32 %v1012_v0, %v224_v48  ;;  %744 = vst.msk [vmem:[%s1051_s26 + $0xac] sm:$0xf] %vm700_vm0, %v941_v56  ;;  %v945_v4 = vpack.c.bf16 %v427_v59, %v427_v59  ;;  %v296_v5 = vmul.f32 %v1012_v0, %v225_v53 }
  0x46   : > { %745 = vst.msk [vmem:[%s1051_s26 + $0xb0] sm:$0xf] %vm700_vm0, %v942_v57  ;;  %746 = vst.msk [vmem:[%s1051_s26 + $0xb4] sm:$0xf] %vm700_vm0, %v943_v58  ;;  %v297_v6 = vmul.f32 %v1012_v0, %v226_v54  ;;  %v298_v7 = vmul.f32 %v1012_v0, %v227_v55  ;;  %v364_v8 = vadd.f32 %v1022_v1, %v293_v62 }
  0x47   : > { %747 = vst.msk [vmem:[%s1051_s26 + $0xb8] sm:$0xf] %vm700_vm0, %v944_v61  ;;  %v365_v9 = vadd.f32 %v1022_v1, %v294_v63  ;;  %v366_v10 = vadd.f32 %v1022_v1, %v295_v2  ;;  %v299_v11 = vmul.f32 %v1012_v0, %v228_v60  ;;  %748 = vst.msk [vmem:[%s1051_s26 + $0xbc] sm:$0xf] %vm700_vm0, %v945_v4 }
  0x48   : > { %v367_v12 = vadd.f32 %v1022_v1, %v296_v5  ;;  %v368_v13 = vadd.f32 %v1022_v1, %v297_v6  ;;  %v369_v14 = vadd.f32 %v1022_v1, %v298_v7  ;;  %v300_v15 = vmul.f32 %v1012_v0, %v229_v3 }
  0x49   : > { %v428_v16 = vmax.f32 %v364_v8, 0.0  ;;  %v429_v17 = vmax.f32 %v365_v9, 0.0  ;;  %v430_v18 = vmax.f32 %v366_v10, 0.0  ;;  %v370_v19 = vadd.f32 %v1022_v1, %v299_v11 }
  0x4a   : > { %v431_v20 = vmax.f32 %v367_v12, 0.0  ;;  %v432_v21 = vmax.f32 %v368_v13, 0.0  ;;  %v433_v22 = vmax.f32 %v369_v14, 0.0  ;;  %v371_v23 = vadd.f32 %v1022_v1, %v300_v15 }
  0x4b   : > { %v946_v27 = vpack.c.bf16 %v428_v16, %v428_v16  ;;  %v947_v28 = vpack.c.bf16 %v429_v17, %v429_v17  ;;  %v948_v29 = vpack.c.bf16 %v430_v18, %v430_v18  ;;  %v434_v30 = vmax.f32 %v370_v19, 0.0 }
  0x4c   : > { %v949_v34 = vpack.c.bf16 %v431_v20, %v431_v20  ;;  %v950_v35 = vpack.c.bf16 %v432_v21, %v432_v21  ;;  %v951_v36 = vpack.c.bf16 %v433_v22, %v433_v22  ;;  %v435_v37 = vmax.f32 %v371_v23, 0.0 }
  0x4d   : > { %749 = vst.msk [vmem:[%s1051_s26 + $0xc0] sm:$0xf] %vm700_vm0, %v946_v27  ;;  %750 = vst.msk [vmem:[%s1051_s26 + $0xc4] sm:$0xf] %vm700_vm0, %v947_v28  ;;  %v952_v39 = vpack.c.bf16 %v434_v30, %v434_v30  ;;  %v301_v40 = vmul.f32 %v1012_v0, %v230_v24  ;;  %v302_v41 = vmul.f32 %v1012_v0, %v231_v25 }
  0x4e   : > { %751 = vst.msk [vmem:[%s1051_s26 + $0xc8] sm:$0xf] %vm700_vm0, %v948_v29  ;;  %v303_v42 = vmul.f32 %v1012_v0, %v232_v26  ;;  %752 = vst.msk [vmem:[%s1051_s26 + $0xcc] sm:$0xf] %vm700_vm0, %v949_v34  ;;  %v953_v44 = vpack.c.bf16 %v435_v37, %v435_v37  ;;  %v304_v45 = vmul.f32 %v1012_v0, %v233_v31 }
  0x4f   : > { %753 = vst.msk [vmem:[%s1051_s26 + $0xd0] sm:$0xf] %vm700_vm0, %v950_v35  ;;  %754 = vst.msk [vmem:[%s1051_s26 + $0xd4] sm:$0xf] %vm700_vm0, %v951_v36  ;;  %v305_v46 = vmul.f32 %v1012_v0, %v234_v32  ;;  %v306_v47 = vmul.f32 %v1012_v0, %v235_v33  ;;  %v372_v48 = vadd.f32 %v1022_v1, %v301_v40 }
  0x50   : > { %755 = vst.msk [vmem:[%s1051_s26 + $0xd8] sm:$0xf] %vm700_vm0, %v952_v39  ;;  %v373_v49 = vadd.f32 %v1022_v1, %v302_v41  ;;  %v374_v50 = vadd.f32 %v1022_v1, %v303_v42  ;;  %v307_v51 = vmul.f32 %v1012_v0, %v236_v38  ;;  %756 = vst.msk [vmem:[%s1051_s26 + $0xdc] sm:$0xf] %vm700_vm0, %v953_v44 }
  0x51   : > { %v375_v52 = vadd.f32 %v1022_v1, %v304_v45  ;;  %v376_v53 = vadd.f32 %v1022_v1, %v305_v46  ;;  %v377_v54 = vadd.f32 %v1022_v1, %v306_v47  ;;  %v308_v55 = vmul.f32 %v1012_v0, %v237_v43 }
  0x52   : > { %v436_v56 = vmax.f32 %v372_v48, 0.0  ;;  %v437_v57 = vmax.f32 %v373_v49, 0.0  ;;  %v438_v58 = vmax.f32 %v374_v50, 0.0  ;;  %v378_v59 = vadd.f32 %v1022_v1, %v307_v51 }
  0x53   : > { %v439_v60 = vmax.f32 %v375_v52, 0.0  ;;  %v440_v61 = vmax.f32 %v376_v53, 0.0  ;;  %v441_v62 = vmax.f32 %v377_v54, 0.0  ;;  %v379_v63 = vadd.f32 %v1022_v1, %v308_v55 }
  0x54   : > { %v954_v2 = vpack.c.bf16 %v436_v56, %v436_v56  ;;  %v955_v3 = vpack.c.bf16 %v437_v57, %v437_v57  ;;  %v956_v0 = vpack.c.bf16 %v438_v58, %v438_v58  ;;  %v442_v4 = vmax.f32 %v378_v59, 0.0 }
  0x55   : > { %v957_v5 = vpack.c.bf16 %v439_v60, %v439_v60  ;;  %v958_v6 = vpack.c.bf16 %v440_v61, %v440_v61  ;;  %v959_v7 = vpack.c.bf16 %v441_v62, %v441_v62  ;;  %v443_v8 = vmax.f32 %v379_v63, 0.0 }
  0x56   : > { %757 = vst.msk [vmem:[%s1051_s26 + $0xe0] sm:$0xf] %vm700_vm0, %v954_v2  ;;  %758 = vst.msk [vmem:[%s1051_s26 + $0xe4] sm:$0xf] %vm700_vm0, %v955_v3  ;;  %v960_v9 = vpack.c.bf16 %v442_v4, %v442_v4 }
  0x57   : > { %759 = vst.msk [vmem:[%s1051_s26 + $0xe8] sm:$0xf] %vm700_vm0, %v956_v0  ;;  %760 = vst.msk [vmem:[%s1051_s26 + $0xec] sm:$0xf] %vm700_vm0, %v957_v5  ;;  %v961_v1 = vpack.c.bf16 %v443_v8, %v443_v8 }
  0x58   : > { %761 = vst.msk [vmem:[%s1051_s26 + $0xf0] sm:$0xf] %vm700_vm0, %v958_v6  ;;  %762 = vst.msk [vmem:[%s1051_s26 + $0xf4] sm:$0xf] %vm700_vm0, %v959_v7 }
  0x59   : > { %763 = vst.msk [vmem:[%s1051_s26 + $0xf8] sm:$0xf] %vm700_vm0, %v960_v9  ;;  %764 = vst.msk [vmem:[%s1051_s26 + $0xfc] sm:$0xf] %vm700_vm0, %v961_v1 }
  0x5a PF: > { %s13_s12 = sadd.s32 1, %s976_s12  }
  0x5b   : > { %p10_p4 = scmp.ge.s32.totalorder %s13_s12, 6  }
  0x5d   :  { %12 = sbr.rel (!%p10_p4) target bundleno = 1 (0x1), region = 62 }

// kernel: allconv_forward.12
= control target key start
LH: loop header
LB: loop body
LE: loop exit
PB: predicated region body
PF: predicated region fallthrough
CT: control target
= control target key end

     0   :  { %v1475_v0 = vmov 0   ;;  %vm446_vm0 = vcmask 130048   ;;  %vm83_vm1 = vcmask 122880   ;;  %s2489_s1 = inlined_call_operand.vmem [shape: bf16[144,16], index: 1, kind: input, shape index: {}]   ;;  %s2490_s0 = inlined_call_operand.vmem [shape: bf16[512,144], index: 0, kind: input, shape index: {}]   ;;  %s2491_s2 = inlined_call_operand.vmem [shape: f32[512,16], index: 2, kind: output, shape index: {0}]   ;;  %s2492_s3 = inlined_call_operand.vmem [shape: f32[1,16], index: 3, kind: output, shape index: {1}]   ;;  %s2493_s4 = inlined_call_operand.vmem [shape: f32[1,16], index: 4, kind: output, shape index: {2}]  }
   0x1   :  { %543 = vmatprep.subr.bf16.mxu0 %v1475_v0  ;;  %v1370_v1 = vld [vmem:[%s2489_s1 + $0x38] sm:$0xff]   ;;  %1350 = vmatprep.subr.bf16.mxu1 %v1475_v0  ;;  %v1371_v2 = vld [vmem:[%s2489_s1 + $0x30] sm:$0xff]   ;;  %v1372_v3 = vld [vmem:[%s2489_s1 + $0x28] sm:$0xff]  }
   0x2   :  { %544 = vmatpush1.bf16.msra.mxu0 %v1370_v1  ;;  %1359 = vmatpush1.bf16.msra.mxu1 %v1370_v1  ;;  %v1373_v4 = vld [vmem:[%s2489_s1 + $0x20] sm:$0xff]   ;;  %v1374_v6 = vld [vmem:[%s2489_s1 + $0x18] sm:$0xff]   ;;  %v1375_v7 = vld [vmem:[%s2489_s1 + $0x10] sm:$0xff]  }
   0x3   :  { %545 = vmatprep.subr.bf16.mxu0 %v1475_v0  ;;  %1351 = vmatprep.subr.bf16.mxu1 %v1475_v0  ;;  %v1381_v5 = vld [vmem:[%s2490_s0 + $0x4] ss:$8 sps:$4 sm:$0xff]   ;;  %v1379_v12 = vld [vmem:[%s2490_s0] ss:$8 sps:$4 sm:$0xff]   ;;  %v1382_v13 = vld [vmem:[%s2490_s0 + $0x14] ss:$8 sps:$4 sm:$0xff]  }
   0x4   :  { %1318 = vmatprep.mubr.msk.bf16.mxu0 %vm446_vm0, %v1381_v5  ;;  %v1405_v8 = vld [vmem:[%s2490_s0 + $0x104] ss:$8 sps:$4 sm:$0xff]   ;;  %v1403_v14 = vld [vmem:[%s2490_s0 + $0x100] ss:$8 sps:$4 sm:$0xff]   ;;  %v1409_v15 = vld [vmem:[%s2490_s0 + $0x114] ss:$8 sps:$4 sm:$0xff]  }
   0x5   :  { %v1376_v9 = vld [vmem:[%s2489_s1 + $0x8] sm:$0xff]   ;;  %1334 = vmatprep.mubr.msk.bf16.mxu1 %vm446_vm0, %v1405_v8  ;;  %v1377_v10 = vld [vmem:[%s2489_s1] sm:$0xff]   ;;  %v1384_v16 = vld [vmem:[%s2490_s0 + $0x10] ss:$8 sps:$4 sm:$0xff]  }
   0x6   :  { %546 = vmatpush1.bf16.msra.mxu0 %v1371_v2  ;;  %1360 = vmatpush1.bf16.msra.mxu1 %v1371_v2  ;;  %v1378_v11 = vld [vmem:[%s2489_s1 + $0x40] sm:$0xff]   ;;  %v1411_v18 = vld [vmem:[%s2490_s0 + $0x110] ss:$8 sps:$4 sm:$0xff]   ;;  %v1388_v21 = vld [vmem:[%s2490_s0 + $0x34] ss:$8 sps:$4 sm:$0xff]  }
   0x7   :  { %547 = vmatprep.subr.bf16.mxu0 %v1475_v0  ;;  %1352 = vmatprep.subr.bf16.mxu1 %v1475_v0  ;;  %v1385_v17 = vld [vmem:[%s2490_s0 + $0x24] ss:$8 sps:$4 sm:$0xff]   ;;  %v1387_v20 = vld [vmem:[%s2490_s0 + $0x20] ss:$8 sps:$4 sm:$0xff]   ;;  %v1421_v23 = vld [vmem:[%s2490_s0 + $0x134] ss:$8 sps:$4 sm:$0xff]  }
   0x8   :  { %v1415_v19 = vld [vmem:[%s2490_s0 + $0x124] ss:$8 sps:$4 sm:$0xff]   ;;  %v1417_v22 = vld [vmem:[%s2490_s0 + $0x120] ss:$8 sps:$4 sm:$0xff]   ;;  %v1390_v24 = vld [vmem:[%s2490_s0 + $0x30] ss:$8 sps:$4 sm:$0xff]  }
   0x9   :  { %v1423_v25 = vld [vmem:[%s2490_s0 + $0x130] ss:$8 sps:$4 sm:$0xff]   ;;  %v1391_v26 = vld [vmem:[%s2490_s0 + $0x44] ss:$8 sps:$4 sm:$0xff]   ;;  %v1393_v28 = vld [vmem:[%s2490_s0 + $0x40] ss:$8 sps:$4 sm:$0xff]  }
   0xa   :  { %548 = vmatpush1.bf16.msra.mxu0 %v1372_v3  ;;  %1361 = vmatpush1.bf16.msra.mxu1 %v1372_v3  ;;  %v1427_v27 = vld [vmem:[%s2490_s0 + $0x144] ss:$8 sps:$4 sm:$0xff]   ;;  %v1429_v29 = vld [vmem:[%s2490_s0 + $0x140] ss:$8 sps:$4 sm:$0xff]   ;;  %v1394_v30 = vld [vmem:[%s2490_s0 + $0x54] ss:$8 sps:$4 sm:$0xff]  }
   0xb   :  { %549 = vmatprep.subr.bf16.mxu0 %v1475_v0  ;;  %1353 = vmatprep.subr.bf16.mxu1 %v1475_v0  ;;  %v1433_v31 = vld [vmem:[%s2490_s0 + $0x154] ss:$8 sps:$4 sm:$0xff]   ;;  %v1396_v32 = vld [vmem:[%s2490_s0 + $0x50] ss:$8 sps:$4 sm:$0xff]   ;;  %v1397_v34 = vld [vmem:[%s2490_s0 + $0x64] ss:$8 sps:$4 sm:$0xff]  }
   0xc   :  { %v1435_v33 = vld [vmem:[%s2490_s0 + $0x150] ss:$8 sps:$4 sm:$0xff]   ;;  %v1439_v35 = vld [vmem:[%s2490_s0 + $0x164] ss:$8 sps:$4 sm:$0xff]   ;;  %v1399_v36 = vld [vmem:[%s2490_s0 + $0x60] ss:$8 sps:$4 sm:$0xff]  }
   0xd   :  { %v1441_v37 = vld [vmem:[%s2490_s0 + $0x160] ss:$8 sps:$4 sm:$0xff]   ;;  %v1400_v38 = vld [vmem:[%s2490_s0 + $0x74] ss:$8 sps:$4 sm:$0xff]   ;;  %v1402_v40 = vld [vmem:[%s2490_s0 + $0x70] ss:$8 sps:$4 sm:$0xff]  }
   0xe   :  { %550 = vmatpush1.bf16.msra.mxu0 %v1373_v4  ;;  %1362 = vmatpush1.bf16.msra.mxu1 %v1373_v4  ;;  %v1445_v39 = vld [vmem:[%s2490_s0 + $0x174] ss:$8 sps:$4 sm:$0xff]   ;;  %v1447_v41 = vld [vmem:[%s2490_s0 + $0x170] ss:$8 sps:$4 sm:$0xff]   ;;  %v1406_v42 = vld [vmem:[%s2490_s0 + $0x84] ss:$8 sps:$4 sm:$0xff]  }
   0xf   :  { %551 = vmatprep.subr.bf16.mxu0 %v1475_v0  ;;  %1354 = vmatprep.subr.bf16.mxu1 %v1475_v0  ;;  %v1451_v43 = vld [vmem:[%s2490_s0 + $0x184] ss:$8 sps:$4 sm:$0xff]   ;;  %v1408_v44 = vld [vmem:[%s2490_s0 + $0x80] ss:$8 sps:$4 sm:$0xff]   ;;  %v1412_v46 = vld [vmem:[%s2490_s0 + $0x94] ss:$8 sps:$4 sm:$0xff]  }
  0x10   :  { %v1453_v45 = vld [vmem:[%s2490_s0 + $0x180] ss:$8 sps:$4 sm:$0xff]   ;;  %v1454_v47 = vld [vmem:[%s2490_s0 + $0x194] ss:$8 sps:$4 sm:$0xff]   ;;  %v1414_v48 = vld [vmem:[%s2490_s0 + $0x90] ss:$8 sps:$4 sm:$0xff]  }
  0x11   :  { %v1456_v49 = vld [vmem:[%s2490_s0 + $0x190] ss:$8 sps:$4 sm:$0xff]   ;;  %v1418_v50 = vld [vmem:[%s2490_s0 + $0xa4] ss:$8 sps:$4 sm:$0xff]   ;;  %v1420_v52 = vld [vmem:[%s2490_s0 + $0xa0] ss:$8 sps:$4 sm:$0xff]  }
  0x12   :  { %552 = vmatpush1.bf16.msra.mxu0 %v1374_v6  ;;  %1363 = vmatpush1.bf16.msra.mxu1 %v1374_v6  ;;  %v1457_v51 = vld [vmem:[%s2490_s0 + $0x1a4] ss:$8 sps:$4 sm:$0xff]   ;;  %v1459_v53 = vld [vmem:[%s2490_s0 + $0x1a0] ss:$8 sps:$4 sm:$0xff]   ;;  %v1424_v54 = vld [vmem:[%s2490_s0 + $0xb4] ss:$8 sps:$4 sm:$0xff]  }
  0x13   :  { %553 = vmatprep.subr.bf16.mxu0 %v1475_v0  ;;  %1355 = vmatprep.subr.bf16.mxu1 %v1475_v0  ;;  %v1460_v55 = vld [vmem:[%s2490_s0 + $0x1b4] ss:$8 sps:$4 sm:$0xff]   ;;  %v1426_v56 = vld [vmem:[%s2490_s0 + $0xb0] ss:$8 sps:$4 sm:$0xff]   ;;  %v1430_v58 = vld [vmem:[%s2490_s0 + $0xc4] ss:$8 sps:$4 sm:$0xff]  }
  0x14   :  { %v1462_v57 = vld [vmem:[%s2490_s0 + $0x1b0] ss:$8 sps:$4 sm:$0xff]   ;;  %v1463_v59 = vld [vmem:[%s2490_s0 + $0x1c4] ss:$8 sps:$4 sm:$0xff]   ;;  %v1432_v60 = vld [vmem:[%s2490_s0 + $0xc0] ss:$8 sps:$4 sm:$0xff]  }
  0x15   :  { %v1465_v61 = vld [vmem:[%s2490_s0 + $0x1c0] ss:$8 sps:$4 sm:$0xff]   ;;  %v1436_v62 = vld [vmem:[%s2490_s0 + $0xd4] ss:$8 sps:$4 sm:$0xff]   ;;  %v1468_v1 = vld [vmem:[%s2490_s0 + $0x1d0] ss:$8 sps:$4 sm:$0xff]  }
  0x16   :  { %554 = vmatpush1.bf16.msra.mxu0 %v1375_v7  ;;  %1364 = vmatpush1.bf16.msra.mxu1 %v1375_v7  ;;  %v1466_v63 = vld [vmem:[%s2490_s0 + $0x1d4] ss:$8 sps:$4 sm:$0xff]   ;;  %v1442_v2 = vld [vmem:[%s2490_s0 + $0xe4] ss:$8 sps:$4 sm:$0xff]   ;;  %v1444_v4 = vld [vmem:[%s2490_s0 + $0xe0] ss:$8 sps:$4 sm:$0xff]  }
  0x17   :  { %555 = vmatprep.subr.bf16.mxu0 %v1475_v0  ;;  %1356 = vmatprep.subr.bf16.mxu1 %v1475_v0  ;;  %v1469_v3 = vld [vmem:[%s2490_s0 + $0x1e4] ss:$8 sps:$4 sm:$0xff]   ;;  %v1471_v5 = vld [vmem:[%s2490_s0 + $0x1e0] ss:$8 sps:$4 sm:$0xff]   ;;  %v1448_v6 = vld [vmem:[%s2490_s0 + $0xf4] ss:$8 sps:$4 sm:$0xff]  }
  0x18   :  { %v1472_v7 = vld [vmem:[%s2490_s0 + $0x1f4] ss:$8 sps:$4 sm:$0xff]   ;;  %v1450_v8 = vld [vmem:[%s2490_s0 + $0xf0] ss:$8 sps:$4 sm:$0xff]  }
  0x1a   :  { %556 = vmatpush1.bf16.msra.mxu0 %v1376_v9  ;;  %1365 = vmatpush1.bf16.msra.mxu1 %v1376_v9  ;;  %v1474_v9 = vld [vmem:[%s2490_s0 + $0x1f0] ss:$8 sps:$4 sm:$0xff]  }
  0x1b   :  { %557 = vmatprep.subr.bf16.mxu0 %v1475_v0  ;;  %1357 = vmatprep.subr.bf16.mxu1 %v1475_v0 }
  0x1e   :  { %558 = vmatpush1.bf16.msra.mxu0 %v1377_v10  ;;  %1366 = vmatpush1.bf16.msra.mxu1 %v1377_v10 }
  0x1f   :  { %573 = vmatprep.subr.bf16.mxu0 %v1475_v0  ;;  %1358 = vmatprep.subr.bf16.mxu1 %v1475_v0  ;;  %v1438_v0 = vld [vmem:[%s2490_s0 + $0xd0] ss:$8 sps:$4 sm:$0xff]  }
  0x22   :  { %574 = vmatpush2.bf16.msra.mxu0 %v1378_v11  ;;  %1367 = vmatpush2.bf16.msra.mxu1 %v1378_v11 }
  0x25   :  { %576 = vmatmul.mubr.bf16.vlgmr.msra.gmra.mxu0 %v1379_v12  ;;  %704 = vmatmul.mubr.bf16.vlgmr.msra.gmra.mxu1 %v1403_v14 }
  0x26   :  { %1319 = vmatprep.mubr.msk.bf16.mxu0 %vm446_vm0, %v1382_v13  ;;  %1335 = vmatprep.mubr.msk.bf16.mxu1 %vm446_vm0, %v1409_v15 }
  0x2d   :  { %584 = vmatmul.mubr.bf16.gmra.mxu0 %v1384_v16  ;;  %712 = vmatmul.mubr.bf16.gmra.mxu1 %v1411_v18 }
  0x2e   :  { %1320 = vmatprep.mubr.msk.bf16.mxu0 %vm446_vm0, %v1385_v17  ;;  %1336 = vmatprep.mubr.msk.bf16.mxu1 %vm446_vm0, %v1415_v19 }
  0x35   :  { %592 = vmatmul.mubr.bf16.gmra.mxu0 %v1387_v20  ;;  %720 = vmatmul.mubr.bf16.gmra.mxu1 %v1417_v22 }
  0x36   :  { %1321 = vmatprep.mubr.msk.bf16.mxu0 %vm446_vm0, %v1388_v21  ;;  %1337 = vmatprep.mubr.msk.bf16.mxu1 %vm446_vm0, %v1421_v23 }
  0x3d   :  { %600 = vmatmul.mubr.bf16.gmra.mxu0 %v1390_v24  ;;  %728 = vmatmul.mubr.bf16.gmra.mxu1 %v1423_v25 }
  0x3e   :  { %1322 = vmatprep.mubr.msk.bf16.mxu0 %vm446_vm0, %v1391_v26  ;;  %1338 = vmatprep.mubr.msk.bf16.mxu1 %vm446_vm0, %v1427_v27 }
  0x45   :  { %608 = vmatmul.mubr.bf16.gmra.mxu0 %v1393_v28  ;;  %736 = vmatmul.mubr.bf16.gmra.mxu1 %v1429_v29 }
  0x46   :  { %1323 = vmatprep.mubr.msk.bf16.mxu0 %vm446_vm0, %v1394_v30  ;;  %1339 = vmatprep.mubr.msk.bf16.mxu1 %vm446_vm0, %v1433_v31 }
  0x4d   :  { %616 = vmatmul.mubr.bf16.gmra.mxu0 %v1396_v32  ;;  %744 = vmatmul.mubr.bf16.gmra.mxu1 %v1435_v33 }
  0x4e   :  { %1324 = vmatprep.mubr.msk.bf16.mxu0 %vm446_vm0, %v1397_v34  ;;  %1340 = vmatprep.mubr.msk.bf16.mxu1 %vm446_vm0, %v1439_v35 }
  0x55   :  { %624 = vmatmul.mubr.bf16.gmra.mxu0 %v1399_v36  ;;  %752 = vmatmul.mubr.bf16.gmra.mxu1 %v1441_v37 }
  0x56   :  { %1325 = vmatprep.mubr.msk.bf16.mxu0 %vm446_vm0, %v1400_v38  ;;  %1341 = vmatprep.mubr.msk.bf16.mxu1 %vm446_vm0, %v1445_v39 }
  0x5d   :  { %632 = vmatmul.mubr.bf16.gmra.mxu0 %v1402_v40  ;;  %760 = vmatmul.mubr.bf16.gmra.mxu1 %v1447_v41 }
  0x5e   :  { %1326 = vmatprep.mubr.msk.bf16.mxu0 %vm446_vm0, %v1406_v42  ;;  %1342 = vmatprep.mubr.msk.bf16.mxu1 %vm446_vm0, %v1451_v43 }
  0x65   :  { %640 = vmatmul.mubr.bf16.gmra.mxu0 %v1408_v44  ;;  %768 = vmatmul.mubr.bf16.gmra.mxu1 %v1453_v45 }
  0x66   :  { %1327 = vmatprep.mubr.msk.bf16.mxu0 %vm446_vm0, %v1412_v46  ;;  %1343 = vmatprep.mubr.msk.bf16.mxu1 %vm446_vm0, %v1454_v47 }
  0x6d   :  { %648 = vmatmul.mubr.bf16.gmra.mxu0 %v1414_v48  ;;  %776 = vmatmul.mubr.bf16.gmra.mxu1 %v1456_v49 }
  0x6e   :  { %1328 = vmatprep.mubr.msk.bf16.mxu0 %vm446_vm0, %v1418_v50  ;;  %1344 = vmatprep.mubr.msk.bf16.mxu1 %vm446_vm0, %v1457_v51 }
  0x75   :  { %656 = vmatmul.mubr.bf16.gmra.mxu0 %v1420_v52  ;;  %784 = vmatmul.mubr.bf16.gmra.mxu1 %v1459_v53 }
  0x76   :  { %1329 = vmatprep.mubr.msk.bf16.mxu0 %vm446_vm0, %v1424_v54  ;;  %1345 = vmatprep.mubr.msk.bf16.mxu1 %vm446_vm0, %v1460_v55 }
  0x7d   :  { %664 = vmatmul.mubr.bf16.gmra.mxu0 %v1426_v56  ;;  %792 = vmatmul.mubr.bf16.gmra.mxu1 %v1462_v57 }
  0x7e   :  { %1330 = vmatprep.mubr.msk.bf16.mxu0 %vm446_vm0, %v1430_v58  ;;  %1346 = vmatprep.mubr.msk.bf16.mxu1 %vm446_vm0, %v1463_v59 }
  0x85   :  { %672 = vmatmul.mubr.bf16.gmra.mxu0 %v1432_v60  ;;  %800 = vmatmul.mubr.bf16.gmra.mxu1 %v1465_v61 }
  0x86   :  { %1331 = vmatprep.mubr.msk.bf16.mxu0 %vm446_vm0, %v1436_v62  ;;  %1347 = vmatprep.mubr.msk.bf16.mxu1 %vm446_vm0, %v1466_v63 }
  0x8d   :  { %680 = vmatmul.mubr.bf16.gmra.mxu0 %v1438_v0  ;;  %808 = vmatmul.mubr.bf16.gmra.mxu1 %v1468_v1 }
  0x8e   :  { %1332 = vmatprep.mubr.msk.bf16.mxu0 %vm446_vm0, %v1442_v2  ;;  %1348 = vmatprep.mubr.msk.bf16.mxu1 %vm446_vm0, %v1469_v3 }
  0x95   :  { %688 = vmatmul.mubr.bf16.gmra.mxu0 %v1444_v4  ;;  %816 = vmatmul.mubr.bf16.gmra.mxu1 %v1471_v5 }
  0x96   :  { %1333 = vmatprep.mubr.msk.bf16.mxu0 %vm446_vm0, %v1448_v6  ;;  %1349 = vmatprep.mubr.msk.bf16.mxu1 %vm446_vm0, %v1472_v7 }
  0x9d   :  { %696 = vmatmul.mubr.bf16.gmra.mxu0 %v1450_v8  ;;  %824 = vmatmul.mubr.bf16.gmra.mxu1 %v1474_v9 }
  0xe5   :  { %v1753_v10 = vpop.f32.mrf.mxu0  ;;  %v1755_v11 = vpop.f32.mrf.mxu1 }
  0xe6   :  { %832 = vst.msk [vmem:[%s2491_s2] sm:$0xff] %vm446_vm0, %v1753_v10  ;;  %864 = vst.msk [vmem:[%s2491_s2 + $0x100] sm:$0xff] %vm446_vm0, %v1755_v11 }
  0xe7   :  { %v579_v12 = vpop.f32.mrf.mxu0  ;;  %v707_v13 = vpop.f32.mrf.mxu1 }
  0xe8   :  { %v1034_v13 = vmul.f32 %v1753_v10, %v1753_v10 }
  0xe9   :  { %v1767_v14 = vpop.f32.mrf.mxu0  ;;  %v1769_v15 = vpop.f32.mrf.mxu1 }
  0xea   :  { %833 = vst.msk [vmem:[%s2491_s2 + $0x8] sm:$0xff] %vm446_vm0, %v1767_v14  ;;  %865 = vst.msk [vmem:[%s2491_s2 + $0x108] sm:$0xff] %vm446_vm0, %v1769_v15  ;;  %v1035_v8 = vmul.f32 %v1767_v14, %v1767_v14 }
  0xeb   :  { %v582_v16 = vpop.f32.mrf.mxu0  ;;  %v710_v17 = vpop.f32.mrf.mxu1 }
  0xec   :  { %v898_v16 = vsel %vm446_vm0, %v1767_v14, 0.0  ;;  %v897_v14 = vsel %vm446_vm0, %v1753_v10, 0.0 }
  0xed   :  { %v1781_v18 = vpop.f32.mrf.mxu0  ;;  %v1783_v19 = vpop.f32.mrf.mxu1  ;;  %v899_v10 = vadd.f32 %v898_v16, %v897_v14 }
  0xee   :  { %834 = vst.msk [vmem:[%s2491_s2 + $0x10] sm:$0xff] %vm446_vm0, %v1781_v18  ;;  %866 = vst.msk [vmem:[%s2491_s2 + $0x110] sm:$0xff] %vm446_vm0, %v1783_v19  ;;  %v1036_v17 = vmul.f32 %v1781_v18, %v1781_v18 }
  0xef   :  { %v587_v20 = vpop.f32.mrf.mxu0  ;;  %v715_v21 = vpop.f32.mrf.mxu1 }
  0xf0   :  { %v1476_v20 = vmov 0.0  }
  0xf1   :  { %v1795_v22 = vpop.f32.mrf.mxu0  ;;  %v1797_v23 = vpop.f32.mrf.mxu1  ;;  %84 = vst.msk [vmem:[%s2492_s3] sm:$0x1] %vm83_vm1, %v1476_v20  ;;  %85 = vst.msk [vmem:[%s2493_s4] sm:$0x1] %vm83_vm1, %v1476_v20 }
  0xf2   :  { %835 = vst.msk [vmem:[%s2491_s2 + $0x18] sm:$0xff] %vm446_vm0, %v1795_v22  ;;  %867 = vst.msk [vmem:[%s2491_s2 + $0x118] sm:$0xff] %vm446_vm0, %v1797_v23 }
  0xf3   :  { %v590_v24 = vpop.f32.mrf.mxu0  ;;  %v718_v25 = vpop.f32.mrf.mxu1 }
  0xf4   :  { %v1099_v25 = vsel %vm446_vm0, %v1035_v8, 0.0 }
  0xf5   :  { %v1809_v26 = vpop.f32.mrf.mxu0  ;;  %v1811_v27 = vpop.f32.mrf.mxu1 }
  0xf6   :  { %836 = vst.msk [vmem:[%s2491_s2 + $0x20] sm:$0xff] %vm446_vm0, %v1809_v26  ;;  %868 = vst.msk [vmem:[%s2491_s2 + $0x120] sm:$0xff] %vm446_vm0, %v1811_v27 }
  0xf7   :  { %v595_v28 = vpop.f32.mrf.mxu0  ;;  %v723_v29 = vpop.f32.mrf.mxu1 }
  0xf8   :  { %v900_v28 = vsel %vm446_vm0, %v1781_v18, 0.0  ;;  %v1037_v29 = vmul.f32 %v1795_v22, %v1795_v22  ;;  %v1098_v18 = vsel %vm446_vm0, %v1034_v13, 0.0 }
  0xf9   :  { %v1823_v30 = vpop.f32.mrf.mxu0  ;;  %v1825_v31 = vpop.f32.mrf.mxu1 }
  0xfa   :  { %837 = vst.msk [vmem:[%s2491_s2 + $0x28] sm:$0xff] %vm446_vm0, %v1823_v30  ;;  %869 = vst.msk [vmem:[%s2491_s2 + $0x128] sm:$0xff] %vm446_vm0, %v1825_v31 }
  0xfb   :  { %v598_v32 = vpop.f32.mrf.mxu0  ;;  %v726_v33 = vpop.f32.mrf.mxu1 }
  0xfd   :  { %v1837_v34 = vpop.f32.mrf.mxu0  ;;  %v1839_v35 = vpop.f32.mrf.mxu1 }
  0xfe   :  { %838 = vst.msk [vmem:[%s2491_s2 + $0x30] sm:$0xff] %vm446_vm0, %v1837_v34  ;;  %870 = vst.msk [vmem:[%s2491_s2 + $0x130] sm:$0xff] %vm446_vm0, %v1839_v35 }
  0xff   :  { %v603_v36 = vpop.f32.mrf.mxu0  ;;  %v731_v37 = vpop.f32.mrf.mxu1 }
 0x100   :  { %v1101_v36 = vsel %vm446_vm0, %v1036_v17, 0.0  ;;  %v902_v37 = vsel %vm446_vm0, %v1795_v22, 0.0 }
 0x101   :  { %v1851_v38 = vpop.f32.mrf.mxu0  ;;  %v1853_v39 = vpop.f32.mrf.mxu1 }
 0x102   :  { %839 = vst.msk [vmem:[%s2491_s2 + $0x38] sm:$0xff] %vm446_vm0, %v1851_v38  ;;  %871 = vst.msk [vmem:[%s2491_s2 + $0x138] sm:$0xff] %vm446_vm0, %v1853_v39  ;;  %v1041_v13 = vmul.f32 %v1851_v38, %v1851_v38  ;;  %v910_v14 = vsel %vm446_vm0, %v1851_v38, 0.0 }
 0x103   :  { %v606_v40 = vpop.f32.mrf.mxu0  ;;  %v734_v41 = vpop.f32.mrf.mxu1 }
 0x104   :  { %v1038_v40 = vmul.f32 %v1809_v26, %v1809_v26  ;;  %v1100_v41 = vadd.f32 %v1099_v25, %v1098_v18 }
 0x105   :  { %v1865_v42 = vpop.f32.mrf.mxu0  ;;  %v1867_v43 = vpop.f32.mrf.mxu1 }
 0x106   :  { %840 = vst.msk [vmem:[%s2491_s2 + $0x40] sm:$0xff] %vm446_vm0, %v1865_v42  ;;  %872 = vst.msk [vmem:[%s2491_s2 + $0x140] sm:$0xff] %vm446_vm0, %v1867_v43  ;;  %v1102_v22 = vadd.f32 %v1101_v36, %v1100_v41  ;;  %v1042_v25 = vmul.f32 %v1865_v42, %v1865_v42  ;;  %v912_v18 = vsel %vm446_vm0, %v1865_v42, 0.0 }
 0x107   :  { %v611_v44 = vpop.f32.mrf.mxu0  ;;  %v739_v45 = vpop.f32.mrf.mxu1 }
 0x108   :  { %v901_v44 = vadd.f32 %v900_v28, %v899_v10  ;;  %v1113_v42 = vsel %vm446_vm0, %v1042_v25, 0.0 }
 0x109   :  { %v1879_v46 = vpop.f32.mrf.mxu0  ;;  %v1881_v47 = vpop.f32.mrf.mxu1 }
 0x10a   :  { %841 = vst.msk [vmem:[%s2491_s2 + $0x48] sm:$0xff] %vm446_vm0, %v1879_v46  ;;  %873 = vst.msk [vmem:[%s2491_s2 + $0x148] sm:$0xff] %vm446_vm0, %v1881_v47  ;;  %v1043_v36 = vmul.f32 %v1879_v46, %v1879_v46 }
 0x10b   :  { %v614_v48 = vpop.f32.mrf.mxu0  ;;  %v742_v49 = vpop.f32.mrf.mxu1 }
 0x10c   :  { %v1103_v49 = vsel %vm446_vm0, %v1037_v29, 0.0 }
 0x10d   :  { %v1893_v50 = vpop.f32.mrf.mxu0  ;;  %v1895_v51 = vpop.f32.mrf.mxu1 }
 0x10e   :  { %842 = vst.msk [vmem:[%s2491_s2 + $0x50] sm:$0xff] %vm446_vm0, %v1893_v50  ;;  %874 = vst.msk [vmem:[%s2491_s2 + $0x150] sm:$0xff] %vm446_vm0, %v1895_v51 }
 0x10f   :  { %v619_v52 = vpop.f32.mrf.mxu0  ;;  %v747_v53 = vpop.f32.mrf.mxu1 }
 0x110   :  { %v904_v52 = vsel %vm446_vm0, %v1809_v26, 0.0  ;;  %v1039_v53 = vmul.f32 %v1823_v30, %v1823_v30  ;;  %v1105_v26 = vsel %vm446_vm0, %v1038_v40, 0.0 }
 0x111   :  { %v1907_v54 = vpop.f32.mrf.mxu0  ;;  %v1909_v55 = vpop.f32.mrf.mxu1 }
 0x112   :  { %843 = vst.msk [vmem:[%s2491_s2 + $0x58] sm:$0xff] %vm446_vm0, %v1907_v54  ;;  %875 = vst.msk [vmem:[%s2491_s2 + $0x158] sm:$0xff] %vm446_vm0, %v1909_v55 }
 0x113   :  { %v622_v56 = vpop.f32.mrf.mxu0  ;;  %v750_v57 = vpop.f32.mrf.mxu1 }
 0x114   :  { %v903_v56 = vadd.f32 %v902_v37, %v901_v44  ;;  %v914_v44 = vsel %vm446_vm0, %v1879_v46, 0.0 }
 0x115   :  { %v1921_v58 = vpop.f32.mrf.mxu0  ;;  %v1923_v59 = vpop.f32.mrf.mxu1 }
 0x116   :  { %844 = vst.msk [vmem:[%s2491_s2 + $0x60] sm:$0xff] %vm446_vm0, %v1921_v58  ;;  %876 = vst.msk [vmem:[%s2491_s2 + $0x160] sm:$0xff] %vm446_vm0, %v1923_v59 }
 0x117   :  { %v627_v60 = vpop.f32.mrf.mxu0  ;;  %v755_v61 = vpop.f32.mrf.mxu1 }
 0x118   :  { %v906_v61 = vsel %vm446_vm0, %v1823_v30, 0.0 }
 0x119   :  { %v1935_v62 = vpop.f32.mrf.mxu0  ;;  %v1937_v63 = vpop.f32.mrf.mxu1 }
 0x11a   :  { %845 = vst.msk [vmem:[%s2491_s2 + $0x68] sm:$0xff] %vm446_vm0, %v1935_v62  ;;  %877 = vst.msk [vmem:[%s2491_s2 + $0x168] sm:$0xff] %vm446_vm0, %v1937_v63 }
 0x11b   :  { %v630_v0 = vpop.f32.mrf.mxu0  ;;  %v758_v1 = vpop.f32.mrf.mxu1 }
 0x11c   :  { %v1040_v0 = vmul.f32 %v1837_v34, %v1837_v34  ;;  %v1104_v1 = vadd.f32 %v1103_v49, %v1102_v22  ;;  %v1044_v49 = vmul.f32 %v1893_v50, %v1893_v50 }
 0x11d   :  { %v1949_v2 = vpop.f32.mrf.mxu0  ;;  %v1951_v3 = vpop.f32.mrf.mxu1 }
 0x11e   :  { %846 = vst.msk [vmem:[%s2491_s2 + $0x70] sm:$0xff] %vm446_vm0, %v1949_v2  ;;  %878 = vst.msk [vmem:[%s2491_s2 + $0x170] sm:$0xff] %vm446_vm0, %v1951_v3  ;;  %v1106_v30 = vadd.f32 %v1105_v26, %v1104_v1  ;;  %v1045_v26 = vmul.f32 %v1907_v54, %v1907_v54 }
 0x11f   :  { %v635_v4 = vpop.f32.mrf.mxu0  ;;  %v763_v5 = vpop.f32.mrf.mxu1 }
 0x120   :  { %v905_v4 = vadd.f32 %v904_v52, %v903_v56 }
 0x121   :  { %v1963_v6 = vpop.f32.mrf.mxu0  ;;  %v1965_v7 = vpop.f32.mrf.mxu1 }
 0x122   :  { %847 = vst.msk [vmem:[%s2491_s2 + $0x78] sm:$0xff] %vm446_vm0, %v1963_v6  ;;  %879 = vst.msk [vmem:[%s2491_s2 + $0x178] sm:$0xff] %vm446_vm0, %v1965_v7  ;;  %v907_v16 = vadd.f32 %v906_v61, %v905_v4  ;;  %v918_v4 = vsel %vm446_vm0, %v1907_v54, 0.0 }
 0x123   :  { %v638_v9 = vpop.f32.mrf.mxu0  ;;  %v766_v12 = vpop.f32.mrf.mxu1 }
 0x124   :  { %v1107_v9 = vsel %vm446_vm0, %v1039_v53, 0.0  ;;  %v908_v12 = vsel %vm446_vm0, %v1837_v34, 0.0  ;;  %v1109_v34 = vsel %vm446_vm0, %v1040_v0, 0.0 }
 0x125   :  { %v1993_v21 = vpop.f32.mrf.mxu0  ;;  %v1995_v24 = vpop.f32.mrf.mxu1  ;;  %v1108_v28 = vadd.f32 %v1107_v9, %v1106_v30  ;;  %v909_v29 = vadd.f32 %v908_v12, %v907_v16  ;;  %v1046_v9 = vmul.f32 %v1921_v58, %v1921_v58 }
 0x126   :  { %848 = vst.msk [vmem:[%s2491_s2 + $0x80] sm:$0xff] %vm446_vm0, %v1993_v21  ;;  %880 = vst.msk [vmem:[%s2491_s2 + $0x180] sm:$0xff] %vm446_vm0, %v1995_v24 }
 0x127   :  { %v643_v32 = vpop.f32.mrf.mxu0  ;;  %v771_v33 = vpop.f32.mrf.mxu1  ;;  %v1110_v38 = vadd.f32 %v1109_v34, %v1108_v28  ;;  %v911_v37 = vadd.f32 %v910_v14, %v909_v29  ;;  %v1047_v34 = vmul.f32 %v1935_v62, %v1935_v62  ;;  %v922_v29 = vsel %vm446_vm0, %v1935_v62, 0.0 }
 0x128   :  { %v1111_v33 = vsel %vm446_vm0, %v1041_v13, 0.0 }
 0x129   :  { %v2020_v45 = vpop.f32.mrf.mxu0  ;;  %v2022_v48 = vpop.f32.mrf.mxu1  ;;  %v1112_v52 = vadd.f32 %v1111_v33, %v1110_v38  ;;  %v913_v53 = vadd.f32 %v912_v18, %v911_v37  ;;  %v1048_v33 = vmul.f32 %v1949_v2, %v1949_v2 }
 0x12a   :  { %849 = vst.msk [vmem:[%s2491_s2 + $0x88] sm:$0xff] %vm446_vm0, %v2020_v45  ;;  %881 = vst.msk [vmem:[%s2491_s2 + $0x188] sm:$0xff] %vm446_vm0, %v2022_v48 }
 0x12b   :  { %v646_v57 = vpop.f32.mrf.mxu0  ;;  %v774_v60 = vpop.f32.mrf.mxu1  ;;  %v1114_v46 = vadd.f32 %v1113_v42, %v1112_v52  ;;  %v915_v61 = vadd.f32 %v914_v44, %v913_v53  ;;  %v1049_v42 = vmul.f32 %v1963_v6, %v1963_v6  ;;  %v926_v53 = vsel %vm446_vm0, %v1963_v6, 0.0 }
 0x12c   :  { %v1115_v57 = vsel %vm446_vm0, %v1043_v36, 0.0  ;;  %v916_v60 = vsel %vm446_vm0, %v1893_v50, 0.0  ;;  %v1117_v50 = vsel %vm446_vm0, %v1044_v49, 0.0 }
 0x12d   :  { %v2044_v5 = vpop.f32.mrf.mxu0  ;;  %v2046_v8 = vpop.f32.mrf.mxu1  ;;  %v1116_v12 = vadd.f32 %v1115_v57, %v1114_v46  ;;  %v917_v13 = vadd.f32 %v916_v60, %v915_v61  ;;  %v1050_v57 = vmul.f32 %v1993_v21, %v1993_v21 }
 0x12e   :  { %850 = vst.msk [vmem:[%s2491_s2 + $0x90] sm:$0xff] %vm446_vm0, %v2044_v5  ;;  %882 = vst.msk [vmem:[%s2491_s2 + $0x190] sm:$0xff] %vm446_vm0, %v2046_v8 }
 0x12f   :  { %v651_v17 = vpop.f32.mrf.mxu0  ;;  %v779_v20 = vpop.f32.mrf.mxu1  ;;  %v1118_v54 = vadd.f32 %v1117_v50, %v1116_v12  ;;  %v919_v14 = vadd.f32 %v918_v4, %v917_v13  ;;  %v1051_v50 = vmul.f32 %v2020_v45, %v2020_v45  ;;  %v930_v13 = vsel %vm446_vm0, %v2020_v45, 0.0 }
 0x130   :  { %v1119_v17 = vsel %vm446_vm0, %v1045_v26, 0.0  ;;  %v920_v20 = vsel %vm446_vm0, %v1921_v58, 0.0  ;;  %v1121_v58 = vsel %vm446_vm0, %v1046_v9, 0.0 }
 0x131   :  { %v2068_v10 = vpop.f32.mrf.mxu0  ;;  %v2070_v32 = vpop.f32.mrf.mxu1  ;;  %v1120_v18 = vadd.f32 %v1119_v17, %v1118_v54  ;;  %v921_v36 = vadd.f32 %v920_v20, %v919_v14  ;;  %v1052_v17 = vmul.f32 %v2044_v5, %v2044_v5 }
 0x132   :  { %851 = vst.msk [vmem:[%s2491_s2 + $0x98] sm:$0xff] %vm446_vm0, %v2068_v10  ;;  %883 = vst.msk [vmem:[%s2491_s2 + $0x198] sm:$0xff] %vm446_vm0, %v2070_v32 }
 0x133   :  { %v654_v40 = vpop.f32.mrf.mxu0  ;;  %v782_v41 = vpop.f32.mrf.mxu1  ;;  %v1122_v62 = vadd.f32 %v1121_v58, %v1120_v18  ;;  %v923_v44 = vadd.f32 %v922_v29, %v921_v36  ;;  %v1053_v58 = vmul.f32 %v2068_v10, %v2068_v10  ;;  %v934_v36 = vsel %vm446_vm0, %v2068_v10, 0.0 }
 0x134   :  { %v1123_v40 = vsel %vm446_vm0, %v1047_v34, 0.0  ;;  %v924_v41 = vsel %vm446_vm0, %v1949_v2, 0.0  ;;  %v1125_v2 = vsel %vm446_vm0, %v1048_v33, 0.0 }
 0x135   :  { %v2092_v22 = vpop.f32.mrf.mxu0  ;;  %v2094_v56 = vpop.f32.mrf.mxu1  ;;  %v1124_v60 = vadd.f32 %v1123_v40, %v1122_v62  ;;  %v925_v26 = vadd.f32 %v924_v41, %v923_v44 }
 0x136   :  { %852 = vst.msk [vmem:[%s2491_s2 + $0xa0] sm:$0xff] %vm446_vm0, %v2092_v22  ;;  %884 = vst.msk [vmem:[%s2491_s2 + $0x1a0] sm:$0xff] %vm446_vm0, %v2094_v56  ;;  %v1054_v40 = vmul.f32 %v2092_v22, %v2092_v22 }
 0x137   :  { %v659_v0 = vpop.f32.mrf.mxu0  ;;  %v787_v1 = vpop.f32.mrf.mxu1  ;;  %v1126_v6 = vadd.f32 %v1125_v2, %v1124_v60  ;;  %v927_v4 = vadd.f32 %v926_v53, %v925_v26 }
 0x138   :  { %v1127_v0 = vsel %vm446_vm0, %v1049_v42, 0.0  ;;  %v928_v1 = vsel %vm446_vm0, %v1993_v21, 0.0  ;;  %v1129_v21 = vsel %vm446_vm0, %v1050_v57, 0.0 }
 0x139   :  { %v2116_v30 = vpop.f32.mrf.mxu0  ;;  %v2118_v16 = vpop.f32.mrf.mxu1  ;;  %v1128_v20 = vadd.f32 %v1127_v0, %v1126_v6  ;;  %v929_v34 = vadd.f32 %v928_v1, %v927_v4 }
 0x13a   :  { %853 = vst.msk [vmem:[%s2491_s2 + $0xa8] sm:$0xff] %vm446_vm0, %v2116_v30  ;;  %885 = vst.msk [vmem:[%s2491_s2 + $0x1a8] sm:$0xff] %vm446_vm0, %v2118_v16  ;;  %v1055_v2 = vmul.f32 %v2116_v30, %v2116_v30  ;;  %v938_v26 = vsel %vm446_vm0, %v2116_v30, 0.0 }
 0x13b   :  { %v662_v25 = vpop.f32.mrf.mxu0  ;;  %v790_v28 = vpop.f32.mrf.mxu1  ;;  %v1130_v45 = vadd.f32 %v1129_v21, %v1128_v20  ;;  %v931_v29 = vadd.f32 %v930_v13, %v929_v34 }
 0x13c   :  { %v1131_v25 = vsel %vm446_vm0, %v1051_v50, 0.0  ;;  %v932_v28 = vsel %vm446_vm0, %v2044_v5, 0.0  ;;  %v1133_v5 = vsel %vm446_vm0, %v1052_v17, 0.0 }
 0x13d   :  { %v2140_v38 = vpop.f32.mrf.mxu0  ;;  %v2142_v37 = vpop.f32.mrf.mxu1  ;;  %v1132_v41 = vadd.f32 %v1131_v25, %v1130_v45  ;;  %v933_v42 = vadd.f32 %v932_v28, %v931_v29 }
 0x13e   :  { %854 = vst.msk [vmem:[%s2491_s2 + $0xb0] sm:$0xff] %vm446_vm0, %v2140_v38  ;;  %886 = vst.msk [vmem:[%s2491_s2 + $0x1b0] sm:$0xff] %vm446_vm0, %v2142_v37  ;;  %v1056_v0 = vmul.f32 %v2140_v38, %v2140_v38 }
 0x13f   :  { %v667_v49 = vpop.f32.mrf.mxu0  ;;  %v795_v52 = vpop.f32.mrf.mxu1  ;;  %v1134_v10 = vadd.f32 %v1133_v5, %v1132_v41  ;;  %v935_v53 = vadd.f32 %v934_v36, %v933_v42 }
 0x140   :  { %v1135_v49 = vsel %vm446_vm0, %v1053_v58, 0.0  ;;  %v936_v52 = vsel %vm446_vm0, %v2092_v22, 0.0  ;;  %v1137_v22 = vsel %vm446_vm0, %v1054_v40, 0.0  ;;  %v1141_v34 = vsel %vm446_vm0, %v1056_v0, 0.0 }
 0x141   :  { %v668_v46 = vpop.f32.mrf.mxu0  ;;  %v2164_v61 = vpop.f32.mrf.mxu1  ;;  %v1136_v1 = vadd.f32 %v1135_v49, %v1134_v10  ;;  %v937_v50 = vadd.f32 %v936_v52, %v935_v53 }
 0x142   :  { %855 = vst.msk [vmem:[%s2491_s2 + $0xb8] sm:$0xff] %vm446_vm0, %v668_v46  ;;  %887 = vst.msk [vmem:[%s2491_s2 + $0x1b8] sm:$0xff] %vm446_vm0, %v2164_v61  ;;  %v1057_v21 = vmul.f32 %v668_v46, %v668_v46 }
 0x143   :  { %v670_v9 = vpop.f32.mrf.mxu0  ;;  %v798_v12 = vpop.f32.mrf.mxu1  ;;  %v1138_v30 = vadd.f32 %v1137_v22, %v1136_v1  ;;  %v939_v13 = vadd.f32 %v938_v26, %v937_v50 }
 0x144   :  { %v1139_v9 = vsel %vm446_vm0, %v1055_v2, 0.0  ;;  %v940_v12 = vsel %vm446_vm0, %v2140_v38, 0.0  ;;  %v942_v38 = vsel %vm446_vm0, %v668_v46, 0.0 }
 0x145   :  { %v673_v54 = vpop.f32.mrf.mxu0  ;;  %v2185_v14 = vpop.f32.mrf.mxu1  ;;  %v1140_v28 = vadd.f32 %v1139_v9, %v1138_v30  ;;  %v941_v58 = vadd.f32 %v940_v12, %v939_v13 }
 0x146   :  { %856 = vst.msk [vmem:[%s2491_s2 + $0xc0] sm:$0xff] %vm446_vm0, %v673_v54  ;;  %888 = vst.msk [vmem:[%s2491_s2 + $0x1c0] sm:$0xff] %vm446_vm0, %v2185_v14  ;;  %v1058_v25 = vmul.f32 %v673_v54, %v673_v54 }
 0x147   :  { %v675_v33 = vpop.f32.mrf.mxu0  ;;  %v803_v18 = vpop.f32.mrf.mxu1  ;;  %v1142_v46 = vadd.f32 %v1141_v34, %v1140_v28  ;;  %v943_v36 = vadd.f32 %v942_v38, %v941_v58 }
 0x148   :  { %v1143_v33 = vsel %vm446_vm0, %v1057_v21, 0.0  ;;  %v944_v18 = vsel %vm446_vm0, %v673_v54, 0.0  ;;  %v1145_v42 = vsel %vm446_vm0, %v1058_v25, 0.0 }
 0x149   :  { %v676_v62 = vpop.f32.mrf.mxu0  ;;  %v2206_v44 = vpop.f32.mrf.mxu1  ;;  %v1144_v52 = vadd.f32 %v1143_v33, %v1142_v46  ;;  %v945_v2 = vadd.f32 %v944_v18, %v943_v36 }
 0x14a   :  { %857 = vst.msk [vmem:[%s2491_s2 + $0xc8] sm:$0xff] %vm446_vm0, %v676_v62  ;;  %889 = vst.msk [vmem:[%s2491_s2 + $0x1c8] sm:$0xff] %vm446_vm0, %v2206_v44  ;;  %v1059_v5 = vmul.f32 %v676_v62, %v676_v62  ;;  %v946_v54 = vsel %vm446_vm0, %v676_v62, 0.0 }
 0x14b   :  { %v678_v57 = vpop.f32.mrf.mxu0  ;;  %v806_v60 = vpop.f32.mrf.mxu1  ;;  %v1146_v62 = vadd.f32 %v1145_v42, %v1144_v52  ;;  %v947_v26 = vadd.f32 %v946_v54, %v945_v2 }
 0x14c   :  { %v1147_v57 = vsel %vm446_vm0, %v1059_v5, 0.0 }
 0x14d   :  { %v681_v6 = vpop.f32.mrf.mxu0  ;;  %v2227_v4 = vpop.f32.mrf.mxu1  ;;  %v1148_v12 = vadd.f32 %v1147_v57, %v1146_v62 }
 0x14e   :  { %858 = vst.msk [vmem:[%s2491_s2 + $0xd0] sm:$0xff] %vm446_vm0, %v681_v6  ;;  %890 = vst.msk [vmem:[%s2491_s2 + $0x1d0] sm:$0xff] %vm446_vm0, %v2227_v4  ;;  %v1060_v49 = vmul.f32 %v681_v6, %v681_v6  ;;  %v948_v60 = vsel %vm446_vm0, %v681_v6, 0.0 }
 0x14f   :  { %v683_v17 = vpop.f32.mrf.mxu0  ;;  %v811_v20 = vpop.f32.mrf.mxu1  ;;  %v949_v21 = vadd.f32 %v948_v60, %v947_v26  ;;  %v1066_v26 = vmul.f32 %v1755_v11, %v1755_v11 }
 0x150   :  { %v1149_v50 = vsel %vm446_vm0, %v1060_v49, 0.0 }
 0x151   :  { %v684_v45 = vpop.f32.mrf.mxu0  ;;  %v2243_v29 = vpop.f32.mrf.mxu1  ;;  %v1150_v38 = vadd.f32 %v1149_v50, %v1148_v12 }
 0x152   :  { %859 = vst.msk [vmem:[%s2491_s2 + $0xd8] sm:$0xff] %vm446_vm0, %v684_v45  ;;  %891 = vst.msk [vmem:[%s2491_s2 + $0x1d8] sm:$0xff] %vm446_vm0, %v2243_v29  ;;  %v1061_v22 = vmul.f32 %v684_v45, %v684_v45  ;;  %v950_v6 = vsel %vm446_vm0, %v684_v45, 0.0 }
 0x153   :  { %v686_v40 = vpop.f32.mrf.mxu0  ;;  %v814_v41 = vpop.f32.mrf.mxu1  ;;  %v951_v25 = vadd.f32 %v950_v6, %v949_v21  ;;  %v960_v21 = vsel %vm446_vm0, %v1755_v11, 0.0  ;;  %v964_v11 = vsel %vm446_vm0, %v1783_v19, 0.0 }
 0x154   :  { %v1151_v17 = vsel %vm446_vm0, %v1061_v22, 0.0 }
 0x155   :  { %v689_v10 = vpop.f32.mrf.mxu0  ;;  %v2258_v53 = vpop.f32.mrf.mxu1  ;;  %v1152_v18 = vadd.f32 %v1151_v17, %v1150_v38  ;;  %v1161_v38 = vsel %vm446_vm0, %v1066_v26, 0.0 }
 0x156   :  { %860 = vst.msk [vmem:[%s2491_s2 + $0xe0] sm:$0xff] %vm446_vm0, %v689_v10  ;;  %892 = vst.msk [vmem:[%s2491_s2 + $0x1e0] sm:$0xff] %vm446_vm0, %v2258_v53  ;;  %v1062_v9 = vmul.f32 %v689_v10, %v689_v10  ;;  %v952_v20 = vsel %vm446_vm0, %v689_v10, 0.0 }
 0x157   :  { %v691_v0 = vpop.f32.mrf.mxu0  ;;  %v819_v1 = vpop.f32.mrf.mxu1  ;;  %v953_v5 = vadd.f32 %v952_v20, %v951_v25  ;;  %v962_v25 = vsel %vm446_vm0, %v1769_v15, 0.0 }
 0x158   :  { %v1153_v45 = vsel %vm446_vm0, %v1062_v9, 0.0 }
 0x159   :  { %v692_v30 = vpop.f32.mrf.mxu0  ;;  %v2273_v13 = vpop.f32.mrf.mxu1  ;;  %v1154_v54 = vadd.f32 %v1153_v45, %v1152_v18  ;;  %v1069_v18 = vmul.f32 %v1797_v23, %v1797_v23 }
 0x15a   :  { %861 = vst.msk [vmem:[%s2491_s2 + $0xe8] sm:$0xff] %vm446_vm0, %v692_v30  ;;  %v1063_v34 = vmul.f32 %v692_v30, %v692_v30  ;;  %893 = vst.msk [vmem:[%s2491_s2 + $0x1e8] sm:$0xff] %vm446_vm0, %v2273_v13  ;;  %v954_v33 = vsel %vm446_vm0, %v692_v30, 0.0  ;;  %v1067_v30 = vmul.f32 %v1769_v15, %v1769_v15  ;;  %v966_v15 = vsel %vm446_vm0, %v1797_v23, 0.0 }
 0x15b   :  { %v694_v28 = vpop.f32.mrf.mxu0  ;;  %v822_v58 = vpop.f32.mrf.mxu1  ;;  %v955_v49 = vadd.f32 %v954_v33, %v953_v5  ;;  %v970_v23 = vsel %vm446_vm0, %v1825_v31, 0.0 }
 0x15c   :  { %v1155_v40 = vsel %vm446_vm0, %v1063_v34, 0.0  ;;  %v1068_v28 = vmul.f32 %v1783_v19, %v1783_v19  ;;  %v1163_v33 = vsel %vm446_vm0, %v1067_v30, 0.0  ;;  %v968_v19 = vsel %vm446_vm0, %v1811_v27, 0.0 }
 0x15d   :  { %v697_v46 = vpop.f32.mrf.mxu0  ;;  %v2288_v36 = vpop.f32.mrf.mxu1  ;;  %v1156_v57 = vadd.f32 %v1155_v40, %v1154_v54 }
 0x15e   :  { %862 = vst.msk [vmem:[%s2491_s2 + $0xf0] sm:$0xff] %vm446_vm0, %v697_v46  ;;  %v956_v41 = vsel %vm446_vm0, %v697_v46, 0.0  ;;  %v1064_v42 = vmul.f32 %v697_v46, %v697_v46  ;;  %894 = vst.msk [vmem:[%s2491_s2 + $0x1f0] sm:$0xff] %vm446_vm0, %v2288_v36  ;;  %v1165_v40 = vsel %vm446_vm0, %v1068_v28, 0.0  ;;  %v1076_v28 = vmul.f32 %v1895_v51, %v1895_v51 }
 0x15f   :  { %v699_v52 = vpop.f32.mrf.mxu0  ;;  %v827_v2 = vpop.f32.mrf.mxu1  ;;  %v957_v60 = vadd.f32 %v956_v41, %v955_v49  ;;  %v1070_v41 = vmul.f32 %v1811_v27, %v1811_v27  ;;  %v1167_v49 = vsel %vm446_vm0, %v1069_v18, 0.0  ;;  %v972_v27 = vsel %vm446_vm0, %v1839_v35, 0.0 }
 0x160   :  { %v1157_v10 = vsel %vm446_vm0, %v1064_v42, 0.0  ;;  %v1071_v52 = vmul.f32 %v1825_v31, %v1825_v31  ;;  %v974_v31 = vsel %vm446_vm0, %v1853_v39, 0.0 }
 0x161   :  { %v700_v22 = vpop.f32.mrf.mxu0  ;;  %v2302_v62 = vpop.f32.mrf.mxu1  ;;  %v1158_v50 = vadd.f32 %v1157_v10, %v1156_v57  ;;  %v1169_v57 = vsel %vm446_vm0, %v1070_v41, 0.0 }
 0x162   :  { %863 = vst.msk [vmem:[%s2491_s2 + $0xf8] sm:$0xff] %vm446_vm0, %v700_v22  ;;  %v958_v0 = vsel %vm446_vm0, %v700_v22, 0.0  ;;  %v1065_v1 = vmul.f32 %v700_v22, %v700_v22  ;;  %895 = vst.msk [vmem:[%s2491_s2 + $0x1f8] sm:$0xff] %vm446_vm0, %v2302_v62 }
 0x163   :  { %v959_v6 = vadd.f32 %v958_v0, %v957_v60  ;;  %v702_v9 = vpop.f32.mrf.mxu0  ;;  %v830_v12 = vpop.f32.mrf.mxu1  ;;  %v1072_v60 = vmul.f32 %v1839_v35, %v1839_v35  ;;  %v1171_v0 = vsel %vm446_vm0, %v1071_v52, 0.0  ;;  %v976_v35 = vsel %vm446_vm0, %v1867_v43, 0.0 }
 0x164   :  { %v1159_v17 = vsel %vm446_vm0, %v1065_v1, 0.0  ;;  %v1073_v1 = vmul.f32 %v1853_v39, %v1853_v39  ;;  %v1074_v12 = vmul.f32 %v1867_v43, %v1867_v43  ;;  %v978_v39 = vsel %vm446_vm0, %v1881_v47, 0.0 }
 0x165   :  { %v961_v20 = vadd.f32 %v960_v21, %v959_v6  ;;  %v1160_v34 = vadd.f32 %v1159_v17, %v1158_v50  ;;  %v1173_v9 = vsel %vm446_vm0, %v1072_v60, 0.0  ;;  %v980_v43 = vsel %vm446_vm0, %v1895_v51, 0.0 }
 0x166   :  { %v1175_v17 = vsel %vm446_vm0, %v1073_v1, 0.0  ;;  %v984_v51 = vsel %vm446_vm0, %v1923_v59, 0.0  ;;  %v1081_v60 = vmul.f32 %v1965_v7, %v1965_v7 }
 0x167   :  { %v963_v58 = vadd.f32 %v962_v25, %v961_v20  ;;  %v1162_v45 = vadd.f32 %v1161_v38, %v1160_v34  ;;  %v1075_v20 = vmul.f32 %v1881_v47, %v1881_v47  ;;  %v1177_v25 = vsel %vm446_vm0, %v1074_v12, 0.0 }
 0x168   :  { %v982_v47 = vsel %vm446_vm0, %v1909_v55, 0.0 }
 0x169   :  { %v965_v5 = vadd.f32 %v964_v11, %v963_v58  ;;  %v1164_v46 = vadd.f32 %v1163_v33, %v1162_v45  ;;  %v1179_v33 = vsel %vm446_vm0, %v1075_v20, 0.0  ;;  %v1077_v11 = vmul.f32 %v1909_v55, %v1909_v55 }
 0x16a   :  { %v986_v55 = vsel %vm446_vm0, %v1937_v63, 0.0 }
 0x16b   :  { %v967_v42 = vadd.f32 %v966_v15, %v965_v5  ;;  %v1166_v54 = vadd.f32 %v1165_v40, %v1164_v46  ;;  %v1181_v46 = vsel %vm446_vm0, %v1076_v28, 0.0  ;;  %v1078_v40 = vmul.f32 %v1923_v59, %v1923_v59 }
 0x16c   :  { %v988_v59 = vsel %vm446_vm0, %v1951_v3, 0.0  ;;  %v1086_v28 = vmul.f32 %v2094_v56, %v2094_v56 }
 0x16d   :  { %v969_v2 = vadd.f32 %v968_v19, %v967_v42  ;;  %v1168_v10 = vadd.f32 %v1167_v49, %v1166_v54  ;;  %v1183_v42 = vsel %vm446_vm0, %v1077_v11, 0.0  ;;  %v1079_v54 = vmul.f32 %v1937_v63, %v1937_v63 }
 0x16e   :  { %v1185_v52 = vsel %vm446_vm0, %v1078_v40, 0.0  ;;  %v990_v63 = vsel %vm446_vm0, %v1965_v7, 0.0  ;;  %v994_v7 = vsel %vm446_vm0, %v2022_v48, 0.0 }
 0x16f   :  { %v971_v22 = vadd.f32 %v970_v23, %v969_v2  ;;  %v1170_v26 = vadd.f32 %v1169_v57, %v1168_v10  ;;  %v1080_v2 = vmul.f32 %v1951_v3, %v1951_v3  ;;  %v1187_v23 = vsel %vm446_vm0, %v1079_v54, 0.0 }
 0x170   :  { %v992_v3 = vsel %vm446_vm0, %v1995_v24, 0.0 }
 0x171   :  { %v973_v50 = vadd.f32 %v972_v27, %v971_v22  ;;  %v1172_v6 = vadd.f32 %v1171_v0, %v1170_v26  ;;  %v1189_v0 = vsel %vm446_vm0, %v1080_v2, 0.0  ;;  %v1082_v27 = vmul.f32 %v1995_v24, %v1995_v24 }
 0x172   :  { %v996_v24 = vsel %vm446_vm0, %v2046_v8, 0.0  ;;  %v1091_v2 = vmul.f32 %v2206_v44, %v2206_v44 }
 0x173   :  { %v975_v21 = vadd.f32 %v974_v31, %v973_v50  ;;  %v1174_v30 = vadd.f32 %v1173_v9, %v1172_v6  ;;  %v1191_v6 = vsel %vm446_vm0, %v1081_v60, 0.0  ;;  %v1083_v9 = vmul.f32 %v2022_v48, %v2022_v48 }
 0x174   :  { %v998_v48 = vsel %vm446_vm0, %v2070_v32, 0.0 }
 0x175   :  { %v1176_v34 = vadd.f32 %v1175_v17, %v1174_v30  ;;  %v977_v38 = vadd.f32 %v976_v35, %v975_v21  ;;  %v1193_v21 = vsel %vm446_vm0, %v1082_v27, 0.0  ;;  %v1084_v30 = vmul.f32 %v2046_v8, %v2046_v8 }
 0x176   :  { %v1195_v20 = vsel %vm446_vm0, %v1083_v9, 0.0  ;;  %v1000_v8 = vsel %vm446_vm0, %v2094_v56, 0.0  ;;  %v1004_v56 = vsel %vm446_vm0, %v2142_v37, 0.0 }
 0x177   :  { %v979_v58 = vadd.f32 %v978_v39, %v977_v38  ;;  %v1178_v45 = vadd.f32 %v1177_v25, %v1176_v34  ;;  %v1085_v34 = vmul.f32 %v2070_v32, %v2070_v32  ;;  %v1197_v39 = vsel %vm446_vm0, %v1084_v30, 0.0 }
 0x178   :  { %v1002_v32 = vsel %vm446_vm0, %v2118_v16, 0.0  ;;  %v1096_v30 = vmul.f32 %v2288_v36, %v2288_v36 }
 0x179   :  { %v981_v18 = vadd.f32 %v980_v43, %v979_v58  ;;  %v1180_v5 = vadd.f32 %v1179_v33, %v1178_v45  ;;  %v1199_v33 = vsel %vm446_vm0, %v1085_v34, 0.0  ;;  %v1087_v43 = vmul.f32 %v2118_v16, %v2118_v16 }
 0x17a   :  { %v1006_v16 = vsel %vm446_vm0, %v2164_v61, 0.0 }
 0x17b   :  { %v983_v15 = vadd.f32 %v982_v47, %v981_v18  ;;  %v1182_v41 = vadd.f32 %v1181_v46, %v1180_v5  ;;  %v1201_v5 = vsel %vm446_vm0, %v1086_v28, 0.0  ;;  %v1088_v46 = vmul.f32 %v2142_v37, %v2142_v37 }
 0x17c   :  { %v1008_v37 = vsel %vm446_vm0, %v2185_v14, 0.0 }
 0x17d   :  { %v985_v49 = vadd.f32 %v984_v51, %v983_v15  ;;  %v1184_v19 = vadd.f32 %v1183_v42, %v1182_v41  ;;  %v1203_v15 = vsel %vm446_vm0, %v1087_v43, 0.0  ;;  %v1089_v41 = vmul.f32 %v2164_v61, %v2164_v61 }
 0x17e   :  { %v1205_v54 = vsel %vm446_vm0, %v1088_v46, 0.0  ;;  %v1010_v61 = vsel %vm446_vm0, %v2206_v44, 0.0  ;;  %v1014_v44 = vsel %vm446_vm0, %v2243_v29, 0.0  ;;  %v896_v46 = vld [vmem:[%s2492_s3] sm:$0x1] }
 0x17f   :  { %v987_v10 = vadd.f32 %v986_v55, %v985_v49  ;;  %v1186_v57 = vadd.f32 %v1185_v52, %v1184_v19  ;;  %v1090_v49 = vmul.f32 %v2185_v14, %v2185_v14  ;;  %v1207_v55 = vsel %vm446_vm0, %v1089_v41, 0.0 }
 0x180   :  { %v1012_v14 = vsel %vm446_vm0, %v2227_v4, 0.0 }
 0x181   :  { %v989_v22 = vadd.f32 %v988_v59, %v987_v10  ;;  %v1188_v26 = vadd.f32 %v1187_v23, %v1186_v57  ;;  %v1209_v23 = vsel %vm446_vm0, %v1090_v49, 0.0  ;;  %v1092_v59 = vmul.f32 %v2227_v4, %v2227_v4 }
 0x182   :  { %v1016_v4 = vsel %vm446_vm0, %v2258_v53, 0.0 }
 0x183   :  { %v991_v1 = vadd.f32 %v990_v63, %v989_v22  ;;  %v1190_v50 = vadd.f32 %v1189_v0, %v1188_v26  ;;  %v1211_v26 = vsel %vm446_vm0, %v1091_v2, 0.0  ;;  %v1093_v0 = vmul.f32 %v2243_v29, %v2243_v29 }
 0x184   :  { %v1018_v29 = vsel %vm446_vm0, %v2273_v13, 0.0 }
 0x185   :  { %v993_v31 = vadd.f32 %v992_v3, %v991_v1  ;;  %v1192_v12 = vadd.f32 %v1191_v6, %v1190_v50  ;;  %v1213_v1 = vsel %vm446_vm0, %v1092_v59, 0.0  ;;  %v1094_v50 = vmul.f32 %v2258_v53, %v2258_v53 }
 0x186   :  { %v1215_v9 = vsel %vm446_vm0, %v1093_v0, 0.0  ;;  %v1020_v53 = vsel %vm446_vm0, %v2288_v36, 0.0 }
 0x187   :  { %v995_v17 = vadd.f32 %v994_v7, %v993_v31  ;;  %v1194_v35 = vadd.f32 %v1193_v21, %v1192_v12  ;;  %v1095_v31 = vmul.f32 %v2273_v13, %v2273_v13  ;;  %v1217_v7 = vsel %vm446_vm0, %v1094_v50, 0.0 }
 0x188   :  { %v1022_v13 = vsel %vm446_vm0, %v2302_v62, 0.0 }
 0x189   :  { %v1196_v38 = vadd.f32 %v1195_v20, %v1194_v35  ;;  %v997_v25 = vadd.f32 %v996_v24, %v995_v17  ;;  %v1219_v20 = vsel %vm446_vm0, %v1095_v31, 0.0  ;;  %v1097_v24 = vmul.f32 %v2302_v62, %v2302_v62 }
 0x18b   :  { %v1198_v58 = vadd.f32 %v1197_v39, %v1196_v38  ;;  %v999_v45 = vadd.f32 %v998_v48, %v997_v25  ;;  %v1221_v25 = vsel %vm446_vm0, %v1096_v30, 0.0  ;;  %v1223_v28 = vsel %vm446_vm0, %v1097_v24, 0.0 }
 0x18d   :  { %v1200_v11 = vadd.f32 %v1199_v33, %v1198_v58  ;;  %v1001_v18 = vadd.f32 %v1000_v8, %v999_v45 }
 0x18f   :  { %v1202_v47 = vadd.f32 %v1201_v5, %v1200_v11  ;;  %v1003_v40 = vadd.f32 %v1002_v32, %v1001_v18 }
 0x191   :  { %v1204_v42 = vadd.f32 %v1203_v15, %v1202_v47  ;;  %v1005_v51 = vadd.f32 %v1004_v56, %v1003_v40  ;;  %v1033_v40 = vld [vmem:[%s2493_s4] sm:$0x1] }
 0x193   :  { %v1206_v19 = vadd.f32 %v1205_v54, %v1204_v42  ;;  %v1007_v52 = vadd.f32 %v1006_v16, %v1005_v51 }
 0x195   :  { %v1208_v10 = vadd.f32 %v1207_v55, %v1206_v19  ;;  %v1009_v57 = vadd.f32 %v1008_v37, %v1007_v52 }
 0x197   :  { %v1210_v60 = vadd.f32 %v1209_v23, %v1208_v10  ;;  %v1011_v22 = vadd.f32 %v1010_v61, %v1009_v57 }
 0x199   :  { %v1212_v63 = vadd.f32 %v1211_v26, %v1210_v60  ;;  %v1013_v27 = vadd.f32 %v1012_v14, %v1011_v22 }
 0x19b   :  { %v1214_v6 = vadd.f32 %v1213_v1, %v1212_v63  ;;  %v1015_v3 = vadd.f32 %v1014_v44, %v1013_v27 }
 0x19d   :  { %v1216_v12 = vadd.f32 %v1215_v9, %v1214_v6  ;;  %v1017_v21 = vadd.f32 %v1016_v4, %v1015_v3 }
 0x19f   :  { %v1218_v17 = vadd.f32 %v1217_v7, %v1216_v12  ;;  %v1019_v35 = vadd.f32 %v1018_v29, %v1017_v21 }
 0x1a1   :  { %v1220_v34 = vadd.f32 %v1219_v20, %v1218_v17  ;;  %v1021_v38 = vadd.f32 %v1020_v53, %v1019_v35 }
 0x1a3   :  { %v1222_v39 = vadd.f32 %v1221_v25, %v1220_v34  ;;  %v1023_v48 = vadd.f32 %v1022_v13, %v1021_v38 }
 0x1a5   :  { %v1024_v58 = vrot.slane %v1023_v48, 4  ;;  %v1224_v45 = vadd.f32 %v1223_v28, %v1222_v39 }
 0x1a7   :  { %v1025_v33 = vadd.f32 %v1024_v58, %v1023_v48  ;;  %v1225_v8 = vrot.slane %v1224_v45, 4 }
 0x1a9   :  { %v1026_v43 = vrot.slane %v1025_v33, 2  ;;  %v1226_v36 = vadd.f32 %v1225_v8, %v1224_v45 }
 0x1ab   :  { %v1027_v11 = vadd.f32 %v1026_v43, %v1025_v33  ;;  %v1227_v18 = vrot.slane %v1226_v36, 2 }
 0x1ad   :  { %v1028_v5 = vrot.slane %v1027_v11, 1  ;;  %v1228_v32 = vadd.f32 %v1227_v18, %v1226_v36 }
 0x1af   :  { %v1029_v47 = vadd.f32 %v1028_v5, %v1027_v11  ;;  %v1229_v62 = vrot.slane %v1228_v32, 1 }
 0x1b1   :  { %v1030_v15 = vadd.f32 %v1029_v47, %v896_v46  ;;  %v1230_v56 = vadd.f32 %v1229_v62, %v1228_v32 }
 0x1b3   :  { %1032 = vst.msk [vmem:[%s2492_s3] sm:$0x1] %vm83_vm1, %v1030_v15  ;;  %v1231_v41 = vadd.f32 %v1230_v56, %v1033_v40 }
 0x1b5   :  { %1232 = vst.msk [vmem:[%s2493_s4] sm:$0x1] %vm83_vm1, %v1231_v41 }

// kernel: allconv_forward.13
= control target key start
LH: loop header
LB: loop body
LE: loop exit
PB: predicated region body
PF: predicated region fallthrough
CT: control target
= control target key end

     0   :  { %vm540_vm0 = vcmask 125952   ;;  %s1345_s0 = inlined_call_operand.vmem [shape: f32[512,16], index: 0, kind: input, shape index: {}]   ;;  %s1346_s1 = inlined_call_operand.vmem [shape: f32[1,16], index: 1, kind: input, shape index: {}]   ;;  %s1347_s2 = inlined_call_operand.vmem [shape: f32[1,16], index: 2, kind: input, shape index: {}]   ;;  %s1348_s3 = inlined_call_operand.vmem [shape: bf16[512,16], index: 3, kind: output, shape index: {}]  }
   0x1   :  { %v14_v0 = vld [vmem:[%s1345_s0] sm:$0xff]  ;;  %v15_v4 = vld [vmem:[%s1345_s0 + $0x8] sm:$0xff]  ;;  %v16_v5 = vld [vmem:[%s1345_s0 + $0x10] sm:$0xff] }
   0x2   :  { %v765_v1 = vld [vmem:[%s1346_s1] ss:$0 sm:$0xff]  ;;  %v17_v6 = vld [vmem:[%s1345_s0 + $0x18] sm:$0xff]  ;;  %v19_v11 = vld [vmem:[%s1345_s0 + $0x28] sm:$0xff] }
   0x3   :  { %v770_v2 = vld [vmem:[%s1347_s2] ss:$0 sm:$0xff]  ;;  %v85_v3 = vmul.f32 %v765_v1, %v14_v0  ;;  %v86_v7 = vmul.f32 %v765_v1, %v15_v4  ;;  %v87_v8 = vmul.f32 %v765_v1, %v16_v5  ;;  %v88_v9 = vmul.f32 %v765_v1, %v17_v6  ;;  %v20_v12 = vld [vmem:[%s1345_s0 + $0x30] sm:$0xff]  ;;  %v21_v17 = vld [vmem:[%s1345_s0 + $0x38] sm:$0xff] }
   0x4   :  { %v18_v10 = vld [vmem:[%s1345_s0 + $0x20] sm:$0xff]  ;;  %v90_v15 = vmul.f32 %v765_v1, %v19_v11  ;;  %v91_v16 = vmul.f32 %v765_v1, %v20_v12  ;;  %v92_v21 = vmul.f32 %v765_v1, %v21_v17  ;;  %v23_v35 = vld [vmem:[%s1345_s0 + $0x48] sm:$0xff]  ;;  %v24_v36 = vld [vmem:[%s1345_s0 + $0x50] sm:$0xff] }
   0x5   :  { %v156_v13 = vadd.f32 %v770_v2, %v85_v3  ;;  %v89_v14 = vmul.f32 %v765_v1, %v18_v10  ;;  %v157_v18 = vadd.f32 %v770_v2, %v86_v7  ;;  %v158_v19 = vadd.f32 %v770_v2, %v87_v8  ;;  %v22_v30 = vld [vmem:[%s1345_s0 + $0x40] sm:$0xff]  ;;  %v25_v37 = vld [vmem:[%s1345_s0 + $0x58] sm:$0xff]  ;;  %v27_v43 = vld [vmem:[%s1345_s0 + $0x68] sm:$0xff] }
   0x6   :  { %v159_v20 = vadd.f32 %v770_v2, %v88_v9  ;;  %v161_v24 = vadd.f32 %v770_v2, %v90_v15  ;;  %v162_v25 = vadd.f32 %v770_v2, %v91_v16  ;;  %v163_v29 = vadd.f32 %v770_v2, %v92_v21  ;;  %v26_v42 = vld [vmem:[%s1345_s0 + $0x60] sm:$0xff]  ;;  %v28_v44 = vld [vmem:[%s1345_s0 + $0x70] sm:$0xff]  ;;  %v29_v49 = vld [vmem:[%s1345_s0 + $0x78] sm:$0xff] }
   0x7   :  { %v220_v22 = vmax.f32 %v156_v13, 0.0  ;;  %v160_v23 = vadd.f32 %v770_v2, %v89_v14  ;;  %v221_v26 = vmax.f32 %v157_v18, 0.0  ;;  %v222_v27 = vmax.f32 %v158_v19, 0.0  ;;  %v30_v8 = vld [vmem:[%s1345_s0 + $0x80] sm:$0xff]  ;;  %v31_v13 = vld [vmem:[%s1345_s0 + $0x88] sm:$0xff]  ;;  %v32_v14 = vld [vmem:[%s1345_s0 + $0x90] sm:$0xff] }
   0x8   :  { %v223_v28 = vmax.f32 %v159_v20, 0.0  ;;  %v225_v33 = vmax.f32 %v161_v24, 0.0  ;;  %v226_v34 = vmax.f32 %v162_v25, 0.0  ;;  %v227_v41 = vmax.f32 %v163_v29, 0.0  ;;  %v33_v15 = vld [vmem:[%s1345_s0 + $0x98] sm:$0xff]  ;;  %v34_v20 = vld [vmem:[%s1345_s0 + $0xa0] sm:$0xff] }
   0x9   :  { %v675_v31 = vpack.c.bf16 %v220_v22, %v220_v22  ;;  %v224_v32 = vmax.f32 %v160_v23, 0.0  ;;  %v676_v38 = vpack.c.bf16 %v221_v26, %v221_v26  ;;  %v677_v39 = vpack.c.bf16 %v222_v27, %v222_v27  ;;  %v35_v21 = vld [vmem:[%s1345_s0 + $0xa8] sm:$0xff]  ;;  %v36_v22 = vld [vmem:[%s1345_s0 + $0xb0] sm:$0xff]  ;;  %v37_v27 = vld [vmem:[%s1345_s0 + $0xb8] sm:$0xff] }
   0xa   :  { %v678_v40 = vpack.c.bf16 %v223_v28, %v223_v28  ;;  %v680_v46 = vpack.c.bf16 %v225_v33, %v225_v33  ;;  %v681_v47 = vpack.c.bf16 %v226_v34, %v226_v34  ;;  %v93_v48 = vmul.f32 %v765_v1, %v22_v30 }
   0xb   :  { %541 = vst.msk [vmem:[%s1348_s3] sm:$0xf] %vm540_vm0, %v675_v31  ;;  %v679_v45 = vpack.c.bf16 %v224_v32, %v224_v32  ;;  %542 = vst.msk [vmem:[%s1348_s3 + $0x4] sm:$0xf] %vm540_vm0, %v676_v38  ;;  %v682_v50 = vpack.c.bf16 %v227_v41, %v227_v41  ;;  %v94_v51 = vmul.f32 %v765_v1, %v23_v35 }
   0xc   :  { %543 = vst.msk [vmem:[%s1348_s3 + $0x8] sm:$0xf] %vm540_vm0, %v677_v39  ;;  %544 = vst.msk [vmem:[%s1348_s3 + $0xc] sm:$0xf] %vm540_vm0, %v678_v40  ;;  %v95_v52 = vmul.f32 %v765_v1, %v24_v36  ;;  %v96_v53 = vmul.f32 %v765_v1, %v25_v37  ;;  %v164_v54 = vadd.f32 %v770_v2, %v93_v48  ;;  %v38_v48 = vld [vmem:[%s1345_s0 + $0xc0] sm:$0xff] }
   0xd   :  { %545 = vst.msk [vmem:[%s1348_s3 + $0x10] sm:$0xf] %vm540_vm0, %v679_v45  ;;  %546 = vst.msk [vmem:[%s1348_s3 + $0x14] sm:$0xf] %vm540_vm0, %v680_v46  ;;  %v97_v55 = vmul.f32 %v765_v1, %v26_v42  ;;  %v98_v56 = vmul.f32 %v765_v1, %v27_v43  ;;  %v99_v57 = vmul.f32 %v765_v1, %v28_v44 }
   0xe   :  { %547 = vst.msk [vmem:[%s1348_s3 + $0x18] sm:$0xf] %vm540_vm0, %v681_v47  ;;  %548 = vst.msk [vmem:[%s1348_s3 + $0x1c] sm:$0xf] %vm540_vm0, %v682_v50  ;;  %v165_v58 = vadd.f32 %v770_v2, %v94_v51  ;;  %v166_v59 = vadd.f32 %v770_v2, %v95_v52  ;;  %v167_v60 = vadd.f32 %v770_v2, %v96_v53  ;;  %v228_v62 = vmax.f32 %v164_v54, 0.0  ;;  %v39_v53 = vld [vmem:[%s1345_s0 + $0xc8] sm:$0xff] }
   0xf   :  { %v100_v61 = vmul.f32 %v765_v1, %v29_v49  ;;  %v168_v63 = vadd.f32 %v770_v2, %v97_v55  ;;  %v169_v0 = vadd.f32 %v770_v2, %v98_v56  ;;  %v170_v3 = vadd.f32 %v770_v2, %v99_v57  ;;  %v40_v54 = vld [vmem:[%s1345_s0 + $0xd0] sm:$0xff]  ;;  %v41_v55 = vld [vmem:[%s1345_s0 + $0xd8] sm:$0xff] }
  0x10   :  { %v229_v4 = vmax.f32 %v165_v58, 0.0  ;;  %v230_v5 = vmax.f32 %v166_v59, 0.0  ;;  %v231_v6 = vmax.f32 %v167_v60, 0.0  ;;  %v683_v9 = vpack.c.bf16 %v228_v62, %v228_v62  ;;  %v42_v60 = vld [vmem:[%s1345_s0 + $0xe0] sm:$0xff]  ;;  %v44_v62 = vld [vmem:[%s1345_s0 + $0xf0] sm:$0xff] }
  0x11   :  { %v171_v7 = vadd.f32 %v770_v2, %v100_v61  ;;  %v232_v10 = vmax.f32 %v168_v63, 0.0  ;;  %v233_v11 = vmax.f32 %v169_v0, 0.0  ;;  %v234_v12 = vmax.f32 %v170_v3, 0.0  ;;  %v43_v61 = vld [vmem:[%s1345_s0 + $0xe8] sm:$0xff] }
  0x12   :  { %v684_v16 = vpack.c.bf16 %v229_v4, %v229_v4  ;;  %v685_v17 = vpack.c.bf16 %v230_v5, %v230_v5  ;;  %v686_v18 = vpack.c.bf16 %v231_v6, %v231_v6  ;;  %549 = vst.msk [vmem:[%s1348_s3 + $0x20] sm:$0xf] %vm540_vm0, %v683_v9  ;;  %v101_v26 = vmul.f32 %v765_v1, %v30_v8  ;;  %v45_v5 = vld [vmem:[%s1345_s0 + $0xf8] sm:$0xff] }
  0x13   :  { %v235_v19 = vmax.f32 %v171_v7, 0.0  ;;  %v687_v23 = vpack.c.bf16 %v232_v10, %v232_v10  ;;  %v688_v24 = vpack.c.bf16 %v233_v11, %v233_v11  ;;  %v689_v25 = vpack.c.bf16 %v234_v12, %v234_v12 }
  0x14   :  { %550 = vst.msk [vmem:[%s1348_s3 + $0x24] sm:$0xf] %vm540_vm0, %v684_v16  ;;  %551 = vst.msk [vmem:[%s1348_s3 + $0x28] sm:$0xf] %vm540_vm0, %v685_v17  ;;  %v102_v29 = vmul.f32 %v765_v1, %v31_v13  ;;  %v103_v30 = vmul.f32 %v765_v1, %v32_v14  ;;  %v104_v31 = vmul.f32 %v765_v1, %v33_v15 }
  0x15   :  { %552 = vst.msk [vmem:[%s1348_s3 + $0x2c] sm:$0xf] %vm540_vm0, %v686_v18  ;;  %v690_v28 = vpack.c.bf16 %v235_v19, %v235_v19  ;;  %553 = vst.msk [vmem:[%s1348_s3 + $0x30] sm:$0xf] %vm540_vm0, %v687_v23  ;;  %v172_v32 = vadd.f32 %v770_v2, %v101_v26  ;;  %v105_v33 = vmul.f32 %v765_v1, %v34_v20  ;;  %v46_v26 = vld [vmem:[%s1345_s0 + $0x100] sm:$0xff] }
  0x16   :  { %554 = vst.msk [vmem:[%s1348_s3 + $0x34] sm:$0xf] %vm540_vm0, %v688_v24  ;;  %555 = vst.msk [vmem:[%s1348_s3 + $0x38] sm:$0xf] %vm540_vm0, %v689_v25  ;;  %v106_v34 = vmul.f32 %v765_v1, %v35_v21  ;;  %v107_v35 = vmul.f32 %v765_v1, %v36_v22  ;;  %v173_v36 = vadd.f32 %v770_v2, %v102_v29 }
  0x17   :  { %556 = vst.msk [vmem:[%s1348_s3 + $0x3c] sm:$0xf] %vm540_vm0, %v690_v28  ;;  %v174_v37 = vadd.f32 %v770_v2, %v103_v30  ;;  %v175_v38 = vadd.f32 %v770_v2, %v104_v31  ;;  %v108_v39 = vmul.f32 %v765_v1, %v37_v27  ;;  %v236_v40 = vmax.f32 %v172_v32, 0.0  ;;  %v47_v31 = vld [vmem:[%s1345_s0 + $0x108] sm:$0xff]  ;;  %v48_v32 = vld [vmem:[%s1345_s0 + $0x110] sm:$0xff] }
  0x18   :  { %v176_v41 = vadd.f32 %v770_v2, %v105_v33  ;;  %v177_v42 = vadd.f32 %v770_v2, %v106_v34  ;;  %v178_v43 = vadd.f32 %v770_v2, %v107_v35  ;;  %v237_v44 = vmax.f32 %v173_v36, 0.0  ;;  %v49_v33 = vld [vmem:[%s1345_s0 + $0x118] sm:$0xff] }
  0x19   :  { %v238_v45 = vmax.f32 %v174_v37, 0.0  ;;  %v239_v46 = vmax.f32 %v175_v38, 0.0  ;;  %v179_v47 = vadd.f32 %v770_v2, %v108_v39  ;;  %v691_v49 = vpack.c.bf16 %v236_v40, %v236_v40  ;;  %v50_v38 = vld [vmem:[%s1345_s0 + $0x120] sm:$0xff]  ;;  %v51_v39 = vld [vmem:[%s1345_s0 + $0x128] sm:$0xff]  ;;  %v52_v40 = vld [vmem:[%s1345_s0 + $0x130] sm:$0xff] }
  0x1a   :  { %v240_v50 = vmax.f32 %v176_v41, 0.0  ;;  %v241_v51 = vmax.f32 %v177_v42, 0.0  ;;  %v242_v52 = vmax.f32 %v178_v43, 0.0  ;;  %v692_v56 = vpack.c.bf16 %v237_v44, %v237_v44 }
  0x1b   :  { %v693_v57 = vpack.c.bf16 %v238_v45, %v238_v45  ;;  %v694_v58 = vpack.c.bf16 %v239_v46, %v239_v46  ;;  %v243_v59 = vmax.f32 %v179_v47, 0.0  ;;  %557 = vst.msk [vmem:[%s1348_s3 + $0x40] sm:$0xf] %vm540_vm0, %v691_v49  ;;  %v109_v4 = vmul.f32 %v765_v1, %v38_v48  ;;  %v53_v45 = vld [vmem:[%s1345_s0 + $0x138] sm:$0xff] }
  0x1c   :  { %v695_v63 = vpack.c.bf16 %v240_v50, %v240_v50  ;;  %v696_v0 = vpack.c.bf16 %v241_v51, %v241_v51  ;;  %v697_v3 = vpack.c.bf16 %v242_v52, %v242_v52  ;;  %558 = vst.msk [vmem:[%s1348_s3 + $0x44] sm:$0xf] %vm540_vm0, %v692_v56  ;;  %v110_v7 = vmul.f32 %v765_v1, %v39_v53 }
  0x1d   :  { %559 = vst.msk [vmem:[%s1348_s3 + $0x48] sm:$0xf] %vm540_vm0, %v693_v57  ;;  %560 = vst.msk [vmem:[%s1348_s3 + $0x4c] sm:$0xf] %vm540_vm0, %v694_v58  ;;  %v698_v6 = vpack.c.bf16 %v243_v59, %v243_v59  ;;  %v111_v8 = vmul.f32 %v765_v1, %v40_v54  ;;  %v112_v9 = vmul.f32 %v765_v1, %v41_v55 }
  0x1e   :  { %561 = vst.msk [vmem:[%s1348_s3 + $0x50] sm:$0xf] %vm540_vm0, %v695_v63  ;;  %562 = vst.msk [vmem:[%s1348_s3 + $0x54] sm:$0xf] %vm540_vm0, %v696_v0  ;;  %v180_v10 = vadd.f32 %v770_v2, %v109_v4  ;;  %v113_v11 = vmul.f32 %v765_v1, %v42_v60  ;;  %v114_v12 = vmul.f32 %v765_v1, %v43_v61  ;;  %v54_v4 = vld [vmem:[%s1345_s0 + $0x140] sm:$0xff] }
  0x1f   :  { %563 = vst.msk [vmem:[%s1348_s3 + $0x58] sm:$0xf] %vm540_vm0, %v697_v3  ;;  %v115_v13 = vmul.f32 %v765_v1, %v44_v62  ;;  %564 = vst.msk [vmem:[%s1348_s3 + $0x5c] sm:$0xf] %vm540_vm0, %v698_v6  ;;  %v181_v14 = vadd.f32 %v770_v2, %v110_v7  ;;  %v182_v15 = vadd.f32 %v770_v2, %v111_v8 }
  0x20   :  { %v183_v16 = vadd.f32 %v770_v2, %v112_v9  ;;  %v116_v17 = vmul.f32 %v765_v1, %v45_v5  ;;  %v244_v18 = vmax.f32 %v180_v10, 0.0  ;;  %v184_v19 = vadd.f32 %v770_v2, %v113_v11  ;;  %v55_v9 = vld [vmem:[%s1345_s0 + $0x148] sm:$0xff]  ;;  %v56_v10 = vld [vmem:[%s1345_s0 + $0x150] sm:$0xff]  ;;  %v57_v11 = vld [vmem:[%s1345_s0 + $0x158] sm:$0xff] }
  0x21   :  { %v185_v20 = vadd.f32 %v770_v2, %v114_v12  ;;  %v186_v21 = vadd.f32 %v770_v2, %v115_v13  ;;  %v245_v22 = vmax.f32 %v181_v14, 0.0  ;;  %v246_v23 = vmax.f32 %v182_v15, 0.0 }
  0x22   :  { %v247_v24 = vmax.f32 %v183_v16, 0.0  ;;  %v187_v25 = vadd.f32 %v770_v2, %v116_v17  ;;  %v699_v27 = vpack.c.bf16 %v244_v18, %v244_v18  ;;  %v248_v28 = vmax.f32 %v184_v19, 0.0  ;;  %v58_v16 = vld [vmem:[%s1345_s0 + $0x160] sm:$0xff]  ;;  %v59_v17 = vld [vmem:[%s1345_s0 + $0x168] sm:$0xff]  ;;  %v60_v18 = vld [vmem:[%s1345_s0 + $0x170] sm:$0xff] }
  0x23   :  { %v249_v29 = vmax.f32 %v185_v20, 0.0  ;;  %v250_v30 = vmax.f32 %v186_v21, 0.0  ;;  %v700_v34 = vpack.c.bf16 %v245_v22, %v245_v22  ;;  %v701_v35 = vpack.c.bf16 %v246_v23, %v246_v23  ;;  %v61_v23 = vld [vmem:[%s1345_s0 + $0x178] sm:$0xff] }
  0x24   :  { %v702_v36 = vpack.c.bf16 %v247_v24, %v247_v24  ;;  %v251_v37 = vmax.f32 %v187_v25, 0.0  ;;  %565 = vst.msk [vmem:[%s1348_s3 + $0x60] sm:$0xf] %vm540_vm0, %v699_v27  ;;  %v703_v41 = vpack.c.bf16 %v248_v28, %v248_v28  ;;  %v117_v44 = vmul.f32 %v765_v1, %v46_v26 }
  0x25   :  { %v704_v42 = vpack.c.bf16 %v249_v29, %v249_v29  ;;  %v705_v43 = vpack.c.bf16 %v250_v30, %v250_v30  ;;  %566 = vst.msk [vmem:[%s1348_s3 + $0x64] sm:$0xf] %vm540_vm0, %v700_v34  ;;  %567 = vst.msk [vmem:[%s1348_s3 + $0x68] sm:$0xf] %vm540_vm0, %v701_v35  ;;  %v118_v47 = vmul.f32 %v765_v1, %v47_v31 }
  0x26   :  { %568 = vst.msk [vmem:[%s1348_s3 + $0x6c] sm:$0xf] %vm540_vm0, %v702_v36  ;;  %v706_v46 = vpack.c.bf16 %v251_v37, %v251_v37  ;;  %v119_v48 = vmul.f32 %v765_v1, %v48_v32  ;;  %v120_v49 = vmul.f32 %v765_v1, %v49_v33  ;;  %569 = vst.msk [vmem:[%s1348_s3 + $0x70] sm:$0xf] %vm540_vm0, %v703_v41 }
  0x27   :  { %570 = vst.msk [vmem:[%s1348_s3 + $0x74] sm:$0xf] %vm540_vm0, %v704_v42  ;;  %571 = vst.msk [vmem:[%s1348_s3 + $0x78] sm:$0xf] %vm540_vm0, %v705_v43  ;;  %v188_v50 = vadd.f32 %v770_v2, %v117_v44  ;;  %v121_v51 = vmul.f32 %v765_v1, %v50_v38  ;;  %v122_v52 = vmul.f32 %v765_v1, %v51_v39  ;;  %v62_v44 = vld [vmem:[%s1345_s0 + $0x180] sm:$0xff] }
  0x28   :  { %v123_v53 = vmul.f32 %v765_v1, %v52_v40  ;;  %572 = vst.msk [vmem:[%s1348_s3 + $0x7c] sm:$0xf] %vm540_vm0, %v706_v46  ;;  %v189_v54 = vadd.f32 %v770_v2, %v118_v47  ;;  %v190_v55 = vadd.f32 %v770_v2, %v119_v48  ;;  %v191_v56 = vadd.f32 %v770_v2, %v120_v49  ;;  %v63_v49 = vld [vmem:[%s1345_s0 + $0x188] sm:$0xff] }
  0x29   :  { %v124_v57 = vmul.f32 %v765_v1, %v53_v45  ;;  %v252_v58 = vmax.f32 %v188_v50, 0.0  ;;  %v192_v59 = vadd.f32 %v770_v2, %v121_v51  ;;  %v193_v60 = vadd.f32 %v770_v2, %v122_v52  ;;  %v64_v50 = vld [vmem:[%s1345_s0 + $0x190] sm:$0xff]  ;;  %v65_v51 = vld [vmem:[%s1345_s0 + $0x198] sm:$0xff] }
  0x2a   :  { %v194_v61 = vadd.f32 %v770_v2, %v123_v53  ;;  %v253_v62 = vmax.f32 %v189_v54, 0.0  ;;  %v254_v63 = vmax.f32 %v190_v55, 0.0  ;;  %v255_v0 = vmax.f32 %v191_v56, 0.0  ;;  %v66_v56 = vld [vmem:[%s1345_s0 + $0x1a0] sm:$0xff] }
  0x2b   :  { %v195_v3 = vadd.f32 %v770_v2, %v124_v57  ;;  %v707_v5 = vpack.c.bf16 %v252_v58, %v252_v58  ;;  %v256_v6 = vmax.f32 %v192_v59, 0.0  ;;  %v257_v7 = vmax.f32 %v193_v60, 0.0  ;;  %v67_v57 = vld [vmem:[%s1345_s0 + $0x1a8] sm:$0xff]  ;;  %v68_v58 = vld [vmem:[%s1345_s0 + $0x1b0] sm:$0xff] }
  0x2c   :  { %v258_v8 = vmax.f32 %v194_v61, 0.0  ;;  %v708_v12 = vpack.c.bf16 %v253_v62, %v253_v62  ;;  %v709_v13 = vpack.c.bf16 %v254_v63, %v254_v63  ;;  %v710_v14 = vpack.c.bf16 %v255_v0, %v255_v0  ;;  %v69_v63 = vld [vmem:[%s1345_s0 + $0x1b8] sm:$0xff] }
  0x2d   :  { %v259_v15 = vmax.f32 %v195_v3, 0.0  ;;  %573 = vst.msk [vmem:[%s1348_s3 + $0x80] sm:$0xf] %vm540_vm0, %v707_v5  ;;  %v711_v19 = vpack.c.bf16 %v256_v6, %v256_v6  ;;  %v712_v20 = vpack.c.bf16 %v257_v7, %v257_v7  ;;  %v125_v22 = vmul.f32 %v765_v1, %v54_v4 }
  0x2e   :  { %v713_v21 = vpack.c.bf16 %v258_v8, %v258_v8  ;;  %574 = vst.msk [vmem:[%s1348_s3 + $0x84] sm:$0xf] %vm540_vm0, %v708_v12  ;;  %575 = vst.msk [vmem:[%s1348_s3 + $0x88] sm:$0xf] %vm540_vm0, %v709_v13  ;;  %v126_v25 = vmul.f32 %v765_v1, %v55_v9  ;;  %v127_v26 = vmul.f32 %v765_v1, %v56_v10 }
  0x2f   :  { %576 = vst.msk [vmem:[%s1348_s3 + $0x8c] sm:$0xf] %vm540_vm0, %v710_v14  ;;  %v714_v24 = vpack.c.bf16 %v259_v15, %v259_v15  ;;  %v128_v27 = vmul.f32 %v765_v1, %v57_v11  ;;  %577 = vst.msk [vmem:[%s1348_s3 + $0x90] sm:$0xf] %vm540_vm0, %v711_v19  ;;  %v196_v28 = vadd.f32 %v770_v2, %v125_v22  ;;  %v70_v22 = vld [vmem:[%s1345_s0 + $0x1c0] sm:$0xff] }
  0x30   :  { %578 = vst.msk [vmem:[%s1348_s3 + $0x94] sm:$0xf] %vm540_vm0, %v712_v20  ;;  %579 = vst.msk [vmem:[%s1348_s3 + $0x98] sm:$0xf] %vm540_vm0, %v713_v21  ;;  %v129_v29 = vmul.f32 %v765_v1, %v58_v16  ;;  %v130_v30 = vmul.f32 %v765_v1, %v59_v17  ;;  %v131_v31 = vmul.f32 %v765_v1, %v60_v18 }
  0x31   :  { %580 = vst.msk [vmem:[%s1348_s3 + $0x9c] sm:$0xf] %vm540_vm0, %v714_v24  ;;  %v197_v32 = vadd.f32 %v770_v2, %v126_v25  ;;  %v198_v33 = vadd.f32 %v770_v2, %v127_v26  ;;  %v199_v34 = vadd.f32 %v770_v2, %v128_v27  ;;  %v132_v35 = vmul.f32 %v765_v1, %v61_v23  ;;  %v71_v27 = vld [vmem:[%s1345_s0 + $0x1c8] sm:$0xff] }
  0x32   :  { %v260_v36 = vmax.f32 %v196_v28, 0.0  ;;  %v200_v37 = vadd.f32 %v770_v2, %v129_v29  ;;  %v201_v38 = vadd.f32 %v770_v2, %v130_v30  ;;  %v202_v39 = vadd.f32 %v770_v2, %v131_v31  ;;  %v72_v28 = vld [vmem:[%s1345_s0 + $0x1d0] sm:$0xff]  ;;  %v73_v29 = vld [vmem:[%s1345_s0 + $0x1d8] sm:$0xff] }
  0x33   :  { %v261_v40 = vmax.f32 %v197_v32, 0.0  ;;  %v262_v41 = vmax.f32 %v198_v33, 0.0  ;;  %v263_v42 = vmax.f32 %v199_v34, 0.0  ;;  %v203_v43 = vadd.f32 %v770_v2, %v132_v35  ;;  %v74_v34 = vld [vmem:[%s1345_s0 + $0x1e0] sm:$0xff]  ;;  %v75_v35 = vld [vmem:[%s1345_s0 + $0x1e8] sm:$0xff] }
  0x34   :  { %v715_v45 = vpack.c.bf16 %v260_v36, %v260_v36  ;;  %v264_v46 = vmax.f32 %v200_v37, 0.0  ;;  %v265_v47 = vmax.f32 %v201_v38, 0.0  ;;  %v266_v48 = vmax.f32 %v202_v39, 0.0  ;;  %v76_v36 = vld [vmem:[%s1345_s0 + $0x1f0] sm:$0xff] }
  0x35   :  { %v716_v52 = vpack.c.bf16 %v261_v40, %v261_v40  ;;  %v717_v53 = vpack.c.bf16 %v262_v41, %v262_v41  ;;  %v718_v54 = vpack.c.bf16 %v263_v42, %v263_v42  ;;  %v267_v55 = vmax.f32 %v203_v43, 0.0  ;;  %v77_v41 = vld [vmem:[%s1345_s0 + $0x1f8] sm:$0xff] }
  0x36   :  { %581 = vst.msk [vmem:[%s1348_s3 + $0xa0] sm:$0xf] %vm540_vm0, %v715_v45  ;;  %v719_v59 = vpack.c.bf16 %v264_v46, %v264_v46  ;;  %v720_v60 = vpack.c.bf16 %v265_v47, %v265_v47  ;;  %v721_v61 = vpack.c.bf16 %v266_v48, %v266_v48  ;;  %v133_v62 = vmul.f32 %v765_v1, %v62_v44 }
  0x37   :  { %582 = vst.msk [vmem:[%s1348_s3 + $0xa4] sm:$0xf] %vm540_vm0, %v716_v52  ;;  %583 = vst.msk [vmem:[%s1348_s3 + $0xa8] sm:$0xf] %vm540_vm0, %v717_v53  ;;  %v722_v0 = vpack.c.bf16 %v267_v55, %v267_v55  ;;  %v134_v3 = vmul.f32 %v765_v1, %v63_v49  ;;  %v135_v4 = vmul.f32 %v765_v1, %v64_v50 }
  0x38   :  { %584 = vst.msk [vmem:[%s1348_s3 + $0xac] sm:$0xf] %vm540_vm0, %v718_v54  ;;  %v136_v5 = vmul.f32 %v765_v1, %v65_v51  ;;  %585 = vst.msk [vmem:[%s1348_s3 + $0xb0] sm:$0xf] %vm540_vm0, %v719_v59  ;;  %v204_v6 = vadd.f32 %v770_v2, %v133_v62  ;;  %v137_v7 = vmul.f32 %v765_v1, %v66_v56 }
  0x39   :  { %586 = vst.msk [vmem:[%s1348_s3 + $0xb4] sm:$0xf] %vm540_vm0, %v720_v60  ;;  %587 = vst.msk [vmem:[%s1348_s3 + $0xb8] sm:$0xf] %vm540_vm0, %v721_v61  ;;  %v138_v8 = vmul.f32 %v765_v1, %v67_v57  ;;  %v139_v9 = vmul.f32 %v765_v1, %v68_v58  ;;  %v205_v10 = vadd.f32 %v770_v2, %v134_v3 }
  0x3a   :  { %588 = vst.msk [vmem:[%s1348_s3 + $0xbc] sm:$0xf] %vm540_vm0, %v722_v0  ;;  %v206_v11 = vadd.f32 %v770_v2, %v135_v4  ;;  %v207_v12 = vadd.f32 %v770_v2, %v136_v5  ;;  %v140_v13 = vmul.f32 %v765_v1, %v69_v63  ;;  %v268_v14 = vmax.f32 %v204_v6, 0.0 }
  0x3b   :  { %v208_v15 = vadd.f32 %v770_v2, %v137_v7  ;;  %v209_v16 = vadd.f32 %v770_v2, %v138_v8  ;;  %v210_v17 = vadd.f32 %v770_v2, %v139_v9  ;;  %v269_v18 = vmax.f32 %v205_v10, 0.0 }
  0x3c   :  { %v270_v19 = vmax.f32 %v206_v11, 0.0  ;;  %v271_v20 = vmax.f32 %v207_v12, 0.0  ;;  %v211_v21 = vadd.f32 %v770_v2, %v140_v13  ;;  %v723_v23 = vpack.c.bf16 %v268_v14, %v268_v14 }
  0x3d   :  { %v272_v24 = vmax.f32 %v208_v15, 0.0  ;;  %v273_v25 = vmax.f32 %v209_v16, 0.0  ;;  %v274_v26 = vmax.f32 %v210_v17, 0.0  ;;  %v724_v30 = vpack.c.bf16 %v269_v18, %v269_v18 }
  0x3e   :  { %v725_v31 = vpack.c.bf16 %v270_v19, %v270_v19  ;;  %v726_v32 = vpack.c.bf16 %v271_v20, %v271_v20  ;;  %v275_v33 = vmax.f32 %v211_v21, 0.0  ;;  %589 = vst.msk [vmem:[%s1348_s3 + $0xc0] sm:$0xf] %vm540_vm0, %v723_v23  ;;  %v141_v40 = vmul.f32 %v765_v1, %v70_v22 }
  0x3f   :  { %v727_v37 = vpack.c.bf16 %v272_v24, %v272_v24  ;;  %v728_v38 = vpack.c.bf16 %v273_v25, %v273_v25  ;;  %v729_v39 = vpack.c.bf16 %v274_v26, %v274_v26  ;;  %590 = vst.msk [vmem:[%s1348_s3 + $0xc4] sm:$0xf] %vm540_vm0, %v724_v30  ;;  %v142_v43 = vmul.f32 %v765_v1, %v71_v27 }
  0x40   :  { %591 = vst.msk [vmem:[%s1348_s3 + $0xc8] sm:$0xf] %vm540_vm0, %v725_v31  ;;  %592 = vst.msk [vmem:[%s1348_s3 + $0xcc] sm:$0xf] %vm540_vm0, %v726_v32  ;;  %v730_v42 = vpack.c.bf16 %v275_v33, %v275_v33  ;;  %v143_v44 = vmul.f32 %v765_v1, %v72_v28  ;;  %v144_v45 = vmul.f32 %v765_v1, %v73_v29 }
  0x41   :  { %593 = vst.msk [vmem:[%s1348_s3 + $0xd0] sm:$0xf] %vm540_vm0, %v727_v37  ;;  %594 = vst.msk [vmem:[%s1348_s3 + $0xd4] sm:$0xf] %vm540_vm0, %v728_v38  ;;  %v212_v46 = vadd.f32 %v770_v2, %v141_v40  ;;  %v145_v47 = vmul.f32 %v765_v1, %v74_v34  ;;  %v146_v48 = vmul.f32 %v765_v1, %v75_v35 }
  0x42   :  { %595 = vst.msk [vmem:[%s1348_s3 + $0xd8] sm:$0xf] %vm540_vm0, %v729_v39  ;;  %v147_v49 = vmul.f32 %v765_v1, %v76_v36  ;;  %596 = vst.msk [vmem:[%s1348_s3 + $0xdc] sm:$0xf] %vm540_vm0, %v730_v42  ;;  %v213_v50 = vadd.f32 %v770_v2, %v142_v43  ;;  %v214_v51 = vadd.f32 %v770_v2, %v143_v44 }
  0x43   :  { %v215_v52 = vadd.f32 %v770_v2, %v144_v45  ;;  %v148_v53 = vmul.f32 %v765_v1, %v77_v41  ;;  %v276_v54 = vmax.f32 %v212_v46, 0.0  ;;  %v216_v55 = vadd.f32 %v770_v2, %v145_v47 }
  0x44   :  { %v217_v56 = vadd.f32 %v770_v2, %v146_v48  ;;  %v218_v57 = vadd.f32 %v770_v2, %v147_v49  ;;  %v277_v58 = vmax.f32 %v213_v50, 0.0  ;;  %v278_v59 = vmax.f32 %v214_v51, 0.0 }
  0x45   :  { %v279_v60 = vmax.f32 %v215_v52, 0.0  ;;  %v219_v61 = vadd.f32 %v770_v2, %v148_v53  ;;  %v731_v62 = vpack.c.bf16 %v276_v54, %v276_v54  ;;  %v280_v63 = vmax.f32 %v216_v55, 0.0 }
  0x46   :  { %v281_v0 = vmax.f32 %v217_v56, 0.0  ;;  %v282_v3 = vmax.f32 %v218_v57, 0.0  ;;  %v732_v4 = vpack.c.bf16 %v277_v58, %v277_v58  ;;  %v733_v5 = vpack.c.bf16 %v278_v59, %v278_v59 }
  0x47   :  { %v734_v6 = vpack.c.bf16 %v279_v60, %v279_v60  ;;  %v283_v1 = vmax.f32 %v219_v61, 0.0  ;;  %597 = vst.msk [vmem:[%s1348_s3 + $0xe0] sm:$0xf] %vm540_vm0, %v731_v62  ;;  %v735_v7 = vpack.c.bf16 %v280_v63, %v280_v63 }
  0x48   :  { %v736_v8 = vpack.c.bf16 %v281_v0, %v281_v0  ;;  %v737_v9 = vpack.c.bf16 %v282_v3, %v282_v3  ;;  %598 = vst.msk [vmem:[%s1348_s3 + $0xe4] sm:$0xf] %vm540_vm0, %v732_v4  ;;  %599 = vst.msk [vmem:[%s1348_s3 + $0xe8] sm:$0xf] %vm540_vm0, %v733_v5 }
  0x49   :  { %600 = vst.msk [vmem:[%s1348_s3 + $0xec] sm:$0xf] %vm540_vm0, %v734_v6  ;;  %v738_v2 = vpack.c.bf16 %v283_v1, %v283_v1  ;;  %601 = vst.msk [vmem:[%s1348_s3 + $0xf0] sm:$0xf] %vm540_vm0, %v735_v7 }
  0x4a   :  { %602 = vst.msk [vmem:[%s1348_s3 + $0xf4] sm:$0xf] %vm540_vm0, %v736_v8  ;;  %603 = vst.msk [vmem:[%s1348_s3 + $0xf8] sm:$0xf] %vm540_vm0, %v737_v9 }
  0x4b   :  { %604 = vst.msk [vmem:[%s1348_s3 + $0xfc] sm:$0xf] %vm540_vm0, %v738_v2 }

// kernel: allconv_forward.14
= control target key start
LH: loop header
LB: loop body
LE: loop exit
PB: predicated region body
PF: predicated region fallthrough
CT: control target
= control target key end

     0   :  { %v2447_v0 = vmov 0   ;;  %vm958_vm0 = vcmask 130048   ;;  %vm1633_vm1 = vcmask 261120   ;;  %vm147_vm2 = vcmask 253952   ;;  %s3684_s1 = inlined_call_operand.vmem [shape: bf16[400,32], index: 1, kind: input, shape index: {}]   ;;  %s3685_s0 = inlined_call_operand.vmem [shape: bf16[512,400], index: 0, kind: input, shape index: {}]   ;;  %s3686_s2 = inlined_call_operand.vmem [shape: f32[512,32], index: 2, kind: output, shape index: {0}]   ;;  %s3687_s3 = inlined_call_operand.vmem [shape: f32[1,32], index: 3, kind: output, shape index: {1}]   ;;  %s3688_s4 = inlined_call_operand.vmem [shape: f32[1,32], index: 4, kind: output, shape index: {2}]  }
   0x1   :  { %1055 = vmatprep.subr.bf16.mxu0 %v2447_v0  ;;  %v2234_v1 = vld [vmem:[%s3684_s1 + $0x38] sm:$0xff]   ;;  %1344 = vmatprep.subr.bf16.mxu1 %v2447_v0  ;;  %v2235_v2 = vld [vmem:[%s3684_s1 + $0x30] sm:$0xff]   ;;  %v2236_v3 = vld [vmem:[%s3684_s1 + $0x28] sm:$0xff]  }
   0x2   :  { %1056 = vmatpush1.bf16.msra.mxu0 %v2234_v1  ;;  %v2240_v4 = vld [vmem:[%s3684_s1 + $0xb8] sm:$0xff]   ;;  %v2242_v5 = vld [vmem:[%s3684_s1 + $0xb0] sm:$0xff]   ;;  %v2237_v6 = vld [vmem:[%s3684_s1 + $0x20] sm:$0xff]  }
   0x3   :  { %1057 = vmatprep.subr.bf16.mxu0 %v2447_v0  ;;  %1345 = vmatpush1.bf16.msra.mxu1 %v2240_v4  ;;  %v2244_v7 = vld [vmem:[%s3684_s1 + $0xa8] sm:$0xff]   ;;  %v2238_v8 = vld [vmem:[%s3684_s1 + $0x18] sm:$0xff]   ;;  %v2246_v9 = vld [vmem:[%s3684_s1 + $0xa0] sm:$0xff]  }
   0x4   :  { %1346 = vmatprep.subr.bf16.mxu1 %v2447_v0  ;;  %v2239_v10 = vld [vmem:[%s3684_s1 + $0x10] sm:$0xff]   ;;  %v2248_v11 = vld [vmem:[%s3684_s1 + $0x98] sm:$0xff]   ;;  %v2241_v12 = vld [vmem:[%s3684_s1 + $0x8] sm:$0xff]  }
   0x5   :  { %v2250_v13 = vld [vmem:[%s3684_s1 + $0x90] sm:$0xff]   ;;  %v2260_v14 = vld [vmem:[%s3685_s0 + $0xc] ss:$16 sps:$4 sm:$0xff]   ;;  %v2243_v15 = vld [vmem:[%s3684_s1] sm:$0xff]  }
   0x6   :  { %1058 = vmatpush1.bf16.msra.mxu0 %v2235_v2  ;;  %2200 = vmatprep.mubr.msk.bf16.mxu1 %vm958_vm0, %v2260_v14  ;;  %v2264_v16 = vld [vmem:[%s3685_s0 + $0x4] ss:$16 sps:$4 sm:$0xff]   ;;  %v2252_v17 = vld [vmem:[%s3684_s1 + $0x88] sm:$0xff]   ;;  %v2245_v18 = vld [vmem:[%s3684_s1 + $0x78] sm:$0xff]  }
   0x7   :  { %1059 = vmatprep.subr.bf16.mxu0 %v2447_v0  ;;  %1347 = vmatpush1.bf16.msra.mxu1 %v2242_v5  ;;  %v2254_v19 = vld [vmem:[%s3684_s1 + $0x80] sm:$0xff]   ;;  %v2247_v20 = vld [vmem:[%s3684_s1 + $0x70] sm:$0xff]   ;;  %v2249_v22 = vld [vmem:[%s3684_s1 + $0x68] sm:$0xff]  }
   0x8   :  { %1348 = vmatprep.subr.bf16.mxu1 %v2447_v0  ;;  %1087 = vmatprep.mubr.bf16.mxu0 %v2264_v16  ;;  %v2256_v21 = vld [vmem:[%s3684_s1 + $0xc0] sm:$0xff]   ;;  %v2258_v23 = vld [vmem:[%s3685_s0 + $0x8] ss:$16 sps:$4 sm:$0xff]   ;;  %v2265_v24 = vld [vmem:[%s3685_s0 + $0x2c] ss:$16 sps:$4 sm:$0xff]  }
   0x9   :  { %v2251_v25 = vld [vmem:[%s3684_s1 + $0x60] sm:$0xff]   ;;  %v2253_v26 = vld [vmem:[%s3684_s1 + $0x58] sm:$0xff]   ;;  %v2255_v29 = vld [vmem:[%s3684_s1 + $0x50] sm:$0xff]  }
   0xa   :  { %1060 = vmatpush1.bf16.msra.mxu0 %v2236_v3  ;;  %v2267_v27 = vld [vmem:[%s3685_s0 + $0x28] ss:$16 sps:$4 sm:$0xff]   ;;  %v2271_v28 = vld [vmem:[%s3685_s0 + $0x4c] ss:$16 sps:$4 sm:$0xff]   ;;  %v2261_v33 = vld [vmem:[%s3684_s1 + $0x40] sm:$0xff]  }
   0xb   :  { %1061 = vmatprep.subr.bf16.mxu0 %v2447_v0  ;;  %1349 = vmatpush1.bf16.msra.mxu1 %v2244_v7  ;;  %v2257_v30 = vld [vmem:[%s3684_s1 + $0x48] sm:$0xff]   ;;  %v2262_v34 = vld [vmem:[%s3685_s0] ss:$16 sps:$4 sm:$0xff]   ;;  %v2268_v35 = vld [vmem:[%s3685_s0 + $0x24] ss:$16 sps:$4 sm:$0xff]  }
   0xc   :  { %1350 = vmatprep.subr.bf16.mxu1 %v2447_v0  ;;  %v2273_v31 = vld [vmem:[%s3685_s0 + $0x48] ss:$16 sps:$4 sm:$0xff]   ;;  %v2277_v32 = vld [vmem:[%s3685_s0 + $0x6c] ss:$16 sps:$4 sm:$0xff]   ;;  %v2270_v38 = vld [vmem:[%s3685_s0 + $0x20] ss:$16 sps:$4 sm:$0xff]  }
   0xd   :  { %v2279_v36 = vld [vmem:[%s3685_s0 + $0x68] ss:$16 sps:$4 sm:$0xff]   ;;  %v2283_v37 = vld [vmem:[%s3685_s0 + $0x8c] ss:$16 sps:$4 sm:$0xff]   ;;  %v2274_v39 = vld [vmem:[%s3685_s0 + $0x44] ss:$16 sps:$4 sm:$0xff]  }
   0xe   :  { %1062 = vmatpush1.bf16.msra.mxu0 %v2237_v6  ;;  %v2285_v40 = vld [vmem:[%s3685_s0 + $0x88] ss:$16 sps:$4 sm:$0xff]   ;;  %v2289_v41 = vld [vmem:[%s3685_s0 + $0xac] ss:$16 sps:$4 sm:$0xff]   ;;  %v2276_v42 = vld [vmem:[%s3685_s0 + $0x40] ss:$16 sps:$4 sm:$0xff]  }
   0xf   :  { %1063 = vmatprep.subr.bf16.mxu0 %v2447_v0  ;;  %1351 = vmatpush1.bf16.msra.mxu1 %v2246_v9  ;;  %v2280_v43 = vld [vmem:[%s3685_s0 + $0x64] ss:$16 sps:$4 sm:$0xff]   ;;  %v2291_v44 = vld [vmem:[%s3685_s0 + $0xa8] ss:$16 sps:$4 sm:$0xff]   ;;  %v2295_v45 = vld [vmem:[%s3685_s0 + $0xcc] ss:$16 sps:$4 sm:$0xff]  }
  0x10   :  { %1352 = vmatprep.subr.bf16.mxu1 %v2447_v0  ;;  %v2282_v46 = vld [vmem:[%s3685_s0 + $0x60] ss:$16 sps:$4 sm:$0xff]   ;;  %v2286_v47 = vld [vmem:[%s3685_s0 + $0x84] ss:$16 sps:$4 sm:$0xff]   ;;  %v2297_v48 = vld [vmem:[%s3685_s0 + $0xc8] ss:$16 sps:$4 sm:$0xff]  }
  0x11   :  { %v2301_v49 = vld [vmem:[%s3685_s0 + $0xec] ss:$16 sps:$4 sm:$0xff]   ;;  %v2288_v50 = vld [vmem:[%s3685_s0 + $0x80] ss:$16 sps:$4 sm:$0xff]   ;;  %v2292_v51 = vld [vmem:[%s3685_s0 + $0xa4] ss:$16 sps:$4 sm:$0xff]  }
  0x12   :  { %1064 = vmatpush1.bf16.msra.mxu0 %v2238_v8  ;;  %v2303_v52 = vld [vmem:[%s3685_s0 + $0xe8] ss:$16 sps:$4 sm:$0xff]   ;;  %v2307_v53 = vld [vmem:[%s3685_s0 + $0x10c] ss:$16 sps:$4 sm:$0xff]   ;;  %v2294_v54 = vld [vmem:[%s3685_s0 + $0xa0] ss:$16 sps:$4 sm:$0xff]  }
  0x13   :  { %1065 = vmatprep.subr.bf16.mxu0 %v2447_v0  ;;  %1353 = vmatpush1.bf16.msra.mxu1 %v2248_v11  ;;  %v2298_v55 = vld [vmem:[%s3685_s0 + $0xc4] ss:$16 sps:$4 sm:$0xff]   ;;  %v2309_v56 = vld [vmem:[%s3685_s0 + $0x108] ss:$16 sps:$4 sm:$0xff]   ;;  %v2313_v57 = vld [vmem:[%s3685_s0 + $0x12c] ss:$16 sps:$4 sm:$0xff]  }
  0x14   :  { %1354 = vmatprep.subr.bf16.mxu1 %v2447_v0  ;;  %v2300_v58 = vld [vmem:[%s3685_s0 + $0xc0] ss:$16 sps:$4 sm:$0xff]   ;;  %v2304_v59 = vld [vmem:[%s3685_s0 + $0xe4] ss:$16 sps:$4 sm:$0xff]   ;;  %v2315_v60 = vld [vmem:[%s3685_s0 + $0x128] ss:$16 sps:$4 sm:$0xff]  }
  0x15   :  { %v2319_v61 = vld [vmem:[%s3685_s0 + $0x14c] ss:$16 sps:$4 sm:$0xff]   ;;  %v2306_v62 = vld [vmem:[%s3685_s0 + $0xe0] ss:$16 sps:$4 sm:$0xff]   ;;  %v2310_v63 = vld [vmem:[%s3685_s0 + $0x104] ss:$16 sps:$4 sm:$0xff]  }
  0x16   :  { %1066 = vmatpush1.bf16.msra.mxu0 %v2239_v10  ;;  %v2325_v1 = vld [vmem:[%s3685_s0 + $0x16c] ss:$16 sps:$4 sm:$0xff]   ;;  %v2312_v2 = vld [vmem:[%s3685_s0 + $0x100] ss:$16 sps:$4 sm:$0xff]   ;;  %v2316_v3 = vld [vmem:[%s3685_s0 + $0x124] ss:$16 sps:$4 sm:$0xff]  }
  0x17   :  { %1067 = vmatprep.subr.bf16.mxu0 %v2447_v0  ;;  %1355 = vmatpush1.bf16.msra.mxu1 %v2250_v13  ;;  %v2327_v4 = vld [vmem:[%s3685_s0 + $0x168] ss:$16 sps:$4 sm:$0xff]   ;;  %v2331_v5 = vld [vmem:[%s3685_s0 + $0x18c] ss:$16 sps:$4 sm:$0xff]   ;;  %v2318_v6 = vld [vmem:[%s3685_s0 + $0x120] ss:$16 sps:$4 sm:$0xff]  }
  0x18   :  { %1356 = vmatprep.subr.bf16.mxu1 %v2447_v0  ;;  %v2322_v7 = vld [vmem:[%s3685_s0 + $0x144] ss:$16 sps:$4 sm:$0xff]   ;;  %v2333_v8 = vld [vmem:[%s3685_s0 + $0x188] ss:$16 sps:$4 sm:$0xff]   ;;  %v2337_v9 = vld [vmem:[%s3685_s0 + $0x1ac] ss:$16 sps:$4 sm:$0xff]  }
  0x19   :  { %v2324_v10 = vld [vmem:[%s3685_s0 + $0x140] ss:$16 sps:$4 sm:$0xff]   ;;  %v2328_v11 = vld [vmem:[%s3685_s0 + $0x164] ss:$16 sps:$4 sm:$0xff]   ;;  %v2343_v13 = vld [vmem:[%s3685_s0 + $0x1cc] ss:$16 sps:$4 sm:$0xff]  }
  0x1a   :  { %1068 = vmatpush1.bf16.msra.mxu0 %v2241_v12  ;;  %v2339_v12 = vld [vmem:[%s3685_s0 + $0x1a8] ss:$16 sps:$4 sm:$0xff]   ;;  %v2330_v14 = vld [vmem:[%s3685_s0 + $0x160] ss:$16 sps:$4 sm:$0xff]  }
  0x1b   :  { %1069 = vmatprep.subr.bf16.mxu0 %v2447_v0  ;;  %1357 = vmatpush1.bf16.msra.mxu1 %v2252_v17  ;;  %v2345_v16 = vld [vmem:[%s3685_s0 + $0x1c8] ss:$16 sps:$4 sm:$0xff]   ;;  %v2349_v17 = vld [vmem:[%s3685_s0 + $0x1ec] ss:$16 sps:$4 sm:$0xff]  }
  0x1c   :  { %1358 = vmatprep.subr.bf16.mxu1 %v2447_v0 }
  0x1e   :  { %1070 = vmatpush1.bf16.msra.mxu0 %v2243_v15  ;;  %v2334_v15 = vld [vmem:[%s3685_s0 + $0x184] ss:$16 sps:$4 sm:$0xff]  }
  0x1f   :  { %1071 = vmatprep.subr.bf16.mxu0 %v2447_v0  ;;  %1359 = vmatpush1.bf16.msra.mxu1 %v2254_v19  ;;  %v2340_v19 = vld [vmem:[%s3685_s0 + $0x1a4] ss:$16 sps:$4 sm:$0xff]  }
  0x20   :  { %1374 = vmatprep.subr.bf16.mxu1 %v2447_v0 }
  0x22   :  { %1072 = vmatpush2.bf16.msra.mxu0 %v2245_v18  ;;  %v2336_v18 = vld [vmem:[%s3685_s0 + $0x180] ss:$16 sps:$4 sm:$0xff]  }
  0x23   :  { %1073 = vmatprep.subr.bf16.mxu0 %v2447_v0  ;;  %1375 = vmatpush2.bf16.msra.mxu1 %v2256_v21  ;;  %v2355_v21 = vld [vmem:[%s3685_s0 + $0x20c] ss:$16 sps:$4 sm:$0xff]  }
  0x26   :  { %1074 = vmatpush2.bf16.msra.mxu0 %v2247_v20  ;;  %1377 = vmatmul.mubr.bf16.vlgmr.msra.gmra.mxu1 %v2258_v23  ;;  %v2351_v20 = vld [vmem:[%s3685_s0 + $0x1e8] ss:$16 sps:$4 sm:$0xff]   ;;  %v2346_v23 = vld [vmem:[%s3685_s0 + $0x1c4] ss:$16 sps:$4 sm:$0xff]  }
  0x27   :  { %1075 = vmatprep.subr.bf16.mxu0 %v2447_v0  ;;  %2201 = vmatprep.mubr.msk.bf16.mxu1 %vm958_vm0, %v2265_v24  ;;  %v2357_v24 = vld [vmem:[%s3685_s0 + $0x208] ss:$16 sps:$4 sm:$0xff]  }
  0x2a   :  { %1076 = vmatpush2.bf16.msra.mxu0 %v2249_v22  ;;  %v2342_v22 = vld [vmem:[%s3685_s0 + $0x1a0] ss:$16 sps:$4 sm:$0xff]  }
  0x2b   :  { %1077 = vmatprep.subr.bf16.mxu0 %v2447_v0 }
  0x2e   :  { %1078 = vmatpush2.bf16.msra.mxu0 %v2251_v25  ;;  %1385 = vmatmul.mubr.bf16.gmra.mxu1 %v2267_v27  ;;  %v2361_v25 = vld [vmem:[%s3685_s0 + $0x22c] ss:$16 sps:$4 sm:$0xff]   ;;  %v2352_v27 = vld [vmem:[%s3685_s0 + $0x1e4] ss:$16 sps:$4 sm:$0xff]  }
  0x2f   :  { %1079 = vmatprep.subr.bf16.mxu0 %v2447_v0  ;;  %2202 = vmatprep.mubr.msk.bf16.mxu1 %vm958_vm0, %v2271_v28  ;;  %v2363_v28 = vld [vmem:[%s3685_s0 + $0x228] ss:$16 sps:$4 sm:$0xff]  }
  0x32   :  { %1080 = vmatpush2.bf16.msra.mxu0 %v2253_v26  ;;  %v2348_v26 = vld [vmem:[%s3685_s0 + $0x1c0] ss:$16 sps:$4 sm:$0xff]  }
  0x33   :  { %1081 = vmatprep.subr.bf16.mxu0 %v2447_v0 }
  0x36   :  { %1082 = vmatpush2.bf16.msra.mxu0 %v2255_v29  ;;  %1393 = vmatmul.mubr.bf16.gmra.mxu1 %v2273_v31  ;;  %v2367_v29 = vld [vmem:[%s3685_s0 + $0x24c] ss:$16 sps:$4 sm:$0xff]   ;;  %v2358_v31 = vld [vmem:[%s3685_s0 + $0x204] ss:$16 sps:$4 sm:$0xff]  }
  0x37   :  { %1083 = vmatprep.subr.bf16.mxu0 %v2447_v0  ;;  %2203 = vmatprep.mubr.msk.bf16.mxu1 %vm958_vm0, %v2277_v32  ;;  %v2369_v32 = vld [vmem:[%s3685_s0 + $0x248] ss:$16 sps:$4 sm:$0xff]  }
  0x3a   :  { %1084 = vmatpush2.bf16.msra.mxu0 %v2257_v30  ;;  %v2354_v30 = vld [vmem:[%s3685_s0 + $0x1e0] ss:$16 sps:$4 sm:$0xff]  }
  0x3b   :  { %1085 = vmatprep.subr.bf16.mxu0 %v2447_v0  ;;  %v2321_v0 = vld [vmem:[%s3685_s0 + $0x148] ss:$16 sps:$4 sm:$0xff]  }
  0x3e   :  { %1086 = vmatpush2.bf16.msra.mxu0 %v2261_v33  ;;  %1401 = vmatmul.mubr.bf16.gmra.mxu1 %v2279_v36  ;;  %v2373_v33 = vld [vmem:[%s3685_s0 + $0x26c] ss:$16 sps:$4 sm:$0xff]   ;;  %v2375_v36 = vld [vmem:[%s3685_s0 + $0x268] ss:$16 sps:$4 sm:$0xff]  }
  0x3f   :  { %2204 = vmatprep.mubr.msk.bf16.mxu1 %vm958_vm0, %v2283_v37  ;;  %v2379_v37 = vld [vmem:[%s3685_s0 + $0x28c] ss:$16 sps:$4 sm:$0xff]  }
  0x41   :  { %1088 = vmatmul.mubr.bf16.vlgmr.msra.gmra.mxu0 %v2262_v34  ;;  %v2360_v34 = vld [vmem:[%s3685_s0 + $0x200] ss:$16 sps:$4 sm:$0xff]  }
  0x42   :  { %1095 = vmatprep.mubr.bf16.mxu0 %v2268_v35  ;;  %v2364_v35 = vld [vmem:[%s3685_s0 + $0x224] ss:$16 sps:$4 sm:$0xff]  }
  0x46   :  { %1409 = vmatmul.mubr.bf16.gmra.mxu1 %v2285_v40  ;;  %v2381_v40 = vld [vmem:[%s3685_s0 + $0x288] ss:$16 sps:$4 sm:$0xff]  }
  0x47   :  { %2205 = vmatprep.mubr.msk.bf16.mxu1 %vm958_vm0, %v2289_v41  ;;  %v2385_v41 = vld [vmem:[%s3685_s0 + $0x2ac] ss:$16 sps:$4 sm:$0xff]  }
  0x49   :  { %1096 = vmatmul.mubr.bf16.gmra.mxu0 %v2270_v38  ;;  %v2366_v38 = vld [vmem:[%s3685_s0 + $0x220] ss:$16 sps:$4 sm:$0xff]  }
  0x4a   :  { %1103 = vmatprep.mubr.bf16.mxu0 %v2274_v39  ;;  %v2370_v39 = vld [vmem:[%s3685_s0 + $0x244] ss:$16 sps:$4 sm:$0xff]  }
  0x4e   :  { %1417 = vmatmul.mubr.bf16.gmra.mxu1 %v2291_v44  ;;  %v2387_v44 = vld [vmem:[%s3685_s0 + $0x2a8] ss:$16 sps:$4 sm:$0xff]  }
  0x4f   :  { %2206 = vmatprep.mubr.msk.bf16.mxu1 %vm958_vm0, %v2295_v45  ;;  %v2391_v45 = vld [vmem:[%s3685_s0 + $0x2cc] ss:$16 sps:$4 sm:$0xff]  }
  0x51   :  { %1104 = vmatmul.mubr.bf16.gmra.mxu0 %v2276_v42  ;;  %v2372_v42 = vld [vmem:[%s3685_s0 + $0x240] ss:$16 sps:$4 sm:$0xff]  }
  0x52   :  { %1111 = vmatprep.mubr.bf16.mxu0 %v2280_v43  ;;  %v2376_v43 = vld [vmem:[%s3685_s0 + $0x264] ss:$16 sps:$4 sm:$0xff]  }
  0x56   :  { %1425 = vmatmul.mubr.bf16.gmra.mxu1 %v2297_v48  ;;  %v2393_v48 = vld [vmem:[%s3685_s0 + $0x2c8] ss:$16 sps:$4 sm:$0xff]  }
  0x57   :  { %2207 = vmatprep.mubr.msk.bf16.mxu1 %vm958_vm0, %v2301_v49  ;;  %v2397_v49 = vld [vmem:[%s3685_s0 + $0x2ec] ss:$16 sps:$4 sm:$0xff]  }
  0x59   :  { %1112 = vmatmul.mubr.bf16.gmra.mxu0 %v2282_v46  ;;  %v2378_v46 = vld [vmem:[%s3685_s0 + $0x260] ss:$16 sps:$4 sm:$0xff]  }
  0x5a   :  { %1119 = vmatprep.mubr.bf16.mxu0 %v2286_v47  ;;  %v2382_v47 = vld [vmem:[%s3685_s0 + $0x284] ss:$16 sps:$4 sm:$0xff]  }
  0x5e   :  { %1433 = vmatmul.mubr.bf16.gmra.mxu1 %v2303_v52  ;;  %v2399_v52 = vld [vmem:[%s3685_s0 + $0x2e8] ss:$16 sps:$4 sm:$0xff]  }
  0x5f   :  { %2208 = vmatprep.mubr.msk.bf16.mxu1 %vm958_vm0, %v2307_v53  ;;  %v2403_v53 = vld [vmem:[%s3685_s0 + $0x30c] ss:$16 sps:$4 sm:$0xff]  }
  0x61   :  { %1120 = vmatmul.mubr.bf16.gmra.mxu0 %v2288_v50  ;;  %v2384_v50 = vld [vmem:[%s3685_s0 + $0x280] ss:$16 sps:$4 sm:$0xff]  }
  0x62   :  { %1127 = vmatprep.mubr.bf16.mxu0 %v2292_v51  ;;  %v2388_v51 = vld [vmem:[%s3685_s0 + $0x2a4] ss:$16 sps:$4 sm:$0xff]  }
  0x66   :  { %1441 = vmatmul.mubr.bf16.gmra.mxu1 %v2309_v56  ;;  %v2405_v56 = vld [vmem:[%s3685_s0 + $0x308] ss:$16 sps:$4 sm:$0xff]  }
  0x67   :  { %2209 = vmatprep.mubr.msk.bf16.mxu1 %vm958_vm0, %v2313_v57  ;;  %v2408_v57 = vld [vmem:[%s3685_s0 + $0x32c] ss:$16 sps:$4 sm:$0xff]  }
  0x69   :  { %1128 = vmatmul.mubr.bf16.gmra.mxu0 %v2294_v54  ;;  %v2390_v54 = vld [vmem:[%s3685_s0 + $0x2a0] ss:$16 sps:$4 sm:$0xff]  }
  0x6a   :  { %1135 = vmatprep.mubr.bf16.mxu0 %v2298_v55  ;;  %v2394_v55 = vld [vmem:[%s3685_s0 + $0x2c4] ss:$16 sps:$4 sm:$0xff]  }
  0x6e   :  { %1449 = vmatmul.mubr.bf16.gmra.mxu1 %v2315_v60 }
  0x6f   :  { %2210 = vmatprep.mubr.msk.bf16.mxu1 %vm958_vm0, %v2319_v61  ;;  %v2400_v61 = vld [vmem:[%s3685_s0 + $0x2e4] ss:$16 sps:$4 sm:$0xff]  }
  0x71   :  { %1136 = vmatmul.mubr.bf16.gmra.mxu0 %v2300_v58 }
  0x72   :  { %1143 = vmatprep.mubr.bf16.mxu0 %v2304_v59  ;;  %v2396_v59 = vld [vmem:[%s3685_s0 + $0x2c0] ss:$16 sps:$4 sm:$0xff]  }
  0x76   :  { %1457 = vmatmul.mubr.bf16.gmra.mxu1 %v2321_v0  ;;  %v2413_v0 = vld [vmem:[%s3685_s0 + $0x34c] ss:$16 sps:$4 sm:$0xff]  }
  0x77   :  { %2211 = vmatprep.mubr.msk.bf16.mxu1 %vm958_vm0, %v2325_v1 }
  0x79   :  { %1144 = vmatmul.mubr.bf16.gmra.mxu0 %v2306_v62 }
  0x7a   :  { %1151 = vmatprep.mubr.bf16.mxu0 %v2310_v63  ;;  %v2410_v63 = vld [vmem:[%s3685_s0 + $0x328] ss:$16 sps:$4 sm:$0xff]  }
  0x7e   :  { %1465 = vmatmul.mubr.bf16.gmra.mxu1 %v2327_v4 }
  0x7f   :  { %2212 = vmatprep.mubr.msk.bf16.mxu1 %vm958_vm0, %v2331_v5  ;;  %v2406_v5 = vld [vmem:[%s3685_s0 + $0x304] ss:$16 sps:$4 sm:$0xff]  }
  0x81   :  { %1152 = vmatmul.mubr.bf16.gmra.mxu0 %v2312_v2 }
  0x82   :  { %1159 = vmatprep.mubr.bf16.mxu0 %v2316_v3  ;;  %v2402_v3 = vld [vmem:[%s3685_s0 + $0x2e0] ss:$16 sps:$4 sm:$0xff]  }
  0x86   :  { %1473 = vmatmul.mubr.bf16.gmra.mxu1 %v2333_v8  ;;  %v2418_v8 = vld [vmem:[%s3685_s0 + $0x36c] ss:$16 sps:$4 sm:$0xff]  }
  0x87   :  { %2213 = vmatprep.mubr.msk.bf16.mxu1 %vm958_vm0, %v2337_v9 }
  0x89   :  { %1160 = vmatmul.mubr.bf16.gmra.mxu0 %v2318_v6 }
  0x8a   :  { %1167 = vmatprep.mubr.bf16.mxu0 %v2322_v7  ;;  %v2415_v7 = vld [vmem:[%s3685_s0 + $0x348] ss:$16 sps:$4 sm:$0xff]  }
  0x8e   :  { %1481 = vmatmul.mubr.bf16.gmra.mxu1 %v2339_v12 }
  0x8f   :  { %2214 = vmatprep.mubr.msk.bf16.mxu1 %vm958_vm0, %v2343_v13 }
  0x91   :  { %1168 = vmatmul.mubr.bf16.gmra.mxu0 %v2324_v10  ;;  %v111_v10 = vld [vmem:[%s3685_s0 + $0x300] sm:$0xff] }
  0x92   :  { %1175 = vmatprep.mubr.bf16.mxu0 %v2328_v11  ;;  %v113_v11 = vld [vmem:[%s3685_s0 + $0x310] sm:$0xff] }
  0x93   :  { %v2143_v13 = vcombine.low %v111_v10, %v113_v11 }
  0x96   :  { %1489 = vmatmul.mubr.bf16.gmra.mxu1 %v2345_v16 }
  0x97   :  { %2215 = vmatprep.mubr.msk.bf16.mxu1 %vm958_vm0, %v2349_v17  ;;  %v2420_v17 = vld [vmem:[%s3685_s0 + $0x368] ss:$16 sps:$4 sm:$0xff]  }
  0x99   :  { %1176 = vmatmul.mubr.bf16.gmra.mxu0 %v2330_v14 }
  0x9a   :  { %1183 = vmatprep.mubr.bf16.mxu0 %v2334_v15  ;;  %v2411_v15 = vld [vmem:[%s3685_s0 + $0x324] ss:$16 sps:$4 sm:$0xff]  }
  0x9e   :  { %1497 = vmatmul.mubr.bf16.gmra.mxu1 %v2351_v20 }
  0x9f   :  { %2216 = vmatprep.mubr.msk.bf16.mxu1 %vm958_vm0, %v2355_v21 }
  0xa1   :  { %1184 = vmatmul.mubr.bf16.gmra.mxu0 %v2336_v18  ;;  %v2423_v18 = vld [vmem:[%s3685_s0 + $0x38c] ss:$16 sps:$4 sm:$0xff]  }
  0xa2   :  { %1191 = vmatprep.mubr.bf16.mxu0 %v2340_v19 }
  0xa6   :  { %1505 = vmatmul.mubr.bf16.gmra.mxu1 %v2357_v24 }
  0xa7   :  { %2217 = vmatprep.mubr.msk.bf16.mxu1 %vm958_vm0, %v2361_v25 }
  0xa9   :  { %1192 = vmatmul.mubr.bf16.gmra.mxu0 %v2342_v22  ;;  %v115_v22 = vld [vmem:[%s3685_s0 + $0x320] sm:$0xff] }
  0xaa   :  { %1199 = vmatprep.mubr.bf16.mxu0 %v2346_v23  ;;  %v117_v23 = vld [vmem:[%s3685_s0 + $0x330] sm:$0xff] }
  0xae   :  { %1513 = vmatmul.mubr.bf16.gmra.mxu1 %v2363_v28 }
  0xaf   :  { %2218 = vmatprep.mubr.msk.bf16.mxu1 %vm958_vm0, %v2367_v29 }
  0xb1   :  { %1200 = vmatmul.mubr.bf16.gmra.mxu0 %v2348_v26 }
  0xb2   :  { %1207 = vmatprep.mubr.bf16.mxu0 %v2352_v27  ;;  %v2147_v27 = vcombine.low %v115_v22, %v117_v23 }
  0xb6   :  { %1521 = vmatmul.mubr.bf16.gmra.mxu1 %v2369_v32 }
  0xb7   :  { %2219 = vmatprep.mubr.msk.bf16.mxu1 %vm958_vm0, %v2373_v33 }
  0xb9   :  { %1208 = vmatmul.mubr.bf16.gmra.mxu0 %v2354_v30 }
  0xba   :  { %1215 = vmatprep.mubr.bf16.mxu0 %v2358_v31  ;;  %v2416_v31 = vld [vmem:[%s3685_s0 + $0x344] ss:$16 sps:$4 sm:$0xff]  }
  0xbe   :  { %1529 = vmatmul.mubr.bf16.gmra.mxu1 %v2375_v36 }
  0xbf   :  { %2220 = vmatprep.mubr.msk.bf16.mxu1 %vm958_vm0, %v2379_v37 }
  0xc1   :  { %1216 = vmatmul.mubr.bf16.gmra.mxu0 %v2360_v34  ;;  %v2425_v34 = vld [vmem:[%s3685_s0 + $0x388] ss:$16 sps:$4 sm:$0xff]  }
  0xc2   :  { %1223 = vmatprep.mubr.bf16.mxu0 %v2364_v35 }
  0xc6   :  { %1537 = vmatmul.mubr.bf16.gmra.mxu1 %v2381_v40 }
  0xc7   :  { %2221 = vmatprep.mubr.msk.bf16.mxu1 %vm958_vm0, %v2385_v41 }
  0xc9   :  { %1224 = vmatmul.mubr.bf16.gmra.mxu0 %v2366_v38  ;;  %v2429_v38 = vld [vmem:[%s3685_s0 + $0x3ac] ss:$16 sps:$4 sm:$0xff]  }
  0xca   :  { %1231 = vmatprep.mubr.bf16.mxu0 %v2370_v39 }
  0xce   :  { %1545 = vmatmul.mubr.bf16.gmra.mxu1 %v2387_v44 }
  0xcf   :  { %2222 = vmatprep.mubr.msk.bf16.mxu1 %vm958_vm0, %v2391_v45  ;;  %v119_v45 = vld [vmem:[%s3685_s0 + $0x340] sm:$0xff] }
  0xd1   :  { %1232 = vmatmul.mubr.bf16.gmra.mxu0 %v2372_v42 }
  0xd2   :  { %1239 = vmatprep.mubr.bf16.mxu0 %v2376_v43 }
  0xd6   :  { %1553 = vmatmul.mubr.bf16.gmra.mxu1 %v2393_v48 }
  0xd7   :  { %2223 = vmatprep.mubr.msk.bf16.mxu1 %vm958_vm0, %v2397_v49 }
  0xd9   :  { %1240 = vmatmul.mubr.bf16.gmra.mxu0 %v2378_v46  ;;  %v121_v46 = vld [vmem:[%s3685_s0 + $0x350] sm:$0xff] }
  0xda   :  { %1247 = vmatprep.mubr.bf16.mxu0 %v2382_v47 }
  0xde   :  { %1561 = vmatmul.mubr.bf16.gmra.mxu1 %v2399_v52 }
  0xdf   :  { %2224 = vmatprep.mubr.msk.bf16.mxu1 %vm958_vm0, %v2403_v53 }
  0xe1   :  { %1248 = vmatmul.mubr.bf16.gmra.mxu0 %v2384_v50 }
  0xe2   :  { %1255 = vmatprep.mubr.bf16.mxu0 %v2388_v51 }
  0xe6   :  { %v1378_v58 = vpop.f32.mrf.mxu1  ;;  %1569 = vmatmul.mubr.bf16.gmra.mxu1 %v2405_v56 }
  0xe7   :  { %2225 = vmatprep.mubr.msk.bf16.mxu1 %vm958_vm0, %v2408_v57 }
  0xe8   :  { %v1380_v60 = vpop.f32.mrf.mxu1 }
  0xe9   :  { %1256 = vmatmul.mubr.bf16.gmra.mxu0 %v2390_v54  ;;  %v2151_v54 = vcombine.low %v119_v45, %v121_v46  ;;  %v2434_v45 = vld [vmem:[%s3685_s0 + $0x3a4] ss:$16 sps:$4 sm:$0xff]  }
  0xea   :  { %1263 = vmatprep.mubr.bf16.mxu0 %v2394_v55  ;;  %v1381_v62 = vpop.f32.mrf.mxu1 }
  0xec   :  { %v1383_v1 = vpop.f32.mrf.mxu1 }
  0xed   :  { %v2435_v1 = vld [vmem:[%s3685_s0 + $0x3cc] ss:$16 sps:$4 sm:$0xff]  }
  0xee   :  { %v1386_v2 = vpop.f32.mrf.mxu1  ;;  %1577 = vmatmul.mubr.bf16.gmra.mxu1 %v2410_v63 }
  0xef   :  { %2226 = vmatprep.mubr.msk.bf16.mxu1 %vm958_vm0, %v2413_v0 }
  0xf0   :  { %v1388_v4 = vpop.f32.mrf.mxu1 }
  0xf1   :  { %1264 = vmatmul.mubr.bf16.gmra.mxu0 %v2396_v59 }
  0xf2   :  { %1271 = vmatprep.mubr.bf16.mxu0 %v2400_v61  ;;  %v2907_v6 = vpop.f32.mrf.mxu1 }
  0xf4   :  { %v1391_v9 = vpop.f32.mrf.mxu1 }
  0xf6   :  { %v2921_v12 = vpop.f32.mrf.mxu1  ;;  %1585 = vmatmul.mubr.bf16.gmra.mxu1 %v2415_v7  ;;  %v123_v7 = vld [vmem:[%s3685_s0 + $0x360] sm:$0xff] }
  0xf7   :  { %2227 = vmatprep.mubr.msk.bf16.mxu1 %vm958_vm0, %v2418_v8  ;;  %v125_v8 = vld [vmem:[%s3685_s0 + $0x370] sm:$0xff] }
  0xf8   :  { %v1396_v14 = vpop.f32.mrf.mxu1 }
  0xf9   :  { %1272 = vmatmul.mubr.bf16.gmra.mxu0 %v2402_v3 }
  0xfa   :  { %1279 = vmatprep.mubr.bf16.mxu0 %v2406_v5  ;;  %v2927_v16 = vpop.f32.mrf.mxu1 }
  0xfc   :  { %v1399_v20 = vpop.f32.mrf.mxu1 }
  0xfe   :  { %v2941_v25 = vpop.f32.mrf.mxu1  ;;  %1593 = vmatmul.mubr.bf16.gmra.mxu1 %v2420_v17  ;;  %v2155_v17 = vcombine.low %v123_v7, %v125_v8 }
  0xff   :  { %2228 = vmatprep.mubr.msk.bf16.mxu1 %vm958_vm0, %v2423_v18 }
 0x100   :  { %v1404_v28 = vpop.f32.mrf.mxu1 }
 0x101   :  { %v1089_v19 = vpop.f32.mrf.mxu0  ;;  %1280 = vmatmul.mubr.bf16.gmra.mxu0 %v2143_v13  ;;  %v2441_v28 = vld [vmem:[%s3685_s0 + $0x3ec] ss:$16 sps:$4 sm:$0xff]  }
 0x102   :  { %v1379_v21 = vadd.f32 %v1378_v58, %v1089_v19  ;;  %1287 = vmatprep.mubr.bf16.mxu0 %v2411_v15  ;;  %v2951_v33 = vpop.f32.mrf.mxu1  ;;  %v2421_v58 = vld [vmem:[%s3685_s0 + $0x364] ss:$16 sps:$4 sm:$0xff]  }
 0x103   :  { %v1091_v24 = vpop.f32.mrf.mxu0 }
 0x104   :  { %1634 = vst.msk [vmem:[%s3686_s2] sm:$0xff] %vm1633_vm1, %v1379_v21  ;;  %v1836_v29 = vmul.f32 %v1379_v21, %v1379_v21  ;;  %v1699_v35 = vsel %vm1633_vm1, %v1379_v21, 0.0  ;;  %v1407_v41 = vpop.f32.mrf.mxu1  ;;  %v2428_v21 = vld [vmem:[%s3685_s0 + $0x384] ss:$16 sps:$4 sm:$0xff]  }
 0x105   :  { %v1092_v26 = vpop.f32.mrf.mxu0 }
 0x106   :  { %v1382_v30 = vadd.f32 %v1381_v62, %v1092_v26  ;;  %v1900_v42 = vsel %vm1633_vm1, %v1836_v29, 0.0  ;;  %v2973_v49 = vpop.f32.mrf.mxu1  ;;  %1601 = vmatmul.mubr.bf16.gmra.mxu1 %v2425_v34  ;;  %v2431_v62 = vld [vmem:[%s3685_s0 + $0x3a8] ss:$16 sps:$4 sm:$0xff]  }
 0x107   :  { %v1094_v32 = vpop.f32.mrf.mxu0  ;;  %2229 = vmatprep.mubr.msk.bf16.mxu1 %vm958_vm0, %v2429_v38  ;;  %v2437_v26 = vld [vmem:[%s3685_s0 + $0x3c8] ss:$16 sps:$4 sm:$0xff]  }
 0x108   :  { %1635 = vst.msk [vmem:[%s3686_s2 + $0x8] sm:$0xff] %vm1633_vm1, %v1382_v30  ;;  %v1700_v36 = vsel %vm1633_vm1, %v1382_v30, 0.0  ;;  %v1837_v37 = vmul.f32 %v1382_v30, %v1382_v30  ;;  %v1412_v55 = vpop.f32.mrf.mxu1 }
 0x109   :  { %v1701_v39 = vadd.f32 %v1700_v36, %v1699_v35  ;;  %v1097_v40 = vpop.f32.mrf.mxu0  ;;  %1288 = vmatmul.mubr.bf16.gmra.mxu0 %v2147_v27 }
 0x10a   :  { %v1901_v43 = vsel %vm1633_vm1, %v1837_v37, 0.0  ;;  %v1387_v44 = vadd.f32 %v1386_v2, %v1097_v40  ;;  %1295 = vmatprep.mubr.bf16.mxu0 %v2416_v31  ;;  %v2986_v61 = vpop.f32.mrf.mxu1 }
 0x10b   :  { %v1902_v47 = vadd.f32 %v1901_v43, %v1900_v42  ;;  %v1099_v48 = vpop.f32.mrf.mxu0 }
 0x10c   :  { %1636 = vst.msk [vmem:[%s3686_s2 + $0x10] sm:$0xff] %vm1633_vm1, %v1387_v44  ;;  %v1702_v50 = vsel %vm1633_vm1, %v1387_v44, 0.0  ;;  %v1838_v51 = vmul.f32 %v1387_v44, %v1387_v44  ;;  %v1415_v4 = vpop.f32.mrf.mxu1 }
 0x10d   :  { %v1703_v52 = vadd.f32 %v1702_v50, %v1701_v39  ;;  %v1100_v53 = vpop.f32.mrf.mxu0  ;;  %v2443_v50 = vld [vmem:[%s3685_s0 + $0x3e8] ss:$16 sps:$4 sm:$0xff]   ;;  %v2440_v4 = vld [vmem:[%s3685_s0 + $0x3c4] ss:$16 sps:$4 sm:$0xff]  }
 0x10e   :  { %v1903_v56 = vsel %vm1633_vm1, %v1838_v51, 0.0  ;;  %v1390_v57 = vadd.f32 %v2907_v6, %v1100_v53  ;;  %v3007_v11 = vpop.f32.mrf.mxu1  ;;  %1609 = vmatmul.mubr.bf16.gmra.mxu1 %v2431_v62 }
 0x10f   :  { %v1904_v59 = vadd.f32 %v1903_v56, %v1902_v47  ;;  %v1102_v60 = vpop.f32.mrf.mxu0  ;;  %2230 = vmatprep.mubr.msk.bf16.mxu1 %vm958_vm0, %v2435_v1 }
 0x110   :  { %1637 = vst.msk [vmem:[%s3686_s2 + $0x18] sm:$0xff] %vm1633_vm1, %v1390_v57  ;;  %v1704_v63 = vsel %vm1633_vm1, %v1390_v57, 0.0  ;;  %v1839_v0 = vmul.f32 %v1390_v57, %v1390_v57  ;;  %v1420_v18 = vpop.f32.mrf.mxu1 }
 0x111   :  { %v1705_v2 = vadd.f32 %v1704_v63, %v1703_v52  ;;  %v1105_v3 = vpop.f32.mrf.mxu0  ;;  %1296 = vmatmul.mubr.bf16.gmra.mxu0 %v2151_v54 }
 0x112   :  { %v1905_v5 = vsel %vm1633_vm1, %v1839_v0, 0.0  ;;  %v1395_v6 = vadd.f32 %v2921_v12, %v1105_v3  ;;  %1303 = vmatprep.mubr.bf16.mxu0 %v2421_v58  ;;  %v3020_v24 = vpop.f32.mrf.mxu1 }
 0x113   :  { %v1906_v9 = vadd.f32 %v1905_v5, %v1904_v59  ;;  %v1107_v10 = vpop.f32.mrf.mxu0 }
 0x114   :  { %1638 = vst.msk [vmem:[%s3686_s2 + $0x20] sm:$0xff] %vm1633_vm1, %v1395_v6  ;;  %v1706_v12 = vsel %vm1633_vm1, %v1395_v6, 0.0  ;;  %v1840_v13 = vmul.f32 %v1395_v6, %v1395_v6  ;;  %v1423_v31 = vpop.f32.mrf.mxu1 }
 0x115   :  { %v1707_v14 = vadd.f32 %v1706_v12, %v1705_v2  ;;  %v1108_v15 = vpop.f32.mrf.mxu0 }
 0x116   :  { %v1907_v19 = vsel %vm1633_vm1, %v1840_v13, 0.0  ;;  %v1398_v20 = vadd.f32 %v2927_v16, %v1108_v15  ;;  %v3035_v37 = vpop.f32.mrf.mxu1  ;;  %1617 = vmatmul.mubr.bf16.gmra.mxu1 %v2437_v26 }
 0x117   :  { %v1908_v22 = vadd.f32 %v1907_v19, %v1906_v9  ;;  %v1110_v23 = vpop.f32.mrf.mxu0  ;;  %2231 = vmatprep.mubr.msk.bf16.mxu1 %vm958_vm0, %v2441_v28 }
 0x118   :  { %1639 = vst.msk [vmem:[%s3686_s2 + $0x28] sm:$0xff] %vm1633_vm1, %v1398_v20  ;;  %v1708_v27 = vsel %vm1633_vm1, %v1398_v20, 0.0  ;;  %v1841_v16 = vmul.f32 %v1398_v20, %v1398_v20  ;;  %v1428_v42 = vpop.f32.mrf.mxu1  ;;  %v2438_v23 = vld [vmem:[%s3685_s0 + $0x3c0] ss:$16 sps:$4 sm:$0xff]  }
 0x119   :  { %v1709_v29 = vadd.f32 %v1708_v27, %v1707_v14  ;;  %v1113_v30 = vpop.f32.mrf.mxu0  ;;  %1304 = vmatmul.mubr.bf16.gmra.mxu0 %v2155_v17 }
 0x11a   :  { %v1909_v32 = vsel %vm1633_vm1, %v1841_v16, 0.0  ;;  %v1403_v34 = vadd.f32 %v2941_v25, %v1113_v30  ;;  %1311 = vmatprep.mubr.bf16.mxu0 %v2428_v21  ;;  %v2426_v25 = vld [vmem:[%s3685_s0 + $0x380] ss:$16 sps:$4 sm:$0xff]   ;;  %v3051_v48 = vpop.f32.mrf.mxu1  ;;  %v2446_v16 = vld [vmem:[%s3685_s0 + $0x3e4] ss:$16 sps:$4 sm:$0xff]  }
 0x11b   :  { %v1910_v35 = vadd.f32 %v1909_v32, %v1908_v22  ;;  %v1115_v36 = vpop.f32.mrf.mxu0 }
 0x11c   :  { %1640 = vst.msk [vmem:[%s3686_s2 + $0x30] sm:$0xff] %vm1633_vm1, %v1403_v34  ;;  %v1710_v38 = vsel %vm1633_vm1, %v1403_v34, 0.0  ;;  %v1842_v39 = vmul.f32 %v1403_v34, %v1403_v34  ;;  %v1431_v54 = vpop.f32.mrf.mxu1 }
 0x11d   :  { %v1711_v40 = vadd.f32 %v1710_v38, %v1709_v29  ;;  %v1116_v41 = vpop.f32.mrf.mxu0 }
 0x11e   :  { %v1911_v43 = vsel %vm1633_vm1, %v1842_v39, 0.0  ;;  %v1406_v44 = vadd.f32 %v2951_v33, %v1116_v41  ;;  %v3063_v59 = vpop.f32.mrf.mxu1  ;;  %1625 = vmatmul.mubr.bf16.gmra.mxu1 %v2443_v50 }
 0x11f   :  { %v1912_v46 = vadd.f32 %v1911_v43, %v1910_v35  ;;  %v1118_v47 = vpop.f32.mrf.mxu0 }
 0x120   :  { %1641 = vst.msk [vmem:[%s3686_s2 + $0x38] sm:$0xff] %vm1633_vm1, %v1406_v44  ;;  %v1712_v51 = vsel %vm1633_vm1, %v1406_v44, 0.0  ;;  %v1843_v33 = vmul.f32 %v1406_v44, %v1406_v44  ;;  %v1436_v1 = vpop.f32.mrf.mxu1 }
 0x121   :  { %v1713_v52 = vadd.f32 %v1712_v51, %v1711_v40  ;;  %v1121_v53 = vpop.f32.mrf.mxu0  ;;  %1312 = vmatmul.mubr.bf16.gmra.mxu0 %v2426_v25 }
 0x122   :  { %v1913_v55 = vsel %vm1633_vm1, %v1843_v33, 0.0  ;;  %v1411_v56 = vadd.f32 %v2973_v49, %v1121_v53  ;;  %1319 = vmatprep.mubr.bf16.mxu0 %v2434_v45  ;;  %v2432_v49 = vld [vmem:[%s3685_s0 + $0x3a0] ss:$16 sps:$4 sm:$0xff]   ;;  %v3078_v7 = vpop.f32.mrf.mxu1 }
 0x123   :  { %v1914_v57 = vadd.f32 %v1913_v55, %v1912_v46  ;;  %v1123_v58 = vpop.f32.mrf.mxu0  ;;  %v2444_v45 = vld [vmem:[%s3685_s0 + $0x3e0] ss:$16 sps:$4 sm:$0xff]  }
 0x124   :  { %1642 = vst.msk [vmem:[%s3686_s2 + $0x40] sm:$0xff] %vm1633_vm1, %v1411_v56  ;;  %v1714_v60 = vsel %vm1633_vm1, %v1411_v56, 0.0  ;;  %v1844_v62 = vmul.f32 %v1411_v56, %v1411_v56 }
 0x125   :  { %v1715_v63 = vadd.f32 %v1714_v60, %v1713_v52  ;;  %v1124_v0 = vpop.f32.mrf.mxu0 }
 0x126   :  { %v1915_v2 = vsel %vm1633_vm1, %v1844_v62, 0.0  ;;  %v1414_v3 = vadd.f32 %v2986_v61, %v1124_v0  ;;  %v1439_v61 = vpop.f32.mrf.mxu1 }
 0x127   :  { %v1916_v5 = vadd.f32 %v1915_v2, %v1914_v57  ;;  %v1126_v6 = vpop.f32.mrf.mxu0 }
 0x128   :  { %1643 = vst.msk [vmem:[%s3686_s2 + $0x48] sm:$0xff] %vm1633_vm1, %v1414_v3  ;;  %v1716_v8 = vsel %vm1633_vm1, %v1414_v3, 0.0  ;;  %v1845_v9 = vmul.f32 %v1414_v3, %v1414_v3  ;;  %v3087_v18 = vpop.f32.mrf.mxu1 }
 0x129   :  { %v1717_v10 = vadd.f32 %v1716_v8, %v1715_v63  ;;  %v1129_v12 = vpop.f32.mrf.mxu0  ;;  %1320 = vmatmul.mubr.bf16.gmra.mxu0 %v2432_v49 }
 0x12a   :  { %v1917_v13 = vsel %vm1633_vm1, %v1845_v9, 0.0  ;;  %v1419_v14 = vadd.f32 %v3007_v11, %v1129_v12  ;;  %1327 = vmatprep.mubr.bf16.mxu0 %v2440_v4  ;;  %v1444_v11 = vpop.f32.mrf.mxu1 }
 0x12b   :  { %v1918_v15 = vadd.f32 %v1917_v13, %v1916_v5  ;;  %v1131_v17 = vpop.f32.mrf.mxu0 }
 0x12c   :  { %1644 = vst.msk [vmem:[%s3686_s2 + $0x50] sm:$0xff] %vm1633_vm1, %v1419_v14  ;;  %v1718_v19 = vsel %vm1633_vm1, %v1419_v14, 0.0  ;;  %v1846_v20 = vmul.f32 %v1419_v14, %v1419_v14  ;;  %v3102_v30 = vpop.f32.mrf.mxu1 }
 0x12d   :  { %v1719_v21 = vadd.f32 %v1718_v19, %v1717_v10  ;;  %v1132_v22 = vpop.f32.mrf.mxu0 }
 0x12e   :  { %v1919_v26 = vsel %vm1633_vm1, %v1846_v20, 0.0  ;;  %v1422_v27 = vadd.f32 %v3020_v24, %v1132_v22  ;;  %v1447_v24 = vpop.f32.mrf.mxu1 }
 0x12f   :  { %v1920_v28 = vadd.f32 %v1919_v26, %v1918_v15  ;;  %v1134_v29 = vpop.f32.mrf.mxu0 }
 0x130   :  { %1645 = vst.msk [vmem:[%s3686_s2 + $0x58] sm:$0xff] %vm1633_vm1, %v1422_v27  ;;  %v1720_v31 = vsel %vm1633_vm1, %v1422_v27, 0.0  ;;  %v1847_v32 = vmul.f32 %v1422_v27, %v1422_v27  ;;  %v3111_v41 = vpop.f32.mrf.mxu1 }
 0x131   :  { %v1721_v34 = vadd.f32 %v1720_v31, %v1719_v21  ;;  %v1137_v35 = vpop.f32.mrf.mxu0  ;;  %1328 = vmatmul.mubr.bf16.gmra.mxu0 %v2438_v23 }
 0x132   :  { %v1921_v36 = vsel %vm1633_vm1, %v1847_v32, 0.0  ;;  %v1427_v38 = vadd.f32 %v3035_v37, %v1137_v35  ;;  %1335 = vmatprep.mubr.bf16.mxu0 %v2446_v16  ;;  %v1452_v37 = vpop.f32.mrf.mxu1 }
 0x133   :  { %v1922_v39 = vadd.f32 %v1921_v36, %v1920_v28  ;;  %v1139_v40 = vpop.f32.mrf.mxu0 }
 0x134   :  { %1646 = vst.msk [vmem:[%s3686_s2 + $0x60] sm:$0xff] %vm1633_vm1, %v1427_v38  ;;  %v1722_v25 = vsel %vm1633_vm1, %v1427_v38, 0.0  ;;  %v1848_v42 = vmul.f32 %v1427_v38, %v1427_v38  ;;  %v3123_v33 = vpop.f32.mrf.mxu1 }
 0x135   :  { %v1723_v43 = vadd.f32 %v1722_v25, %v1721_v34  ;;  %v1140_v44 = vpop.f32.mrf.mxu0 }
 0x136   :  { %v1923_v46 = vsel %vm1633_vm1, %v1848_v42, 0.0  ;;  %v1430_v47 = vadd.f32 %v3051_v48, %v1140_v44  ;;  %v1455_v56 = vpop.f32.mrf.mxu1 }
 0x137   :  { %v1924_v50 = vadd.f32 %v1923_v46, %v1922_v39  ;;  %v1142_v51 = vpop.f32.mrf.mxu0 }
 0x138   :  { %1647 = vst.msk [vmem:[%s3686_s2 + $0x68] sm:$0xff] %vm1633_vm1, %v1430_v47  ;;  %v1724_v52 = vsel %vm1633_vm1, %v1430_v47, 0.0  ;;  %v1849_v53 = vmul.f32 %v1430_v47, %v1430_v47  ;;  %v3132_v62 = vpop.f32.mrf.mxu1 }
 0x139   :  { %v1725_v54 = vadd.f32 %v1724_v52, %v1723_v43  ;;  %v1145_v55 = vpop.f32.mrf.mxu0  ;;  %1336 = vmatmul.mubr.bf16.gmra.mxu0 %v2444_v45 }
 0x13a   :  { %v1925_v57 = vsel %vm1633_vm1, %v1849_v53, 0.0  ;;  %v1435_v48 = vadd.f32 %v3063_v59, %v1145_v55  ;;  %v1460_v2 = vpop.f32.mrf.mxu1 }
 0x13b   :  { %v1926_v58 = vadd.f32 %v1925_v57, %v1924_v50  ;;  %v1147_v60 = vpop.f32.mrf.mxu0 }
 0x13c   :  { %1648 = vst.msk [vmem:[%s3686_s2 + $0x70] sm:$0xff] %vm1633_vm1, %v1435_v48  ;;  %v1726_v63 = vsel %vm1633_vm1, %v1435_v48, 0.0  ;;  %v1850_v0 = vmul.f32 %v1435_v48, %v1435_v48  ;;  %v3141_v6 = vpop.f32.mrf.mxu1 }
 0x13d   :  { %v1727_v49 = vadd.f32 %v1726_v63, %v1725_v54  ;;  %v1148_v1 = vpop.f32.mrf.mxu0 }
 0x13e   :  { %v1927_v3 = vsel %vm1633_vm1, %v1850_v0, 0.0  ;;  %v1438_v4 = vadd.f32 %v3078_v7, %v1148_v1  ;;  %v1463_v61 = vpop.f32.mrf.mxu1 }
 0x13f   :  { %v1928_v59 = vadd.f32 %v1927_v3, %v1926_v58  ;;  %v1150_v5 = vpop.f32.mrf.mxu0 }
 0x140   :  { %1649 = vst.msk [vmem:[%s3686_s2 + $0x78] sm:$0xff] %vm1633_vm1, %v1438_v4  ;;  %v1728_v8 = vsel %vm1633_vm1, %v1438_v4, 0.0  ;;  %v1851_v9 = vmul.f32 %v1438_v4, %v1438_v4  ;;  %v3150_v17 = vpop.f32.mrf.mxu1 }
 0x141   :  { %v1729_v10 = vadd.f32 %v1728_v8, %v1727_v49  ;;  %v1153_v12 = vpop.f32.mrf.mxu0 }
 0x142   :  { %v1929_v13 = vsel %vm1633_vm1, %v1851_v9, 0.0  ;;  %v1443_v14 = vadd.f32 %v3087_v18, %v1153_v12  ;;  %v1468_v23 = vpop.f32.mrf.mxu1 }
 0x143   :  { %v1930_v7 = vadd.f32 %v1929_v13, %v1928_v59  ;;  %v1155_v15 = vpop.f32.mrf.mxu0 }
 0x144   :  { %1650 = vst.msk [vmem:[%s3686_s2 + $0x80] sm:$0xff] %vm1633_vm1, %v1443_v14  ;;  %v1730_v19 = vsel %vm1633_vm1, %v1443_v14, 0.0  ;;  %v1852_v20 = vmul.f32 %v1443_v14, %v1443_v14  ;;  %v3159_v16 = vpop.f32.mrf.mxu1 }
 0x145   :  { %v1731_v21 = vadd.f32 %v1730_v19, %v1729_v10  ;;  %v1156_v22 = vpop.f32.mrf.mxu0 }
 0x146   :  { %v1931_v11 = vsel %vm1633_vm1, %v1852_v20, 0.0  ;;  %v1446_v26 = vadd.f32 %v3102_v30, %v1156_v22  ;;  %v1471_v34 = vpop.f32.mrf.mxu1 }
 0x147   :  { %v1932_v18 = vadd.f32 %v1931_v11, %v1930_v7  ;;  %v1158_v27 = vpop.f32.mrf.mxu0 }
 0x148   :  { %1651 = vst.msk [vmem:[%s3686_s2 + $0x88] sm:$0xff] %vm1633_vm1, %v1446_v26  ;;  %v1732_v28 = vsel %vm1633_vm1, %v1446_v26, 0.0  ;;  %v1853_v29 = vmul.f32 %v1446_v26, %v1446_v26  ;;  %v3168_v38 = vpop.f32.mrf.mxu1 }
 0x149   :  { %v1733_v31 = vadd.f32 %v1732_v28, %v1731_v21  ;;  %v1161_v32 = vpop.f32.mrf.mxu0 }
 0x14a   :  { %v1933_v35 = vsel %vm1633_vm1, %v1853_v29, 0.0  ;;  %v1451_v24 = vadd.f32 %v3111_v41, %v1161_v32  ;;  %v1476_v43 = vpop.f32.mrf.mxu1 }
 0x14b   :  { %v1934_v30 = vadd.f32 %v1933_v35, %v1932_v18  ;;  %v1163_v36 = vpop.f32.mrf.mxu0 }
 0x14c   :  { %1652 = vst.msk [vmem:[%s3686_s2 + $0x90] sm:$0xff] %vm1633_vm1, %v1451_v24  ;;  %v1734_v39 = vsel %vm1633_vm1, %v1451_v24, 0.0  ;;  %v1854_v40 = vmul.f32 %v1451_v24, %v1451_v24  ;;  %v3177_v46 = vpop.f32.mrf.mxu1 }
 0x14d   :  { %v1735_v25 = vadd.f32 %v1734_v39, %v1733_v31  ;;  %v1164_v42 = vpop.f32.mrf.mxu0 }
 0x14e   :  { %v1935_v44 = vsel %vm1633_vm1, %v1854_v40, 0.0  ;;  %v1454_v45 = vadd.f32 %v3123_v33, %v1164_v42  ;;  %v1479_v53 = vpop.f32.mrf.mxu1 }
 0x14f   :  { %v1936_v41 = vadd.f32 %v1935_v44, %v1934_v30  ;;  %v1166_v37 = vpop.f32.mrf.mxu0 }
 0x150   :  { %1653 = vst.msk [vmem:[%s3686_s2 + $0x98] sm:$0xff] %vm1633_vm1, %v1454_v45  ;;  %v1736_v47 = vsel %vm1633_vm1, %v1454_v45, 0.0  ;;  %v1855_v50 = vmul.f32 %v1454_v45, %v1454_v45  ;;  %v3186_v57 = vpop.f32.mrf.mxu1 }
 0x151   :  { %v1737_v51 = vadd.f32 %v1736_v47, %v1735_v25  ;;  %v1169_v52 = vpop.f32.mrf.mxu0 }
 0x152   :  { %v1937_v54 = vsel %vm1633_vm1, %v1855_v50, 0.0  ;;  %v1459_v55 = vadd.f32 %v3132_v62, %v1169_v52  ;;  %v1484_v0 = vpop.f32.mrf.mxu1 }
 0x153   :  { %v1938_v33 = vadd.f32 %v1937_v54, %v1936_v41  ;;  %v1171_v56 = vpop.f32.mrf.mxu0 }
 0x154   :  { %1654 = vst.msk [vmem:[%s3686_s2 + $0xa0] sm:$0xff] %vm1633_vm1, %v1459_v55  ;;  %v1738_v48 = vsel %vm1633_vm1, %v1459_v55, 0.0  ;;  %v1856_v58 = vmul.f32 %v1459_v55, %v1459_v55  ;;  %v3195_v3 = vpop.f32.mrf.mxu1 }
 0x155   :  { %v1739_v60 = vadd.f32 %v1738_v48, %v1737_v51  ;;  %v1172_v63 = vpop.f32.mrf.mxu0 }
 0x156   :  { %v1939_v49 = vsel %vm1633_vm1, %v1856_v58, 0.0  ;;  %v1462_v1 = vadd.f32 %v3141_v6, %v1172_v63  ;;  %v1487_v9 = vpop.f32.mrf.mxu1 }
 0x157   :  { %v1940_v62 = vadd.f32 %v1939_v49, %v1938_v33  ;;  %v1174_v2 = vpop.f32.mrf.mxu0 }
 0x158   :  { %1655 = vst.msk [vmem:[%s3686_s2 + $0xa8] sm:$0xff] %vm1633_vm1, %v1462_v1  ;;  %v1740_v4 = vsel %vm1633_vm1, %v1462_v1, 0.0  ;;  %v1857_v59 = vmul.f32 %v1462_v1, %v1462_v1  ;;  %v3204_v13 = vpop.f32.mrf.mxu1 }
 0x159   :  { %v1741_v5 = vadd.f32 %v1740_v4, %v1739_v60  ;;  %v1177_v8 = vpop.f32.mrf.mxu0 }
 0x15a   :  { %v1941_v10 = vsel %vm1633_vm1, %v1857_v59, 0.0  ;;  %v1467_v12 = vadd.f32 %v3150_v17, %v1177_v8  ;;  %v1492_v20 = vpop.f32.mrf.mxu1 }
 0x15b   :  { %v1942_v6 = vadd.f32 %v1941_v10, %v1940_v62  ;;  %v1179_v61 = vpop.f32.mrf.mxu0 }
 0x15c   :  { %1656 = vst.msk [vmem:[%s3686_s2 + $0xb0] sm:$0xff] %vm1633_vm1, %v1467_v12  ;;  %v1742_v14 = vsel %vm1633_vm1, %v1467_v12, 0.0  ;;  %v1858_v7 = vmul.f32 %v1467_v12, %v1467_v12  ;;  %v3213_v11 = vpop.f32.mrf.mxu1 }
 0x15d   :  { %v1743_v15 = vadd.f32 %v1742_v14, %v1741_v5  ;;  %v1180_v19 = vpop.f32.mrf.mxu0 }
 0x15e   :  { %v1943_v21 = vsel %vm1633_vm1, %v1858_v7, 0.0  ;;  %v1470_v22 = vadd.f32 %v3159_v16, %v1180_v19  ;;  %v1495_v29 = vpop.f32.mrf.mxu1 }
 0x15f   :  { %v1944_v17 = vadd.f32 %v1943_v21, %v1942_v6  ;;  %v1182_v23 = vpop.f32.mrf.mxu0 }
 0x160   :  { %1657 = vst.msk [vmem:[%s3686_s2 + $0xb8] sm:$0xff] %vm1633_vm1, %v1470_v22  ;;  %v1744_v26 = vsel %vm1633_vm1, %v1470_v22, 0.0  ;;  %v1859_v18 = vmul.f32 %v1470_v22, %v1470_v22  ;;  %v3222_v35 = vpop.f32.mrf.mxu1 }
 0x161   :  { %v1745_v27 = vadd.f32 %v1744_v26, %v1743_v15  ;;  %v1185_v28 = vpop.f32.mrf.mxu0 }
 0x162   :  { %v1945_v31 = vsel %vm1633_vm1, %v1859_v18, 0.0  ;;  %v1475_v32 = vadd.f32 %v3168_v38, %v1185_v28  ;;  %v1500_v40 = vpop.f32.mrf.mxu1 }
 0x163   :  { %v1946_v16 = vadd.f32 %v1945_v31, %v1944_v17  ;;  %v1187_v34 = vpop.f32.mrf.mxu0 }
 0x164   :  { %1658 = vst.msk [vmem:[%s3686_s2 + $0xc0] sm:$0xff] %vm1633_vm1, %v1475_v32  ;;  %v1746_v24 = vsel %vm1633_vm1, %v1475_v32, 0.0  ;;  %v1860_v30 = vmul.f32 %v1475_v32, %v1475_v32  ;;  %v3231_v44 = vpop.f32.mrf.mxu1 }
 0x165   :  { %v1747_v36 = vadd.f32 %v1746_v24, %v1745_v27  ;;  %v1188_v39 = vpop.f32.mrf.mxu0 }
 0x166   :  { %v1947_v25 = vsel %vm1633_vm1, %v1860_v30, 0.0  ;;  %v1478_v42 = vadd.f32 %v3177_v46, %v1188_v39  ;;  %v1503_v50 = vpop.f32.mrf.mxu1 }
 0x167   :  { %v1948_v38 = vadd.f32 %v1947_v25, %v1946_v16  ;;  %v1190_v43 = vpop.f32.mrf.mxu0 }
 0x168   :  { %1659 = vst.msk [vmem:[%s3686_s2 + $0xc8] sm:$0xff] %vm1633_vm1, %v1478_v42  ;;  %v1748_v45 = vsel %vm1633_vm1, %v1478_v42, 0.0  ;;  %v1861_v41 = vmul.f32 %v1478_v42, %v1478_v42  ;;  %v3240_v54 = vpop.f32.mrf.mxu1  ;;  %v2448_v43 = vmov 0.0  }
 0x169   :  { %v1749_v37 = vadd.f32 %v1748_v45, %v1747_v36  ;;  %v1193_v47 = vpop.f32.mrf.mxu0  ;;  %148 = vst.msk [vmem:[%s3687_s3] sm:$0x1] %vm147_vm2, %v2448_v43  ;;  %149 = vst.msk [vmem:[%s3688_s4] sm:$0x1] %vm147_vm2, %v2448_v43 }
 0x16a   :  { %v1949_v51 = vsel %vm1633_vm1, %v1861_v41, 0.0  ;;  %v1483_v52 = vadd.f32 %v3186_v57, %v1193_v47  ;;  %v1508_v58 = vpop.f32.mrf.mxu1 }
 0x16b   :  { %v1950_v46 = vadd.f32 %v1949_v51, %v1948_v38  ;;  %v1195_v53 = vpop.f32.mrf.mxu0 }
 0x16c   :  { %1660 = vst.msk [vmem:[%s3686_s2 + $0xd0] sm:$0xff] %vm1633_vm1, %v1483_v52  ;;  %v1750_v55 = vsel %vm1633_vm1, %v1483_v52, 0.0  ;;  %v1862_v33 = vmul.f32 %v1483_v52, %v1483_v52  ;;  %v3249_v49 = vpop.f32.mrf.mxu1 }
 0x16d   :  { %v1751_v56 = vadd.f32 %v1750_v55, %v1749_v37  ;;  %v1196_v48 = vpop.f32.mrf.mxu0 }
 0x16e   :  { %v1951_v60 = vsel %vm1633_vm1, %v1862_v33, 0.0  ;;  %v1486_v63 = vadd.f32 %v3195_v3, %v1196_v48  ;;  %v1511_v59 = vpop.f32.mrf.mxu1 }
 0x16f   :  { %v1952_v57 = vadd.f32 %v1951_v60, %v1950_v46  ;;  %v1198_v0 = vpop.f32.mrf.mxu0 }
 0x170   :  { %1661 = vst.msk [vmem:[%s3686_s2 + $0xd8] sm:$0xff] %vm1633_vm1, %v1486_v63  ;;  %v1752_v1 = vsel %vm1633_vm1, %v1486_v63, 0.0  ;;  %v1863_v62 = vmul.f32 %v1486_v63, %v1486_v63  ;;  %v1514_v10 = vpop.f32.mrf.mxu1 }
 0x171   :  { %v1753_v2 = vadd.f32 %v1752_v1, %v1751_v56  ;;  %v1201_v4 = vpop.f32.mrf.mxu0 }
 0x172   :  { %v1953_v5 = vsel %vm1633_vm1, %v1863_v62, 0.0  ;;  %v1491_v8 = vadd.f32 %v3204_v13, %v1201_v4  ;;  %v1516_v7 = vpop.f32.mrf.mxu1 }
 0x173   :  { %v1954_v3 = vadd.f32 %v1953_v5, %v1952_v57  ;;  %v1203_v9 = vpop.f32.mrf.mxu0 }
 0x174   :  { %1662 = vst.msk [vmem:[%s3686_s2 + $0xe0] sm:$0xff] %vm1633_vm1, %v1491_v8  ;;  %v1754_v12 = vsel %vm1633_vm1, %v1491_v8, 0.0  ;;  %v1864_v6 = vmul.f32 %v1491_v8, %v1491_v8  ;;  %v1517_v21 = vpop.f32.mrf.mxu1 }
 0x175   :  { %v1755_v61 = vadd.f32 %v1754_v12, %v1753_v2  ;;  %v1204_v14 = vpop.f32.mrf.mxu0 }
 0x176   :  { %v1955_v15 = vsel %vm1633_vm1, %v1864_v6, 0.0  ;;  %v1494_v19 = vadd.f32 %v3213_v11, %v1204_v14  ;;  %v1519_v18 = vpop.f32.mrf.mxu1 }
 0x177   :  { %v1956_v20 = vadd.f32 %v1955_v15, %v1954_v3  ;;  %v1206_v13 = vpop.f32.mrf.mxu0 }
 0x178   :  { %1663 = vst.msk [vmem:[%s3686_s2 + $0xe8] sm:$0xff] %vm1633_vm1, %v1494_v19  ;;  %v1756_v22 = vsel %vm1633_vm1, %v1494_v19, 0.0  ;;  %v1865_v17 = vmul.f32 %v1494_v19, %v1494_v19  ;;  %v1522_v31 = vpop.f32.mrf.mxu1 }
 0x179   :  { %v1757_v23 = vadd.f32 %v1756_v22, %v1755_v61  ;;  %v1209_v26 = vpop.f32.mrf.mxu0 }
 0x17a   :  { %v1957_v27 = vsel %vm1633_vm1, %v1865_v17, 0.0  ;;  %v1499_v28 = vadd.f32 %v3222_v35, %v1209_v26  ;;  %v1524_v30 = vpop.f32.mrf.mxu1 }
 0x17b   :  { %v1958_v29 = vadd.f32 %v1957_v27, %v1956_v20  ;;  %v1211_v11 = vpop.f32.mrf.mxu0 }
 0x17c   :  { %1664 = vst.msk [vmem:[%s3686_s2 + $0xf0] sm:$0xff] %vm1633_vm1, %v1499_v28  ;;  %v1758_v32 = vsel %vm1633_vm1, %v1499_v28, 0.0  ;;  %v1866_v16 = vmul.f32 %v1499_v28, %v1499_v28  ;;  %v1525_v25 = vpop.f32.mrf.mxu1 }
 0x17d   :  { %v1759_v34 = vadd.f32 %v1758_v32, %v1757_v23  ;;  %v1212_v24 = vpop.f32.mrf.mxu0 }
 0x17e   :  { %v1959_v36 = vsel %vm1633_vm1, %v1866_v16, 0.0  ;;  %v1502_v39 = vadd.f32 %v3231_v44, %v1212_v24  ;;  %v1527_v41 = vpop.f32.mrf.mxu1 }
 0x17f   :  { %v1960_v40 = vadd.f32 %v1959_v36, %v1958_v29  ;;  %v1214_v35 = vpop.f32.mrf.mxu0 }
 0x180   :  { %1665 = vst.msk [vmem:[%s3686_s2 + $0xf8] sm:$0xff] %vm1633_vm1, %v1502_v39  ;;  %v1760_v42 = vsel %vm1633_vm1, %v1502_v39, 0.0  ;;  %v1867_v38 = vmul.f32 %v1502_v39, %v1502_v39  ;;  %v1530_v52 = vpop.f32.mrf.mxu1 }
 0x181   :  { %v3292_v44 = vadd.f32 %v1760_v42, %v1759_v34  ;;  %v1217_v45 = vpop.f32.mrf.mxu0 }
 0x182   :  { %v1961_v37 = vsel %vm1633_vm1, %v1867_v38, 0.0  ;;  %v3296_v47 = vadd.f32 %v3240_v54, %v1217_v45  ;;  %v1532_v53 = vpop.f32.mrf.mxu1 }
 0x183   :  { %v3298_v50 = vadd.f32 %v1961_v37, %v1960_v40  ;;  %v1219_v51 = vpop.f32.mrf.mxu0 }
 0x184   :  { %1666 = vst.msk [vmem:[%s3686_s2 + $0x100] sm:$0xff] %vm1633_vm1, %v3296_v47  ;;  %v1533_v56 = vpop.f32.mrf.mxu1 }
 0x185   :  { %v1220_v46 = vpop.f32.mrf.mxu0 }
 0x186   :  { %v3306_v55 = vadd.f32 %v3249_v49, %v1220_v46  ;;  %v1535_v48 = vpop.f32.mrf.mxu1 }
 0x187   :  { %v1222_v33 = vpop.f32.mrf.mxu0 }
 0x188   :  { %1667 = vst.msk [vmem:[%s3686_s2 + $0x108] sm:$0xff] %vm1633_vm1, %v3306_v55  ;;  %v1538_v63 = vpop.f32.mrf.mxu1 }
 0x189   :  { %v1225_v54 = vpop.f32.mrf.mxu0 }
 0x18a   :  { %v3313_v58 = vadd.f32 %v1514_v10, %v1225_v54  ;;  %v1540_v0 = vpop.f32.mrf.mxu1 }
 0x18b   :  { %v1227_v60 = vpop.f32.mrf.mxu0 }
 0x18c   :  { %1668 = vst.msk [vmem:[%s3686_s2 + $0x110] sm:$0xff] %vm1633_vm1, %v3313_v58  ;;  %v1541_v62 = vpop.f32.mrf.mxu1 }
 0x18d   :  { %v1228_v57 = vpop.f32.mrf.mxu0 }
 0x18e   :  { %v3320_v49 = vadd.f32 %v1517_v21, %v1228_v57  ;;  %v1543_v4 = vpop.f32.mrf.mxu1 }
 0x18f   :  { %v1230_v1 = vpop.f32.mrf.mxu0 }
 0x190   :  { %1669 = vst.msk [vmem:[%s3686_s2 + $0x118] sm:$0xff] %vm1633_vm1, %v3320_v49  ;;  %v1546_v8 = vpop.f32.mrf.mxu1 }
 0x191   :  { %v1233_v2 = vpop.f32.mrf.mxu0 }
 0x192   :  { %v3327_v59 = vadd.f32 %v1522_v31, %v1233_v2  ;;  %v1548_v9 = vpop.f32.mrf.mxu1 }
 0x193   :  { %v1235_v5 = vpop.f32.mrf.mxu0 }
 0x194   :  { %1670 = vst.msk [vmem:[%s3686_s2 + $0x120] sm:$0xff] %vm1633_vm1, %v3327_v59  ;;  %v1549_v6 = vpop.f32.mrf.mxu1 }
 0x195   :  { %v1236_v3 = vpop.f32.mrf.mxu0 }
 0x196   :  { %v3334_v10 = vadd.f32 %v1525_v25, %v1236_v3  ;;  %v1551_v14 = vpop.f32.mrf.mxu1  ;;  %v1869_v3 = vmul.f32 %v3306_v55, %v3306_v55 }
 0x197   :  { %v1238_v12 = vpop.f32.mrf.mxu0  ;;  %v1870_v14 = vmul.f32 %v3313_v58, %v3313_v58 }
 0x198   :  { %1671 = vst.msk [vmem:[%s3686_s2 + $0x128] sm:$0xff] %vm1633_vm1, %v3334_v10  ;;  %v1554_v19 = vpop.f32.mrf.mxu1 }
 0x199   :  { %v1241_v61 = vpop.f32.mrf.mxu0 }
 0x19a   :  { %v3341_v7 = vadd.f32 %v1530_v52, %v1241_v61  ;;  %v1556_v13 = vpop.f32.mrf.mxu1  ;;  %v1764_v61 = vsel %vm1633_vm1, %v3306_v55, 0.0 }
 0x19b   :  { %v1243_v15 = vpop.f32.mrf.mxu0  ;;  %v1965_v13 = vsel %vm1633_vm1, %v1869_v3, 0.0 }
 0x19c   :  { %1672 = vst.msk [vmem:[%s3686_s2 + $0x130] sm:$0xff] %vm1633_vm1, %v3341_v7  ;;  %v1557_v17 = vpop.f32.mrf.mxu1 }
 0x19d   :  { %v1244_v20 = vpop.f32.mrf.mxu0 }
 0x19e   :  { %v3348_v21 = vadd.f32 %v1533_v56, %v1244_v20  ;;  %v1559_v26 = vpop.f32.mrf.mxu1 }
 0x19f   :  { %v1246_v22 = vpop.f32.mrf.mxu0 }
 0x1a0   :  { %1673 = vst.msk [vmem:[%s3686_s2 + $0x138] sm:$0xff] %vm1633_vm1, %v3348_v21  ;;  %v1562_v28 = vpop.f32.mrf.mxu1  ;;  %v1766_v22 = vsel %vm1633_vm1, %v3313_v58, 0.0  ;;  %v1872_v58 = vmul.f32 %v3327_v59, %v3327_v59 }
 0x1a1   :  { %v1249_v23 = vpop.f32.mrf.mxu0 }
 0x1a2   :  { %v3355_v18 = vadd.f32 %v1538_v63, %v1249_v23  ;;  %v1564_v11 = vpop.f32.mrf.mxu1 }
 0x1a3   :  { %v1251_v27 = vpop.f32.mrf.mxu0 }
 0x1a4   :  { %1674 = vst.msk [vmem:[%s3686_s2 + $0x140] sm:$0xff] %vm1633_vm1, %v3355_v18  ;;  %v1565_v16 = vpop.f32.mrf.mxu1  ;;  %v1967_v27 = vsel %vm1633_vm1, %v1870_v14, 0.0 }
 0x1a5   :  { %v1252_v29 = vpop.f32.mrf.mxu0 }
 0x1a6   :  { %v3362_v31 = vadd.f32 %v1541_v62, %v1252_v29  ;;  %v1567_v24 = vpop.f32.mrf.mxu1  ;;  %v1868_v62 = vmul.f32 %v3296_v47, %v3296_v47 }
 0x1a7   :  { %v1254_v32 = vpop.f32.mrf.mxu0  ;;  %v1770_v24 = vsel %vm1633_vm1, %v3327_v59, 0.0  ;;  %v1874_v59 = vmul.f32 %v3341_v7, %v3341_v7 }
 0x1a8   :  { %1675 = vst.msk [vmem:[%s3686_s2 + $0x148] sm:$0xff] %vm1633_vm1, %v3362_v31  ;;  %v1570_v39 = vpop.f32.mrf.mxu1  ;;  %v1877_v14 = vmul.f32 %v3362_v31, %v3362_v31 }
 0x1a9   :  { %v1257_v34 = vpop.f32.mrf.mxu0 }
 0x1aa   :  { %v3369_v30 = vadd.f32 %v1546_v8, %v1257_v34  ;;  %v1572_v35 = vpop.f32.mrf.mxu1  ;;  %v1762_v8 = vsel %vm1633_vm1, %v3296_v47, 0.0 }
 0x1ab   :  { %v1259_v36 = vpop.f32.mrf.mxu0  ;;  %v1763_v15 = vadd.f32 %v1762_v8, %v3292_v44 }
 0x1ac   :  { %1676 = vst.msk [vmem:[%s3686_s2 + $0x150] sm:$0xff] %vm1633_vm1, %v3369_v30  ;;  %v1573_v38 = vpop.f32.mrf.mxu1  ;;  %v1873_v36 = vmul.f32 %v3334_v10, %v3334_v10 }
 0x1ad   :  { %v1260_v40 = vpop.f32.mrf.mxu0  ;;  %v1765_v44 = vadd.f32 %v1764_v61, %v1763_v15  ;;  %v1778_v61 = vsel %vm1633_vm1, %v3355_v18, 0.0 }
 0x1ae   :  { %v3376_v25 = vadd.f32 %v1549_v6, %v1260_v40  ;;  %v1575_v45 = vpop.f32.mrf.mxu1  ;;  %v1963_v6 = vsel %vm1633_vm1, %v1868_v62, 0.0  ;;  %v1776_v62 = vsel %vm1633_vm1, %v3348_v21, 0.0 }
 0x1af   :  { %v1262_v42 = vpop.f32.mrf.mxu0  ;;  %v1964_v55 = vadd.f32 %v1963_v6, %v3298_v50  ;;  %v1767_v32 = vadd.f32 %v1766_v22, %v1765_v44  ;;  %v1780_v22 = vsel %vm1633_vm1, %v3362_v31, 0.0 }
 0x1b0   :  { %1677 = vst.msk [vmem:[%s3686_s2 + $0x158] sm:$0xff] %vm1633_vm1, %v3376_v25  ;;  %v1578_v51 = vpop.f32.mrf.mxu1  ;;  %v1971_v42 = vsel %vm1633_vm1, %v1872_v58, 0.0  ;;  %v1879_v58 = vmul.f32 %v3376_v25, %v3376_v25 }
 0x1b1   :  { %v1265_v43 = vpop.f32.mrf.mxu0  ;;  %v1966_v11 = vadd.f32 %v1965_v13, %v1964_v55 }
 0x1b2   :  { %v3383_v41 = vadd.f32 %v1554_v19, %v1265_v43  ;;  %v1580_v46 = vpop.f32.mrf.mxu1 }
 0x1b3   :  { %v1267_v37 = vpop.f32.mrf.mxu0 }
 0x1b4   :  { %1678 = vst.msk [vmem:[%s3686_s2 + $0x160] sm:$0xff] %vm1633_vm1, %v3383_v41  ;;  %v3392_v56 = vpop.f32.mrf.mxu1 }
 0x1b5   :  { %v1268_v52 = vpop.f32.mrf.mxu0 }
 0x1b6   :  { %v3390_v53 = vadd.f32 %v1557_v17, %v1268_v52  ;;  %v1583_v48 = vpop.f32.mrf.mxu1  ;;  %v1871_v17 = vmul.f32 %v3320_v49, %v3320_v49 }
 0x1b7   :  { %v1270_v33 = vpop.f32.mrf.mxu0  ;;  %v1875_v48 = vmul.f32 %v3348_v21, %v3348_v21 }
 0x1b8   :  { %1679 = vst.msk [vmem:[%s3686_s2 + $0x168] sm:$0xff] %vm1633_vm1, %v3390_v53  ;;  %v3401_v57 = vpop.f32.mrf.mxu1  ;;  %v1969_v50 = vsel %vm1633_vm1, %v1871_v17, 0.0  ;;  %v1973_v33 = vsel %vm1633_vm1, %v1873_v36, 0.0 }
 0x1b9   :  { %v1273_v54 = vpop.f32.mrf.mxu0  ;;  %v1977_v6 = vsel %vm1633_vm1, %v1875_v48, 0.0 }
 0x1ba   :  { %v3399_v60 = vadd.f32 %v1562_v28, %v1273_v54  ;;  %v1588_v1 = vpop.f32.mrf.mxu1  ;;  %v1768_v28 = vsel %vm1633_vm1, %v3320_v49, 0.0  ;;  %v1968_v49 = vadd.f32 %v1967_v27, %v1966_v11  ;;  %v1774_v54 = vsel %vm1633_vm1, %v3341_v7, 0.0 }
 0x1bb   :  { %v1275_v63 = vpop.f32.mrf.mxu0  ;;  %v1975_v1 = vsel %vm1633_vm1, %v1874_v59, 0.0  ;;  %v1876_v7 = vmul.f32 %v3355_v18, %v3355_v18  ;;  %v1878_v18 = vmul.f32 %v3369_v30, %v3369_v30  ;;  %v1981_v27 = vsel %vm1633_vm1, %v1877_v14, 0.0 }
 0x1bc   :  { %1680 = vst.msk [vmem:[%s3686_s2 + $0x170] sm:$0xff] %vm1633_vm1, %v3399_v60  ;;  %v3412_v5 = vpop.f32.mrf.mxu1  ;;  %v1970_v45 = vadd.f32 %v1969_v50, %v1968_v49  ;;  %v1784_v50 = vsel %vm1633_vm1, %v3376_v25, 0.0 }
 0x1bd   :  { %v1276_v0 = vpop.f32.mrf.mxu0  ;;  %v1979_v13 = vsel %vm1633_vm1, %v1876_v7, 0.0 }
 0x1be   :  { %v3410_v2 = vadd.f32 %v1565_v16, %v1276_v0  ;;  %v1591_v12 = vpop.f32.mrf.mxu1 }
 0x1bf   :  { %v1278_v4 = vpop.f32.mrf.mxu0 }
 0x1c0   :  { %1681 = vst.msk [vmem:[%s3686_s2 + $0x178] sm:$0xff] %vm1633_vm1, %v3410_v2  ;;  %v3431_v20 = vpop.f32.mrf.mxu1 }
 0x1c1   :  { %v1281_v9 = vpop.f32.mrf.mxu0 }
 0x1c2   :  { %v3428_v47 = vadd.f32 %v1570_v39, %v1281_v9  ;;  %v1596_v26 = vpop.f32.mrf.mxu1  ;;  %v1769_v39 = vadd.f32 %v1768_v28, %v1767_v32  ;;  %v1782_v28 = vsel %vm1633_vm1, %v3369_v30, 0.0  ;;  %v1880_v30 = vmul.f32 %v3383_v41, %v3383_v41 }
 0x1c3   :  { %v1283_v19 = vpop.f32.mrf.mxu0 }
 0x1c4   :  { %1682 = vst.msk [vmem:[%s3686_s2 + $0x180] sm:$0xff] %vm1633_vm1, %v3428_v47  ;;  %v3451_v34 = vpop.f32.mrf.mxu1  ;;  %v1771_v37 = vadd.f32 %v1770_v24, %v1769_v39 }
 0x1c5   :  { %v1284_v23 = vpop.f32.mrf.mxu0 }
 0x1c6   :  { %v3449_v29 = vadd.f32 %v1573_v38, %v1284_v23  ;;  %v1599_v35 = vpop.f32.mrf.mxu1  ;;  %v1772_v38 = vsel %vm1633_vm1, %v3334_v10, 0.0  ;;  %v1972_v10 = vadd.f32 %v1971_v42, %v1970_v45  ;;  %v1786_v42 = vsel %vm1633_vm1, %v3383_v41, 0.0 }
 0x1c7   :  { %v1286_v16 = vpop.f32.mrf.mxu0  ;;  %v1985_v35 = vsel %vm1633_vm1, %v1879_v58, 0.0  ;;  %v1882_v41 = vmul.f32 %v3399_v60, %v3399_v60 }
 0x1c8   :  { %1683 = vst.msk [vmem:[%s3686_s2 + $0x188] sm:$0xff] %vm1633_vm1, %v3449_v29  ;;  %v3470_v46 = vpop.f32.mrf.mxu1  ;;  %v1974_v8 = vadd.f32 %v1973_v33, %v1972_v10  ;;  %v1983_v16 = vsel %vm1633_vm1, %v1878_v18, 0.0 }
 0x1c9   :  { %v1289_v40 = vpop.f32.mrf.mxu0 }
 0x1ca   :  { %v3468_v43 = vadd.f32 %v1578_v51, %v1289_v40  ;;  %v1773_v51 = vadd.f32 %v1772_v38, %v1771_v37  ;;  %v1604_v0 = vpop.f32.mrf.mxu1  ;;  %v1976_v21 = vadd.f32 %v1975_v1, %v1974_v8  ;;  %v1881_v38 = vmul.f32 %v3390_v53, %v3390_v53 }
 0x1cb   :  { %v1291_v52 = vpop.f32.mrf.mxu0  ;;  %v1987_v37 = vsel %vm1633_vm1, %v1880_v30, 0.0  ;;  %v1790_v0 = vsel %vm1633_vm1, %v3399_v60, 0.0  ;;  %v1883_v1 = vmul.f32 %v3410_v2, %v3410_v2  ;;  %v1991_v8 = vsel %vm1633_vm1, %v1882_v41, 0.0 }
 0x1cc   :  { %1684 = vst.msk [vmem:[%s3686_s2 + $0x190] sm:$0xff] %vm1633_vm1, %v3468_v43  ;;  %v1775_v3 = vadd.f32 %v1774_v54, %v1773_v51  ;;  %v3490_v12 = vpop.f32.mrf.mxu1  ;;  %v1978_v55 = vadd.f32 %v1977_v6, %v1976_v21  ;;  %v1788_v52 = vsel %vm1633_vm1, %v3390_v53, 0.0  ;;  %v1884_v60 = vmul.f32 %v3428_v47, %v3428_v47 }
 0x1cd   :  { %v1292_v63 = vpop.f32.mrf.mxu0 }
 0x1ce   :  { %v3488_v4 = vadd.f32 %v3392_v56, %v1292_v63  ;;  %v1777_v56 = vadd.f32 %v1776_v62, %v1775_v3  ;;  %v1607_v19 = vpop.f32.mrf.mxu1  ;;  %v1980_v31 = vadd.f32 %v1979_v13, %v1978_v55  ;;  %v1989_v63 = vsel %vm1633_vm1, %v1881_v38, 0.0 }
 0x1cf   :  { %v1294_v9 = vpop.f32.mrf.mxu0  ;;  %v1792_v3 = vsel %vm1633_vm1, %v3410_v2, 0.0  ;;  %v1885_v19 = vmul.f32 %v3449_v29, %v3449_v29  ;;  %v1995_v18 = vsel %vm1633_vm1, %v1884_v60, 0.0  ;;  %v1796_v55 = vsel %vm1633_vm1, %v3449_v29, 0.0 }
 0x1d0   :  { %1685 = vst.msk [vmem:[%s3686_s2 + $0x198] sm:$0xff] %vm1633_vm1, %v3488_v4  ;;  %v1779_v44 = vadd.f32 %v1778_v61, %v1777_v56  ;;  %v3510_v26 = vpop.f32.mrf.mxu1  ;;  %v1982_v36 = vadd.f32 %v1981_v27, %v1980_v31  ;;  %v1993_v56 = vsel %vm1633_vm1, %v1883_v1, 0.0  ;;  %v1800_v30 = vsel %vm1633_vm1, %v3488_v4, 0.0 }
 0x1d1   :  { %v1297_v15 = vpop.f32.mrf.mxu0  ;;  %v1997_v31 = vsel %vm1633_vm1, %v1885_v19, 0.0 }
 0x1d2   :  { %v3508_v17 = vadd.f32 %v3401_v57, %v1297_v15  ;;  %v1781_v57 = vadd.f32 %v1780_v22, %v1779_v44  ;;  %v1612_v32 = vpop.f32.mrf.mxu1  ;;  %v1984_v25 = vadd.f32 %v1983_v16, %v1982_v36  ;;  %v1794_v15 = vsel %vm1633_vm1, %v3428_v47, 0.0 }
 0x1d3   :  { %v1299_v23 = vpop.f32.mrf.mxu0  ;;  %v1886_v47 = vmul.f32 %v3468_v43, %v3468_v43 }
 0x1d4   :  { %1686 = vst.msk [vmem:[%s3686_s2 + $0x1a0] sm:$0xff] %vm1633_vm1, %v3508_v17  ;;  %v1783_v49 = vadd.f32 %v1782_v28, %v1781_v57  ;;  %v3530_v40 = vpop.f32.mrf.mxu1  ;;  %v1986_v54 = vadd.f32 %v1985_v35, %v1984_v25  ;;  %v1798_v57 = vsel %vm1633_vm1, %v3468_v43, 0.0  ;;  %v1888_v43 = vmul.f32 %v3508_v17, %v3508_v17 }
 0x1d5   :  { %v1300_v11 = vpop.f32.mrf.mxu0  ;;  %v1802_v25 = vsel %vm1633_vm1, %v3508_v17, 0.0 }
 0x1d6   :  { %v3528_v24 = vadd.f32 %v3412_v5, %v1300_v11  ;;  %v1785_v5 = vadd.f32 %v1784_v50, %v1783_v49  ;;  %v1615_v45 = vpop.f32.mrf.mxu1  ;;  %v1988_v53 = vadd.f32 %v1987_v37, %v1986_v54  ;;  %v1887_v11 = vmul.f32 %v3488_v4, %v3488_v4 }
 0x1d7   :  { %v1302_v39 = vpop.f32.mrf.mxu0  ;;  %v1999_v50 = vsel %vm1633_vm1, %v1886_v47, 0.0  ;;  %v2003_v37 = vsel %vm1633_vm1, %v1888_v43, 0.0 }
 0x1d8   :  { %1687 = vst.msk [vmem:[%s3686_s2 + $0x1a8] sm:$0xff] %vm1633_vm1, %v3528_v24  ;;  %v1787_v48 = vadd.f32 %v1786_v42, %v1785_v5  ;;  %v3550_v51 = vpop.f32.mrf.mxu1  ;;  %v1990_v6 = vadd.f32 %v1989_v63, %v1988_v53  ;;  %v2001_v38 = vsel %vm1633_vm1, %v1887_v11, 0.0  ;;  %v1889_v5 = vmul.f32 %v3528_v24, %v3528_v24 }
 0x1d9   :  { %v1305_v59 = vpop.f32.mrf.mxu0 }
 0x1da   :  { %v3548_v33 = vadd.f32 %v3431_v20, %v1305_v59  ;;  %v1789_v20 = vadd.f32 %v1788_v52, %v1787_v48  ;;  %v1620_v7 = vpop.f32.mrf.mxu1  ;;  %v1992_v2 = vadd.f32 %v1991_v8, %v1990_v6  ;;  %v1804_v52 = vsel %vm1633_vm1, %v3528_v24, 0.0 }
 0x1db   :  { %v1307_v10 = vpop.f32.mrf.mxu0  ;;  %v2005_v63 = vsel %vm1633_vm1, %v1889_v5, 0.0 }
 0x1dc   :  { %1688 = vst.msk [vmem:[%s3686_s2 + $0x1b0] sm:$0xff] %vm1633_vm1, %v3548_v33  ;;  %v1791_v61 = vadd.f32 %v1790_v0, %v1789_v20  ;;  %v3568_v21 = vpop.f32.mrf.mxu1  ;;  %v1994_v23 = vadd.f32 %v1993_v56, %v1992_v2  ;;  %v1890_v17 = vmul.f32 %v3548_v33, %v3548_v33  ;;  %v1806_v0 = vsel %vm1633_vm1, %v3548_v33, 0.0 }
 0x1dd   :  { %v1308_v62 = vpop.f32.mrf.mxu0 }
 0x1de   :  { %v1598_v9 = vadd.f32 %v3451_v34, %v1308_v62  ;;  %v1793_v34 = vadd.f32 %v1792_v3, %v1791_v61  ;;  %v1623_v22 = vpop.f32.mrf.mxu1  ;;  %v1996_v29 = vadd.f32 %v1995_v18, %v1994_v23  ;;  %v2007_v62 = vsel %vm1633_vm1, %v1890_v17, 0.0 }
 0x1df   :  { %v1310_v14 = vpop.f32.mrf.mxu0 }
 0x1e0   :  { %1689 = vst.msk [vmem:[%s3686_s2 + $0x1b8] sm:$0xff] %vm1633_vm1, %v1598_v9  ;;  %v1795_v27 = vadd.f32 %v1794_v15, %v1793_v34  ;;  %v3585_v58 = vpop.f32.mrf.mxu1  ;;  %v1998_v49 = vadd.f32 %v1997_v31, %v1996_v29  ;;  %v1891_v1 = vmul.f32 %v1598_v9, %v1598_v9 }
 0x1e1   :  { %v1313_v13 = vpop.f32.mrf.mxu0 }
 0x1e2   :  { %v1603_v44 = vadd.f32 %v3470_v46, %v1313_v13  ;;  %v1797_v46 = vadd.f32 %v1796_v55, %v1795_v27  ;;  %v1628_v16 = vpop.f32.mrf.mxu1  ;;  %v2000_v4 = vadd.f32 %v1999_v50, %v1998_v49  ;;  %v2009_v33 = vsel %vm1633_vm1, %v1891_v1, 0.0 }
 0x1e3   :  { %v1315_v28 = vpop.f32.mrf.mxu0 }
 0x1e4   :  { %1690 = vst.msk [vmem:[%s3686_s2 + $0x1c0] sm:$0xff] %vm1633_vm1, %v1603_v44  ;;  %v1799_v39 = vadd.f32 %v1798_v57, %v1797_v46  ;;  %v3602_v42 = vpop.f32.mrf.mxu1  ;;  %v2002_v54 = vadd.f32 %v2001_v38, %v2000_v4  ;;  %v1892_v7 = vmul.f32 %v1603_v44, %v1603_v44  ;;  %v1810_v61 = vsel %vm1633_vm1, %v1603_v44, 0.0 }
 0x1e5   :  { %v1316_v32 = vpop.f32.mrf.mxu0 }
 0x1e6   :  { %v1606_v36 = vadd.f32 %v3490_v12, %v1316_v32  ;;  %v1801_v12 = vadd.f32 %v1800_v30, %v1799_v39  ;;  %v1631_v45 = vpop.f32.mrf.mxu1  ;;  %v2004_v24 = vadd.f32 %v2003_v37, %v2002_v54 }
 0x1e7   :  { %v1318_v35 = vpop.f32.mrf.mxu0 }
 0x1e8   :  { %1691 = vst.msk [vmem:[%s3686_s2 + $0x1c8] sm:$0xff] %vm1633_vm1, %v1606_v36  ;;  %v1803_v48 = vadd.f32 %v1802_v25, %v1801_v12  ;;  %v2006_v3 = vadd.f32 %v2005_v63, %v2004_v24  ;;  %v1893_v14 = vmul.f32 %v1606_v36, %v1606_v36 }
 0x1e9   :  { %v1321_v59 = vpop.f32.mrf.mxu0 }
 0x1ea   :  { %v1611_v41 = vadd.f32 %v3510_v26, %v1321_v59  ;;  %v1805_v53 = vadd.f32 %v1804_v52, %v1803_v48  ;;  %v1808_v26 = vsel %vm1633_vm1, %v1598_v9, 0.0  ;;  %v2008_v56 = vadd.f32 %v2007_v62, %v2006_v3 }
 0x1eb   :  { %v1323_v10 = vpop.f32.mrf.mxu0  ;;  %v2011_v9 = vsel %vm1633_vm1, %v1892_v7, 0.0  ;;  %v2013_v55 = vsel %vm1633_vm1, %v1893_v14, 0.0 }
 0x1ec   :  { %1692 = vst.msk [vmem:[%s3686_s2 + $0x1d0] sm:$0xff] %vm1633_vm1, %v1611_v41  ;;  %v1807_v60 = vadd.f32 %v1806_v0, %v1805_v53  ;;  %v1894_v2 = vmul.f32 %v1611_v41, %v1611_v41  ;;  %v2010_v13 = vadd.f32 %v2009_v33, %v2008_v56  ;;  %v1814_v47 = vsel %vm1633_vm1, %v1611_v41, 0.0  ;;  %v1698_v33 = vld [vmem:[%s3687_s3] sm:$0x1] }
 0x1ed   :  { %v1324_v20 = vpop.f32.mrf.mxu0  ;;  %v1835_v56 = vld [vmem:[%s3688_s4] sm:$0x1] }
 0x1ee   :  { %v1614_v8 = vadd.f32 %v3530_v40, %v1324_v20  ;;  %v1809_v15 = vadd.f32 %v1808_v26, %v1807_v60  ;;  %v1812_v40 = vsel %vm1633_vm1, %v1606_v36, 0.0  ;;  %v2012_v23 = vadd.f32 %v2011_v9, %v2010_v13 }
 0x1ef   :  { %v1326_v6 = vpop.f32.mrf.mxu0  ;;  %v2015_v31 = vsel %vm1633_vm1, %v1894_v2, 0.0 }
 0x1f0   :  { %1693 = vst.msk [vmem:[%s3686_s2 + $0x1d8] sm:$0xff] %vm1633_vm1, %v1614_v8  ;;  %v1811_v22 = vadd.f32 %v1810_v61, %v1809_v15  ;;  %v1895_v44 = vmul.f32 %v1614_v8, %v1614_v8  ;;  %v2014_v29 = vadd.f32 %v2013_v55, %v2012_v23 }
 0x1f1   :  { %v1329_v19 = vpop.f32.mrf.mxu0 }
 0x1f2   :  { %v1619_v34 = vadd.f32 %v3550_v51, %v1329_v19  ;;  %v1813_v27 = vadd.f32 %v1812_v40, %v1811_v22  ;;  %v1816_v51 = vsel %vm1633_vm1, %v1614_v8, 0.0  ;;  %v2017_v16 = vsel %vm1633_vm1, %v1895_v44, 0.0 }
 0x1f3   :  { %v1331_v18 = vpop.f32.mrf.mxu0  ;;  %v2016_v43 = vadd.f32 %v2015_v31, %v2014_v29 }
 0x1f4   :  { %1694 = vst.msk [vmem:[%s3686_s2 + $0x1e0] sm:$0xff] %vm1633_vm1, %v1619_v34  ;;  %v1896_v57 = vmul.f32 %v1619_v34, %v1619_v34  ;;  %v1815_v46 = vadd.f32 %v1814_v47, %v1813_v27  ;;  %v1818_v50 = vsel %vm1633_vm1, %v1619_v34, 0.0 }
 0x1f5   :  { %v1332_v28 = vpop.f32.mrf.mxu0  ;;  %v2018_v38 = vadd.f32 %v2017_v16, %v2016_v43 }
 0x1f6   :  { %v1622_v11 = vadd.f32 %v3568_v21, %v1332_v28  ;;  %v1817_v36 = vadd.f32 %v1816_v51, %v1815_v46  ;;  %v2019_v39 = vsel %vm1633_vm1, %v1896_v57, 0.0 }
 0x1f7   :  { %v1334_v32 = vpop.f32.mrf.mxu0  ;;  %v2020_v45 = vadd.f32 %v2019_v39, %v2018_v38 }
 0x1f8   :  { %1695 = vst.msk [vmem:[%s3686_s2 + $0x1e8] sm:$0xff] %vm1633_vm1, %v1622_v11  ;;  %v1897_v30 = vmul.f32 %v1622_v11, %v1622_v11  ;;  %v1820_v21 = vsel %vm1633_vm1, %v1622_v11, 0.0  ;;  %v1819_v25 = vadd.f32 %v1818_v50, %v1817_v36 }
 0x1f9   :  { %v1337_v49 = vpop.f32.mrf.mxu0 }
 0x1fa   :  { %v1627_v35 = vadd.f32 %v3585_v58, %v1337_v49  ;;  %v2021_v4 = vsel %vm1633_vm1, %v1897_v30, 0.0  ;;  %v1821_v37 = vadd.f32 %v1820_v21, %v1819_v25 }
 0x1fb   :  { %v1339_v5 = vpop.f32.mrf.mxu0  ;;  %v2022_v41 = vadd.f32 %v2021_v4, %v2020_v45 }
 0x1fc   :  { %1696 = vst.msk [vmem:[%s3686_s2 + $0x1f0] sm:$0xff] %vm1633_vm1, %v1627_v35  ;;  %v1822_v12 = vsel %vm1633_vm1, %v1627_v35, 0.0  ;;  %v1898_v59 = vmul.f32 %v1627_v35, %v1627_v35 }
 0x1fd   :  { %v1340_v52 = vpop.f32.mrf.mxu0  ;;  %v1823_v54 = vadd.f32 %v1822_v12, %v1821_v37 }
 0x1fe   :  { %v2023_v17 = vsel %vm1633_vm1, %v1898_v59, 0.0  ;;  %v1630_v58 = vadd.f32 %v3602_v42, %v1340_v52 }
 0x1ff   :  { %v1342_v48 = vpop.f32.mrf.mxu0  ;;  %v2024_v0 = vadd.f32 %v2023_v17, %v2022_v41 }
 0x200   :  { %1697 = vst.msk [vmem:[%s3686_s2 + $0x1f8] sm:$0xff] %vm1633_vm1, %v1630_v58  ;;  %v1824_v10 = vsel %vm1633_vm1, %v1630_v58, 0.0  ;;  %v1899_v63 = vmul.f32 %v1630_v58, %v1630_v58 }
 0x201   :  { %v1825_v1 = vadd.f32 %v1824_v10, %v1823_v54 }
 0x202   :  { %v2025_v24 = vsel %vm1633_vm1, %v1899_v63, 0.0 }
 0x203   :  { %v1826_v53 = vrot.slane %v1825_v1, 4  ;;  %v2026_v20 = vadd.f32 %v2025_v24, %v2024_v0 }
 0x205   :  { %v1827_v62 = vadd.f32 %v1826_v53, %v1825_v1  ;;  %v2027_v26 = vrot.slane %v2026_v20, 4 }
 0x207   :  { %v1828_v42 = vrot.slane %v1827_v62, 2  ;;  %v2028_v7 = vadd.f32 %v2027_v26, %v2026_v20 }
 0x209   :  { %v1829_v8 = vadd.f32 %v1828_v42, %v1827_v62  ;;  %v2029_v3 = vrot.slane %v2028_v7, 2 }
 0x20b   :  { %v1830_v60 = vrot.slane %v1829_v8, 1  ;;  %v2030_v6 = vadd.f32 %v2029_v3, %v2028_v7 }
 0x20d   :  { %v1831_v61 = vadd.f32 %v1830_v60, %v1829_v8  ;;  %v2031_v14 = vrot.slane %v2030_v6, 1 }
 0x20f   :  { %v1832_v15 = vadd.f32 %v1831_v61, %v1698_v33  ;;  %v2032_v19 = vadd.f32 %v2031_v14, %v2030_v6 }
 0x211   :  { %1834 = vst.msk [vmem:[%s3687_s3] sm:$0x1] %vm147_vm2, %v1832_v15  ;;  %v2033_v9 = vadd.f32 %v2032_v19, %v1835_v56 }
 0x213   :  { %2034 = vst.msk [vmem:[%s3688_s4] sm:$0x1] %vm147_vm2, %v2033_v9 }

// kernel: allconv_forward.15
= control target key start
LH: loop header
LB: loop body
LE: loop exit
PB: predicated region body
PF: predicated region fallthrough
CT: control target
= control target key end

     0   :  { %vm540_vm0 = vcmask 257024   ;;  %s1345_s0 = inlined_call_operand.vmem [shape: f32[512,32], index: 0, kind: input, shape index: {}]   ;;  %s1346_s1 = inlined_call_operand.vmem [shape: f32[1,32], index: 1, kind: input, shape index: {}]   ;;  %s1347_s2 = inlined_call_operand.vmem [shape: f32[1,32], index: 2, kind: input, shape index: {}]   ;;  %s1348_s3 = inlined_call_operand.vmem [shape: bf16[512,32], index: 3, kind: output, shape index: {}]  }
   0x1   :  { %v14_v0 = vld [vmem:[%s1345_s0] sm:$0xff]  ;;  %v15_v4 = vld [vmem:[%s1345_s0 + $0x8] sm:$0xff]  ;;  %v16_v5 = vld [vmem:[%s1345_s0 + $0x10] sm:$0xff] }
   0x2   :  { %v765_v1 = vld [vmem:[%s1346_s1] ss:$0 sm:$0xff]  ;;  %v17_v6 = vld [vmem:[%s1345_s0 + $0x18] sm:$0xff]  ;;  %v19_v11 = vld [vmem:[%s1345_s0 + $0x28] sm:$0xff] }
   0x3   :  { %v770_v2 = vld [vmem:[%s1347_s2] ss:$0 sm:$0xff]  ;;  %v85_v3 = vmul.f32 %v765_v1, %v14_v0  ;;  %v86_v7 = vmul.f32 %v765_v1, %v15_v4  ;;  %v87_v8 = vmul.f32 %v765_v1, %v16_v5  ;;  %v88_v9 = vmul.f32 %v765_v1, %v17_v6  ;;  %v20_v12 = vld [vmem:[%s1345_s0 + $0x30] sm:$0xff]  ;;  %v21_v17 = vld [vmem:[%s1345_s0 + $0x38] sm:$0xff] }
   0x4   :  { %v18_v10 = vld [vmem:[%s1345_s0 + $0x20] sm:$0xff]  ;;  %v90_v15 = vmul.f32 %v765_v1, %v19_v11  ;;  %v91_v16 = vmul.f32 %v765_v1, %v20_v12  ;;  %v92_v21 = vmul.f32 %v765_v1, %v21_v17  ;;  %v23_v35 = vld [vmem:[%s1345_s0 + $0x48] sm:$0xff]  ;;  %v24_v36 = vld [vmem:[%s1345_s0 + $0x50] sm:$0xff] }
   0x5   :  { %v156_v13 = vadd.f32 %v770_v2, %v85_v3  ;;  %v89_v14 = vmul.f32 %v765_v1, %v18_v10  ;;  %v157_v18 = vadd.f32 %v770_v2, %v86_v7  ;;  %v158_v19 = vadd.f32 %v770_v2, %v87_v8  ;;  %v22_v30 = vld [vmem:[%s1345_s0 + $0x40] sm:$0xff]  ;;  %v25_v37 = vld [vmem:[%s1345_s0 + $0x58] sm:$0xff]  ;;  %v27_v43 = vld [vmem:[%s1345_s0 + $0x68] sm:$0xff] }
   0x6   :  { %v159_v20 = vadd.f32 %v770_v2, %v88_v9  ;;  %v161_v24 = vadd.f32 %v770_v2, %v90_v15  ;;  %v162_v25 = vadd.f32 %v770_v2, %v91_v16  ;;  %v163_v29 = vadd.f32 %v770_v2, %v92_v21  ;;  %v26_v42 = vld [vmem:[%s1345_s0 + $0x60] sm:$0xff]  ;;  %v28_v44 = vld [vmem:[%s1345_s0 + $0x70] sm:$0xff]  ;;  %v29_v49 = vld [vmem:[%s1345_s0 + $0x78] sm:$0xff] }
   0x7   :  { %v220_v22 = vmax.f32 %v156_v13, 0.0  ;;  %v160_v23 = vadd.f32 %v770_v2, %v89_v14  ;;  %v221_v26 = vmax.f32 %v157_v18, 0.0  ;;  %v222_v27 = vmax.f32 %v158_v19, 0.0  ;;  %v30_v8 = vld [vmem:[%s1345_s0 + $0x80] sm:$0xff]  ;;  %v31_v13 = vld [vmem:[%s1345_s0 + $0x88] sm:$0xff]  ;;  %v32_v14 = vld [vmem:[%s1345_s0 + $0x90] sm:$0xff] }
   0x8   :  { %v223_v28 = vmax.f32 %v159_v20, 0.0  ;;  %v225_v33 = vmax.f32 %v161_v24, 0.0  ;;  %v226_v34 = vmax.f32 %v162_v25, 0.0  ;;  %v227_v41 = vmax.f32 %v163_v29, 0.0  ;;  %v33_v15 = vld [vmem:[%s1345_s0 + $0x98] sm:$0xff]  ;;  %v34_v20 = vld [vmem:[%s1345_s0 + $0xa0] sm:$0xff] }
   0x9   :  { %v675_v31 = vpack.c.bf16 %v220_v22, %v220_v22  ;;  %v224_v32 = vmax.f32 %v160_v23, 0.0  ;;  %v676_v38 = vpack.c.bf16 %v221_v26, %v221_v26  ;;  %v677_v39 = vpack.c.bf16 %v222_v27, %v222_v27  ;;  %v35_v21 = vld [vmem:[%s1345_s0 + $0xa8] sm:$0xff]  ;;  %v36_v22 = vld [vmem:[%s1345_s0 + $0xb0] sm:$0xff]  ;;  %v37_v27 = vld [vmem:[%s1345_s0 + $0xb8] sm:$0xff] }
   0xa   :  { %v678_v40 = vpack.c.bf16 %v223_v28, %v223_v28  ;;  %v680_v46 = vpack.c.bf16 %v225_v33, %v225_v33  ;;  %v681_v47 = vpack.c.bf16 %v226_v34, %v226_v34  ;;  %v93_v48 = vmul.f32 %v765_v1, %v22_v30 }
   0xb   :  { %541 = vst.msk [vmem:[%s1348_s3] sm:$0xf] %vm540_vm0, %v675_v31  ;;  %v679_v45 = vpack.c.bf16 %v224_v32, %v224_v32  ;;  %542 = vst.msk [vmem:[%s1348_s3 + $0x4] sm:$0xf] %vm540_vm0, %v676_v38  ;;  %v682_v50 = vpack.c.bf16 %v227_v41, %v227_v41  ;;  %v94_v51 = vmul.f32 %v765_v1, %v23_v35 }
   0xc   :  { %543 = vst.msk [vmem:[%s1348_s3 + $0x8] sm:$0xf] %vm540_vm0, %v677_v39  ;;  %544 = vst.msk [vmem:[%s1348_s3 + $0xc] sm:$0xf] %vm540_vm0, %v678_v40  ;;  %v95_v52 = vmul.f32 %v765_v1, %v24_v36  ;;  %v96_v53 = vmul.f32 %v765_v1, %v25_v37  ;;  %v164_v54 = vadd.f32 %v770_v2, %v93_v48  ;;  %v38_v48 = vld [vmem:[%s1345_s0 + $0xc0] sm:$0xff] }
   0xd   :  { %545 = vst.msk [vmem:[%s1348_s3 + $0x10] sm:$0xf] %vm540_vm0, %v679_v45  ;;  %546 = vst.msk [vmem:[%s1348_s3 + $0x14] sm:$0xf] %vm540_vm0, %v680_v46  ;;  %v97_v55 = vmul.f32 %v765_v1, %v26_v42  ;;  %v98_v56 = vmul.f32 %v765_v1, %v27_v43  ;;  %v99_v57 = vmul.f32 %v765_v1, %v28_v44 }
   0xe   :  { %547 = vst.msk [vmem:[%s1348_s3 + $0x18] sm:$0xf] %vm540_vm0, %v681_v47  ;;  %548 = vst.msk [vmem:[%s1348_s3 + $0x1c] sm:$0xf] %vm540_vm0, %v682_v50  ;;  %v165_v58 = vadd.f32 %v770_v2, %v94_v51  ;;  %v166_v59 = vadd.f32 %v770_v2, %v95_v52  ;;  %v167_v60 = vadd.f32 %v770_v2, %v96_v53  ;;  %v228_v62 = vmax.f32 %v164_v54, 0.0  ;;  %v39_v53 = vld [vmem:[%s1345_s0 + $0xc8] sm:$0xff] }
   0xf   :  { %v100_v61 = vmul.f32 %v765_v1, %v29_v49  ;;  %v168_v63 = vadd.f32 %v770_v2, %v97_v55  ;;  %v169_v0 = vadd.f32 %v770_v2, %v98_v56  ;;  %v170_v3 = vadd.f32 %v770_v2, %v99_v57  ;;  %v40_v54 = vld [vmem:[%s1345_s0 + $0xd0] sm:$0xff]  ;;  %v41_v55 = vld [vmem:[%s1345_s0 + $0xd8] sm:$0xff] }
  0x10   :  { %v229_v4 = vmax.f32 %v165_v58, 0.0  ;;  %v230_v5 = vmax.f32 %v166_v59, 0.0  ;;  %v231_v6 = vmax.f32 %v167_v60, 0.0  ;;  %v683_v9 = vpack.c.bf16 %v228_v62, %v228_v62  ;;  %v42_v60 = vld [vmem:[%s1345_s0 + $0xe0] sm:$0xff]  ;;  %v44_v62 = vld [vmem:[%s1345_s0 + $0xf0] sm:$0xff] }
  0x11   :  { %v171_v7 = vadd.f32 %v770_v2, %v100_v61  ;;  %v232_v10 = vmax.f32 %v168_v63, 0.0  ;;  %v233_v11 = vmax.f32 %v169_v0, 0.0  ;;  %v234_v12 = vmax.f32 %v170_v3, 0.0  ;;  %v43_v61 = vld [vmem:[%s1345_s0 + $0xe8] sm:$0xff] }
  0x12   :  { %v684_v16 = vpack.c.bf16 %v229_v4, %v229_v4  ;;  %v685_v17 = vpack.c.bf16 %v230_v5, %v230_v5  ;;  %v686_v18 = vpack.c.bf16 %v231_v6, %v231_v6  ;;  %549 = vst.msk [vmem:[%s1348_s3 + $0x20] sm:$0xf] %vm540_vm0, %v683_v9  ;;  %v101_v26 = vmul.f32 %v765_v1, %v30_v8  ;;  %v45_v5 = vld [vmem:[%s1345_s0 + $0xf8] sm:$0xff] }
  0x13   :  { %v235_v19 = vmax.f32 %v171_v7, 0.0  ;;  %v687_v23 = vpack.c.bf16 %v232_v10, %v232_v10  ;;  %v688_v24 = vpack.c.bf16 %v233_v11, %v233_v11  ;;  %v689_v25 = vpack.c.bf16 %v234_v12, %v234_v12 }
  0x14   :  { %550 = vst.msk [vmem:[%s1348_s3 + $0x24] sm:$0xf] %vm540_vm0, %v684_v16  ;;  %551 = vst.msk [vmem:[%s1348_s3 + $0x28] sm:$0xf] %vm540_vm0, %v685_v17  ;;  %v102_v29 = vmul.f32 %v765_v1, %v31_v13  ;;  %v103_v30 = vmul.f32 %v765_v1, %v32_v14  ;;  %v104_v31 = vmul.f32 %v765_v1, %v33_v15 }
  0x15   :  { %552 = vst.msk [vmem:[%s1348_s3 + $0x2c] sm:$0xf] %vm540_vm0, %v686_v18  ;;  %v690_v28 = vpack.c.bf16 %v235_v19, %v235_v19  ;;  %553 = vst.msk [vmem:[%s1348_s3 + $0x30] sm:$0xf] %vm540_vm0, %v687_v23  ;;  %v172_v32 = vadd.f32 %v770_v2, %v101_v26  ;;  %v105_v33 = vmul.f32 %v765_v1, %v34_v20  ;;  %v46_v26 = vld [vmem:[%s1345_s0 + $0x100] sm:$0xff] }
  0x16   :  { %554 = vst.msk [vmem:[%s1348_s3 + $0x34] sm:$0xf] %vm540_vm0, %v688_v24  ;;  %555 = vst.msk [vmem:[%s1348_s3 + $0x38] sm:$0xf] %vm540_vm0, %v689_v25  ;;  %v106_v34 = vmul.f32 %v765_v1, %v35_v21  ;;  %v107_v35 = vmul.f32 %v765_v1, %v36_v22  ;;  %v173_v36 = vadd.f32 %v770_v2, %v102_v29 }
  0x17   :  { %556 = vst.msk [vmem:[%s1348_s3 + $0x3c] sm:$0xf] %vm540_vm0, %v690_v28  ;;  %v174_v37 = vadd.f32 %v770_v2, %v103_v30  ;;  %v175_v38 = vadd.f32 %v770_v2, %v104_v31  ;;  %v108_v39 = vmul.f32 %v765_v1, %v37_v27  ;;  %v236_v40 = vmax.f32 %v172_v32, 0.0  ;;  %v47_v31 = vld [vmem:[%s1345_s0 + $0x108] sm:$0xff]  ;;  %v48_v32 = vld [vmem:[%s1345_s0 + $0x110] sm:$0xff] }
  0x18   :  { %v176_v41 = vadd.f32 %v770_v2, %v105_v33  ;;  %v177_v42 = vadd.f32 %v770_v2, %v106_v34  ;;  %v178_v43 = vadd.f32 %v770_v2, %v107_v35  ;;  %v237_v44 = vmax.f32 %v173_v36, 0.0  ;;  %v49_v33 = vld [vmem:[%s1345_s0 + $0x118] sm:$0xff] }
  0x19   :  { %v238_v45 = vmax.f32 %v174_v37, 0.0  ;;  %v239_v46 = vmax.f32 %v175_v38, 0.0  ;;  %v179_v47 = vadd.f32 %v770_v2, %v108_v39  ;;  %v691_v49 = vpack.c.bf16 %v236_v40, %v236_v40  ;;  %v50_v38 = vld [vmem:[%s1345_s0 + $0x120] sm:$0xff]  ;;  %v51_v39 = vld [vmem:[%s1345_s0 + $0x128] sm:$0xff]  ;;  %v52_v40 = vld [vmem:[%s1345_s0 + $0x130] sm:$0xff] }
  0x1a   :  { %v240_v50 = vmax.f32 %v176_v41, 0.0  ;;  %v241_v51 = vmax.f32 %v177_v42, 0.0  ;;  %v242_v52 = vmax.f32 %v178_v43, 0.0  ;;  %v692_v56 = vpack.c.bf16 %v237_v44, %v237_v44 }
  0x1b   :  { %v693_v57 = vpack.c.bf16 %v238_v45, %v238_v45  ;;  %v694_v58 = vpack.c.bf16 %v239_v46, %v239_v46  ;;  %v243_v59 = vmax.f32 %v179_v47, 0.0  ;;  %557 = vst.msk [vmem:[%s1348_s3 + $0x40] sm:$0xf] %vm540_vm0, %v691_v49  ;;  %v109_v4 = vmul.f32 %v765_v1, %v38_v48  ;;  %v53_v45 = vld [vmem:[%s1345_s0 + $0x138] sm:$0xff] }
  0x1c   :  { %v695_v63 = vpack.c.bf16 %v240_v50, %v240_v50  ;;  %v696_v0 = vpack.c.bf16 %v241_v51, %v241_v51  ;;  %v697_v3 = vpack.c.bf16 %v242_v52, %v242_v52  ;;  %558 = vst.msk [vmem:[%s1348_s3 + $0x44] sm:$0xf] %vm540_vm0, %v692_v56  ;;  %v110_v7 = vmul.f32 %v765_v1, %v39_v53 }
  0x1d   :  { %559 = vst.msk [vmem:[%s1348_s3 + $0x48] sm:$0xf] %vm540_vm0, %v693_v57  ;;  %560 = vst.msk [vmem:[%s1348_s3 + $0x4c] sm:$0xf] %vm540_vm0, %v694_v58  ;;  %v698_v6 = vpack.c.bf16 %v243_v59, %v243_v59  ;;  %v111_v8 = vmul.f32 %v765_v1, %v40_v54  ;;  %v112_v9 = vmul.f32 %v765_v1, %v41_v55 }
  0x1e   :  { %561 = vst.msk [vmem:[%s1348_s3 + $0x50] sm:$0xf] %vm540_vm0, %v695_v63  ;;  %562 = vst.msk [vmem:[%s1348_s3 + $0x54] sm:$0xf] %vm540_vm0, %v696_v0  ;;  %v180_v10 = vadd.f32 %v770_v2, %v109_v4  ;;  %v113_v11 = vmul.f32 %v765_v1, %v42_v60  ;;  %v114_v12 = vmul.f32 %v765_v1, %v43_v61  ;;  %v54_v4 = vld [vmem:[%s1345_s0 + $0x140] sm:$0xff] }
  0x1f   :  { %563 = vst.msk [vmem:[%s1348_s3 + $0x58] sm:$0xf] %vm540_vm0, %v697_v3  ;;  %v115_v13 = vmul.f32 %v765_v1, %v44_v62  ;;  %564 = vst.msk [vmem:[%s1348_s3 + $0x5c] sm:$0xf] %vm540_vm0, %v698_v6  ;;  %v181_v14 = vadd.f32 %v770_v2, %v110_v7  ;;  %v182_v15 = vadd.f32 %v770_v2, %v111_v8 }
  0x20   :  { %v183_v16 = vadd.f32 %v770_v2, %v112_v9  ;;  %v116_v17 = vmul.f32 %v765_v1, %v45_v5  ;;  %v244_v18 = vmax.f32 %v180_v10, 0.0  ;;  %v184_v19 = vadd.f32 %v770_v2, %v113_v11  ;;  %v55_v9 = vld [vmem:[%s1345_s0 + $0x148] sm:$0xff]  ;;  %v56_v10 = vld [vmem:[%s1345_s0 + $0x150] sm:$0xff]  ;;  %v57_v11 = vld [vmem:[%s1345_s0 + $0x158] sm:$0xff] }
  0x21   :  { %v185_v20 = vadd.f32 %v770_v2, %v114_v12  ;;  %v186_v21 = vadd.f32 %v770_v2, %v115_v13  ;;  %v245_v22 = vmax.f32 %v181_v14, 0.0  ;;  %v246_v23 = vmax.f32 %v182_v15, 0.0 }
  0x22   :  { %v247_v24 = vmax.f32 %v183_v16, 0.0  ;;  %v187_v25 = vadd.f32 %v770_v2, %v116_v17  ;;  %v699_v27 = vpack.c.bf16 %v244_v18, %v244_v18  ;;  %v248_v28 = vmax.f32 %v184_v19, 0.0  ;;  %v58_v16 = vld [vmem:[%s1345_s0 + $0x160] sm:$0xff]  ;;  %v59_v17 = vld [vmem:[%s1345_s0 + $0x168] sm:$0xff]  ;;  %v60_v18 = vld [vmem:[%s1345_s0 + $0x170] sm:$0xff] }
  0x23   :  { %v249_v29 = vmax.f32 %v185_v20, 0.0  ;;  %v250_v30 = vmax.f32 %v186_v21, 0.0  ;;  %v700_v34 = vpack.c.bf16 %v245_v22, %v245_v22  ;;  %v701_v35 = vpack.c.bf16 %v246_v23, %v246_v23  ;;  %v61_v23 = vld [vmem:[%s1345_s0 + $0x178] sm:$0xff] }
  0x24   :  { %v702_v36 = vpack.c.bf16 %v247_v24, %v247_v24  ;;  %v251_v37 = vmax.f32 %v187_v25, 0.0  ;;  %565 = vst.msk [vmem:[%s1348_s3 + $0x60] sm:$0xf] %vm540_vm0, %v699_v27  ;;  %v703_v41 = vpack.c.bf16 %v248_v28, %v248_v28  ;;  %v117_v44 = vmul.f32 %v765_v1, %v46_v26 }
  0x25   :  { %v704_v42 = vpack.c.bf16 %v249_v29, %v249_v29  ;;  %v705_v43 = vpack.c.bf16 %v250_v30, %v250_v30  ;;  %566 = vst.msk [vmem:[%s1348_s3 + $0x64] sm:$0xf] %vm540_vm0, %v700_v34  ;;  %567 = vst.msk [vmem:[%s1348_s3 + $0x68] sm:$0xf] %vm540_vm0, %v701_v35  ;;  %v118_v47 = vmul.f32 %v765_v1, %v47_v31 }
  0x26   :  { %568 = vst.msk [vmem:[%s1348_s3 + $0x6c] sm:$0xf] %vm540_vm0, %v702_v36  ;;  %v706_v46 = vpack.c.bf16 %v251_v37, %v251_v37  ;;  %v119_v48 = vmul.f32 %v765_v1, %v48_v32  ;;  %v120_v49 = vmul.f32 %v765_v1, %v49_v33  ;;  %569 = vst.msk [vmem:[%s1348_s3 + $0x70] sm:$0xf] %vm540_vm0, %v703_v41 }
  0x27   :  { %570 = vst.msk [vmem:[%s1348_s3 + $0x74] sm:$0xf] %vm540_vm0, %v704_v42  ;;  %571 = vst.msk [vmem:[%s1348_s3 + $0x78] sm:$0xf] %vm540_vm0, %v705_v43  ;;  %v188_v50 = vadd.f32 %v770_v2, %v117_v44  ;;  %v121_v51 = vmul.f32 %v765_v1, %v50_v38  ;;  %v122_v52 = vmul.f32 %v765_v1, %v51_v39  ;;  %v62_v44 = vld [vmem:[%s1345_s0 + $0x180] sm:$0xff] }
  0x28   :  { %v123_v53 = vmul.f32 %v765_v1, %v52_v40  ;;  %572 = vst.msk [vmem:[%s1348_s3 + $0x7c] sm:$0xf] %vm540_vm0, %v706_v46  ;;  %v189_v54 = vadd.f32 %v770_v2, %v118_v47  ;;  %v190_v55 = vadd.f32 %v770_v2, %v119_v48  ;;  %v191_v56 = vadd.f32 %v770_v2, %v120_v49  ;;  %v63_v49 = vld [vmem:[%s1345_s0 + $0x188] sm:$0xff] }
  0x29   :  { %v124_v57 = vmul.f32 %v765_v1, %v53_v45  ;;  %v252_v58 = vmax.f32 %v188_v50, 0.0  ;;  %v192_v59 = vadd.f32 %v770_v2, %v121_v51  ;;  %v193_v60 = vadd.f32 %v770_v2, %v122_v52  ;;  %v64_v50 = vld [vmem:[%s1345_s0 + $0x190] sm:$0xff]  ;;  %v65_v51 = vld [vmem:[%s1345_s0 + $0x198] sm:$0xff] }
  0x2a   :  { %v194_v61 = vadd.f32 %v770_v2, %v123_v53  ;;  %v253_v62 = vmax.f32 %v189_v54, 0.0  ;;  %v254_v63 = vmax.f32 %v190_v55, 0.0  ;;  %v255_v0 = vmax.f32 %v191_v56, 0.0  ;;  %v66_v56 = vld [vmem:[%s1345_s0 + $0x1a0] sm:$0xff] }
  0x2b   :  { %v195_v3 = vadd.f32 %v770_v2, %v124_v57  ;;  %v707_v5 = vpack.c.bf16 %v252_v58, %v252_v58  ;;  %v256_v6 = vmax.f32 %v192_v59, 0.0  ;;  %v257_v7 = vmax.f32 %v193_v60, 0.0  ;;  %v67_v57 = vld [vmem:[%s1345_s0 + $0x1a8] sm:$0xff]  ;;  %v68_v58 = vld [vmem:[%s1345_s0 + $0x1b0] sm:$0xff] }
  0x2c   :  { %v258_v8 = vmax.f32 %v194_v61, 0.0  ;;  %v708_v12 = vpack.c.bf16 %v253_v62, %v253_v62  ;;  %v709_v13 = vpack.c.bf16 %v254_v63, %v254_v63  ;;  %v710_v14 = vpack.c.bf16 %v255_v0, %v255_v0  ;;  %v69_v63 = vld [vmem:[%s1345_s0 + $0x1b8] sm:$0xff] }
  0x2d   :  { %v259_v15 = vmax.f32 %v195_v3, 0.0  ;;  %573 = vst.msk [vmem:[%s1348_s3 + $0x80] sm:$0xf] %vm540_vm0, %v707_v5  ;;  %v711_v19 = vpack.c.bf16 %v256_v6, %v256_v6  ;;  %v712_v20 = vpack.c.bf16 %v257_v7, %v257_v7  ;;  %v125_v22 = vmul.f32 %v765_v1, %v54_v4 }
  0x2e   :  { %v713_v21 = vpack.c.bf16 %v258_v8, %v258_v8  ;;  %574 = vst.msk [vmem:[%s1348_s3 + $0x84] sm:$0xf] %vm540_vm0, %v708_v12  ;;  %575 = vst.msk [vmem:[%s1348_s3 + $0x88] sm:$0xf] %vm540_vm0, %v709_v13  ;;  %v126_v25 = vmul.f32 %v765_v1, %v55_v9  ;;  %v127_v26 = vmul.f32 %v765_v1, %v56_v10 }
  0x2f   :  { %576 = vst.msk [vmem:[%s1348_s3 + $0x8c] sm:$0xf] %vm540_vm0, %v710_v14  ;;  %v714_v24 = vpack.c.bf16 %v259_v15, %v259_v15  ;;  %v128_v27 = vmul.f32 %v765_v1, %v57_v11  ;;  %577 = vst.msk [vmem:[%s1348_s3 + $0x90] sm:$0xf] %vm540_vm0, %v711_v19  ;;  %v196_v28 = vadd.f32 %v770_v2, %v125_v22  ;;  %v70_v22 = vld [vmem:[%s1345_s0 + $0x1c0] sm:$0xff] }
  0x30   :  { %578 = vst.msk [vmem:[%s1348_s3 + $0x94] sm:$0xf] %vm540_vm0, %v712_v20  ;;  %579 = vst.msk [vmem:[%s1348_s3 + $0x98] sm:$0xf] %vm540_vm0, %v713_v21  ;;  %v129_v29 = vmul.f32 %v765_v1, %v58_v16  ;;  %v130_v30 = vmul.f32 %v765_v1, %v59_v17  ;;  %v131_v31 = vmul.f32 %v765_v1, %v60_v18 }
  0x31   :  { %580 = vst.msk [vmem:[%s1348_s3 + $0x9c] sm:$0xf] %vm540_vm0, %v714_v24  ;;  %v197_v32 = vadd.f32 %v770_v2, %v126_v25  ;;  %v198_v33 = vadd.f32 %v770_v2, %v127_v26  ;;  %v199_v34 = vadd.f32 %v770_v2, %v128_v27  ;;  %v132_v35 = vmul.f32 %v765_v1, %v61_v23  ;;  %v71_v27 = vld [vmem:[%s1345_s0 + $0x1c8] sm:$0xff] }
  0x32   :  { %v260_v36 = vmax.f32 %v196_v28, 0.0  ;;  %v200_v37 = vadd.f32 %v770_v2, %v129_v29  ;;  %v201_v38 = vadd.f32 %v770_v2, %v130_v30  ;;  %v202_v39 = vadd.f32 %v770_v2, %v131_v31  ;;  %v72_v28 = vld [vmem:[%s1345_s0 + $0x1d0] sm:$0xff]  ;;  %v73_v29 = vld [vmem:[%s1345_s0 + $0x1d8] sm:$0xff] }
  0x33   :  { %v261_v40 = vmax.f32 %v197_v32, 0.0  ;;  %v262_v41 = vmax.f32 %v198_v33, 0.0  ;;  %v263_v42 = vmax.f32 %v199_v34, 0.0  ;;  %v203_v43 = vadd.f32 %v770_v2, %v132_v35  ;;  %v74_v34 = vld [vmem:[%s1345_s0 + $0x1e0] sm:$0xff]  ;;  %v75_v35 = vld [vmem:[%s1345_s0 + $0x1e8] sm:$0xff] }
  0x34   :  { %v715_v45 = vpack.c.bf16 %v260_v36, %v260_v36  ;;  %v264_v46 = vmax.f32 %v200_v37, 0.0  ;;  %v265_v47 = vmax.f32 %v201_v38, 0.0  ;;  %v266_v48 = vmax.f32 %v202_v39, 0.0  ;;  %v76_v36 = vld [vmem:[%s1345_s0 + $0x1f0] sm:$0xff] }
  0x35   :  { %v716_v52 = vpack.c.bf16 %v261_v40, %v261_v40  ;;  %v717_v53 = vpack.c.bf16 %v262_v41, %v262_v41  ;;  %v718_v54 = vpack.c.bf16 %v263_v42, %v263_v42  ;;  %v267_v55 = vmax.f32 %v203_v43, 0.0  ;;  %v77_v41 = vld [vmem:[%s1345_s0 + $0x1f8] sm:$0xff] }
  0x36   :  { %581 = vst.msk [vmem:[%s1348_s3 + $0xa0] sm:$0xf] %vm540_vm0, %v715_v45  ;;  %v719_v59 = vpack.c.bf16 %v264_v46, %v264_v46  ;;  %v720_v60 = vpack.c.bf16 %v265_v47, %v265_v47  ;;  %v721_v61 = vpack.c.bf16 %v266_v48, %v266_v48  ;;  %v133_v62 = vmul.f32 %v765_v1, %v62_v44 }
  0x37   :  { %582 = vst.msk [vmem:[%s1348_s3 + $0xa4] sm:$0xf] %vm540_vm0, %v716_v52  ;;  %583 = vst.msk [vmem:[%s1348_s3 + $0xa8] sm:$0xf] %vm540_vm0, %v717_v53  ;;  %v722_v0 = vpack.c.bf16 %v267_v55, %v267_v55  ;;  %v134_v3 = vmul.f32 %v765_v1, %v63_v49  ;;  %v135_v4 = vmul.f32 %v765_v1, %v64_v50 }
  0x38   :  { %584 = vst.msk [vmem:[%s1348_s3 + $0xac] sm:$0xf] %vm540_vm0, %v718_v54  ;;  %v136_v5 = vmul.f32 %v765_v1, %v65_v51  ;;  %585 = vst.msk [vmem:[%s1348_s3 + $0xb0] sm:$0xf] %vm540_vm0, %v719_v59  ;;  %v204_v6 = vadd.f32 %v770_v2, %v133_v62  ;;  %v137_v7 = vmul.f32 %v765_v1, %v66_v56 }
  0x39   :  { %586 = vst.msk [vmem:[%s1348_s3 + $0xb4] sm:$0xf] %vm540_vm0, %v720_v60  ;;  %587 = vst.msk [vmem:[%s1348_s3 + $0xb8] sm:$0xf] %vm540_vm0, %v721_v61  ;;  %v138_v8 = vmul.f32 %v765_v1, %v67_v57  ;;  %v139_v9 = vmul.f32 %v765_v1, %v68_v58  ;;  %v205_v10 = vadd.f32 %v770_v2, %v134_v3 }
  0x3a   :  { %588 = vst.msk [vmem:[%s1348_s3 + $0xbc] sm:$0xf] %vm540_vm0, %v722_v0  ;;  %v206_v11 = vadd.f32 %v770_v2, %v135_v4  ;;  %v207_v12 = vadd.f32 %v770_v2, %v136_v5  ;;  %v140_v13 = vmul.f32 %v765_v1, %v69_v63  ;;  %v268_v14 = vmax.f32 %v204_v6, 0.0 }
  0x3b   :  { %v208_v15 = vadd.f32 %v770_v2, %v137_v7  ;;  %v209_v16 = vadd.f32 %v770_v2, %v138_v8  ;;  %v210_v17 = vadd.f32 %v770_v2, %v139_v9  ;;  %v269_v18 = vmax.f32 %v205_v10, 0.0 }
  0x3c   :  { %v270_v19 = vmax.f32 %v206_v11, 0.0  ;;  %v271_v20 = vmax.f32 %v207_v12, 0.0  ;;  %v211_v21 = vadd.f32 %v770_v2, %v140_v13  ;;  %v723_v23 = vpack.c.bf16 %v268_v14, %v268_v14 }
  0x3d   :  { %v272_v24 = vmax.f32 %v208_v15, 0.0  ;;  %v273_v25 = vmax.f32 %v209_v16, 0.0  ;;  %v274_v26 = vmax.f32 %v210_v17, 0.0  ;;  %v724_v30 = vpack.c.bf16 %v269_v18, %v269_v18 }
  0x3e   :  { %v725_v31 = vpack.c.bf16 %v270_v19, %v270_v19  ;;  %v726_v32 = vpack.c.bf16 %v271_v20, %v271_v20  ;;  %v275_v33 = vmax.f32 %v211_v21, 0.0  ;;  %589 = vst.msk [vmem:[%s1348_s3 + $0xc0] sm:$0xf] %vm540_vm0, %v723_v23  ;;  %v141_v40 = vmul.f32 %v765_v1, %v70_v22 }
  0x3f   :  { %v727_v37 = vpack.c.bf16 %v272_v24, %v272_v24  ;;  %v728_v38 = vpack.c.bf16 %v273_v25, %v273_v25  ;;  %v729_v39 = vpack.c.bf16 %v274_v26, %v274_v26  ;;  %590 = vst.msk [vmem:[%s1348_s3 + $0xc4] sm:$0xf] %vm540_vm0, %v724_v30  ;;  %v142_v43 = vmul.f32 %v765_v1, %v71_v27 }
  0x40   :  { %591 = vst.msk [vmem:[%s1348_s3 + $0xc8] sm:$0xf] %vm540_vm0, %v725_v31  ;;  %592 = vst.msk [vmem:[%s1348_s3 + $0xcc] sm:$0xf] %vm540_vm0, %v726_v32  ;;  %v730_v42 = vpack.c.bf16 %v275_v33, %v275_v33  ;;  %v143_v44 = vmul.f32 %v765_v1, %v72_v28  ;;  %v144_v45 = vmul.f32 %v765_v1, %v73_v29 }
  0x41   :  { %593 = vst.msk [vmem:[%s1348_s3 + $0xd0] sm:$0xf] %vm540_vm0, %v727_v37  ;;  %594 = vst.msk [vmem:[%s1348_s3 + $0xd4] sm:$0xf] %vm540_vm0, %v728_v38  ;;  %v212_v46 = vadd.f32 %v770_v2, %v141_v40  ;;  %v145_v47 = vmul.f32 %v765_v1, %v74_v34  ;;  %v146_v48 = vmul.f32 %v765_v1, %v75_v35 }
  0x42   :  { %595 = vst.msk [vmem:[%s1348_s3 + $0xd8] sm:$0xf] %vm540_vm0, %v729_v39  ;;  %v147_v49 = vmul.f32 %v765_v1, %v76_v36  ;;  %596 = vst.msk [vmem:[%s1348_s3 + $0xdc] sm:$0xf] %vm540_vm0, %v730_v42  ;;  %v213_v50 = vadd.f32 %v770_v2, %v142_v43  ;;  %v214_v51 = vadd.f32 %v770_v2, %v143_v44 }
  0x43   :  { %v215_v52 = vadd.f32 %v770_v2, %v144_v45  ;;  %v148_v53 = vmul.f32 %v765_v1, %v77_v41  ;;  %v276_v54 = vmax.f32 %v212_v46, 0.0  ;;  %v216_v55 = vadd.f32 %v770_v2, %v145_v47 }
  0x44   :  { %v217_v56 = vadd.f32 %v770_v2, %v146_v48  ;;  %v218_v57 = vadd.f32 %v770_v2, %v147_v49  ;;  %v277_v58 = vmax.f32 %v213_v50, 0.0  ;;  %v278_v59 = vmax.f32 %v214_v51, 0.0 }
  0x45   :  { %v279_v60 = vmax.f32 %v215_v52, 0.0  ;;  %v219_v61 = vadd.f32 %v770_v2, %v148_v53  ;;  %v731_v62 = vpack.c.bf16 %v276_v54, %v276_v54  ;;  %v280_v63 = vmax.f32 %v216_v55, 0.0 }
  0x46   :  { %v281_v0 = vmax.f32 %v217_v56, 0.0  ;;  %v282_v3 = vmax.f32 %v218_v57, 0.0  ;;  %v732_v4 = vpack.c.bf16 %v277_v58, %v277_v58  ;;  %v733_v5 = vpack.c.bf16 %v278_v59, %v278_v59 }
  0x47   :  { %v734_v6 = vpack.c.bf16 %v279_v60, %v279_v60  ;;  %v283_v1 = vmax.f32 %v219_v61, 0.0  ;;  %597 = vst.msk [vmem:[%s1348_s3 + $0xe0] sm:$0xf] %vm540_vm0, %v731_v62  ;;  %v735_v7 = vpack.c.bf16 %v280_v63, %v280_v63 }
  0x48   :  { %v736_v8 = vpack.c.bf16 %v281_v0, %v281_v0  ;;  %v737_v9 = vpack.c.bf16 %v282_v3, %v282_v3  ;;  %598 = vst.msk [vmem:[%s1348_s3 + $0xe4] sm:$0xf] %vm540_vm0, %v732_v4  ;;  %599 = vst.msk [vmem:[%s1348_s3 + $0xe8] sm:$0xf] %vm540_vm0, %v733_v5 }
  0x49   :  { %600 = vst.msk [vmem:[%s1348_s3 + $0xec] sm:$0xf] %vm540_vm0, %v734_v6  ;;  %v738_v2 = vpack.c.bf16 %v283_v1, %v283_v1  ;;  %601 = vst.msk [vmem:[%s1348_s3 + $0xf0] sm:$0xf] %vm540_vm0, %v735_v7 }
  0x4a   :  { %602 = vst.msk [vmem:[%s1348_s3 + $0xf4] sm:$0xf] %vm540_vm0, %v736_v8  ;;  %603 = vst.msk [vmem:[%s1348_s3 + $0xf8] sm:$0xf] %vm540_vm0, %v737_v9 }
  0x4b   :  { %604 = vst.msk [vmem:[%s1348_s3 + $0xfc] sm:$0xf] %vm540_vm0, %v738_v2 }

// kernel: allconv_forward.17
= control target key start
LH: loop header
LB: loop body
LE: loop exit
PB: predicated region body
PF: predicated region fallthrough
CT: control target
= control target key end

     0   :  { %vm130_vm0 = vcmask 261120   ;;  %vm111_vm1 = vcmask 253952   ;;  %s690_s3 = inlined_call_operand.vmem [shape: bf16[32,32], index: 3, kind: input, shape index: {}]   ;;  %s691_s0 = inlined_call_operand.vmem [shape: f32[128,32], index: 0, kind: input, shape index: {}]   ;;  %s692_s1 = inlined_call_operand.vmem [shape: f32[1,32], index: 1, kind: input, shape index: {}]   ;;  %s693_s2 = inlined_call_operand.vmem [shape: f32[1,32], index: 2, kind: input, shape index: {}]   ;;  %s694_s5 = inlined_call_operand.vmem [shape: f32[1,32], index: 5, kind: output, shape index: {1}]   ;;  %s695_s6 = inlined_call_operand.vmem [shape: f32[1,32], index: 6, kind: output, shape index: {2}]   ;;  %s696_s4 = inlined_call_operand.vmem [shape: f32[128,32], index: 4, kind: output, shape index: {0}]  }
   0x1   :  { %v424_v0 = vld [vmem:[%s690_s3 + $0x8] sm:$0xff]   ;;  %v425_v1 = vld [vmem:[%s690_s3] sm:$0xff]   ;;  %v23_v8 = vld [vmem:[%s691_s0 + $0x10] sm:$0xff] }
   0x2   :  { %399 = vmatprep.subr.bf16.mxu0 %v424_v0  ;;  %v21_v2 = vld [vmem:[%s691_s0] sm:$0xff]  ;;  %v22_v3 = vld [vmem:[%s691_s0 + $0x8] sm:$0xff]  ;;  %419 = vmatprep.subr.bf16.mxu1 %v424_v0  ;;  %v24_v9 = vld [vmem:[%s691_s0 + $0x18] sm:$0xff] }
   0x3   :  { %v477_v4 = vld [vmem:[%s692_s1] ss:$0 sm:$0xff]  ;;  %400 = vmatpush3.bf16.msra.mxu0 %v424_v0  ;;  %421 = vmatpush3.bf16.msra.mxu1 %v424_v0  ;;  %v26_v13 = vld [vmem:[%s691_s0 + $0x28] sm:$0xff]  ;;  %v27_v14 = vld [vmem:[%s691_s0 + $0x30] sm:$0xff] }
   0x4   :  { %v44_v5 = vmul.f32 %v477_v4, %v21_v2  ;;  %v45_v6 = vmul.f32 %v477_v4, %v22_v3  ;;  %v484_v7 = vld [vmem:[%s693_s2] ss:$0 sm:$0xff]  ;;  %401 = vmatprep.subr.bf16.mxu0 %v425_v1  ;;  %v46_v10 = vmul.f32 %v477_v4, %v23_v8  ;;  %v47_v11 = vmul.f32 %v477_v4, %v24_v9  ;;  %v28_v19 = vld [vmem:[%s691_s0 + $0x38] sm:$0xff]  ;;  %v30_v29 = vld [vmem:[%s691_s0 + $0x48] sm:$0xff] }
   0x5   :  { %420 = vmatprep.subr.bf16.mxu1 %v425_v1  ;;  %v25_v12 = vld [vmem:[%s691_s0 + $0x20] sm:$0xff]  ;;  %v49_v18 = vmul.f32 %v477_v4, %v26_v13  ;;  %v50_v22 = vmul.f32 %v477_v4, %v27_v14  ;;  %v51_v23 = vmul.f32 %v477_v4, %v28_v19  ;;  %v31_v34 = vld [vmem:[%s691_s0 + $0x50] sm:$0xff]  ;;  %v32_v35 = vld [vmem:[%s691_s0 + $0x58] sm:$0xff]  ;;  %v53_v45 = vmul.f32 %v477_v4, %v30_v29 }
   0x6   :  { %v67_v15 = vadd.f32 %v484_v7, %v44_v5  ;;  %v68_v16 = vadd.f32 %v484_v7, %v45_v6  ;;  %v48_v17 = vmul.f32 %v477_v4, %v25_v12  ;;  %v69_v20 = vadd.f32 %v484_v7, %v46_v10  ;;  %v29_v24 = vld [vmem:[%s691_s0 + $0x40] sm:$0xff]  ;;  %v34_v41 = vld [vmem:[%s691_s0 + $0x68] sm:$0xff]  ;;  %v35_v46 = vld [vmem:[%s691_s0 + $0x70] sm:$0xff] }
   0x7   :  { %v70_v21 = vadd.f32 %v484_v7, %v47_v11  ;;  %402 = vmatpush3.bf16.msra.mxu0 %v425_v1  ;;  %422 = vmatpush3.bf16.msra.mxu1 %v425_v1  ;;  %v72_v28 = vadd.f32 %v484_v7, %v49_v18  ;;  %v73_v32 = vadd.f32 %v484_v7, %v50_v22  ;;  %v33_v40 = vld [vmem:[%s691_s0 + $0x60] sm:$0xff]  ;;  %v36_v51 = vld [vmem:[%s691_s0 + $0x78] sm:$0xff]  ;;  %v426_v13 = vmov 0.0  }
   0x8   :  { %v83_v25 = vmax.f32 %v67_v15, 0.0  ;;  %v84_v26 = vmax.f32 %v68_v16, 0.0  ;;  %v71_v27 = vadd.f32 %v484_v7, %v48_v17  ;;  %v85_v30 = vmax.f32 %v69_v20, 0.0  ;;  %112 = vst.msk [vmem:[%s694_s5] sm:$0x1] %vm111_vm1, %v426_v13 }
   0x9   :  { %v86_v31 = vmax.f32 %v70_v21, 0.0  ;;  %v74_v33 = vadd.f32 %v484_v7, %v51_v23  ;;  %v88_v38 = vmax.f32 %v72_v28, 0.0  ;;  %v52_v39 = vmul.f32 %v477_v4, %v29_v24  ;;  %113 = vst.msk [vmem:[%s695_s6] sm:$0x1] %vm111_vm1, %v426_v13 }
   0xa   :  { %v99_v36 = vpack.c.bf16 %v84_v26, %v83_v25  ;;  %v87_v37 = vmax.f32 %v71_v27, 0.0  ;;  %v89_v43 = vmax.f32 %v73_v32, 0.0  ;;  %v54_v49 = vmul.f32 %v477_v4, %v31_v34 }
   0xb   :  { %v100_v42 = vpack.c.bf16 %v86_v31, %v85_v30  ;;  %v90_v44 = vmax.f32 %v74_v33, 0.0  ;;  %v75_v48 = vadd.f32 %v484_v7, %v52_v39  ;;  %v55_v50 = vmul.f32 %v477_v4, %v32_v35 }
   0xc   :  { %403 = vmatprep.mubr.msk.bf16.mxu0 %vm130_vm0, %v99_v36  ;;  %v101_v47 = vpack.c.bf16 %v88_v38, %v87_v37  ;;  %v76_v52 = vadd.f32 %v484_v7, %v53_v45  ;;  %v56_v53 = vmul.f32 %v477_v4, %v33_v40  ;;  %v57_v54 = vmul.f32 %v477_v4, %v34_v41 }
   0xd   :  { %404 = vmatmul.mubr.msk.bf16.vlgmr.msra.gmra.mxu0 %vm130_vm0, %v100_v42  ;;  %v91_v55 = vmax.f32 %v75_v48, 0.0  ;;  %v77_v56 = vadd.f32 %v484_v7, %v54_v49  ;;  %v78_v57 = vadd.f32 %v484_v7, %v55_v50  ;;  %v58_v58 = vmul.f32 %v477_v4, %v35_v46 }
   0xe   :  { %407 = vmatprep.mubr.msk.bf16.mxu0 %vm130_vm0, %v101_v47  ;;  %v92_v59 = vmax.f32 %v76_v52, 0.0  ;;  %v79_v60 = vadd.f32 %v484_v7, %v56_v53  ;;  %v80_v61 = vadd.f32 %v484_v7, %v57_v54  ;;  %v59_v62 = vmul.f32 %v477_v4, %v36_v51 }
   0xf   :  { %v102_v63 = vpack.c.bf16 %v90_v44, %v89_v43  ;;  %v93_v0 = vmax.f32 %v77_v56, 0.0  ;;  %v94_v1 = vmax.f32 %v78_v57, 0.0  ;;  %v81_v2 = vadd.f32 %v484_v7, %v58_v58 }
  0x10   :  { %v103_v3 = vpack.c.bf16 %v92_v59, %v91_v55  ;;  %v95_v5 = vmax.f32 %v79_v60, 0.0  ;;  %v96_v6 = vmax.f32 %v80_v61, 0.0  ;;  %v82_v8 = vadd.f32 %v484_v7, %v59_v62 }
  0x11   :  { %v104_v9 = vpack.c.bf16 %v94_v1, %v93_v0  ;;  %v97_v11 = vmax.f32 %v81_v2, 0.0 }
  0x12   :  { %411 = vmatprep.mubr.msk.bf16.mxu1 %vm130_vm0, %v103_v3  ;;  %v105_v10 = vpack.c.bf16 %v96_v6, %v95_v5  ;;  %v98_v12 = vmax.f32 %v82_v8, 0.0 }
  0x13   :  { %412 = vmatmul.mubr.msk.bf16.vlgmr.msra.gmra.mxu1 %vm130_vm0, %v104_v9 }
  0x14   :  { %415 = vmatprep.mubr.msk.bf16.mxu1 %vm130_vm0, %v105_v10  ;;  %v106_v4 = vpack.c.bf16 %v98_v12, %v97_v11 }
  0x15   :  { %408 = vmatmul.mubr.msk.bf16.gmra.mxu0 %vm130_vm0, %v102_v63 }
  0x1b   :  { %416 = vmatmul.mubr.msk.bf16.gmra.mxu1 %vm130_vm0, %v106_v4 }
  0xcd   :  { %v405_v7 = vpop.f32.mrf.mxu0 }
  0xce   :  { %254 = vst.msk [vmem:[%s696_s4 + $0x10] sm:$0xff] %vm130_vm0, %v405_v7  ;;  %v312_v18 = vmul.f32 %v405_v7, %v405_v7  ;;  %v272_v25 = vsel %vm130_vm0, %v405_v7, 0.0 }
  0xcf   :  { %v189_v14 = vpop.f32.mrf.mxu0 }
  0xd0   :  { %252 = vst.msk [vmem:[%s696_s4] sm:$0xff] %vm130_vm0, %v189_v14  ;;  %v310_v16 = vmul.f32 %v189_v14, %v189_v14  ;;  %v269_v19 = vsel %vm130_vm0, %v189_v14, 0.0  ;;  %v329_v33 = vsel %vm130_vm0, %v312_v18, 0.0 }
  0xd1   :  { %v406_v15 = vpop.f32.mrf.mxu0 }
  0xd2   :  { %255 = vst.msk [vmem:[%s696_s4 + $0x18] sm:$0xff] %vm130_vm0, %v406_v15  ;;  %v326_v26 = vsel %vm130_vm0, %v310_v16, 0.0  ;;  %v313_v27 = vmul.f32 %v406_v15, %v406_v15  ;;  %v274_v34 = vsel %vm130_vm0, %v406_v15, 0.0 }
  0xd3   :  { %v192_v17 = vpop.f32.mrf.mxu0  ;;  %v592_v22 = vpop.f32.mrf.mxu1 }
  0xd4   :  { %253 = vst.msk [vmem:[%s696_s4 + $0x8] sm:$0xff] %vm130_vm0, %v192_v17  ;;  %v270_v20 = vsel %vm130_vm0, %v192_v17, 0.0  ;;  %v311_v21 = vmul.f32 %v192_v17, %v192_v17  ;;  %262 = vst.msk [vmem:[%s696_s4 + $0x50] sm:$0xff] %vm130_vm0, %v592_v22  ;;  %v331_v40 = vsel %vm130_vm0, %v313_v27, 0.0  ;;  %v320_v9 = vmul.f32 %v592_v22, %v592_v22 }
  0xd5   :  { %v271_v23 = vadd.f32 %v270_v20, %v269_v19  ;;  %v409_v24 = vpop.f32.mrf.mxu0  ;;  %v221_v29 = vpop.f32.mrf.mxu1  ;;  %v288_v13 = vsel %vm130_vm0, %v592_v22, 0.0 }
  0xd6   :  { %v327_v28 = vsel %vm130_vm0, %v311_v21, 0.0  ;;  %258 = vst.msk [vmem:[%s696_s4 + $0x30] sm:$0xff] %vm130_vm0, %v409_v24  ;;  %260 = vst.msk [vmem:[%s696_s4 + $0x40] sm:$0xff] %vm130_vm0, %v221_v29  ;;  %v316_v46 = vmul.f32 %v409_v24, %v409_v24  ;;  %v280_v53 = vsel %vm130_vm0, %v409_v24, 0.0  ;;  %v318_v61 = vmul.f32 %v221_v29, %v221_v29 }
  0xd7   :  { %v273_v30 = vadd.f32 %v272_v25, %v271_v23  ;;  %v328_v31 = vadd.f32 %v327_v28, %v326_v26  ;;  %v205_v32 = vpop.f32.mrf.mxu0  ;;  %v414_v36 = vpop.f32.mrf.mxu1  ;;  %v284_v2 = vsel %vm130_vm0, %v221_v29, 0.0  ;;  %v345_v17 = vsel %vm130_vm0, %v320_v9, 0.0 }
  0xd8   :  { %256 = vst.msk [vmem:[%s696_s4 + $0x20] sm:$0xff] %vm130_vm0, %v205_v32  ;;  %v314_v35 = vmul.f32 %v205_v32, %v205_v32  ;;  %263 = vst.msk [vmem:[%s696_s4 + $0x58] sm:$0xff] %vm130_vm0, %v414_v36  ;;  %v276_v41 = vsel %vm130_vm0, %v205_v32, 0.0  ;;  %v337_v59 = vsel %vm130_vm0, %v316_v46, 0.0  ;;  %v341_v10 = vsel %vm130_vm0, %v318_v61, 0.0 }
  0xd9   :  { %v330_v37 = vadd.f32 %v329_v33, %v328_v31  ;;  %v275_v38 = vadd.f32 %v274_v34, %v273_v30  ;;  %v410_v39 = vpop.f32.mrf.mxu0  ;;  %v224_v42 = vpop.f32.mrf.mxu1  ;;  %v321_v7 = vmul.f32 %v414_v36, %v414_v36  ;;  %v290_v18 = vsel %vm130_vm0, %v414_v36, 0.0 }
  0xda   :  { %259 = vst.msk [vmem:[%s696_s4 + $0x38] sm:$0xff] %vm130_vm0, %v410_v39  ;;  %261 = vst.msk [vmem:[%s696_s4 + $0x48] sm:$0xff] %vm130_vm0, %v224_v42  ;;  %v333_v47 = vsel %vm130_vm0, %v314_v35, 0.0  ;;  %v317_v54 = vmul.f32 %v410_v39, %v410_v39  ;;  %v282_v60 = vsel %vm130_vm0, %v410_v39, 0.0  ;;  %v319_v3 = vmul.f32 %v224_v42, %v224_v42 }
  0xdb   :  { %v277_v43 = vadd.f32 %v276_v41, %v275_v38  ;;  %v332_v44 = vadd.f32 %v331_v40, %v330_v37  ;;  %v208_v45 = vpop.f32.mrf.mxu0  ;;  %v417_v50 = vpop.f32.mrf.mxu1  ;;  %v286_v11 = vsel %vm130_vm0, %v224_v42, 0.0  ;;  %v347_v23 = vsel %vm130_vm0, %v321_v7, 0.0 }
  0xdc   :  { %257 = vst.msk [vmem:[%s696_s4 + $0x28] sm:$0xff] %vm130_vm0, %v208_v45  ;;  %v278_v48 = vsel %vm130_vm0, %v208_v45, 0.0  ;;  %v315_v49 = vmul.f32 %v208_v45, %v208_v45  ;;  %266 = vst.msk [vmem:[%s696_s4 + $0x70] sm:$0xff] %vm130_vm0, %v417_v50  ;;  %v339_v1 = vsel %vm130_vm0, %v317_v54, 0.0  ;;  %v343_v14 = vsel %vm130_vm0, %v319_v3, 0.0 }
  0xdd   :  { %v334_v51 = vadd.f32 %v333_v47, %v332_v44  ;;  %v279_v52 = vadd.f32 %v278_v48, %v277_v43  ;;  %v237_v56 = vpop.f32.mrf.mxu1  ;;  %v324_v22 = vmul.f32 %v417_v50, %v417_v50  ;;  %v296_v32 = vsel %vm130_vm0, %v417_v50, 0.0 }
  0xde   :  { %v335_v55 = vsel %vm130_vm0, %v315_v49, 0.0  ;;  %264 = vst.msk [vmem:[%s696_s4 + $0x60] sm:$0xff] %vm130_vm0, %v237_v56  ;;  %v322_v19 = vmul.f32 %v237_v56, %v237_v56  ;;  %v292_v24 = vsel %vm130_vm0, %v237_v56, 0.0 }
  0xdf   :  { %v281_v57 = vadd.f32 %v280_v53, %v279_v52  ;;  %v336_v58 = vadd.f32 %v335_v55, %v334_v51  ;;  %v418_v62 = vpop.f32.mrf.mxu1  ;;  %v353_v37 = vsel %vm130_vm0, %v324_v22, 0.0  ;;  %v268_v52 = vld [vmem:[%s694_s5] sm:$0x1] }
  0xe0   :  { %267 = vst.msk [vmem:[%s696_s4 + $0x78] sm:$0xff] %vm130_vm0, %v418_v62  ;;  %v349_v28 = vsel %vm130_vm0, %v322_v19, 0.0  ;;  %v325_v33 = vmul.f32 %v418_v62, %v418_v62  ;;  %v298_v38 = vsel %vm130_vm0, %v418_v62, 0.0  ;;  %v309_v55 = vld [vmem:[%s695_s6] sm:$0x1] }
  0xe1   :  { %v283_v63 = vadd.f32 %v282_v60, %v281_v57  ;;  %v338_v0 = vadd.f32 %v337_v59, %v336_v58  ;;  %v240_v5 = vpop.f32.mrf.mxu1 }
  0xe2   :  { %265 = vst.msk [vmem:[%s696_s4 + $0x68] sm:$0xff] %vm130_vm0, %v240_v5  ;;  %v323_v25 = vmul.f32 %v240_v5, %v240_v5  ;;  %v294_v29 = vsel %vm130_vm0, %v240_v5, 0.0  ;;  %v355_v41 = vsel %vm130_vm0, %v325_v33, 0.0 }
  0xe3   :  { %v340_v6 = vadd.f32 %v339_v1, %v338_v0  ;;  %v285_v8 = vadd.f32 %v284_v2, %v283_v63 }
  0xe4   :  { %v351_v34 = vsel %vm130_vm0, %v323_v25, 0.0 }
  0xe5   :  { %v287_v12 = vadd.f32 %v286_v11, %v285_v8  ;;  %v342_v4 = vadd.f32 %v341_v10, %v340_v6 }
  0xe7   :  { %v289_v15 = vadd.f32 %v288_v13, %v287_v12  ;;  %v344_v16 = vadd.f32 %v343_v14, %v342_v4 }
  0xe9   :  { %v346_v20 = vadd.f32 %v345_v17, %v344_v16  ;;  %v291_v21 = vadd.f32 %v290_v18, %v289_v15 }
  0xeb   :  { %v293_v26 = vadd.f32 %v292_v24, %v291_v21  ;;  %v348_v27 = vadd.f32 %v347_v23, %v346_v20 }
  0xed   :  { %v350_v30 = vadd.f32 %v349_v28, %v348_v27  ;;  %v295_v31 = vadd.f32 %v294_v29, %v293_v26 }
  0xef   :  { %v297_v35 = vadd.f32 %v296_v32, %v295_v31  ;;  %v352_v36 = vadd.f32 %v351_v34, %v350_v30 }
  0xf1   :  { %v299_v39 = vadd.f32 %v298_v38, %v297_v35  ;;  %v354_v40 = vadd.f32 %v353_v37, %v352_v36 }
  0xf3   :  { %v300_v42 = vrot.slane %v299_v39, 4  ;;  %v356_v43 = vadd.f32 %v355_v41, %v354_v40 }
  0xf5   :  { %v301_v44 = vadd.f32 %v300_v42, %v299_v39  ;;  %v357_v45 = vrot.slane %v356_v43, 4 }
  0xf7   :  { %v302_v46 = vrot.slane %v301_v44, 2  ;;  %v358_v47 = vadd.f32 %v357_v45, %v356_v43 }
  0xf9   :  { %v303_v48 = vadd.f32 %v302_v46, %v301_v44  ;;  %v359_v49 = vrot.slane %v358_v47, 2 }
  0xfb   :  { %v304_v50 = vrot.slane %v303_v48, 1  ;;  %v360_v51 = vadd.f32 %v359_v49, %v358_v47 }
  0xfd   :  { %v305_v53 = vadd.f32 %v304_v50, %v303_v48  ;;  %v361_v54 = vrot.slane %v360_v51, 1 }
  0xff   :  { %v306_v56 = vadd.f32 %v305_v53, %v268_v52  ;;  %v362_v57 = vadd.f32 %v361_v54, %v360_v51 }
 0x101   :  { %308 = vst.msk [vmem:[%s694_s5] sm:$0x1] %vm111_vm1, %v306_v56  ;;  %v363_v58 = vadd.f32 %v362_v57, %v309_v55 }
 0x103   :  { %364 = vst.msk [vmem:[%s695_s6] sm:$0x1] %vm111_vm1, %v363_v58 }

// kernel: allconv_forward.16
= control target key start
LH: loop header
LB: loop body
LE: loop exit
PB: predicated region body
PF: predicated region fallthrough
CT: control target
= control target key end

     0   :  { %vm318_vm0 = vcmask 261120   ;;  %vm51_vm1 = vcmask 253952   ;;  %v873_v42 = vmov 0.0   ;;  %s1175_s1 = inlined_call_operand.vmem [shape: bf16[288,32], index: 1, kind: input, shape index: {}]   ;;  %s1176_s0 = inlined_call_operand.vmem [shape: bf16[128,288], index: 0, kind: input, shape index: {}]   ;;  %s1177_s3 = inlined_call_operand.vmem [shape: f32[1,32], index: 3, kind: output, shape index: {1}]   ;;  %s1178_s4 = inlined_call_operand.vmem [shape: f32[1,32], index: 4, kind: output, shape index: {2}]   ;;  %s1179_s2 = inlined_call_operand.vmem [shape: f32[128,32], index: 2, kind: output, shape index: {0}]  }
   0x1   :  { %v823_v0 = vld [vmem:[%s1175_s1 + $0x78] sm:$0xff]   ;;  %v825_v2 = vld [vmem:[%s1175_s1 + $0x70] sm:$0xff]   ;;  %v827_v4 = vld [vmem:[%s1175_s1 + $0x68] sm:$0xff]   ;;  %52 = vst.msk [vmem:[%s1177_s3] sm:$0x1] %vm51_vm1, %v873_v42 }
   0x2   :  { %v824_v1 = vld [vmem:[%s1175_s1 + $0x38] sm:$0xff]   ;;  %712 = vmatprep.subr.bf16.mxu0 %v823_v0  ;;  %806 = vmatprep.subr.bf16.mxu1 %v823_v0  ;;  %v826_v3 = vld [vmem:[%s1175_s1 + $0x30] sm:$0xff]   ;;  %v828_v5 = vld [vmem:[%s1175_s1 + $0x28] sm:$0xff]   ;;  %53 = vst.msk [vmem:[%s1178_s4] sm:$0x1] %vm51_vm1, %v873_v42 }
   0x3   :  { %713 = vmatpush3.bf16.msra.mxu0 %v824_v1  ;;  %814 = vmatpush3.bf16.msra.mxu1 %v824_v1  ;;  %v829_v6 = vld [vmem:[%s1175_s1 + $0x60] sm:$0xff]   ;;  %v831_v8 = vld [vmem:[%s1175_s1 + $0x58] sm:$0xff]   ;;  %v833_v10 = vld [vmem:[%s1175_s1 + $0x50] sm:$0xff]  }
   0x4   :  { %714 = vmatprep.subr.bf16.mxu0 %v825_v2  ;;  %807 = vmatprep.subr.bf16.mxu1 %v825_v2  ;;  %v830_v7 = vld [vmem:[%s1175_s1 + $0x20] sm:$0xff]   ;;  %v832_v9 = vld [vmem:[%s1175_s1 + $0x18] sm:$0xff]   ;;  %v834_v13 = vld [vmem:[%s1175_s1 + $0x10] sm:$0xff]  }
   0x5   :  { %v841_v11 = vld [vmem:[%s1176_s0 + $0x4] ss:$12 sps:$4 sm:$0xff]   ;;  %v844_v12 = vld [vmem:[%s1176_s0 + $0x94] ss:$12 sps:$4 sm:$0xff]   ;;  %v835_v14 = vld [vmem:[%s1175_s1 + $0x48] sm:$0xff]  }
   0x6   :  { %375 = vmatprep.mubr.bf16.mxu0 %v841_v11  ;;  %423 = vmatprep.mubr.bf16.mxu1 %v844_v12  ;;  %v836_v15 = vld [vmem:[%s1175_s1 + $0x8] sm:$0xff]   ;;  %v837_v16 = vld [vmem:[%s1175_s1 + $0x40] sm:$0xff]   ;;  %v842_v20 = vld [vmem:[%s1176_s0 + $0x90] ss:$12 sps:$4 sm:$0xff]  }
   0x7   :  { %715 = vmatpush3.bf16.msra.mxu0 %v826_v3  ;;  %815 = vmatpush3.bf16.msra.mxu1 %v826_v3  ;;  %v838_v17 = vld [vmem:[%s1175_s1] sm:$0xff]   ;;  %v845_v19 = vld [vmem:[%s1175_s1 + $0x88] sm:$0xff]   ;;  %v856_v28 = vld [vmem:[%s1176_s0 + $0x30] ss:$12 sps:$4 sm:$0xff]  }
   0x8   :  { %716 = vmatprep.subr.bf16.mxu0 %v827_v4  ;;  %808 = vmatprep.subr.bf16.mxu1 %v827_v4  ;;  %v839_v18 = vld [vmem:[%s1176_s0] ss:$12 sps:$4 sm:$0xff]   ;;  %v846_v21 = vld [vmem:[%s1176_s0 + $0x1c] ss:$12 sps:$4 sm:$0xff]   ;;  %v850_v24 = vld [vmem:[%s1176_s0 + $0x18] ss:$12 sps:$4 sm:$0xff]  }
   0x9   :  { %v848_v22 = vld [vmem:[%s1176_s0 + $0xac] ss:$12 sps:$4 sm:$0xff]   ;;  %v852_v23 = vld [vmem:[%s1175_s1 + $0x80] sm:$0xff]   ;;  %v851_v25 = vld [vmem:[%s1176_s0 + $0xa8] ss:$12 sps:$4 sm:$0xff]  }
   0xa   :  { %v853_v26 = vld [vmem:[%s1176_s0 + $0x34] ss:$12 sps:$4 sm:$0xff]   ;;  %v858_v30 = vld [vmem:[%s1176_s0 + $0x4c] ss:$12 sps:$4 sm:$0xff]   ;;  %v862_v33 = vld [vmem:[%s1176_s0 + $0x50] ss:$12 sps:$4 sm:$0xff]  }
   0xb   :  { %717 = vmatpush3.bf16.msra.mxu0 %v828_v5  ;;  %816 = vmatpush3.bf16.msra.mxu1 %v828_v5  ;;  %v855_v27 = vld [vmem:[%s1176_s0 + $0x8] ss:$12 sps:$4 sm:$0xff]   ;;  %v857_v29 = vld [vmem:[%s1176_s0 + $0x20] ss:$12 sps:$4 sm:$0xff]   ;;  %v860_v31 = vld [vmem:[%s1176_s0 + $0x38] ss:$12 sps:$4 sm:$0xff]  }
   0xc   :  { %718 = vmatprep.subr.bf16.mxu0 %v829_v6  ;;  %809 = vmatprep.subr.bf16.mxu1 %v829_v6  ;;  %v861_v32 = vld [vmem:[%s1176_s0 + $0x48] ss:$12 sps:$4 sm:$0xff]   ;;  %v863_v34 = vld [vmem:[%s1176_s0 + $0x64] ss:$12 sps:$4 sm:$0xff]   ;;  %v866_v36 = vld [vmem:[%s1176_s0 + $0x60] ss:$12 sps:$4 sm:$0xff]  }
   0xd   :  { %v865_v35 = vld [vmem:[%s1176_s0 + $0x68] ss:$12 sps:$4 sm:$0xff]   ;;  %v867_v37 = vld [vmem:[%s1176_s0 + $0x80] ss:$12 sps:$4 sm:$0xff]   ;;  %v870_v39 = vld [vmem:[%s1176_s0 + $0x98] ss:$12 sps:$4 sm:$0xff]  }
   0xe   :  { %v868_v38 = vld [vmem:[%s1176_s0 + $0x7c] ss:$12 sps:$4 sm:$0xff]   ;;  %v871_v40 = vld [vmem:[%s1176_s0 + $0x78] ss:$12 sps:$4 sm:$0xff]  }
   0xf   :  { %719 = vmatpush3.bf16.msra.mxu0 %v830_v7  ;;  %817 = vmatpush3.bf16.msra.mxu1 %v830_v7  ;;  %v872_v41 = vld [vmem:[%s1176_s0 + $0xb0] ss:$12 sps:$4 sm:$0xff]  }
  0x10   :  { %720 = vmatprep.subr.bf16.mxu0 %v831_v8  ;;  %810 = vmatprep.subr.bf16.mxu1 %v831_v8 }
  0x13   :  { %721 = vmatpush3.bf16.msra.mxu0 %v832_v9  ;;  %818 = vmatpush3.bf16.msra.mxu1 %v832_v9 }
  0x14   :  { %722 = vmatprep.subr.bf16.mxu0 %v833_v10  ;;  %811 = vmatprep.subr.bf16.mxu1 %v833_v10 }
  0x17   :  { %723 = vmatpush3.bf16.msra.mxu0 %v834_v13  ;;  %819 = vmatpush3.bf16.msra.mxu1 %v834_v13 }
  0x18   :  { %724 = vmatprep.subr.bf16.mxu0 %v835_v14  ;;  %812 = vmatprep.subr.bf16.mxu1 %v835_v14 }
  0x1b   :  { %725 = vmatpush3.bf16.msra.mxu0 %v836_v15  ;;  %820 = vmatpush3.bf16.msra.mxu1 %v836_v15 }
  0x1c   :  { %726 = vmatprep.subr.bf16.mxu0 %v837_v16  ;;  %813 = vmatprep.subr.bf16.mxu1 %v837_v16 }
  0x1f   :  { %727 = vmatpush3.bf16.msra.mxu0 %v838_v17  ;;  %821 = vmatpush3.bf16.msra.mxu1 %v838_v17 }
  0x20   :  { %786 = vmatprep.subr.bf16.mxu1 %v845_v19 }
  0x22   :  { %376 = vmatmul.mubr.bf16.vlgmr.msra.gmra.mxu0 %v839_v18  ;;  %424 = vmatmul.mubr.bf16.vlgmr.msra.gmra.mxu1 %v842_v20 }
  0x23   :  { %787 = vmatpush3.bf16.msra.mxu1 %v845_v19  ;;  %383 = vmatprep.mubr.bf16.mxu0 %v846_v21 }
  0x24   :  { %431 = vmatprep.mubr.bf16.mxu1 %v848_v22  ;;  %788 = vmatprep.subr.bf16.mxu1 %v852_v23 }
  0x27   :  { %789 = vmatpush3.bf16.msra.mxu1 %v852_v23 }
  0x2a   :  { %384 = vmatmul.mubr.bf16.gmra.mxu0 %v850_v24  ;;  %432 = vmatmul.mubr.bf16.gmra.mxu1 %v851_v25 }
  0x2b   :  { %391 = vmatprep.mubr.bf16.mxu0 %v853_v26  ;;  %790 = vmatprep.mubr.msk.bf16.mxu1 %vm318_vm0, %v855_v27 }
  0x32   :  { %392 = vmatmul.mubr.bf16.gmra.mxu0 %v856_v28  ;;  %791 = vmatmul.mubr.msk.bf16.vlgmr.msra.gmra.mxu1 %vm318_vm0, %v857_v29 }
  0x33   :  { %399 = vmatprep.mubr.bf16.mxu0 %v858_v30  ;;  %794 = vmatprep.mubr.msk.bf16.mxu1 %vm318_vm0, %v860_v31 }
  0x3a   :  { %400 = vmatmul.mubr.bf16.gmra.mxu0 %v861_v32  ;;  %795 = vmatmul.mubr.msk.bf16.gmra.mxu1 %vm318_vm0, %v862_v33 }
  0x3b   :  { %407 = vmatprep.mubr.bf16.mxu0 %v863_v34  ;;  %798 = vmatprep.mubr.msk.bf16.mxu1 %vm318_vm0, %v865_v35 }
  0x42   :  { %408 = vmatmul.mubr.bf16.gmra.mxu0 %v866_v36  ;;  %799 = vmatmul.mubr.msk.bf16.gmra.mxu1 %vm318_vm0, %v867_v37 }
  0x43   :  { %415 = vmatprep.mubr.bf16.mxu0 %v868_v38  ;;  %802 = vmatprep.mubr.msk.bf16.mxu1 %vm318_vm0, %v870_v39 }
  0x4a   :  { %416 = vmatmul.mubr.bf16.gmra.mxu0 %v871_v40  ;;  %803 = vmatmul.mubr.msk.bf16.gmra.mxu1 %vm318_vm0, %v872_v41 }
  0xe2   :  { %v728_v43 = vpop.f32.mrf.mxu0  ;;  %v1041_v44 = vpop.f32.mrf.mxu1 }
  0xe4   :  { %v729_v45 = vpop.f32.mrf.mxu0  ;;  %v1043_v46 = vpop.f32.mrf.mxu1 }
  0xe5   :  { %v730_v62 = vadd.f32 %v729_v45, %v728_v43 }
  0xe6   :  { %v731_v47 = vpop.f32.mrf.mxu0  ;;  %v1045_v48 = vpop.f32.mrf.mxu1 }
  0xe8   :  { %v732_v49 = vpop.f32.mrf.mxu0  ;;  %v1047_v50 = vpop.f32.mrf.mxu1 }
  0xe9   :  { %v733_v7 = vadd.f32 %v732_v49, %v731_v47 }
  0xea   :  { %v734_v51 = vpop.f32.mrf.mxu0  ;;  %v1049_v52 = vpop.f32.mrf.mxu1 }
  0xec   :  { %v735_v53 = vpop.f32.mrf.mxu0  ;;  %v1051_v54 = vpop.f32.mrf.mxu1 }
  0xed   :  { %v736_v59 = vadd.f32 %v735_v53, %v734_v51 }
  0xee   :  { %v737_v55 = vpop.f32.mrf.mxu0  ;;  %v1053_v56 = vpop.f32.mrf.mxu1 }
  0xf0   :  { %v738_v57 = vpop.f32.mrf.mxu0  ;;  %v1055_v58 = vpop.f32.mrf.mxu1 }
  0xf1   :  { %v739_v2 = vadd.f32 %v738_v57, %v737_v55 }
  0xf2   :  { %v740_v60 = vpop.f32.mrf.mxu0  ;;  %v792_v61 = vpop.f32.mrf.mxu1 }
  0xf3   :  { %v483_v63 = vadd.f32 %v792_v61, %v736_v59 }
  0xf4   :  { %v741_v0 = vpop.f32.mrf.mxu0  ;;  %v474_v1 = vpop.f32.mrf.mxu1 }
  0xf5   :  { %539 = vst.msk [vmem:[%s1179_s2 + $0x10] sm:$0xff] %vm318_vm0, %v483_v63  ;;  %v475_v3 = vadd.f32 %v730_v62, %v474_v1  ;;  %v742_v14 = vadd.f32 %v741_v0, %v740_v60  ;;  %v597_v15 = vmul.f32 %v483_v63, %v483_v63  ;;  %v557_v24 = vsel %vm318_vm0, %v483_v63, 0.0 }
  0xf6   :  { %v743_v4 = vpop.f32.mrf.mxu0  ;;  %v793_v5 = vpop.f32.mrf.mxu1 }
  0xf7   :  { %537 = vst.msk [vmem:[%s1179_s2] sm:$0xff] %vm318_vm0, %v475_v3  ;;  %v486_v6 = vadd.f32 %v793_v5, %v739_v2  ;;  %v595_v10 = vmul.f32 %v475_v3, %v475_v3  ;;  %v554_v16 = vsel %vm318_vm0, %v475_v3, 0.0  ;;  %v614_v33 = vsel %vm318_vm0, %v597_v15, 0.0 }
  0xf8   :  { %v744_v8 = vpop.f32.mrf.mxu0  ;;  %v477_v9 = vpop.f32.mrf.mxu1 }
  0xf9   :  { %540 = vst.msk [vmem:[%s1179_s2 + $0x18] sm:$0xff] %vm318_vm0, %v486_v6  ;;  %v478_v11 = vadd.f32 %v733_v7, %v477_v9  ;;  %v611_v25 = vsel %vm318_vm0, %v595_v10, 0.0  ;;  %v598_v26 = vmul.f32 %v486_v6, %v486_v6  ;;  %v559_v34 = vsel %vm318_vm0, %v486_v6, 0.0 }
  0xfa   :  { %v746_v12 = vpop.f32.mrf.mxu0  ;;  %v796_v13 = vpop.f32.mrf.mxu1  ;;  %v745_v35 = vadd.f32 %v744_v8, %v743_v4 }
  0xfb   :  { %538 = vst.msk [vmem:[%s1179_s2 + $0x8] sm:$0xff] %vm318_vm0, %v478_v11  ;;  %v555_v17 = vsel %vm318_vm0, %v478_v11, 0.0  ;;  %v596_v18 = vmul.f32 %v478_v11, %v478_v11  ;;  %v616_v41 = vsel %vm318_vm0, %v598_v26, 0.0  ;;  %v772_v11 = vadd.f32 %v1051_v54, %v1049_v52 }
  0xfc   :  { %v747_v19 = vpop.f32.mrf.mxu0  ;;  %v490_v20 = vpop.f32.mrf.mxu1  ;;  %v556_v21 = vadd.f32 %v555_v17, %v554_v16 }
  0xfd   :  { %v748_v22 = vadd.f32 %v747_v19, %v746_v12  ;;  %v491_v23 = vadd.f32 %v742_v14, %v490_v20  ;;  %v612_v27 = vsel %vm318_vm0, %v596_v18, 0.0  ;;  %v766_v20 = vadd.f32 %v1043_v46, %v1041_v44 }
  0xfe   :  { %v749_v28 = vpop.f32.mrf.mxu0  ;;  %v797_v29 = vpop.f32.mrf.mxu1  ;;  %v558_v30 = vadd.f32 %v557_v24, %v556_v21  ;;  %v613_v31 = vadd.f32 %v612_v27, %v611_v25  ;;  %v775_v24 = vadd.f32 %v1055_v58, %v1053_v56 }
  0xff   :  { %v499_v32 = vadd.f32 %v796_v13, %v748_v22  ;;  %541 = vst.msk [vmem:[%s1179_s2 + $0x20] sm:$0xff] %vm318_vm0, %v491_v23  ;;  %v599_v36 = vmul.f32 %v491_v23, %v491_v23  ;;  %v561_v42 = vsel %vm318_vm0, %v491_v23, 0.0 }
 0x100   :  { %v750_v37 = vpop.f32.mrf.mxu0  ;;  %v493_v38 = vpop.f32.mrf.mxu1  ;;  %v615_v39 = vadd.f32 %v614_v33, %v613_v31  ;;  %v560_v40 = vadd.f32 %v559_v34, %v558_v30 }
 0x101   :  { %543 = vst.msk [vmem:[%s1179_s2 + $0x30] sm:$0xff] %vm318_vm0, %v499_v32  ;;  %v751_v43 = vadd.f32 %v750_v37, %v749_v28  ;;  %v494_v45 = vadd.f32 %v745_v35, %v493_v38  ;;  %v618_v55 = vsel %vm318_vm0, %v599_v36, 0.0  ;;  %v601_v2 = vmul.f32 %v499_v32, %v499_v32 }
 0x102   :  { %v752_v47 = vpop.f32.mrf.mxu0  ;;  %v800_v49 = vpop.f32.mrf.mxu1  ;;  %v562_v51 = vadd.f32 %v561_v42, %v560_v40  ;;  %v617_v53 = vadd.f32 %v616_v41, %v615_v39  ;;  %v565_v8 = vsel %vm318_vm0, %v499_v32, 0.0  ;;  %v769_v36 = vadd.f32 %v1047_v50, %v1045_v48 }
 0x103   :  { %v502_v57 = vadd.f32 %v797_v29, %v751_v43  ;;  %542 = vst.msk [vmem:[%s1179_s2 + $0x28] sm:$0xff] %vm318_vm0, %v494_v45  ;;  %v563_v59 = vsel %vm318_vm0, %v494_v45, 0.0  ;;  %v600_v60 = vmul.f32 %v494_v45, %v494_v45  ;;  %v622_v13 = vsel %vm318_vm0, %v601_v2, 0.0 }
 0x104   :  { %v753_v61 = vpop.f32.mrf.mxu0  ;;  %v506_v62 = vpop.f32.mrf.mxu1  ;;  %v619_v63 = vadd.f32 %v618_v55, %v617_v53  ;;  %v564_v0 = vadd.f32 %v563_v59, %v562_v51 }
 0x105   :  { %v754_v1 = vadd.f32 %v753_v61, %v752_v47  ;;  %544 = vst.msk [vmem:[%s1179_s2 + $0x38] sm:$0xff] %vm318_vm0, %v502_v57  ;;  %v620_v3 = vsel %vm318_vm0, %v600_v60, 0.0  ;;  %v602_v14 = vmul.f32 %v502_v57, %v502_v57  ;;  %v567_v21 = vsel %vm318_vm0, %v502_v57, 0.0 }
 0x106   :  { %v755_v4 = vpop.f32.mrf.mxu0  ;;  %v801_v5 = vpop.f32.mrf.mxu1  ;;  %v621_v6 = vadd.f32 %v620_v3, %v619_v63  ;;  %v566_v12 = vadd.f32 %v565_v8, %v564_v0 }
 0x107   :  { %v507_v7 = vadd.f32 %v754_v1, %v506_v62  ;;  %v624_v27 = vsel %vm318_vm0, %v602_v14, 0.0 }
 0x108   :  { %v756_v9 = vpop.f32.mrf.mxu0  ;;  %v509_v10 = vpop.f32.mrf.mxu1  ;;  %v623_v18 = vadd.f32 %v622_v13, %v621_v6  ;;  %v568_v25 = vadd.f32 %v567_v21, %v566_v12 }
 0x109   :  { %545 = vst.msk [vmem:[%s1179_s2 + $0x40] sm:$0xff] %vm318_vm0, %v507_v7  ;;  %v757_v15 = vadd.f32 %v756_v9, %v755_v4  ;;  %v603_v52 = vmul.f32 %v507_v7, %v507_v7  ;;  %v569_v44 = vsel %vm318_vm0, %v507_v7, 0.0 }
 0x10a   :  { %v758_v16 = vpop.f32.mrf.mxu0  ;;  %v804_v17 = vpop.f32.mrf.mxu1  ;;  %v625_v58 = vadd.f32 %v624_v27, %v623_v18  ;;  %v570_v37 = vadd.f32 %v569_v44, %v568_v25  ;;  %v594_v27 = vld [vmem:[%s1178_s4] sm:$0x1] }
 0x10b   :  { %v531_v19 = vadd.f32 %v804_v17, %v772_v11  ;;  %v510_v54 = vadd.f32 %v757_v15, %v509_v10  ;;  %v626_v32 = vsel %vm318_vm0, %v603_v52, 0.0 }
 0x10c   :  { %v759_v22 = vpop.f32.mrf.mxu0  ;;  %v522_v23 = vpop.f32.mrf.mxu1  ;;  %v627_v42 = vadd.f32 %v626_v32, %v625_v58 }
 0x10d   :  { %551 = vst.msk [vmem:[%s1179_s2 + $0x70] sm:$0xff] %vm318_vm0, %v531_v19  ;;  %v760_v26 = vadd.f32 %v759_v22, %v758_v16  ;;  %546 = vst.msk [vmem:[%s1179_s2 + $0x48] sm:$0xff] %vm318_vm0, %v510_v54  ;;  %v604_v46 = vmul.f32 %v510_v54, %v510_v54  ;;  %v523_v28 = vadd.f32 %v766_v20, %v522_v23  ;;  %v571_v33 = vsel %vm318_vm0, %v510_v54, 0.0 }
 0x10e   :  { %v761_v29 = vpop.f32.mrf.mxu0  ;;  %v805_v56 = vpop.f32.mrf.mxu1  ;;  %v572_v43 = vadd.f32 %v571_v33, %v570_v37  ;;  %v609_v1 = vmul.f32 %v531_v19, %v531_v19  ;;  %v581_v6 = vsel %vm318_vm0, %v531_v19, 0.0 }
 0x10f   :  { %v515_v30 = vadd.f32 %v800_v49, %v760_v26  ;;  %v534_v31 = vadd.f32 %v805_v56, %v775_v24  ;;  %549 = vst.msk [vmem:[%s1179_s2 + $0x60] sm:$0xff] %vm318_vm0, %v523_v28  ;;  %v628_v39 = vsel %vm318_vm0, %v604_v46, 0.0  ;;  %v607_v51 = vmul.f32 %v523_v28, %v523_v28  ;;  %v553_v24 = vld [vmem:[%s1177_s3] sm:$0x1] }
 0x110   :  { %v762_v34 = vpop.f32.mrf.mxu0  ;;  %v525_v35 = vpop.f32.mrf.mxu1  ;;  %v629_v47 = vadd.f32 %v628_v39, %v627_v42  ;;  %v577_v60 = vsel %vm318_vm0, %v523_v28, 0.0  ;;  %v638_v11 = vsel %vm318_vm0, %v609_v1, 0.0 }
 0x111   :  { %547 = vst.msk [vmem:[%s1179_s2 + $0x50] sm:$0xff] %vm318_vm0, %v515_v30  ;;  %v605_v38 = vmul.f32 %v515_v30, %v515_v30  ;;  %552 = vst.msk [vmem:[%s1179_s2 + $0x78] sm:$0xff] %vm318_vm0, %v534_v31  ;;  %v573_v40 = vsel %vm318_vm0, %v515_v30, 0.0  ;;  %v763_v41 = vadd.f32 %v762_v34, %v761_v29  ;;  %v526_v48 = vadd.f32 %v769_v36, %v525_v35 }
 0x112   :  { %v574_v49 = vadd.f32 %v573_v40, %v572_v43  ;;  %v634_v2 = vsel %vm318_vm0, %v607_v51, 0.0  ;;  %v610_v7 = vmul.f32 %v534_v31, %v534_v31  ;;  %v583_v12 = vsel %vm318_vm0, %v534_v31, 0.0 }
 0x113   :  { %v630_v50 = vsel %vm318_vm0, %v605_v38, 0.0  ;;  %v518_v45 = vadd.f32 %v801_v5, %v763_v41  ;;  %550 = vst.msk [vmem:[%s1179_s2 + $0x68] sm:$0xff] %vm318_vm0, %v526_v48  ;;  %v608_v62 = vmul.f32 %v526_v48, %v526_v48  ;;  %v579_v3 = vsel %vm318_vm0, %v526_v48, 0.0 }
 0x114   :  { %v631_v57 = vadd.f32 %v630_v50, %v629_v47  ;;  %v640_v15 = vsel %vm318_vm0, %v610_v7, 0.0 }
 0x115   :  { %548 = vst.msk [vmem:[%s1179_s2 + $0x58] sm:$0xff] %vm318_vm0, %v518_v45  ;;  %v575_v53 = vsel %vm318_vm0, %v518_v45, 0.0  ;;  %v606_v55 = vmul.f32 %v518_v45, %v518_v45  ;;  %v636_v8 = vsel %vm318_vm0, %v608_v62, 0.0 }
 0x116   :  { %v576_v59 = vadd.f32 %v575_v53, %v574_v49 }
 0x117   :  { %v632_v61 = vsel %vm318_vm0, %v606_v55, 0.0 }
 0x118   :  { %v633_v63 = vadd.f32 %v632_v61, %v631_v57  ;;  %v578_v0 = vadd.f32 %v577_v60, %v576_v59 }
 0x11a   :  { %v580_v4 = vadd.f32 %v579_v3, %v578_v0  ;;  %v635_v5 = vadd.f32 %v634_v2, %v633_v63 }
 0x11c   :  { %v582_v9 = vadd.f32 %v581_v6, %v580_v4  ;;  %v637_v10 = vadd.f32 %v636_v8, %v635_v5 }
 0x11e   :  { %v584_v13 = vadd.f32 %v583_v12, %v582_v9  ;;  %v639_v14 = vadd.f32 %v638_v11, %v637_v10 }
 0x120   :  { %v585_v16 = vrot.slane %v584_v13, 4  ;;  %v641_v17 = vadd.f32 %v640_v15, %v639_v14 }
 0x122   :  { %v586_v18 = vadd.f32 %v585_v16, %v584_v13  ;;  %v642_v20 = vrot.slane %v641_v17, 4 }
 0x124   :  { %v587_v21 = vrot.slane %v586_v18, 2  ;;  %v643_v52 = vadd.f32 %v642_v20, %v641_v17 }
 0x126   :  { %v588_v19 = vadd.f32 %v587_v21, %v586_v18  ;;  %v644_v54 = vrot.slane %v643_v52, 2 }
 0x128   :  { %v589_v22 = vrot.slane %v588_v19, 1  ;;  %v645_v23 = vadd.f32 %v644_v54, %v643_v52 }
 0x12a   :  { %v590_v25 = vadd.f32 %v589_v22, %v588_v19  ;;  %v646_v26 = vrot.slane %v645_v23, 1 }
 0x12c   :  { %v591_v44 = vadd.f32 %v590_v25, %v553_v24  ;;  %v647_v46 = vadd.f32 %v646_v26, %v645_v23 }
 0x12e   :  { %593 = vst.msk [vmem:[%s1177_s3] sm:$0x1] %vm51_vm1, %v591_v44  ;;  %v648_v28 = vadd.f32 %v647_v46, %v594_v27 }
 0x130   :  { %649 = vst.msk [vmem:[%s1178_s4] sm:$0x1] %vm51_vm1, %v648_v28 }

// kernel: allconv_forward.18
= control target key start
LH: loop header
LB: loop body
LE: loop exit
PB: predicated region body
PF: predicated region fallthrough
CT: control target
= control target key end

     0   :  { %vm130_vm0 = vcmask 261120   ;;  %vm111_vm1 = vcmask 24576   ;;  %vm252_vm2 = vcmask 31744   ;;  %s691_s3 = inlined_call_operand.vmem [shape: bf16[32,4], index: 3, kind: input, shape index: {}]   ;;  %s692_s0 = inlined_call_operand.vmem [shape: f32[128,32], index: 0, kind: input, shape index: {}]   ;;  %s693_s1 = inlined_call_operand.vmem [shape: f32[1,32], index: 1, kind: input, shape index: {}]   ;;  %s694_s2 = inlined_call_operand.vmem [shape: f32[1,32], index: 2, kind: input, shape index: {}]   ;;  %s695_s5 = inlined_call_operand.vmem [shape: f32[1,4], index: 5, kind: output, shape index: {1}]   ;;  %s696_s6 = inlined_call_operand.vmem [shape: f32[1,4], index: 6, kind: output, shape index: {2}]   ;;  %s697_s4 = inlined_call_operand.vmem [shape: f32[128,4], index: 4, kind: output, shape index: {0}]  }
   0x1   :  { %v425_v0 = vld [vmem:[%s691_s3 + $0x8] sm:$0xff]   ;;  %v426_v1 = vld [vmem:[%s691_s3] sm:$0xff]   ;;  %v23_v8 = vld [vmem:[%s692_s0 + $0x10] sm:$0xff] }
   0x2   :  { %400 = vmatprep.subr.bf16.mxu0 %v425_v0  ;;  %v21_v2 = vld [vmem:[%s692_s0] sm:$0xff]  ;;  %v22_v3 = vld [vmem:[%s692_s0 + $0x8] sm:$0xff]  ;;  %420 = vmatprep.subr.bf16.mxu1 %v425_v0  ;;  %v24_v9 = vld [vmem:[%s692_s0 + $0x18] sm:$0xff] }
   0x3   :  { %v478_v4 = vld [vmem:[%s693_s1] ss:$0 sm:$0xff]  ;;  %401 = vmatpush3.bf16.msra.mxu0 %v425_v0  ;;  %422 = vmatpush3.bf16.msra.mxu1 %v425_v0  ;;  %v26_v13 = vld [vmem:[%s692_s0 + $0x28] sm:$0xff]  ;;  %v27_v14 = vld [vmem:[%s692_s0 + $0x30] sm:$0xff] }
   0x4   :  { %v44_v5 = vmul.f32 %v478_v4, %v21_v2  ;;  %v45_v6 = vmul.f32 %v478_v4, %v22_v3  ;;  %v485_v7 = vld [vmem:[%s694_s2] ss:$0 sm:$0xff]  ;;  %402 = vmatprep.subr.bf16.mxu0 %v426_v1  ;;  %v46_v10 = vmul.f32 %v478_v4, %v23_v8  ;;  %v47_v11 = vmul.f32 %v478_v4, %v24_v9  ;;  %v28_v19 = vld [vmem:[%s692_s0 + $0x38] sm:$0xff]  ;;  %v30_v29 = vld [vmem:[%s692_s0 + $0x48] sm:$0xff] }
   0x5   :  { %421 = vmatprep.subr.bf16.mxu1 %v426_v1  ;;  %v25_v12 = vld [vmem:[%s692_s0 + $0x20] sm:$0xff]  ;;  %v49_v18 = vmul.f32 %v478_v4, %v26_v13  ;;  %v50_v22 = vmul.f32 %v478_v4, %v27_v14  ;;  %v51_v23 = vmul.f32 %v478_v4, %v28_v19  ;;  %v31_v34 = vld [vmem:[%s692_s0 + $0x50] sm:$0xff]  ;;  %v32_v35 = vld [vmem:[%s692_s0 + $0x58] sm:$0xff]  ;;  %v53_v45 = vmul.f32 %v478_v4, %v30_v29 }
   0x6   :  { %v67_v15 = vadd.f32 %v485_v7, %v44_v5  ;;  %v68_v16 = vadd.f32 %v485_v7, %v45_v6  ;;  %v48_v17 = vmul.f32 %v478_v4, %v25_v12  ;;  %v69_v20 = vadd.f32 %v485_v7, %v46_v10  ;;  %v29_v24 = vld [vmem:[%s692_s0 + $0x40] sm:$0xff]  ;;  %v34_v41 = vld [vmem:[%s692_s0 + $0x68] sm:$0xff]  ;;  %v35_v46 = vld [vmem:[%s692_s0 + $0x70] sm:$0xff] }
   0x7   :  { %v70_v21 = vadd.f32 %v485_v7, %v47_v11  ;;  %403 = vmatpush3.bf16.msra.mxu0 %v426_v1  ;;  %423 = vmatpush3.bf16.msra.mxu1 %v426_v1  ;;  %v72_v28 = vadd.f32 %v485_v7, %v49_v18  ;;  %v73_v32 = vadd.f32 %v485_v7, %v50_v22  ;;  %v33_v40 = vld [vmem:[%s692_s0 + $0x60] sm:$0xff]  ;;  %v36_v51 = vld [vmem:[%s692_s0 + $0x78] sm:$0xff]  ;;  %v427_v13 = vmov 0.0  }
   0x8   :  { %v83_v25 = vmax.f32 %v67_v15, 0.0  ;;  %v84_v26 = vmax.f32 %v68_v16, 0.0  ;;  %v71_v27 = vadd.f32 %v485_v7, %v48_v17  ;;  %v85_v30 = vmax.f32 %v69_v20, 0.0  ;;  %112 = vst.msk [vmem:[%s695_s5] sm:$0x1] %vm111_vm1, %v427_v13 }
   0x9   :  { %v86_v31 = vmax.f32 %v70_v21, 0.0  ;;  %v74_v33 = vadd.f32 %v485_v7, %v51_v23  ;;  %v88_v38 = vmax.f32 %v72_v28, 0.0  ;;  %v52_v39 = vmul.f32 %v478_v4, %v29_v24  ;;  %113 = vst.msk [vmem:[%s696_s6] sm:$0x1] %vm111_vm1, %v427_v13 }
   0xa   :  { %v99_v36 = vpack.c.bf16 %v84_v26, %v83_v25  ;;  %v87_v37 = vmax.f32 %v71_v27, 0.0  ;;  %v89_v43 = vmax.f32 %v73_v32, 0.0  ;;  %v54_v49 = vmul.f32 %v478_v4, %v31_v34 }
   0xb   :  { %v100_v42 = vpack.c.bf16 %v86_v31, %v85_v30  ;;  %v90_v44 = vmax.f32 %v74_v33, 0.0  ;;  %v75_v48 = vadd.f32 %v485_v7, %v52_v39  ;;  %v55_v50 = vmul.f32 %v478_v4, %v32_v35 }
   0xc   :  { %404 = vmatprep.mubr.msk.bf16.mxu0 %vm130_vm0, %v99_v36  ;;  %v101_v47 = vpack.c.bf16 %v88_v38, %v87_v37  ;;  %v76_v52 = vadd.f32 %v485_v7, %v53_v45  ;;  %v56_v53 = vmul.f32 %v478_v4, %v33_v40  ;;  %v57_v54 = vmul.f32 %v478_v4, %v34_v41 }
   0xd   :  { %405 = vmatmul.mubr.msk.bf16.vlgmr.msra.gmra.mxu0 %vm130_vm0, %v100_v42  ;;  %v91_v55 = vmax.f32 %v75_v48, 0.0  ;;  %v77_v56 = vadd.f32 %v485_v7, %v54_v49  ;;  %v78_v57 = vadd.f32 %v485_v7, %v55_v50  ;;  %v58_v58 = vmul.f32 %v478_v4, %v35_v46 }
   0xe   :  { %408 = vmatprep.mubr.msk.bf16.mxu0 %vm130_vm0, %v101_v47  ;;  %v92_v59 = vmax.f32 %v76_v52, 0.0  ;;  %v79_v60 = vadd.f32 %v485_v7, %v56_v53  ;;  %v80_v61 = vadd.f32 %v485_v7, %v57_v54  ;;  %v59_v62 = vmul.f32 %v478_v4, %v36_v51 }
   0xf   :  { %v102_v63 = vpack.c.bf16 %v90_v44, %v89_v43  ;;  %v93_v0 = vmax.f32 %v77_v56, 0.0  ;;  %v94_v1 = vmax.f32 %v78_v57, 0.0  ;;  %v81_v2 = vadd.f32 %v485_v7, %v58_v58 }
  0x10   :  { %v103_v3 = vpack.c.bf16 %v92_v59, %v91_v55  ;;  %v95_v5 = vmax.f32 %v79_v60, 0.0  ;;  %v96_v6 = vmax.f32 %v80_v61, 0.0  ;;  %v82_v8 = vadd.f32 %v485_v7, %v59_v62 }
  0x11   :  { %v104_v9 = vpack.c.bf16 %v94_v1, %v93_v0  ;;  %v97_v11 = vmax.f32 %v81_v2, 0.0 }
  0x12   :  { %412 = vmatprep.mubr.msk.bf16.mxu1 %vm130_vm0, %v103_v3  ;;  %v105_v10 = vpack.c.bf16 %v96_v6, %v95_v5  ;;  %v98_v12 = vmax.f32 %v82_v8, 0.0 }
  0x13   :  { %413 = vmatmul.mubr.msk.bf16.vlgmr.msra.gmra.mxu1 %vm130_vm0, %v104_v9 }
  0x14   :  { %416 = vmatprep.mubr.msk.bf16.mxu1 %vm130_vm0, %v105_v10  ;;  %v106_v4 = vpack.c.bf16 %v98_v12, %v97_v11 }
  0x15   :  { %409 = vmatmul.mubr.msk.bf16.gmra.mxu0 %vm130_vm0, %v102_v63 }
  0x1b   :  { %417 = vmatmul.mubr.msk.bf16.gmra.mxu1 %vm130_vm0, %v106_v4 }
  0xcd   :  { %v406_v7 = vpop.f32.mrf.mxu0 }
  0xce   :  { %255 = vst.msk [vmem:[%s697_s4 + $0x10] sm:$0xff] %vm252_vm2, %v406_v7  ;;  %v313_v18 = vmul.f32 %v406_v7, %v406_v7  ;;  %v273_v25 = vsel %vm252_vm2, %v406_v7, 0.0 }
  0xcf   :  { %v189_v14 = vpop.f32.mrf.mxu0 }
  0xd0   :  { %253 = vst.msk [vmem:[%s697_s4] sm:$0xff] %vm252_vm2, %v189_v14  ;;  %v311_v16 = vmul.f32 %v189_v14, %v189_v14  ;;  %v270_v19 = vsel %vm252_vm2, %v189_v14, 0.0  ;;  %v330_v33 = vsel %vm252_vm2, %v313_v18, 0.0 }
  0xd1   :  { %v407_v15 = vpop.f32.mrf.mxu0 }
  0xd2   :  { %256 = vst.msk [vmem:[%s697_s4 + $0x18] sm:$0xff] %vm252_vm2, %v407_v15  ;;  %v327_v26 = vsel %vm252_vm2, %v311_v16, 0.0  ;;  %v314_v27 = vmul.f32 %v407_v15, %v407_v15  ;;  %v275_v34 = vsel %vm252_vm2, %v407_v15, 0.0 }
  0xd3   :  { %v192_v17 = vpop.f32.mrf.mxu0  ;;  %v593_v22 = vpop.f32.mrf.mxu1 }
  0xd4   :  { %254 = vst.msk [vmem:[%s697_s4 + $0x8] sm:$0xff] %vm252_vm2, %v192_v17  ;;  %v271_v20 = vsel %vm252_vm2, %v192_v17, 0.0  ;;  %v312_v21 = vmul.f32 %v192_v17, %v192_v17  ;;  %263 = vst.msk [vmem:[%s697_s4 + $0x50] sm:$0xff] %vm252_vm2, %v593_v22  ;;  %v332_v40 = vsel %vm252_vm2, %v314_v27, 0.0  ;;  %v321_v9 = vmul.f32 %v593_v22, %v593_v22 }
  0xd5   :  { %v272_v23 = vadd.f32 %v271_v20, %v270_v19  ;;  %v410_v24 = vpop.f32.mrf.mxu0  ;;  %v221_v29 = vpop.f32.mrf.mxu1  ;;  %v289_v13 = vsel %vm252_vm2, %v593_v22, 0.0 }
  0xd6   :  { %v328_v28 = vsel %vm252_vm2, %v312_v21, 0.0  ;;  %259 = vst.msk [vmem:[%s697_s4 + $0x30] sm:$0xff] %vm252_vm2, %v410_v24  ;;  %261 = vst.msk [vmem:[%s697_s4 + $0x40] sm:$0xff] %vm252_vm2, %v221_v29  ;;  %v317_v46 = vmul.f32 %v410_v24, %v410_v24  ;;  %v281_v53 = vsel %vm252_vm2, %v410_v24, 0.0  ;;  %v319_v61 = vmul.f32 %v221_v29, %v221_v29 }
  0xd7   :  { %v274_v30 = vadd.f32 %v273_v25, %v272_v23  ;;  %v329_v31 = vadd.f32 %v328_v28, %v327_v26  ;;  %v205_v32 = vpop.f32.mrf.mxu0  ;;  %v415_v36 = vpop.f32.mrf.mxu1  ;;  %v285_v2 = vsel %vm252_vm2, %v221_v29, 0.0  ;;  %v346_v17 = vsel %vm252_vm2, %v321_v9, 0.0 }
  0xd8   :  { %257 = vst.msk [vmem:[%s697_s4 + $0x20] sm:$0xff] %vm252_vm2, %v205_v32  ;;  %v315_v35 = vmul.f32 %v205_v32, %v205_v32  ;;  %264 = vst.msk [vmem:[%s697_s4 + $0x58] sm:$0xff] %vm252_vm2, %v415_v36  ;;  %v277_v41 = vsel %vm252_vm2, %v205_v32, 0.0  ;;  %v338_v59 = vsel %vm252_vm2, %v317_v46, 0.0  ;;  %v342_v10 = vsel %vm252_vm2, %v319_v61, 0.0 }
  0xd9   :  { %v331_v37 = vadd.f32 %v330_v33, %v329_v31  ;;  %v276_v38 = vadd.f32 %v275_v34, %v274_v30  ;;  %v411_v39 = vpop.f32.mrf.mxu0  ;;  %v224_v42 = vpop.f32.mrf.mxu1  ;;  %v322_v7 = vmul.f32 %v415_v36, %v415_v36  ;;  %v291_v18 = vsel %vm252_vm2, %v415_v36, 0.0 }
  0xda   :  { %260 = vst.msk [vmem:[%s697_s4 + $0x38] sm:$0xff] %vm252_vm2, %v411_v39  ;;  %262 = vst.msk [vmem:[%s697_s4 + $0x48] sm:$0xff] %vm252_vm2, %v224_v42  ;;  %v334_v47 = vsel %vm252_vm2, %v315_v35, 0.0  ;;  %v318_v54 = vmul.f32 %v411_v39, %v411_v39  ;;  %v283_v60 = vsel %vm252_vm2, %v411_v39, 0.0  ;;  %v320_v3 = vmul.f32 %v224_v42, %v224_v42 }
  0xdb   :  { %v278_v43 = vadd.f32 %v277_v41, %v276_v38  ;;  %v333_v44 = vadd.f32 %v332_v40, %v331_v37  ;;  %v208_v45 = vpop.f32.mrf.mxu0  ;;  %v418_v50 = vpop.f32.mrf.mxu1  ;;  %v287_v11 = vsel %vm252_vm2, %v224_v42, 0.0  ;;  %v348_v23 = vsel %vm252_vm2, %v322_v7, 0.0 }
  0xdc   :  { %258 = vst.msk [vmem:[%s697_s4 + $0x28] sm:$0xff] %vm252_vm2, %v208_v45  ;;  %v279_v48 = vsel %vm252_vm2, %v208_v45, 0.0  ;;  %v316_v49 = vmul.f32 %v208_v45, %v208_v45  ;;  %267 = vst.msk [vmem:[%s697_s4 + $0x70] sm:$0xff] %vm252_vm2, %v418_v50  ;;  %v340_v1 = vsel %vm252_vm2, %v318_v54, 0.0  ;;  %v344_v14 = vsel %vm252_vm2, %v320_v3, 0.0 }
  0xdd   :  { %v335_v51 = vadd.f32 %v334_v47, %v333_v44  ;;  %v280_v52 = vadd.f32 %v279_v48, %v278_v43  ;;  %v237_v56 = vpop.f32.mrf.mxu1  ;;  %v325_v22 = vmul.f32 %v418_v50, %v418_v50  ;;  %v297_v32 = vsel %vm252_vm2, %v418_v50, 0.0 }
  0xde   :  { %v336_v55 = vsel %vm252_vm2, %v316_v49, 0.0  ;;  %265 = vst.msk [vmem:[%s697_s4 + $0x60] sm:$0xff] %vm252_vm2, %v237_v56  ;;  %v323_v19 = vmul.f32 %v237_v56, %v237_v56  ;;  %v293_v24 = vsel %vm252_vm2, %v237_v56, 0.0 }
  0xdf   :  { %v282_v57 = vadd.f32 %v281_v53, %v280_v52  ;;  %v337_v58 = vadd.f32 %v336_v55, %v335_v51  ;;  %v419_v62 = vpop.f32.mrf.mxu1  ;;  %v354_v37 = vsel %vm252_vm2, %v325_v22, 0.0  ;;  %v269_v52 = vld [vmem:[%s695_s5] sm:$0x1] }
  0xe0   :  { %268 = vst.msk [vmem:[%s697_s4 + $0x78] sm:$0xff] %vm252_vm2, %v419_v62  ;;  %v350_v28 = vsel %vm252_vm2, %v323_v19, 0.0  ;;  %v326_v33 = vmul.f32 %v419_v62, %v419_v62  ;;  %v299_v38 = vsel %vm252_vm2, %v419_v62, 0.0  ;;  %v310_v55 = vld [vmem:[%s696_s6] sm:$0x1] }
  0xe1   :  { %v284_v63 = vadd.f32 %v283_v60, %v282_v57  ;;  %v339_v0 = vadd.f32 %v338_v59, %v337_v58  ;;  %v240_v5 = vpop.f32.mrf.mxu1 }
  0xe2   :  { %266 = vst.msk [vmem:[%s697_s4 + $0x68] sm:$0xff] %vm252_vm2, %v240_v5  ;;  %v324_v25 = vmul.f32 %v240_v5, %v240_v5  ;;  %v295_v29 = vsel %vm252_vm2, %v240_v5, 0.0  ;;  %v356_v41 = vsel %vm252_vm2, %v326_v33, 0.0 }
  0xe3   :  { %v341_v6 = vadd.f32 %v340_v1, %v339_v0  ;;  %v286_v8 = vadd.f32 %v285_v2, %v284_v63 }
  0xe4   :  { %v352_v34 = vsel %vm252_vm2, %v324_v25, 0.0 }
  0xe5   :  { %v288_v12 = vadd.f32 %v287_v11, %v286_v8  ;;  %v343_v4 = vadd.f32 %v342_v10, %v341_v6 }
  0xe7   :  { %v290_v15 = vadd.f32 %v289_v13, %v288_v12  ;;  %v345_v16 = vadd.f32 %v344_v14, %v343_v4 }
  0xe9   :  { %v347_v20 = vadd.f32 %v346_v17, %v345_v16  ;;  %v292_v21 = vadd.f32 %v291_v18, %v290_v15 }
  0xeb   :  { %v294_v26 = vadd.f32 %v293_v24, %v292_v21  ;;  %v349_v27 = vadd.f32 %v348_v23, %v347_v20 }
  0xed   :  { %v351_v30 = vadd.f32 %v350_v28, %v349_v27  ;;  %v296_v31 = vadd.f32 %v295_v29, %v294_v26 }
  0xef   :  { %v298_v35 = vadd.f32 %v297_v32, %v296_v31  ;;  %v353_v36 = vadd.f32 %v352_v34, %v351_v30 }
  0xf1   :  { %v300_v39 = vadd.f32 %v299_v38, %v298_v35  ;;  %v355_v40 = vadd.f32 %v354_v37, %v353_v36 }
  0xf3   :  { %v301_v42 = vrot.slane %v300_v39, 4  ;;  %v357_v43 = vadd.f32 %v356_v41, %v355_v40 }
  0xf5   :  { %v302_v44 = vadd.f32 %v301_v42, %v300_v39  ;;  %v358_v45 = vrot.slane %v357_v43, 4 }
  0xf7   :  { %v303_v46 = vrot.slane %v302_v44, 2  ;;  %v359_v47 = vadd.f32 %v358_v45, %v357_v43 }
  0xf9   :  { %v304_v48 = vadd.f32 %v303_v46, %v302_v44  ;;  %v360_v49 = vrot.slane %v359_v47, 2 }
  0xfb   :  { %v305_v50 = vrot.slane %v304_v48, 1  ;;  %v361_v51 = vadd.f32 %v360_v49, %v359_v47 }
  0xfd   :  { %v306_v53 = vadd.f32 %v305_v50, %v304_v48  ;;  %v362_v54 = vrot.slane %v361_v51, 1 }
  0xff   :  { %v307_v56 = vadd.f32 %v306_v53, %v269_v52  ;;  %v363_v57 = vadd.f32 %v362_v54, %v361_v51 }
 0x101   :  { %309 = vst.msk [vmem:[%s695_s5] sm:$0x1] %vm111_vm1, %v307_v56  ;;  %v364_v58 = vadd.f32 %v363_v57, %v310_v55 }
 0x103   :  { %365 = vst.msk [vmem:[%s696_s6] sm:$0x1] %vm111_vm1, %v364_v58 }

// kernel: allconv_forward.19
= control target key start
LH: loop header
LB: loop body
LE: loop exit
PB: predicated region body
PF: predicated region fallthrough
CT: control target
= control target key end

     0   :  { %v36_v3 = vlaneseq  ;;  %v473_v7 = vmov 1983009808   ;;  %s662_s0 = inlined_call_operand.vmem [shape: f32[2,256], index: 0, kind: input, shape index: {}]   ;;  %s663_s1 = inlined_call_operand.vmem [shape: f32[1,256], index: 1, kind: input, shape index: {}]   ;;  %s664_s2 = inlined_call_operand.vmem [shape: f32[1,256], index: 2, kind: input, shape index: {}]   ;;  %s665_s3 = inlined_call_operand.vmem [shape: f32[256,32], index: 3, kind: input, shape index: {}]   ;;  %s666_s4 = inlined_call_operand.vmem [shape: f32[1,32], index: 4, kind: input, shape index: {}]   ;;  %s667_s5 = inlined_call_operand.vmem [shape: f32[32,16], index: 5, kind: input, shape index: {}]   ;;  %s668_s6 = inlined_call_operand.vmem [shape: f32[1,16], index: 6, kind: input, shape index: {}]   ;;  %s669_s7 = inlined_call_operand.vmem [shape: f32[16,10], index: 7, kind: input, shape index: {}]   ;;  %s670_s8 = inlined_call_operand.vmem [shape: f32[1,10], index: 8, kind: input, shape index: {}]   ;;  %s671_s9 = inlined_call_operand.hbm [shape: f32[2,10], index: 9, kind: output, shape index: {}]  }
   0x1   :  { %v106_v0 = vld [vmem:[%s665_s3 + $0xf8] sm:$0xff]  ;;  %v105_v2 = vld [vmem:[%s665_s3 + $0xf0] sm:$0xff]  ;;  %v104_v5 = vld [vmem:[%s665_s3 + $0xe8] sm:$0xff]  ;;  %v46_v8 = vunpack.c.l.s4 %v473_v7 }
   0x2   :  { %v90_v1 = vld [vmem:[%s665_s3 + $0x78] sm:$0xff]  ;;  %386 = vmatprep.subr.mxu0 %v106_v0  ;;  %v89_v4 = vld [vmem:[%s665_s3 + $0x70] sm:$0xff]  ;;  %v88_v6 = vld [vmem:[%s665_s3 + $0x68] sm:$0xff]  ;;  %v37_v10 = vshrl.u32 %v36_v3, 7 }
   0x3   :  { %387 = vmatpush3.msra.mxu0 %v90_v1  ;;  %v103_v9 = vld [vmem:[%s665_s3 + $0xe0] sm:$0xff]  ;;  %v102_v12 = vld [vmem:[%s665_s3 + $0xd8] sm:$0xff]  ;;  %v47_v14 = vunpack.c.0.s8 %v46_v8  ;;  %v101_v15 = vld [vmem:[%s665_s3 + $0xd0] sm:$0xff] }
   0x4   :  { %388 = vmatprep.subr.mxu0 %v105_v2  ;;  %v87_v11 = vld [vmem:[%s665_s3 + $0x60] sm:$0xff]  ;;  %v86_v13 = vld [vmem:[%s665_s3 + $0x58] sm:$0xff]  ;;  %v38_v16 = vsub.s32 0, %v37_v10  ;;  %v42_v17 = vsub.s32 1, %v37_v10  ;;  %v85_v18 = vld [vmem:[%s665_s3 + $0x50] sm:$0xff] }
   0x5   :  { %389 = vmatpush3.msra.mxu0 %v89_v4  ;;  %v100_v19 = vld [vmem:[%s665_s3 + $0xc8] sm:$0xff]  ;;  %v34_v21 = vld [vmem:[%s663_s1] sm:$0x3]  ;;  %v50_v22 = vsub.s32 %v47_v14, %v37_v10 }
   0x6   :  { %390 = vmatprep.subr.mxu0 %v104_v5  ;;  %v84_v20 = vld [vmem:[%s665_s3 + $0x48] sm:$0xff]  ;;  %v54_v23 = vld [vmem:[%s664_s2] sm:$0x3] }
   0x7   :  { %391 = vmatpush3.msra.mxu0 %v88_v6 }
   0x8   :  { %392 = vmatprep.subr.mxu0 %v103_v9 }
   0x9   :  { %393 = vmatpush3.msra.mxu0 %v87_v11 }
   0xa   :  { %394 = vmatprep.subr.mxu0 %v102_v12 }
   0xb   :  { %395 = vmatpush3.msra.mxu0 %v86_v13 }
   0xc   :  { %396 = vmatprep.subr.mxu0 %v101_v15 }
   0xd   :  { %14 = vsyncpa [#allocation3], 0  ;;  %397 = vmatpush3.msra.mxu0 %v85_v18  ;;  %v99_v24 = vld [vmem:[%s665_s3 + $0xc0] sm:$0xff]  ;;  %v39_v25 = vrot.slane %v34_v21, %v38_v16  ;;  %v43_v26 = vrot.slane %v34_v21, %v42_v17  ;;  %v59_v27 = vrot.slane %v54_v23, %v38_v16  ;;  %v63_v28 = vrot.slane %v54_v23, %v42_v17  ;;  %v98_v30 = vld [vmem:[%s665_s3 + $0xb8] sm:$0xff]  ;;  %s476_s24 = smov [#allocation2]  }
   0xe   :  { %398 = vmatprep.subr.mxu0 %v100_v19  ;;  %v83_v29 = vld [vmem:[%s665_s3 + $0x40] sm:$0xff]  ;;  %v82_v33 = vld [vmem:[%s665_s3 + $0x38] sm:$0xff]  ;;  %v97_v35 = vld [vmem:[%s665_s3 + $0xb0] sm:$0xff]  ;;  %v474_v56 = vmov 0.0   ;;  %vm475_vm0 = vmmov 0   ;;  %vm207_vm1 = vcmask 261120  }
   0xf   :  { %399 = vmatpush3.msra.mxu0 %v84_v20  ;;  %v44_v31 = vcombine.low %v39_v25, %v43_v26  ;;  %v64_v32 = vcombine.low %v59_v27, %v63_v28  ;;  %v33_v34 = vld [vmem:[%s662_s0] sm:$0xf]  ;;  %v81_v38 = vld [vmem:[%s665_s3 + $0x30] sm:$0xff]  ;;  %v96_v39 = vld [vmem:[%s665_s3 + $0xa8] sm:$0xff]  ;;  %429 = vmatprep.subr.mxu1 %v474_v56  ;;  %vm291_vm2 = vcmask 130048   ;;  %s373_s2 = sshll.u32 %s476_s24, 4  ;;  %s374_s2 = int_to_ptr.vmem [resolvable:$true] %s373_s2 }
  0x10   :  { %400 = vmatprep.subr.mxu0 %v99_v24  ;;  %v80_v41 = vld [vmem:[%s665_s3 + $0x28] sm:$0xff]  ;;  %v95_v42 = vld [vmem:[%s665_s3 + $0xa0] sm:$0xff]  ;;  %v94_v45 = vld [vmem:[%s665_s3 + $0x98] sm:$0xff]  ;;  %437 = vmatprep.mubr.msk.f32.mxu1 %vm475_vm0, %v474_v56  ;;  %vm365_vm3 = vcmask 74752   ;;  %p456_p1 = scmp.lt.s32.totalorder %s374_s2, %s374_s2 }
  0x11   :  { %401 = vmatpush3.msra.mxu0 %v83_v29  ;;  %v51_v36 = vrot.slane %v44_v31, %v50_v22  ;;  %v71_v37 = vrot.slane %v64_v32, %v50_v22  ;;  %v79_v44 = vld [vmem:[%s665_s3 + $0x20] sm:$0xff]  ;;  %v78_v47 = vld [vmem:[%s665_s3 + $0x18] sm:$0xff]  ;;  %v93_v48 = vld [vmem:[%s665_s3 + $0x90] sm:$0xff] }
  0x12   :  { %402 = vmatprep.subr.mxu0 %v98_v30  ;;  %v77_v50 = vld [vmem:[%s665_s3 + $0x10] sm:$0xff]  ;;  %v92_v51 = vld [vmem:[%s665_s3 + $0x88] sm:$0xff]  ;;  %v91_v54 = vld [vmem:[%s665_s3 + $0x80] sm:$0xff] }
  0x13   :  { %403 = vmatpush3.msra.mxu0 %v82_v33  ;;  %v53_v40 = vmul.f32 %v51_v36, %v33_v34  ;;  %v76_v53 = vld [vmem:[%s665_s3 + $0x8] sm:$0xff]  ;;  %v75_v55 = vld [vmem:[%s665_s3] sm:$0xff]  ;;  %v199_v57 = vld [vmem:[%s667_s5 + $0x18] sm:$0xff] }
  0x14   :  { %404 = vmatprep.subr.mxu0 %v97_v35  ;;  %430 = vmatpush3.msra.mxu1 %v199_v57  ;;  %v198_v58 = vld [vmem:[%s667_s5 + $0x10] sm:$0xff]  ;;  %v197_v59 = vld [vmem:[%s667_s5 + $0x8] sm:$0xff]  ;;  %v196_v60 = vld [vmem:[%s667_s5] sm:$0xff] }
  0x15   :  { %405 = vmatpush3.msra.mxu0 %v81_v38  ;;  %v73_v43 = vadd.f32 %v71_v37, %v53_v40  ;;  %431 = vmatprep.subr.mxu1 %v474_v56  ;;  %v381_v62 = vld [vmem:[%s666_s4] ss:$0 sm:$0xff]  ;;  %v283_v3 = vld [vmem:[%s669_s7 + $0x8] sm:$0xff] }
  0x16   :  { %406 = vmatprep.subr.mxu0 %v96_v39  ;;  %432 = vmatpush3.msra.mxu1 %v198_v58  ;;  %v282_v4 = vld [vmem:[%s669_s7] sm:$0xff]  ;;  %s451_s7 = scalar_lea.vmem %s374_s2, 32 }
  0x17   :  { %407 = vmatpush3.msra.mxu0 %v80_v41  ;;  %v74_v46 = vmax.f32 %v73_v43, 0.0  ;;  %433 = vmatprep.subr.mxu1 %v474_v56  ;;  %v382_v5 = vld [vmem:[%s668_s6] ss:$0 sm:$0xff]  ;;  %p452_p0 = scmp.ne.s32.totalorder %s374_s2, %s451_s7  ;;  %p457_p2 = scmp.lt.s32.totalorder %s451_s7, %s451_s7 }
  0x18   :  { %408 = vmatprep.subr.mxu0 %v95_v42  ;;  %434 = vmatpush3.msra.mxu1 %v197_v59  ;;  %v384_v10 = vld [vmem:[%s670_s8] ss:$0 sm:$0xff] }
  0x19   :  { %409 = vmatpush3.msra.mxu0 %v79_v44  ;;  %v121_v49 = vrot.slane %v74_v46, %v50_v22  ;;  %435 = vmatprep.subr.mxu1 %v474_v56  ;;  %p458_p3 = por %p457_p2, %p456_p1 }
  0x1a   :  { %410 = vmatprep.subr.mxu0 %v94_v45  ;;  %436 = vmatpush3.msra.mxu1 %v196_v60 }
  0x1b   :  { %411 = vmatpush3.msra.mxu0 %v78_v47  ;;  %v122_v52 = vcombine.high %v121_v49, %v121_v49  ;;  %440 = vmatprep.subr.mxu1 %v474_v56  ;;  %p459_p4 = pnand %p458_p3, %p452_p0 }
  0x1c   :  { %412 = vmatprep.subr.mxu0 %v93_v48 }
  0x1d   :  { %413 = vmatpush3.msra.mxu0 %v77_v50  ;;  %189 = vmatprep.mubr.f32.mxu0 %v122_v52 }
  0x1e   :  { %414 = vmatprep.subr.mxu0 %v92_v51 }
  0x1f   :  { %415 = vmatpush3.msra.mxu0 %v76_v53 }
  0x20   :  { %416 = vmatprep.subr.mxu0 %v91_v54 }
  0x21   :  { %417 = vmatpush3.msra.mxu0 %v75_v55 }
  0x22   :  { %190 = vmatmul.mubr.f32.vlgmr.msra.gmra.mxu0 %v121_v49 }
  0xe2   :  { %v418_v61 = vpop.f32.mrf.mxu0 }
  0xe4   :  { %v419_v63 = vpop.f32.mrf.mxu0 }
  0xe5   :  { %v420_v0 = vadd.f32 %v419_v63, %v418_v61 }
  0xe7   :  { %v192_v1 = vadd.f32 %v420_v0, %v381_v62 }
  0xe9   :  { %v195_v2 = vmax.f32 %v192_v1, 0.0 }
  0xeb   :  { %438 = vmatmul.mubr.msk.f32.vlgmr.msra.gmra.mxu1 %vm207_vm1, %v195_v2 }
  0xec   :  { %444 = vmatprep.mubr.msk.f32.mxu1 %vm475_vm0, %v474_v56  ;;  %441 = vmatpush3.msra.mxu1 %v283_v3 }
  0xed   :  { %442 = vmatprep.subr.mxu1 %v474_v56 }
  0xee   :  { %443 = vmatpush3.msra.mxu1 %v282_v4 }
 0x1ab   :  { %v277_v6 = vpop.f32.mrf.mxu1 }
 0x1ac   :  { %v278_v7 = vadd.f32 %v382_v5, %v277_v6 }
 0x1ad   :  { %v439_v8 = vpop.f32.mrf.mxu1 }
 0x1ae   :  { %v281_v9 = vmax.f32 %v278_v7, 0.0 }
 0x1b0   :  { %445 = vmatmul.mubr.msk.f32.vlgmr.msra.gmra.mxu1 %vm291_vm2, %v281_v9 }
 0x270   :  { %v361_v11 = vpop.f32.mrf.mxu1 }
 0x271   :  { %v362_v12 = vadd.f32 %v384_v10, %v361_v11 }
 0x272   :  { %v446_v13 = vpop.f32.mrf.mxu1 }
 0x273   :  { %366 = vst.msk [vmem:[#allocation2] sm:$0x3] %vm365_vm3, %v362_v12 }
 0x274   :  { %462 = shalt.err (!%p459_p4)
}
 0x275   :  { %376 = dma.vmem_to_hbm [thread:$0]  %s374_s2, 32, %s671_s9, [#allocation3]  }
 0x276   :  { %471 = dma.done.wait [#allocation3], 32  }
 0x277   :  { %472 = vsyncadd [#allocation3], 4294967264 }
 0x278   :  { %380 = vsyncpa [#allocation3], 1 }

</bundles_post_ra>
